<compile_context>
chip_gen: v6e
topology: v6e:2x2x1
jax: 0.10.0
libtpu: 0.0.40
codegen_flags: <defaults>
</compile_context>

<pallas_src>
import functools
import math

import jax
import jax.numpy as jnp
from jax import lax
from jax.experimental import pallas as pl
from jax.experimental.pallas import tpu as pltpu


def _round_up(v, m):
    return -(-v // m) * m


def _fused_geometry(s):
    """Row-grid geometry for a cubic input of edge s (layer-1 output edge g = s-1)."""
    g = s - 1
    plane = g * g
    # Tap order k = kd*4 + kh*2 + kw  (matches the folded weight layout below).
    offs = tuple(kd * plane + kh * g + kw
                 for kd in (0, 1) for kh in (0, 1) for kw in (0, 1))
    max_off = plane + g + 1
    m3 = (s - 3) * plane                    # rows holding every valid layer-3 output
    m2 = _round_up(m3 + max_off, 16)        # layer-2 rows to compute (incl. halo garbage)
    m1 = _round_up(m2 + max_off, 16)        # layer-1 rows to compute (incl. halo garbage)
    return g, plane, offs, m1, m2, m3


# ----------------------------------------------------------------------------
# Fused Pallas kernel: conv1 -> BN -> LReLU -> conv2 -> BN -> LReLU -> conv3 -> BN -> LReLU
# ----------------------------------------------------------------------------
def _voxelcnn_fused_kernel(xt_ref, w1_ref, s1_ref, w2_ref, s2_ref, w3_ref, s3_ref,
                           o_ref, act1_ref, act2_ref, *, offs, m2, m3):
    # xt_ref : (M1, 8)    f32  layer-1 im2col rows (taps on lanes), zero-padded tail
    # w*_ref : (8*Cin,Cout) bf16  BN-scale-folded conv weights (tap-major rows)
    # s*_ref : (1, Cout)  f32  folded BN shift (beta + scale*(bias - mean))
    # o_ref  : (M3, 256)  f32  layer-3 output rows on the same row grid
    # act1/2 : f32 VMEM scratch holding layer-1 / layer-2 activations (rows x channels)

    # ---------------- layer 1: Conv3d(1 -> 64), K = 8, single bf16 MXU pass -------------
    x = xt_ref[...].astype(jnp.bfloat16)                                   # (M1, 8)
    y1 = jnp.dot(x, w1_ref[...], preferred_element_type=jnp.float32) + s1_ref[...]
    act1_ref[...] = jnp.maximum(y1, 0.2 * y1)                              # LeakyReLU(0.2)

    # ---------------- layer 2: Conv3d(64 -> 128): 8 per-tap bf16 dots, f32 accumulate ----
    for k, off in enumerate(offs):
        lhs = act1_ref[pl.ds(off, m2), :].astype(jnp.bfloat16)             # (M2, 64)
        rhs = w2_ref[pl.ds(k * 64, 64), :]                                 # (64, 128)
        t = jnp.dot(lhs, rhs, preferred_element_type=jnp.float32)
        if k == 0:
            act2_ref[...] = t
        else:
            act2_ref[...] += t
    y2 = act2_ref[...] + s2_ref[...]
    act2_ref[...] = jnp.maximum(y2, 0.2 * y2)

    # ---------------- layer 3: Conv3d(128 -> 256): accumulate straight into the output ---
    for k, off in enumerate(offs):
        lhs = act2_ref[pl.ds(off, m3), :].astype(jnp.bfloat16)             # (M3, 128)
        rhs = w3_ref[pl.ds(k * 128, 128), :]                               # (128, 256)
        t = jnp.dot(lhs, rhs, preferred_element_type=jnp.float32)
        if k == 0:
            o_ref[...] = t
        else:
            o_ref[...] += t
    y3 = o_ref[...] + s3_ref[...]
    o_ref[...] = jnp.maximum(y3, 0.2 * y3)


def _fused_pallas_call(x_taps, w1, s1, w2, s2, w3, s3, *, offs, m1, m2, m3):
    n = x_taps.shape[0]
    kernel = functools.partial(_voxelcnn_fused_kernel, offs=offs, m2=m2, m3=m3)
    return pl.pallas_call(
        kernel,
        out_shape=jax.ShapeDtypeStruct((n, m3, 256), jnp.float32),
        grid=(n,),
        in_specs=[
            pl.BlockSpec((None, m1, 8), lambda i: (i, 0, 0)),      # per-batch im2col rows
            pl.BlockSpec((8, 64), lambda i: (0, 0)),               # w1   (resident)
            pl.BlockSpec((1, 64), lambda i: (0, 0)),               # shift1
            pl.BlockSpec((8 * 64, 128), lambda i: (0, 0)),         # w2   (resident)
            pl.BlockSpec((1, 128), lambda i: (0, 0)),              # shift2
            pl.BlockSpec((8 * 128, 256), lambda i: (0, 0)),        # w3   (resident)
            pl.BlockSpec((1, 256), lambda i: (0, 0)),              # shift3
        ],
        out_specs=pl.BlockSpec((None, m3, 256), lambda i: (i, 0, 0)),
        scratch_shapes=[
            pltpu.VMEM((m1, 64), jnp.float32),                     # layer-1 activations
            pltpu.VMEM((m2, 128), jnp.float32),                    # layer-2 activations
        ],
        compiler_params=pltpu.CompilerParams(
            dimension_semantics=("parallel",)),                    # v7x: batch -> 2 TCs
    )(x_taps, w1, s1, w2, s2, w3, s3)


# ----------------------------------------------------------------------------
# Parameter folding (mirrors nn.Conv3d / nn.BatchNorm3d shapes)
# ----------------------------------------------------------------------------
def _fold_params(w_torch, b, gamma, beta, mean, var, eps):
    """(Cout,Cin,2,2,2) conv + BN(eval) -> (BN-scaled bf16 weight, f32 shift row)."""
    c_out, c_in = w_torch.shape[0], w_torch.shape[1]
    # (Cout, Cin, kd, kh, kw) -> (kd, kh, kw, Cin, Cout) -> (8*Cin, Cout); row = k*Cin + ci.
    w = jnp.transpose(w_torch, (2, 3, 4, 1, 0)).reshape(8 * c_in, c_out)
    scale = gamma / jnp.sqrt(var + eps)                      # (Cout,)
    w_scaled = (w * scale[None, :]).astype(jnp.bfloat16)     # fold scale in f32, then cast
    shift = (beta + scale * (b - mean))[None, :].astype(jnp.float32)
    return w_scaled, shift


def _init_layer(key, c_in, c_out, *, eps=1e-5):
    k_w, k_b, k_g, k_be, k_m, k_v = jax.random.split(key, 6)
    fan_in = c_in * 8
    bound = 1.0 / math.sqrt(fan_in)
    # PyTorch-shaped conv weight (Cout, Cin, 2, 2, 2) and bias (Cout,)
    w_torch = jax.random.uniform(k_w, (c_out, c_in, 2, 2, 2), jnp.float32, -bound, bound)
    b = jax.random.uniform(k_b, (c_out,), jnp.float32, -bound, bound)
    # BatchNorm3d params / running stats (eval-mode use)
    gamma = jax.random.uniform(k_g, (c_out,), jnp.float32, 0.5, 1.5)
    beta = 0.1 * jax.random.normal(k_be, (c_out,), jnp.float32)
    run_mean = 0.1 * jax.random.normal(k_m, (c_out,), jnp.float32)
    run_var = jax.random.uniform(k_v, (c_out,), jnp.float32, 0.5, 1.5)
    torch_params = (w_torch, b, gamma, beta, run_mean, run_var, eps)
    return _fold_params(*torch_params), torch_params


# ----------------------------------------------------------------------------
# Pure-JAX reference (NCDHW, PyTorch semantics) for validation
# ----------------------------------------------------------------------------
def _reference_layer(x_ncdhw, torch_params):
    w, b, gamma, beta, mean, var, eps = torch_params
    y = lax.conv_general_dilated(
        x_ncdhw, w, window_strides=(1, 1, 1), padding="VALID",
        dimension_numbers=("NCDHW", "OIDHW", "NCDHW"))
    y = y + b[None, :, None, None, None]
    y = (y - mean[None, :, None, None, None]) / jnp.sqrt(
        var[None, :, None, None, None] + eps)
    y = gamma[None, :, None, None, None] * y + beta[None, :, None, None, None]
    return jnp.where(y > 0, y, 0.2 * y)


# ----------------------------------------------------------------------------
# Full voxelcnn forward (NCDHW in, NCDHW out)
# ----------------------------------------------------------------------------
@jax.jit
def voxelcnn_forward(x_ncdhw, p1, p2, p3):
    n, c, d, h, w = x_ncdhw.shape
    assert c == 1 and d == h == w and d >= 4, (n, c, d, h, w)
    s = d
    g, _, offs, m1, m2, m3 = _fused_geometry(s)
    g3 = g * g * g

    # NCDHW with C == 1 -> (N, D, H, W): a pure reshape, no transpose / copy.
    x_g = x_ncdhw.reshape(n, s, s, s)
    # Layer-1 tap gather only (8 shifted views of the raw ~3 KB input). Layers 2/3
    # im2col (the 8x channel expansion) happens inside the kernel in VMEM.
    cols = [x_g[:, kd:kd + g, kh:kh + g, kw:kw + g].reshape(n, g3)
            for kd in (0, 1) for kh in (0, 1) for kw in (0, 1)]
    x_taps = jnp.stack(cols, axis=-1)                              # (n, g^3, 8)
    x_taps = jnp.pad(x_taps, ((0, 0), (0, m1 - g3), (0, 0)))       # finite halo rows

    out = _fused_pallas_call(x_taps, *p1, *p2, *p3, offs=offs, m1=m1, m2=m2, m3=m3)

    # Rows live on the g x g per-plane grid: crop the halo columns, back to NCDHW.
    do = s - 3
    out = out.reshape(n, do, g, g, 256)[:, :, :do, :do, :]
    return jnp.transpose(out, (0, 4, 1, 2, 3))                     # (n, 256, do, do, do)


if __name__ == "__main__":
    key = jax.random.PRNGKey(0)
    k_x, k1, k2, k3 = jax.random.split(key, 4)

    # Input: (N=2, C=1, D=9, H=9, W=9)  -> output (2, 256, 6, 6, 6)
    x = jax.random.normal(k_x, (2, 1, 9, 9, 9), jnp.float32)

    p1, t1 = _init_layer(k1, 1, 64)
    p2, t2 = _init_layer(k2, 64, 128)
    p3, t3 = _init_layer(k3, 128, 256)

    out = voxelcnn_forward(x, p1, p2, p3)
    out = jax.block_until_ready(out)

    # Validate against a pure-JAX f32 NCDHW reference of the PyTorch forward.
    ref = _reference_layer(x, t1)
    ref = _reference_layer(ref, t2)
    ref = _reference_layer(ref, t3)
    ref = jax.block_until_ready(ref)

    assert out.shape == (2, 256, 6, 6, 6), out.shape
    assert out.dtype == jnp.float32
    max_err = float(jnp.max(jnp.abs(out - ref)))
    # bf16 matmul operands (f32 accumulation) across 3 layers -> relaxed tolerance.
    assert jnp.allclose(out, ref, rtol=5e-2, atol=5e-2), max_err

    print("KERNEL_OK")
</pallas_src>

<mosaic_0001>
module attributes {stable_mosaic.version = 11 : i64} {
  func.func @_voxelcnn_fused_kernel(%arg0: i32, %arg1: memref<1x544x8xf32, #tpu.memory_space<vmem>>, %arg2: memref<8x64xbf16, #tpu.memory_space<vmem>>, %arg3: memref<1x64xf32, #tpu.memory_space<vmem>>, %arg4: memref<512x128xbf16, #tpu.memory_space<vmem>>, %arg5: memref<1x128xf32, #tpu.memory_space<vmem>>, %arg6: memref<1024x256xbf16, #tpu.memory_space<vmem>>, %arg7: memref<1x256xf32, #tpu.memory_space<vmem>>, %arg8: memref<1x384x256xf32, #tpu.memory_space<vmem>>, %arg9: memref<544x64xf32, #tpu.memory_space<vmem>>, %arg10: memref<464x128xf32, #tpu.memory_space<vmem>>) attributes {dimension_semantics = [#tpu.dimension_semantics<parallel>], iteration_bounds = array<i64: 2>, scalar_prefetch = 0 : i64, scratch_operands = 2 : i64, tpu.core_type = #tpu.core_type<tc>, window_params = [{transform_indices = @transform_0, window_bounds = array<i64: 1, 544, 8>}, {pipeline_mode = #tpu.pipeline_mode<synchronous>, transform_indices = @transform_1, window_bounds = array<i64: 8, 64>}, {pipeline_mode = #tpu.pipeline_mode<synchronous>, transform_indices = @transform_2, window_bounds = array<i64: 1, 64>}, {pipeline_mode = #tpu.pipeline_mode<synchronous>, transform_indices = @transform_3, window_bounds = array<i64: 512, 128>}, {pipeline_mode = #tpu.pipeline_mode<synchronous>, transform_indices = @transform_4, window_bounds = array<i64: 1, 128>}, {pipeline_mode = #tpu.pipeline_mode<synchronous>, transform_indices = @transform_5, window_bounds = array<i64: 1024, 256>}, {pipeline_mode = #tpu.pipeline_mode<synchronous>, transform_indices = @transform_6, window_bounds = array<i64: 1, 256>}, {transform_indices = @transform_7, window_bounds = array<i64: 1, 384, 256>}]} {
    %c0 = arith.constant 0 : index
    %c0_0 = arith.constant 0 : index
    %c0_1 = arith.constant 0 : index
    %0 = vector.load %arg1[%c0, %c0_0, %c0_1] : memref<1x544x8xf32, #tpu.memory_space<vmem>>, vector<1x544x8xf32>
    %1 = vector.shape_cast %0 : vector<1x544x8xf32> to vector<544x8xf32>
    %2 = arith.truncf %1 : vector<544x8xf32> to vector<544x8xbf16>
    %c0_2 = arith.constant 0 : index
    %c0_3 = arith.constant 0 : index
    %3 = vector.load %arg2[%c0_2, %c0_3] : memref<8x64xbf16, #tpu.memory_space<vmem>>, vector<8x64xbf16>
    %cst = arith.constant dense<0.000000e+00> : vector<544x64xf32>
    %4 = tpu.matmul %2, %3, %cst {dimension_numbers = #tpu.dot_dimension_numbers<[1], [0], [0], [1], [0, 0, 1, 1], [], []>} : vector<544x8xbf16>, vector<8x64xbf16>, vector<544x64xf32> -> vector<544x64xf32>
    %c0_4 = arith.constant 0 : index
    %c0_5 = arith.constant 0 : index
    %5 = vector.load %arg3[%c0_4, %c0_5] : memref<1x64xf32, #tpu.memory_space<vmem>>, vector<1x64xf32>
    %6 = vector.broadcast %5 : vector<1x64xf32> to vector<544x64xf32>
    %7 = arith.addf %4, %6 : vector<544x64xf32>
    %cst_6 = arith.constant 2.000000e-01 : f32
    %8 = vector.broadcast %cst_6 : f32 to vector<544x64xf32>
    %9 = arith.mulf %8, %7 : vector<544x64xf32>
    %10 = arith.maximumf %7, %9 : vector<544x64xf32>
    %c0_7 = arith.constant 0 : index
    %c0_8 = arith.constant 0 : index
    %11 = vector.load %arg9[%c0_7, %c0_8] : memref<544x64xf32, #tpu.memory_space<vmem>>, vector<544x64xf32>
    tpu.vector_store %arg9[%c0_7, %c0_8], %10 {strides = array<i32>} : memref<544x64xf32, #tpu.memory_space<vmem>>, vector<544x64xf32>,
    %c0_9 = arith.constant 0 : index
    %c0_10 = arith.constant 0 : index
    %12 = vector.load %arg9[%c0_9, %c0_10] : memref<544x64xf32, #tpu.memory_space<vmem>>, vector<464x64xf32>
    %13 = arith.truncf %12 : vector<464x64xf32> to vector<464x64xbf16>
    %c0_11 = arith.constant 0 : index
    %c0_12 = arith.constant 0 : index
    %14 = vector.load %arg4[%c0_11, %c0_12] : memref<512x128xbf16, #tpu.memory_space<vmem>>, vector<64x128xbf16>
    %cst_13 = arith.constant dense<0.000000e+00> : vector<464x128xf32>
    %15 = tpu.matmul %13, %14, %cst_13 {dimension_numbers = #tpu.dot_dimension_numbers<[1], [0], [0], [1], [0, 0, 1, 1], [], []>} : vector<464x64xbf16>, vector<64x128xbf16>, vector<464x128xf32> -> vector<464x128xf32>
    %c0_14 = arith.constant 0 : index
    %c0_15 = arith.constant 0 : index
    %16 = vector.load %arg10[%c0_14, %c0_15] : memref<464x128xf32, #tpu.memory_space<vmem>>, vector<464x128xf32>
    tpu.vector_store %arg10[%c0_14, %c0_15], %15 {strides = array<i32>} : memref<464x128xf32, #tpu.memory_space<vmem>>, vector<464x128xf32>,
    %c1 = arith.constant 1 : index
    %c0_16 = arith.constant 0 : index
    %17 = vector.load %arg9[%c1, %c0_16] : memref<544x64xf32, #tpu.memory_space<vmem>>, vector<464x64xf32>
    %18 = arith.truncf %17 : vector<464x64xf32> to vector<464x64xbf16>
    %c64 = arith.constant 64 : index
    %c0_17 = arith.constant 0 : index
    %19 = vector.load %arg4[%c64, %c0_17] : memref<512x128xbf16, #tpu.memory_space<vmem>>, vector<64x128xbf16>
    %cst_18 = arith.constant dense<0.000000e+00> : vector<464x128xf32>
    %20 = tpu.matmul %18, %19, %cst_18 {dimension_numbers = #tpu.dot_dimension_numbers<[1], [0], [0], [1], [0, 0, 1, 1], [], []>} : vector<464x64xbf16>, vector<64x128xbf16>, vector<464x128xf32> -> vector<464x128xf32>
    %c0_19 = arith.constant 0 : index
    %c0_20 = arith.constant 0 : index
    %21 = vector.load %arg10[%c0_19, %c0_20] : memref<464x128xf32, #tpu.memory_space<vmem>>, vector<464x128xf32>
    %22 = arith.addf %21, %20 : vector<464x128xf32>
    %c0_21 = arith.constant 0 : index
    %c0_22 = arith.constant 0 : index
    %23 = vector.load %arg10[%c0_21, %c0_22] : memref<464x128xf32, #tpu.memory_space<vmem>>, vector<464x128xf32>
    tpu.vector_store %arg10[%c0_21, %c0_22], %22 {strides = array<i32>} : memref<464x128xf32, #tpu.memory_space<vmem>>, vector<464x128xf32>,
    %c8 = arith.constant 8 : index
    %c0_23 = arith.constant 0 : index
    %24 = vector.load %arg9[%c8, %c0_23] : memref<544x64xf32, #tpu.memory_space<vmem>>, vector<464x64xf32>
    %25 = arith.truncf %24 : vector<464x64xf32> to vector<464x64xbf16>
    %c128 = arith.constant 128 : index
    %c0_24 = arith.constant 0 : index
    %26 = vector.load %arg4[%c128, %c0_24] : memref<512x128xbf16, #tpu.memory_space<vmem>>, vector<64x128xbf16>
    %cst_25 = arith.constant dense<0.000000e+00> : vector<464x128xf32>
    %27 = tpu.matmul %25, %26, %cst_25 {dimension_numbers = #tpu.dot_dimension_numbers<[1], [0], [0], [1], [0, 0, 1, 1], [], []>} : vector<464x64xbf16>, vector<64x128xbf16>, vector<464x128xf32> -> vector<464x128xf32>
    %c0_26 = arith.constant 0 : index
    %c0_27 = arith.constant 0 : index
    %28 = vector.load %arg10[%c0_26, %c0_27] : memref<464x128xf32, #tpu.memory_space<vmem>>, vector<464x128xf32>
    %29 = arith.addf %28, %27 : vector<464x128xf32>
    %c0_28 = arith.constant 0 : index
    %c0_29 = arith.constant 0 : index
    %30 = vector.load %arg10[%c0_28, %c0_29] : memref<464x128xf32, #tpu.memory_space<vmem>>, vector<464x128xf32>
    tpu.vector_store %arg10[%c0_28, %c0_29], %29 {strides = array<i32>} : memref<464x128xf32, #tpu.memory_space<vmem>>, vector<464x128xf32>,
    %c9 = arith.constant 9 : index
    %c0_30 = arith.constant 0 : index
    %31 = vector.load %arg9[%c9, %c0_30] : memref<544x64xf32, #tpu.memory_space<vmem>>, vector<464x64xf32>
    %32 = arith.truncf %31 : vector<464x64xf32> to vector<464x64xbf16>
    %c192 = arith.constant 192 : index
    %c0_31 = arith.constant 0 : index
    %33 = vector.load %arg4[%c192, %c0_31] : memref<512x128xbf16, #tpu.memory_space<vmem>>, vector<64x128xbf16>
    %cst_32 = arith.constant dense<0.000000e+00> : vector<464x128xf32>
    %34 = tpu.matmul %32, %33, %cst_32 {dimension_numbers = #tpu.dot_dimension_numbers<[1], [0], [0], [1], [0, 0, 1, 1], [], []>} : vector<464x64xbf16>, vector<64x128xbf16>, vector<464x128xf32> -> vector<464x128xf32>
    %c0_33 = arith.constant 0 : index
    %c0_34 = arith.constant 0 : index
    %35 = vector.load %arg10[%c0_33, %c0_34] : memref<464x128xf32, #tpu.memory_space<vmem>>, vector<464x128xf32>
    %36 = arith.addf %35, %34 : vector<464x128xf32>
    %c0_35 = arith.constant 0 : index
    %c0_36 = arith.constant 0 : index
    %37 = vector.load %arg10[%c0_35, %c0_36] : memref<464x128xf32, #tpu.memory_space<vmem>>, vector<464x128xf32>
    tpu.vector_store %arg10[%c0_35, %c0_36], %36 {strides = array<i32>} : memref<464x128xf32, #tpu.memory_space<vmem>>, vector<464x128xf32>,
    %c64_37 = arith.constant 64 : index
    %c0_38 = arith.constant 0 : index
    %38 = vector.load %arg9[%c64_37, %c0_38] : memref<544x64xf32, #tpu.memory_space<vmem>>, vector<464x64xf32>
    %39 = arith.truncf %38 : vector<464x64xf32> to vector<464x64xbf16>
    %c256 = arith.constant 256 : index
    %c0_39 = arith.constant 0 : index
    %40 = vector.load %arg4[%c256, %c0_39] : memref<512x128xbf16, #tpu.memory_space<vmem>>, vector<64x128xbf16>
    %cst_40 = arith.constant dense<0.000000e+00> : vector<464x128xf32>
    %41 = tpu.matmul %39, %40, %cst_40 {dimension_numbers = #tpu.dot_dimension_numbers<[1], [0], [0], [1], [0, 0, 1, 1], [], []>} : vector<464x64xbf16>, vector<64x128xbf16>, vector<464x128xf32> -> vector<464x128xf32>
    %c0_41 = arith.constant 0 : index
    %c0_42 = arith.constant 0 : index
    %42 = vector.load %arg10[%c0_41, %c0_42] : memref<464x128xf32, #tpu.memory_space<vmem>>, vector<464x128xf32>
    %43 = arith.addf %42, %41 : vector<464x128xf32>
    %c0_43 = arith.constant 0 : index
    %c0_44 = arith.constant 0 : index
    %44 = vector.load %arg10[%c0_43, %c0_44] : memref<464x128xf32, #tpu.memory_space<vmem>>, vector<464x128xf32>
    tpu.vector_store %arg10[%c0_43, %c0_44], %43 {strides = array<i32>} : memref<464x128xf32, #tpu.memory_space<vmem>>, vector<464x128xf32>,
    %c65 = arith.constant 65 : index
    %c0_45 = arith.constant 0 : index
    %45 = vector.load %arg9[%c65, %c0_45] : memref<544x64xf32, #tpu.memory_space<vmem>>, vector<464x64xf32>
    %46 = arith.truncf %45 : vector<464x64xf32> to vector<464x64xbf16>
    %c320 = arith.constant 320 : index
    %c0_46 = arith.constant 0 : index
    %47 = vector.load %arg4[%c320, %c0_46] : memref<512x128xbf16, #tpu.memory_space<vmem>>, vector<64x128xbf16>
    %cst_47 = arith.constant dense<0.000000e+00> : vector<464x128xf32>
    %48 = tpu.matmul %46, %47, %cst_47 {dimension_numbers = #tpu.dot_dimension_numbers<[1], [0], [0], [1], [0, 0, 1, 1], [], []>} : vector<464x64xbf16>, vector<64x128xbf16>, vector<464x128xf32> -> vector<464x128xf32>
    %c0_48 = arith.constant 0 : index
    %c0_49 = arith.constant 0 : index
    %49 = vector.load %arg10[%c0_48, %c0_49] : memref<464x128xf32, #tpu.memory_space<vmem>>, vector<464x128xf32>
    %50 = arith.addf %49, %48 : vector<464x128xf32>
    %c0_50 = arith.constant 0 : index
    %c0_51 = arith.constant 0 : index
    %51 = vector.load %arg10[%c0_50, %c0_51] : memref<464x128xf32, #tpu.memory_space<vmem>>, vector<464x128xf32>
    tpu.vector_store %arg10[%c0_50, %c0_51], %50 {strides = array<i32>} : memref<464x128xf32, #tpu.memory_space<vmem>>, vector<464x128xf32>,
    %c72 = arith.constant 72 : index
    %c0_52 = arith.constant 0 : index
    %52 = vector.load %arg9[%c72, %c0_52] : memref<544x64xf32, #tpu.memory_space<vmem>>, vector<464x64xf32>
    %53 = arith.truncf %52 : vector<464x64xf32> to vector<464x64xbf16>
    %c384 = arith.constant 384 : index
    %c0_53 = arith.constant 0 : index
    %54 = vector.load %arg4[%c384, %c0_53] : memref<512x128xbf16, #tpu.memory_space<vmem>>, vector<64x128xbf16>
    %cst_54 = arith.constant dense<0.000000e+00> : vector<464x128xf32>
    %55 = tpu.matmul %53, %54, %cst_54 {dimension_numbers = #tpu.dot_dimension_numbers<[1], [0], [0], [1], [0, 0, 1, 1], [], []>} : vector<464x64xbf16>, vector<64x128xbf16>, vector<464x128xf32> -> vector<464x128xf32>
    %c0_55 = arith.constant 0 : index
    %c0_56 = arith.constant 0 : index
    %56 = vector.load %arg10[%c0_55, %c0_56] : memref<464x128xf32, #tpu.memory_space<vmem>>, vector<464x128xf32>
    %57 = arith.addf %56, %55 : vector<464x128xf32>
    %c0_57 = arith.constant 0 : index
    %c0_58 = arith.constant 0 : index
    %58 = vector.load %arg10[%c0_57, %c0_58] : memref<464x128xf32, #tpu.memory_space<vmem>>, vector<464x128xf32>
    tpu.vector_store %arg10[%c0_57, %c0_58], %57 {strides = array<i32>} : memref<464x128xf32, #tpu.memory_space<vmem>>, vector<464x128xf32>,
    %c73 = arith.constant 73 : index
    %c0_59 = arith.constant 0 : index
    %59 = vector.load %arg9[%c73, %c0_59] : memref<544x64xf32, #tpu.memory_space<vmem>>, vector<464x64xf32>
    %60 = arith.truncf %59 : vector<464x64xf32> to vector<464x64xbf16>
    %c448 = arith.constant 448 : index
    %c0_60 = arith.constant 0 : index
    %61 = vector.load %arg4[%c448, %c0_60] : memref<512x128xbf16, #tpu.memory_space<vmem>>, vector<64x128xbf16>
    %cst_61 = arith.constant dense<0.000000e+00> : vector<464x128xf32>
    %62 = tpu.matmul %60, %61, %cst_61 {dimension_numbers = #tpu.dot_dimension_numbers<[1], [0], [0], [1], [0, 0, 1, 1], [], []>} : vector<464x64xbf16>, vector<64x128xbf16>, vector<464x128xf32> -> vector<464x128xf32>
    %c0_62 = arith.constant 0 : index
    %c0_63 = arith.constant 0 : index
    %63 = vector.load %arg10[%c0_62, %c0_63] : memref<464x128xf32, #tpu.memory_space<vmem>>, vector<464x128xf32>
    %64 = arith.addf %63, %62 : vector<464x128xf32>
    %c0_64 = arith.constant 0 : index
    %c0_65 = arith.constant 0 : index
    %65 = vector.load %arg10[%c0_64, %c0_65] : memref<464x128xf32, #tpu.memory_space<vmem>>, vector<464x128xf32>
    tpu.vector_store %arg10[%c0_64, %c0_65], %64 {strides = array<i32>} : memref<464x128xf32, #tpu.memory_space<vmem>>, vector<464x128xf32>,
    %c0_66 = arith.constant 0 : index
    %c0_67 = arith.constant 0 : index
    %66 = vector.load %arg10[%c0_66, %c0_67] : memref<464x128xf32, #tpu.memory_space<vmem>>, vector<464x128xf32>
    %c0_68 = arith.constant 0 : index
    %c0_69 = arith.constant 0 : index
    %67 = vector.load %arg5[%c0_68, %c0_69] : memref<1x128xf32, #tpu.memory_space<vmem>>, vector<1x128xf32>
    %68 = vector.broadcast %67 : vector<1x128xf32> to vector<464x128xf32>
    %69 = arith.addf %66, %68 : vector<464x128xf32>
    %cst_70 = arith.constant 2.000000e-01 : f32
    %70 = vector.broadcast %cst_70 : f32 to vector<464x128xf32>
    %71 = arith.mulf %70, %69 : vector<464x128xf32>
    %72 = arith.maximumf %69, %71 : vector<464x128xf32>
    %c0_71 = arith.constant 0 : index
    %c0_72 = arith.constant 0 : index
    %73 = vector.load %arg10[%c0_71, %c0_72] : memref<464x128xf32, #tpu.memory_space<vmem>>, vector<464x128xf32>
    tpu.vector_store %arg10[%c0_71, %c0_72], %72 {strides = array<i32>} : memref<464x128xf32, #tpu.memory_space<vmem>>, vector<464x128xf32>,
    %c0_73 = arith.constant 0 : index
    %c0_74 = arith.constant 0 : index
    %74 = vector.load %arg10[%c0_73, %c0_74] : memref<464x128xf32, #tpu.memory_space<vmem>>, vector<384x128xf32>
    %75 = arith.truncf %74 : vector<384x128xf32> to vector<384x128xbf16>
    %c0_75 = arith.constant 0 : index
    %c0_76 = arith.constant 0 : index
    %76 = vector.load %arg6[%c0_75, %c0_76] : memref<1024x256xbf16, #tpu.memory_space<vmem>>, vector<128x256xbf16>
    %cst_77 = arith.constant dense<0.000000e+00> : vector<384x256xf32>
    %77 = tpu.matmul %75, %76, %cst_77 {dimension_numbers = #tpu.dot_dimension_numbers<[1], [0], [0], [1], [0, 0, 1, 1], [], []>} : vector<384x128xbf16>, vector<128x256xbf16>, vector<384x256xf32> -> vector<384x256xf32>
    %c0_78 = arith.constant 0 : index
    %c0_79 = arith.constant 0 : index
    %c0_80 = arith.constant 0 : index
    %78 = vector.load %arg8[%c0_78, %c0_79, %c0_80] : memref<1x384x256xf32, #tpu.memory_space<vmem>>, vector<1x384x256xf32>
    %79 = vector.shape_cast %78 : vector<1x384x256xf32> to vector<384x256xf32>
    %80 = vector.shape_cast %77 : vector<384x256xf32> to vector<1x384x256xf32>
    tpu.vector_store %arg8[%c0_78, %c0_79, %c0_80], %80 {strides = array<i32>} : memref<1x384x256xf32, #tpu.memory_space<vmem>>, vector<1x384x256xf32>,
    %c1_81 = arith.constant 1 : index
    %c0_82 = arith.constant 0 : index
    %81 = vector.load %arg10[%c1_81, %c0_82] : memref<464x128xf32, #tpu.memory_space<vmem>>, vector<384x128xf32>
    %82 = arith.truncf %81 : vector<384x128xf32> to vector<384x128xbf16>
    %c128_83 = arith.constant 128 : index
    %c0_84 = arith.constant 0 : index
    %83 = vector.load %arg6[%c128_83, %c0_84] : memref<1024x256xbf16, #tpu.memory_space<vmem>>, vector<128x256xbf16>
    %cst_85 = arith.constant dense<0.000000e+00> : vector<384x256xf32>
    %84 = tpu.matmul %82, %83, %cst_85 {dimension_numbers = #tpu.dot_dimension_numbers<[1], [0], [0], [1], [0, 0, 1, 1], [], []>} : vector<384x128xbf16>, vector<128x256xbf16>, vector<384x256xf32> -> vector<384x256xf32>
    %c0_86 = arith.constant 0 : index
    %c0_87 = arith.constant 0 : index
    %c0_88 = arith.constant 0 : index
    %85 = vector.load %arg8[%c0_86, %c0_87, %c0_88] : memref<1x384x256xf32, #tpu.memory_space<vmem>>, vector<1x384x256xf32>
    %86 = vector.shape_cast %85 : vector<1x384x256xf32> to vector<384x256xf32>
    %87 = arith.addf %86, %84 : vector<384x256xf32>
    %c0_89 = arith.constant 0 : index
    %c0_90 = arith.constant 0 : index
    %c0_91 = arith.constant 0 : index
    %88 = vector.load %arg8[%c0_89, %c0_90, %c0_91] : memref<1x384x256xf32, #tpu.memory_space<vmem>>, vector<1x384x256xf32>
    %89 = vector.shape_cast %88 : vector<1x384x256xf32> to vector<384x256xf32>
    %90 = vector.shape_cast %87 : vector<384x256xf32> to vector<1x384x256xf32>
    tpu.vector_store %arg8[%c0_89, %c0_90, %c0_91], %90 {strides = array<i32>} : memref<1x384x256xf32, #tpu.memory_space<vmem>>, vector<1x384x256xf32>,
    %c8_92 = arith.constant 8 : index
    %c0_93 = arith.constant 0 : index
    %91 = vector.load %arg10[%c8_92, %c0_93] : memref<464x128xf32, #tpu.memory_space<vmem>>, vector<384x128xf32>
    %92 = arith.truncf %91 : vector<384x128xf32> to vector<384x128xbf16>
    %c256_94 = arith.constant 256 : index
    %c0_95 = arith.constant 0 : index
    %93 = vector.load %arg6[%c256_94, %c0_95] : memref<1024x256xbf16, #tpu.memory_space<vmem>>, vector<128x256xbf16>
    %cst_96 = arith.constant dense<0.000000e+00> : vector<384x256xf32>
    %94 = tpu.matmul %92, %93, %cst_96 {dimension_numbers = #tpu.dot_dimension_numbers<[1], [0], [0], [1], [0, 0, 1, 1], [], []>} : vector<384x128xbf16>, vector<128x256xbf16>, vector<384x256xf32> -> vector<384x256xf32>
    %c0_97 = arith.constant 0 : index
    %c0_98 = arith.constant 0 : index
    %c0_99 = arith.constant 0 : index
    %95 = vector.load %arg8[%c0_97, %c0_98, %c0_99] : memref<1x384x256xf32, #tpu.memory_space<vmem>>, vector<1x384x256xf32>
    %96 = vector.shape_cast %95 : vector<1x384x256xf32> to vector<384x256xf32>
    %97 = arith.addf %96, %94 : vector<384x256xf32>
    %c0_100 = arith.constant 0 : index
    %c0_101 = arith.constant 0 : index
    %c0_102 = arith.constant 0 : index
    %98 = vector.load %arg8[%c0_100, %c0_101, %c0_102] : memref<1x384x256xf32, #tpu.memory_space<vmem>>, vector<1x384x256xf32>
    %99 = vector.shape_cast %98 : vector<1x384x256xf32> to vector<384x256xf32>
    %100 = vector.shape_cast %97 : vector<384x256xf32> to vector<1x384x256xf32>
    tpu.vector_store %arg8[%c0_100, %c0_101, %c0_102], %100 {strides = array<i32>} : memref<1x384x256xf32, #tpu.memory_space<vmem>>, vector<1x384x256xf32>,
    %c9_103 = arith.constant 9 : index
    %c0_104 = arith.constant 0 : index
    %101 = vector.load %arg10[%c9_103, %c0_104] : memref<464x128xf32, #tpu.memory_space<vmem>>, vector<384x128xf32>
    %102 = arith.truncf %101 : vector<384x128xf32> to vector<384x128xbf16>
    %c384_105 = arith.constant 384 : index
    %c0_106 = arith.constant 0 : index
    %103 = vector.load %arg6[%c384_105, %c0_106] : memref<1024x256xbf16, #tpu.memory_space<vmem>>, vector<128x256xbf16>
    %cst_107 = arith.constant dense<0.000000e+00> : vector<384x256xf32>
    %104 = tpu.matmul %102, %103, %cst_107 {dimension_numbers = #tpu.dot_dimension_numbers<[1], [0], [0], [1], [0, 0, 1, 1], [], []>} : vector<384x128xbf16>, vector<128x256xbf16>, vector<384x256xf32> -> vector<384x256xf32>
    %c0_108 = arith.constant 0 : index
    %c0_109 = arith.constant 0 : index
    %c0_110 = arith.constant 0 : index
    %105 = vector.load %arg8[%c0_108, %c0_109, %c0_110] : memref<1x384x256xf32, #tpu.memory_space<vmem>>, vector<1x384x256xf32>
    %106 = vector.shape_cast %105 : vector<1x384x256xf32> to vector<384x256xf32>
    %107 = arith.addf %106, %104 : vector<384x256xf32>
    %c0_111 = arith.constant 0 : index
    %c0_112 = arith.constant 0 : index
    %c0_113 = arith.constant 0 : index
    %108 = vector.load %arg8[%c0_111, %c0_112, %c0_113] : memref<1x384x256xf32, #tpu.memory_space<vmem>>, vector<1x384x256xf32>
    %109 = vector.shape_cast %108 : vector<1x384x256xf32> to vector<384x256xf32>
    %110 = vector.shape_cast %107 : vector<384x256xf32> to vector<1x384x256xf32>
    tpu.vector_store %arg8[%c0_111, %c0_112, %c0_113], %110 {strides = array<i32>} : memref<1x384x256xf32, #tpu.memory_space<vmem>>, vector<1x384x256xf32>,
    %c64_114 = arith.constant 64 : index
    %c0_115 = arith.constant 0 : index
    %111 = vector.load %arg10[%c64_114, %c0_115] : memref<464x128xf32, #tpu.memory_space<vmem>>, vector<384x128xf32>
    %112 = arith.truncf %111 : vector<384x128xf32> to vector<384x128xbf16>
    %c512 = arith.constant 512 : index
    %c0_116 = arith.constant 0 : index
    %113 = vector.load %arg6[%c512, %c0_116] : memref<1024x256xbf16, #tpu.memory_space<vmem>>, vector<128x256xbf16>
    %cst_117 = arith.constant dense<0.000000e+00> : vector<384x256xf32>
    %114 = tpu.matmul %112, %113, %cst_117 {dimension_numbers = #tpu.dot_dimension_numbers<[1], [0], [0], [1], [0, 0, 1, 1], [], []>} : vector<384x128xbf16>, vector<128x256xbf16>, vector<384x256xf32> -> vector<384x256xf32>
    %c0_118 = arith.constant 0 : index
    %c0_119 = arith.constant 0 : index
    %c0_120 = arith.constant 0 : index
    %115 = vector.load %arg8[%c0_118, %c0_119, %c0_120] : memref<1x384x256xf32, #tpu.memory_space<vmem>>, vector<1x384x256xf32>
    %116 = vector.shape_cast %115 : vector<1x384x256xf32> to vector<384x256xf32>
    %117 = arith.addf %116, %114 : vector<384x256xf32>
    %c0_121 = arith.constant 0 : index
    %c0_122 = arith.constant 0 : index
    %c0_123 = arith.constant 0 : index
    %118 = vector.load %arg8[%c0_121, %c0_122, %c0_123] : memref<1x384x256xf32, #tpu.memory_space<vmem>>, vector<1x384x256xf32>
    %119 = vector.shape_cast %118 : vector<1x384x256xf32> to vector<384x256xf32>
    %120 = vector.shape_cast %117 : vector<384x256xf32> to vector<1x384x256xf32>
    tpu.vector_store %arg8[%c0_121, %c0_122, %c0_123], %120 {strides = array<i32>} : memref<1x384x256xf32, #tpu.memory_space<vmem>>, vector<1x384x256xf32>,
    %c65_124 = arith.constant 65 : index
    %c0_125 = arith.constant 0 : index
    %121 = vector.load %arg10[%c65_124, %c0_125] : memref<464x128xf32, #tpu.memory_space<vmem>>, vector<384x128xf32>
    %122 = arith.truncf %121 : vector<384x128xf32> to vector<384x128xbf16>
    %c640 = arith.constant 640 : index
    %c0_126 = arith.constant 0 : index
    %123 = vector.load %arg6[%c640, %c0_126] : memref<1024x256xbf16, #tpu.memory_space<vmem>>, vector<128x256xbf16>
    %cst_127 = arith.constant dense<0.000000e+00> : vector<384x256xf32>
    %124 = tpu.matmul %122, %123, %cst_127 {dimension_numbers = #tpu.dot_dimension_numbers<[1], [0], [0], [1], [0, 0, 1, 1], [], []>} : vector<384x128xbf16>, vector<128x256xbf16>, vector<384x256xf32> -> vector<384x256xf32>
    %c0_128 = arith.constant 0 : index
    %c0_129 = arith.constant 0 : index
    %c0_130 = arith.constant 0 : index
    %125 = vector.load %arg8[%c0_128, %c0_129, %c0_130] : memref<1x384x256xf32, #tpu.memory_space<vmem>>, vector<1x384x256xf32>
    %126 = vector.shape_cast %125 : vector<1x384x256xf32> to vector<384x256xf32>
    %127 = arith.addf %126, %124 : vector<384x256xf32>
    %c0_131 = arith.constant 0 : index
    %c0_132 = arith.constant 0 : index
    %c0_133 = arith.constant 0 : index
    %128 = vector.load %arg8[%c0_131, %c0_132, %c0_133] : memref<1x384x256xf32, #tpu.memory_space<vmem>>, vector<1x384x256xf32>
    %129 = vector.shape_cast %128 : vector<1x384x256xf32> to vector<384x256xf32>
    %130 = vector.shape_cast %127 : vector<384x256xf32> to vector<1x384x256xf32>
    tpu.vector_store %arg8[%c0_131, %c0_132, %c0_133], %130 {strides = array<i32>} : memref<1x384x256xf32, #tpu.memory_space<vmem>>, vector<1x384x256xf32>,
    %c72_134 = arith.constant 72 : index
    %c0_135 = arith.constant 0 : index
    %131 = vector.load %arg10[%c72_134, %c0_135] : memref<464x128xf32, #tpu.memory_space<vmem>>, vector<384x128xf32>
    %132 = arith.truncf %131 : vector<384x128xf32> to vector<384x128xbf16>
    %c768 = arith.constant 768 : index
    %c0_136 = arith.constant 0 : index
    %133 = vector.load %arg6[%c768, %c0_136] : memref<1024x256xbf16, #tpu.memory_space<vmem>>, vector<128x256xbf16>
    %cst_137 = arith.constant dense<0.000000e+00> : vector<384x256xf32>
    %134 = tpu.matmul %132, %133, %cst_137 {dimension_numbers = #tpu.dot_dimension_numbers<[1], [0], [0], [1], [0, 0, 1, 1], [], []>} : vector<384x128xbf16>, vector<128x256xbf16>, vector<384x256xf32> -> vector<384x256xf32>
    %c0_138 = arith.constant 0 : index
    %c0_139 = arith.constant 0 : index
    %c0_140 = arith.constant 0 : index
    %135 = vector.load %arg8[%c0_138, %c0_139, %c0_140] : memref<1x384x256xf32, #tpu.memory_space<vmem>>, vector<1x384x256xf32>
    %136 = vector.shape_cast %135 : vector<1x384x256xf32> to vector<384x256xf32>
    %137 = arith.addf %136, %134 : vector<384x256xf32>
    %c0_141 = arith.constant 0 : index
    %c0_142 = arith.constant 0 : index
    %c0_143 = arith.constant 0 : index
    %138 = vector.load %arg8[%c0_141, %c0_142, %c0_143] : memref<1x384x256xf32, #tpu.memory_space<vmem>>, vector<1x384x256xf32>
    %139 = vector.shape_cast %138 : vector<1x384x256xf32> to vector<384x256xf32>
    %140 = vector.shape_cast %137 : vector<384x256xf32> to vector<1x384x256xf32>
    tpu.vector_store %arg8[%c0_141, %c0_142, %c0_143], %140 {strides = array<i32>} : memref<1x384x256xf32, #tpu.memory_space<vmem>>, vector<1x384x256xf32>,
    %c73_144 = arith.constant 73 : index
    %c0_145 = arith.constant 0 : index
    %141 = vector.load %arg10[%c73_144, %c0_145] : memref<464x128xf32, #tpu.memory_space<vmem>>, vector<384x128xf32>
    %142 = arith.truncf %141 : vector<384x128xf32> to vector<384x128xbf16>
    %c896 = arith.constant 896 : index
    %c0_146 = arith.constant 0 : index
    %143 = vector.load %arg6[%c896, %c0_146] : memref<1024x256xbf16, #tpu.memory_space<vmem>>, vector<128x256xbf16>
    %cst_147 = arith.constant dense<0.000000e+00> : vector<384x256xf32>
    %144 = tpu.matmul %142, %143, %cst_147 {dimension_numbers = #tpu.dot_dimension_numbers<[1], [0], [0], [1], [0, 0, 1, 1], [], []>} : vector<384x128xbf16>, vector<128x256xbf16>, vector<384x256xf32> -> vector<384x256xf32>
    %c0_148 = arith.constant 0 : index
    %c0_149 = arith.constant 0 : index
    %c0_150 = arith.constant 0 : index
    %145 = vector.load %arg8[%c0_148, %c0_149, %c0_150] : memref<1x384x256xf32, #tpu.memory_space<vmem>>, vector<1x384x256xf32>
    %146 = vector.shape_cast %145 : vector<1x384x256xf32> to vector<384x256xf32>
    %147 = arith.addf %146, %144 : vector<384x256xf32>
    %c0_151 = arith.constant 0 : index
    %c0_152 = arith.constant 0 : index
    %c0_153 = arith.constant 0 : index
    %148 = vector.load %arg8[%c0_151, %c0_152, %c0_153] : memref<1x384x256xf32, #tpu.memory_space<vmem>>, vector<1x384x256xf32>
    %149 = vector.shape_cast %148 : vector<1x384x256xf32> to vector<384x256xf32>
    %150 = vector.shape_cast %147 : vector<384x256xf32> to vector<1x384x256xf32>
    tpu.vector_store %arg8[%c0_151, %c0_152, %c0_153], %150 {strides = array<i32>} : memref<1x384x256xf32, #tpu.memory_space<vmem>>, vector<1x384x256xf32>,
    %c0_154 = arith.constant 0 : index
    %c0_155 = arith.constant 0 : index
    %c0_156 = arith.constant 0 : index
    %151 = vector.load %arg8[%c0_154, %c0_155, %c0_156] : memref<1x384x256xf32, #tpu.memory_space<vmem>>, vector<1x384x256xf32>
    %152 = vector.shape_cast %151 : vector<1x384x256xf32> to vector<384x256xf32>
    %c0_157 = arith.constant 0 : index
    %c0_158 = arith.constant 0 : index
    %153 = vector.load %arg7[%c0_157, %c0_158] : memref<1x256xf32, #tpu.memory_space<vmem>>, vector<1x256xf32>
    %154 = vector.broadcast %153 : vector<1x256xf32> to vector<384x256xf32>
    %155 = arith.addf %152, %154 : vector<384x256xf32>
    %cst_159 = arith.constant 2.000000e-01 : f32
    %156 = vector.broadcast %cst_159 : f32 to vector<384x256xf32>
    %157 = arith.mulf %156, %155 : vector<384x256xf32>
    %158 = arith.maximumf %155, %157 : vector<384x256xf32>
    %c0_160 = arith.constant 0 : index
    %c0_161 = arith.constant 0 : index
    %c0_162 = arith.constant 0 : index
    %159 = vector.load %arg8[%c0_160, %c0_161, %c0_162] : memref<1x384x256xf32, #tpu.memory_space<vmem>>, vector<1x384x256xf32>
    %160 = vector.shape_cast %159 : vector<1x384x256xf32> to vector<384x256xf32>
    %161 = vector.shape_cast %158 : vector<384x256xf32> to vector<1x384x256xf32>
    tpu.vector_store %arg8[%c0_160, %c0_161, %c0_162], %161 {strides = array<i32>} : memref<1x384x256xf32, #tpu.memory_space<vmem>>, vector<1x384x256xf32>,
    return
  }
  func.func @transform_0(%arg0: i32) -> (i32, i32, i32) {
    %c0_i32 = arith.constant 0 : i32
    %c0_i32_0 = arith.constant 0 : i32
    %c0_i32_1 = arith.constant 0 : i32
    return %arg0, %c0_i32, %c0_i32_0 : i32, i32, i32
  }
  func.func @transform_1(%arg0: i32) -> (i32, i32) {
    %c0_i32 = arith.constant 0 : i32
    %c0_i32_0 = arith.constant 0 : i32
    %c0_i32_1 = arith.constant 0 : i32
    return %c0_i32, %c0_i32_0 : i32, i32
  }
  func.func @transform_2(%arg0: i32) -> (i32, i32) {
    %c0_i32 = arith.constant 0 : i32
    %c0_i32_0 = arith.constant 0 : i32
    %c0_i32_1 = arith.constant 0 : i32
    return %c0_i32, %c0_i32_0 : i32, i32
  }
  func.func @transform_3(%arg0: i32) -> (i32, i32) {
    %c0_i32 = arith.constant 0 : i32
    %c0_i32_0 = arith.constant 0 : i32
    %c0_i32_1 = arith.constant 0 : i32
    return %c0_i32, %c0_i32_0 : i32, i32
  }
  func.func @transform_4(%arg0: i32) -> (i32, i32) {
    %c0_i32 = arith.constant 0 : i32
    %c0_i32_0 = arith.constant 0 : i32
    %c0_i32_1 = arith.constant 0 : i32
    return %c0_i32, %c0_i32_0 : i32, i32
  }
  func.func @transform_5(%arg0: i32) -> (i32, i32) {
    %c0_i32 = arith.constant 0 : i32
    %c0_i32_0 = arith.constant 0 : i32
    %c0_i32_1 = arith.constant 0 : i32
    return %c0_i32, %c0_i32_0 : i32, i32
  }
  func.func @transform_6(%arg0: i32) -> (i32, i32) {
    %c0_i32 = arith.constant 0 : i32
    %c0_i32_0 = arith.constant 0 : i32
    %c0_i32_1 = arith.constant 0 : i32
    return %c0_i32, %c0_i32_0 : i32, i32
  }
  func.func @transform_7(%arg0: i32) -> (i32, i32, i32) {
    %c0_i32 = arith.constant 0 : i32
    %c0_i32_0 = arith.constant 0 : i32
    %c0_i32_1 = arith.constant 0 : i32
    return %arg0, %c0_i32, %c0_i32_0 : i32, i32, i32
  }
}

</mosaic_0001>

<bundles_post_ra>
// kernel: voxelcnn_forward.1
= control target key start
LH: loop header
LB: loop body
LE: loop exit
PB: predicated region body
PF: predicated region fallthrough
CT: control target
= control target key end

     0   :  { %s14626_s24 = smov 0   ;;  %s17332_s0 = inlined_call_operand.vmem [shape: f32[2,544,8], index: 0, kind: input, shape index: {}]   ;;  %s17333_s1 = inlined_call_operand.vmem [shape: bf16[8,64], index: 1, kind: input, shape index: {}]   ;;  %s17334_s2 = inlined_call_operand.vmem [shape: f32[1,64], index: 2, kind: input, shape index: {}]   ;;  %s17335_s3 = inlined_call_operand.vmem [shape: bf16[512,128], index: 3, kind: input, shape index: {}]   ;;  %s17336_s4 = inlined_call_operand.vmem [shape: f32[1,128], index: 4, kind: input, shape index: {}]   ;;  %s17337_s5 = inlined_call_operand.vmem [shape: bf16[1024,256], index: 5, kind: input, shape index: {}]   ;;  %s17338_s6 = inlined_call_operand.vmem [shape: f32[1,256], index: 6, kind: input, shape index: {}]   ;;  %s17339_s7 = inlined_call_operand.vmem [shape: f32[2,384,256], index: 7, kind: output, shape index: {}]  }
   0x1 LB: > { %s12535_s25 = sadd.s32 4294967295, %s14581_s24   ;;  %p12539_p0 = scmp.ge.s32.totalorder %s14581_s24, 1  ;;  %s14581_s24 = sphi %s14626_s24, %s17_s24  }
   0x2   : > { %p237_p1 = scmp.lt.s32.totalorder %s14581_s24, 3 }
   0x4   : > { %p238_p2 = pnand %p12539_p0, %p237_p1 }
   0x5   : > { %p269_p3 = scmp.lt.s32.totalorder (!%p238_p2), %s12535_s25, 1 }
   0x6   : > { %241 = sbr.rel (%p238_p2) target bundleno = 2132 (0x854), region = 48 }
   0xb   : > { %v382_v0 = vld [vmem:[%s17333_s1] sm:$0xf]  ;;  %vm493_vm0 = vcmask 1043456   ;;  %s17341_s25 = smov (!%p269_p3, %s12535_s25), 1  ;;  %v14583_v2 = vmov 0.0   ;;  %v14351_v3 = vld [vmem:[%s17335_s3 + $0x38] sm:$0xff]  }
   0xc   : > { %14335 = vmatprep.subr.msk.bf16.mxu0 %vm493_vm0, %v382_v0  ;;  %v495_v1 = vsel %vm493_vm0, %v382_v0, 0  ;;  %14336 = vmatprep.subr.msk.bf16.mxu1 %vm493_vm0, %v382_v0  ;;  %s14337_s28 = smul.u32 544, %s17341_s25  ;;  %vm390_vm1 = vcmask 64512   ;;  %v14353_v15 = vld [vmem:[%s17335_s3 + $0x30] sm:$0xff]   ;;  %v14355_v20 = vld [vmem:[%s17335_s3 + $0x28] sm:$0xff]   ;;  %v14350_v23 = vld [vmem:[%s17335_s3 + $0x18] sm:$0xff]  }
   0xd   : > { %13272 = vmatpush3.bf16.msra.mxu0 %v495_v1  ;;  %14334 = vmatpush3.bf16.msra.mxu1 %v495_v1  ;;  %v14352_v39 = vld [vmem:[%s17335_s3 + $0x10] sm:$0xff]   ;;  %v14354_v46 = vld [vmem:[%s17335_s3 + $0x8] sm:$0xff]   ;;  %vm14584_vm2 = vmmov 0   ;;  %vm938_vm3 = vcmask 523264   ;;  %s14338_s22 = smul.u32 768, %s17341_s25 }
   0xe   : > { %13341 = vmatprep.subr.bf16.mxu1 %v14583_v2  ;;  %13465 = vmatprep.subr.bf16.mxu0 %v14583_v2  ;;  %s14645_s8 = scalar_lea.vmem %s17332_s0, %s14337_s28 }
   0xf   : > { %v280_v4 = vld [vmem:[%s14645_s8] sm:$0xff]  ;;  %v281_v5 = vld [vmem:[%s14645_s8 + $0x8] sm:$0xff]  ;;  %v282_v6 = vld [vmem:[%s14645_s8 + $0x10] sm:$0xff]  ;;  %s16235_s11 = scalar_lea.vmem %s17339_s7, %s14338_s22 }
  0x10   : > { %v348_v7 = vpack.c.bf16 %v281_v5, %v280_v4  ;;  %v283_v8 = vld [vmem:[%s14645_s8 + $0x18] sm:$0xff]  ;;  %v284_v9 = vld [vmem:[%s14645_s8 + $0x20] sm:$0xff]  ;;  %v285_v10 = vld [vmem:[%s14645_s8 + $0x28] sm:$0xff] }
  0x11   : > { %v349_v11 = vpack.c.bf16 %v283_v8, %v282_v6  ;;  %v350_v12 = vpack.c.bf16 %v285_v10, %v284_v9  ;;  %v286_v13 = vld [vmem:[%s14645_s8 + $0x30] sm:$0xff]  ;;  %v287_v14 = vld [vmem:[%s14645_s8 + $0x38] sm:$0xff]  ;;  %v288_v16 = vld [vmem:[%s14645_s8 + $0x40] sm:$0xff] }
  0x12   : > { %13273 = vmatprep.mubr.msk.bf16.mxu0 %vm390_vm1, %v348_v7  ;;  %v289_v17 = vld [vmem:[%s14645_s8 + $0x48] sm:$0xff]  ;;  %v351_v18 = vpack.c.bf16 %v287_v14, %v286_v13  ;;  %v290_v21 = vld [vmem:[%s14645_s8 + $0x50] sm:$0xff]  ;;  %v291_v22 = vld [vmem:[%s14645_s8 + $0x58] sm:$0xff] }
  0x13   : > { %13274 = vmatmul.mubr.msk.bf16.vlgmr.msra.gmra.mxu0 %vm390_vm1, %v349_v11  ;;  %v352_v19 = vpack.c.bf16 %v289_v17, %v288_v16  ;;  %v316_v24 = vld [vmem:[%s14645_s8 + $0x120] sm:$0xff]  ;;  %v317_v25 = vld [vmem:[%s14645_s8 + $0x128] sm:$0xff]  ;;  %v318_v26 = vld [vmem:[%s14645_s8 + $0x130] sm:$0xff]  ;;  %v353_v35 = vpack.c.bf16 %v291_v22, %v290_v21 }
  0x14   : > { %13277 = vmatprep.mubr.msk.bf16.mxu0 %vm390_vm1, %v350_v12  ;;  %13466 = vmatpush3.bf16.msra.mxu0 %v14351_v3  ;;  %v366_v27 = vpack.c.bf16 %v317_v25, %v316_v24  ;;  %v319_v28 = vld [vmem:[%s14645_s8 + $0x138] sm:$0xff]  ;;  %v320_v29 = vld [vmem:[%s14645_s8 + $0x140] sm:$0xff]  ;;  %v321_v30 = vld [vmem:[%s14645_s8 + $0x148] sm:$0xff] }
  0x15   : > { %13467 = vmatprep.subr.bf16.mxu0 %v14583_v2  ;;  %v292_v31 = vld [vmem:[%s14645_s8 + $0x60] sm:$0xff]  ;;  %v293_v32 = vld [vmem:[%s14645_s8 + $0x68] sm:$0xff]  ;;  %v367_v33 = vpack.c.bf16 %v319_v28, %v318_v26  ;;  %v368_v34 = vpack.c.bf16 %v321_v30, %v320_v29  ;;  %v322_v37 = vld [vmem:[%s14645_s8 + $0x150] sm:$0xff] }
  0x16   : > { %13309 = vmatprep.mubr.msk.bf16.mxu1 %vm390_vm1, %v366_v27  ;;  %v354_v36 = vpack.c.bf16 %v293_v32, %v292_v31  ;;  %v323_v38 = vld [vmem:[%s14645_s8 + $0x158] sm:$0xff]  ;;  %v324_v40 = vld [vmem:[%s14645_s8 + $0x160] sm:$0xff]  ;;  %v325_v41 = vld [vmem:[%s14645_s8 + $0x168] sm:$0xff] }
  0x17   : > { %13310 = vmatmul.mubr.msk.bf16.vlgmr.msra.gmra.mxu1 %vm390_vm1, %v367_v33  ;;  %v369_v42 = vpack.c.bf16 %v323_v38, %v322_v37  ;;  %v294_v43 = vld [vmem:[%s14645_s8 + $0x70] sm:$0xff]  ;;  %v295_v44 = vld [vmem:[%s14645_s8 + $0x78] sm:$0xff]  ;;  %v370_v45 = vpack.c.bf16 %v325_v41, %v324_v40  ;;  %v296_v47 = vld [vmem:[%s14645_s8 + $0x80] sm:$0xff] }
  0x18   : > { %13468 = vmatpush3.bf16.msra.mxu0 %v14353_v15  ;;  %13313 = vmatprep.mubr.msk.bf16.mxu1 %vm390_vm1, %v368_v34  ;;  %v297_v48 = vld [vmem:[%s14645_s8 + $0x88] sm:$0xff]  ;;  %v326_v49 = vld [vmem:[%s14645_s8 + $0x170] sm:$0xff]  ;;  %v327_v50 = vld [vmem:[%s14645_s8 + $0x178] sm:$0xff]  ;;  %v355_v51 = vpack.c.bf16 %v295_v44, %v294_v43 }
  0x19   : > { %13469 = vmatprep.subr.bf16.mxu0 %v14583_v2  ;;  %13342 = vmatpush3.bf16.msra.mxu1 %v14350_v23  ;;  %v328_v52 = vld [vmem:[%s14645_s8 + $0x180] sm:$0xff]  ;;  %v329_v53 = vld [vmem:[%s14645_s8 + $0x188] sm:$0xff]  ;;  %v356_v54 = vpack.c.bf16 %v297_v48, %v296_v47  ;;  %v298_v55 = vld [vmem:[%s14645_s8 + $0x90] sm:$0xff]  ;;  %v371_v59 = vpack.c.bf16 %v327_v50, %v326_v49 }
  0x1a   : > { %13343 = vmatprep.subr.bf16.mxu1 %v14583_v2  ;;  %v299_v56 = vld [vmem:[%s14645_s8 + $0x98] sm:$0xff]  ;;  %v300_v57 = vld [vmem:[%s14645_s8 + $0xa0] sm:$0xff]  ;;  %v301_v58 = vld [vmem:[%s14645_s8 + $0xa8] sm:$0xff]  ;;  %v372_v60 = vpack.c.bf16 %v329_v53, %v328_v52 }
  0x1b   : > { %13278 = vmatmul.mubr.msk.bf16.gmra.mxu0 %vm390_vm1, %v351_v18  ;;  %v330_v61 = vld [vmem:[%s14645_s8 + $0x190] sm:$0xff]  ;;  %v331_v62 = vld [vmem:[%s14645_s8 + $0x198] sm:$0xff]  ;;  %v357_v63 = vpack.c.bf16 %v299_v56, %v298_v55  ;;  %v332_v0 = vld [vmem:[%s14645_s8 + $0x1a0] sm:$0xff]  ;;  %v358_v3 = vpack.c.bf16 %v301_v58, %v300_v57 }
  0x1c   : > { %13281 = vmatprep.mubr.msk.bf16.mxu0 %vm390_vm1, %v352_v19  ;;  %13470 = vmatpush3.bf16.msra.mxu0 %v14355_v20  ;;  %v333_v1 = vld [vmem:[%s14645_s8 + $0x1a8] sm:$0xff]  ;;  %v302_v4 = vld [vmem:[%s14645_s8 + $0xb0] sm:$0xff]  ;;  %v303_v5 = vld [vmem:[%s14645_s8 + $0xb8] sm:$0xff]  ;;  %v373_v8 = vpack.c.bf16 %v331_v62, %v330_v61 }
  0x1d   : > { %13471 = vmatprep.subr.bf16.mxu0 %v14583_v2  ;;  %13344 = vmatpush3.bf16.msra.mxu1 %v14352_v39  ;;  %v304_v6 = vld [vmem:[%s14645_s8 + $0xc0] sm:$0xff]  ;;  %v305_v7 = vld [vmem:[%s14645_s8 + $0xc8] sm:$0xff]  ;;  %v374_v9 = vpack.c.bf16 %v333_v1, %v332_v0  ;;  %v334_v10 = vld [vmem:[%s14645_s8 + $0x1b0] sm:$0xff]  ;;  %v359_v12 = vpack.c.bf16 %v303_v5, %v302_v4 }
  0x1e   : > { %13345 = vmatprep.subr.bf16.mxu1 %v14583_v2  ;;  %v335_v11 = vld [vmem:[%s14645_s8 + $0x1b8] sm:$0xff]  ;;  %v336_v13 = vld [vmem:[%s14645_s8 + $0x1c0] sm:$0xff]  ;;  %v337_v14 = vld [vmem:[%s14645_s8 + $0x1c8] sm:$0xff]  ;;  %v360_v15 = vpack.c.bf16 %v305_v7, %v304_v6 }
  0x1f   : > { %13314 = vmatmul.mubr.msk.bf16.gmra.mxu1 %vm390_vm1, %v369_v42  ;;  %v306_v16 = vld [vmem:[%s14645_s8 + $0xd0] sm:$0xff]  ;;  %v307_v17 = vld [vmem:[%s14645_s8 + $0xd8] sm:$0xff]  ;;  %v308_v18 = vld [vmem:[%s14645_s8 + $0xe0] sm:$0xff]  ;;  %v375_v20 = vpack.c.bf16 %v335_v11, %v334_v10  ;;  %v376_v21 = vpack.c.bf16 %v337_v14, %v336_v13 }
  0x20   : > { %13317 = vmatprep.mubr.msk.bf16.mxu1 %vm390_vm1, %v370_v45  ;;  %v309_v19 = vld [vmem:[%s14645_s8 + $0xe8] sm:$0xff]  ;;  %v338_v22 = vld [vmem:[%s14645_s8 + $0x1d0] sm:$0xff]  ;;  %v339_v23 = vld [vmem:[%s14645_s8 + $0x1d8] sm:$0xff]  ;;  %v361_v24 = vpack.c.bf16 %v307_v17, %v306_v16 }
  0x21   : > { %13346 = vmatpush3.bf16.msra.mxu1 %v14354_v46  ;;  %v340_v25 = vld [vmem:[%s14645_s8 + $0x1e0] sm:$0xff]  ;;  %v341_v26 = vld [vmem:[%s14645_s8 + $0x1e8] sm:$0xff]  ;;  %v362_v27 = vpack.c.bf16 %v309_v19, %v308_v18  ;;  %v310_v28 = vld [vmem:[%s14645_s8 + $0xf0] sm:$0xff]  ;;  %v377_v32 = vpack.c.bf16 %v339_v23, %v338_v22 }
  0x22   : > { %13347 = vmatprep.subr.bf16.mxu1 %v14583_v2  ;;  %v311_v29 = vld [vmem:[%s14645_s8 + $0xf8] sm:$0xff]  ;;  %v312_v30 = vld [vmem:[%s14645_s8 + $0x100] sm:$0xff]  ;;  %v313_v31 = vld [vmem:[%s14645_s8 + $0x108] sm:$0xff]  ;;  %v378_v33 = vpack.c.bf16 %v341_v26, %v340_v25 }
  0x23   : > { %13282 = vmatmul.mubr.msk.bf16.gmra.mxu0 %vm390_vm1, %v353_v35  ;;  %v342_v34 = vld [vmem:[%s14645_s8 + $0x1f0] sm:$0xff]  ;;  %v343_v35 = vld [vmem:[%s14645_s8 + $0x1f8] sm:$0xff]  ;;  %v344_v37 = vld [vmem:[%s14645_s8 + $0x200] sm:$0xff]  ;;  %v364_v39 = vpack.c.bf16 %v313_v31, %v312_v30 }
  0x24   : > { %13285 = vmatprep.mubr.msk.bf16.mxu0 %vm390_vm1, %v354_v36  ;;  %v363_v36 = vpack.c.bf16 %v311_v29, %v310_v28  ;;  %v345_v38 = vld [vmem:[%s14645_s8 + $0x208] sm:$0xff]  ;;  %v314_v40 = vld [vmem:[%s14645_s8 + $0x110] sm:$0xff]  ;;  %v315_v41 = vld [vmem:[%s14645_s8 + $0x118] sm:$0xff]  ;;  %v379_v42 = vpack.c.bf16 %v343_v35, %v342_v34 }
  0x25   : > { %v380_v43 = vpack.c.bf16 %v345_v38, %v344_v37  ;;  %v346_v44 = vld [vmem:[%s14645_s8 + $0x210] sm:$0xff]  ;;  %v347_v45 = vld [vmem:[%s14645_s8 + $0x218] sm:$0xff]  ;;  %v365_v46 = vpack.c.bf16 %v315_v41, %v314_v40  ;;  %v14356_v48 = vld [vmem:[%s17335_s3] sm:$0xff]  }
  0x26   : > { %v381_v47 = vpack.c.bf16 %v347_v45, %v346_v44  ;;  %13348 = vmatpush3.bf16.msra.mxu1 %v14356_v48  ;;  %v14357_v49 = vld [vmem:[%s17335_s3 + $0x20] sm:$0xff]  }
  0x27   : > { %13318 = vmatmul.mubr.msk.bf16.gmra.mxu1 %vm390_vm1, %v371_v59  ;;  %13589 = vmatprep.subr.bf16.mxu1 %v14583_v2  ;;  %v14788_v50 = vld [vmem:[%s17334_s2] ss:$0 sm:$0xff] }
  0x28   : > { %13321 = vmatprep.mubr.msk.bf16.mxu1 %vm390_vm1, %v372_v60  ;;  %13472 = vmatpush3.bf16.msra.mxu0 %v14357_v49 }
  0x29   : > { %13713 = vmatprep.subr.bf16.mxu0 %v14583_v2 }
  0x2b   : > { %13286 = vmatmul.mubr.msk.bf16.gmra.mxu0 %vm390_vm1, %v355_v51 }
  0x2c   : > { %13289 = vmatprep.mubr.msk.bf16.mxu0 %vm390_vm1, %v356_v54 }
  0x2f   : > { %13322 = vmatmul.mubr.msk.bf16.gmra.mxu1 %vm390_vm1, %v373_v8 }
  0x30   : > { %13325 = vmatprep.mubr.msk.bf16.mxu1 %vm390_vm1, %v374_v9 }
  0x33   : > { %13290 = vmatmul.mubr.msk.bf16.gmra.mxu0 %vm390_vm1, %v357_v63 }
  0x34   : > { %13293 = vmatprep.mubr.msk.bf16.mxu0 %vm390_vm1, %v358_v3 }
  0x37   : > { %13326 = vmatmul.mubr.msk.bf16.gmra.mxu1 %vm390_vm1, %v375_v20 }
  0x38   : > { %13329 = vmatprep.mubr.msk.bf16.mxu1 %vm390_vm1, %v376_v21 }
  0x3b   : > { %13294 = vmatmul.mubr.msk.bf16.gmra.mxu0 %vm390_vm1, %v359_v12 }
  0x3c   : > { %13297 = vmatprep.mubr.msk.bf16.mxu0 %vm390_vm1, %v360_v15 }
  0x3f   : > { %13330 = vmatmul.mubr.msk.bf16.gmra.mxu1 %vm390_vm1, %v377_v32 }
  0x40   : > { %13333 = vmatprep.mubr.msk.bf16.mxu1 %vm390_vm1, %v378_v33 }
  0x43   : > { %13298 = vmatmul.mubr.msk.bf16.gmra.mxu0 %vm390_vm1, %v361_v24 }
  0x44   : > { %13301 = vmatprep.mubr.msk.bf16.mxu0 %vm390_vm1, %v362_v27 }
  0x47   : > { %13334 = vmatmul.mubr.msk.bf16.gmra.mxu1 %vm390_vm1, %v379_v42 }
  0x48   : > { %13337 = vmatprep.mubr.msk.bf16.mxu1 %vm390_vm1, %v380_v43 }
  0x4b   : > { %13302 = vmatmul.mubr.msk.bf16.gmra.mxu0 %vm390_vm1, %v363_v36  ;;  %v14358_v36 = vld [vmem:[%s17335_s3 + $0x58] sm:$0xff]  }
  0x4c   : > { %13305 = vmatprep.mubr.msk.bf16.mxu0 %vm390_vm1, %v364_v39 }
  0x4f   : > { %13338 = vmatmul.mubr.msk.bf16.gmra.mxu1 %vm390_vm1, %v381_v47 }
  0x50   : > { %13349 = vmatprep.mubr.msk.bf16.mxu1 %vm14584_vm2, %v14583_v2 }
  0x53   : > { %13306 = vmatmul.mubr.msk.bf16.gmra.mxu0 %vm390_vm1, %v365_v46 }
  0x54   : > { %13473 = vmatprep.mubr.msk.bf16.mxu0 %vm14584_vm2, %v14583_v2 }
  0xd3   : > { %v13275_v51 = vpop.f32.mrf.mxu0 }
  0xd4   : > { %v540_v52 = vadd.f32 %v13275_v51, %v14788_v50 }
  0xd5   : > { %v531_v53 = vpop.f32.mrf.mxu0 }
  0xd6   : > { %v804_v54 = vmul.f32 0.2, %v540_v52  ;;  %v532_v55 = vadd.f32 %v14788_v50, %v531_v53 }
  0xd7   : > { %v13276_v56 = vpop.f32.mrf.mxu0  ;;  %v13311_v10 = vpop.f32.mrf.mxu1 }
  0xd8   : > { %v872_v57 = vmax.f32 %v540_v52, %v804_v54  ;;  %v802_v58 = vmul.f32 0.2, %v532_v55  ;;  %v543_v59 = vadd.f32 %v13276_v56, %v14788_v50  ;;  %v684_v14 = vadd.f32 %v13311_v10, %v14788_v50  ;;  %v14359_v52 = vld [vmem:[%s17335_s3 + $0x78] sm:$0xff]  }
  0xd9   : > { %v534_v60 = vpop.f32.mrf.mxu0  ;;  %v675_v16 = vpop.f32.mrf.mxu1 }
  0xda   : > { %941 = vst.msk [vmem:[#allocation2 + $0x10] sm:$0xff] %vm938_vm3, %v872_v57  ;;  %v870_v61 = vmax.f32 %v532_v55, %v802_v58  ;;  %v805_v62 = vmul.f32 0.2, %v543_v59  ;;  %v535_v63 = vadd.f32 %v14788_v50, %v534_v60  ;;  %v840_v20 = vmul.f32 0.2, %v684_v14 }
  0xdb   : > { %v13279_v0 = vpop.f32.mrf.mxu0  ;;  %v676_v22 = vadd.f32 %v14788_v50, %v675_v16  ;;  %v13312_v23 = vpop.f32.mrf.mxu1 }
  0xdc   : > { %939 = vst.msk [vmem:[#allocation2] sm:$0xff] %vm938_vm3, %v870_v61  ;;  %v873_v1 = vmax.f32 %v543_v59, %v805_v62  ;;  %v803_v3 = vmul.f32 0.2, %v535_v63  ;;  %v556_v4 = vadd.f32 %v13279_v0, %v14788_v50  ;;  %v908_v27 = vmax.f32 %v684_v14, %v840_v20  ;;  %v14360_v62 = vld [vmem:[%s17335_s3 + $0x50] sm:$0xff]  }
  0xdd   : > { %v547_v5 = vpop.f32.mrf.mxu0  ;;  %v838_v29 = vmul.f32 0.2, %v676_v22  ;;  %v687_v30 = vadd.f32 %v13312_v23, %v14788_v50  ;;  %v678_v31 = vpop.f32.mrf.mxu1 }
  0xde   : > { %942 = vst.msk [vmem:[#allocation2 + $0x18] sm:$0xff] %vm938_vm3, %v873_v1  ;;  %v871_v6 = vmax.f32 %v535_v63, %v803_v3  ;;  %v808_v7 = vmul.f32 0.2, %v556_v4  ;;  %v548_v8 = vadd.f32 %v14788_v50, %v547_v5  ;;  %977 = vst.msk [vmem:[#allocation2 + $0x130] sm:$0xff] %vm938_vm3, %v908_v27  ;;  %v679_v43 = vadd.f32 %v14788_v50, %v678_v31 }
  0xdf   : > { %v13280_v9 = vpop.f32.mrf.mxu0  ;;  %v906_v41 = vmax.f32 %v676_v22, %v838_v29  ;;  %v841_v42 = vmul.f32 0.2, %v687_v30  ;;  %v13315_v44 = vpop.f32.mrf.mxu1 }
  0xe0   : > { %940 = vst.msk [vmem:[#allocation2 + $0x8] sm:$0xff] %vm938_vm3, %v871_v6  ;;  %v876_v11 = vmax.f32 %v556_v4, %v808_v7  ;;  %v806_v12 = vmul.f32 0.2, %v548_v8  ;;  %v559_v13 = vadd.f32 %v13280_v9, %v14788_v50  ;;  %v839_v54 = vmul.f32 0.2, %v679_v43 }
  0xe1   : > { %v550_v15 = vpop.f32.mrf.mxu0  ;;  %975 = vst.msk [vmem:[#allocation2 + $0x120] sm:$0xff] %vm938_vm3, %v906_v41  ;;  %v909_v53 = vmax.f32 %v687_v30, %v841_v42  ;;  %v700_v55 = vadd.f32 %v13315_v44, %v14788_v50  ;;  %v691_v56 = vpop.f32.mrf.mxu1 }
  0xe2   : > { %945 = vst.msk [vmem:[#allocation2 + $0x30] sm:$0xff] %vm938_vm3, %v876_v11  ;;  %v874_v17 = vmax.f32 %v548_v8, %v806_v12  ;;  %v809_v18 = vmul.f32 0.2, %v559_v13  ;;  %v551_v19 = vadd.f32 %v14788_v50, %v550_v15  ;;  %v692_v60 = vadd.f32 %v14788_v50, %v691_v56  ;;  %v14361_v8 = vld [vmem:[%s17335_s3 + $0x70] sm:$0xff]  }
  0xe3   : > { %v13283_v21 = vpop.f32.mrf.mxu0  ;;  %v1007_v35 = vld [vmem:[#allocation2] sm:$0xff]  ;;  %978 = vst.msk [vmem:[#allocation2 + $0x138] sm:$0xff] %vm938_vm3, %v909_v53  ;;  %v907_v63 = vmax.f32 %v679_v43, %v839_v54  ;;  %v844_v0 = vmul.f32 0.2, %v700_v55  ;;  %v13316_v1 = vpop.f32.mrf.mxu1 }
  0xe4   : > { %943 = vst.msk [vmem:[#allocation2 + $0x20] sm:$0xff] %vm938_vm3, %v874_v17  ;;  %v877_v24 = vmax.f32 %v559_v13, %v809_v18  ;;  %v807_v25 = vmul.f32 0.2, %v551_v19  ;;  %v572_v26 = vadd.f32 %v13283_v21, %v14788_v50  ;;  %v842_v10 = vmul.f32 0.2, %v692_v60  ;;  %v1009_v18 = vld [vmem:[#allocation2 + $0x10] sm:$0xff] }
  0xe5   : > { %v563_v28 = vpop.f32.mrf.mxu0  ;;  %v1010_v7 = vld [vmem:[#allocation2 + $0x18] sm:$0xff]  ;;  %976 = vst.msk [vmem:[#allocation2 + $0x128] sm:$0xff] %vm938_vm3, %v907_v63  ;;  %v912_v9 = vmax.f32 %v700_v55, %v844_v0  ;;  %v703_v11 = vadd.f32 %v13316_v1, %v14788_v50  ;;  %v694_v12 = vpop.f32.mrf.mxu1 }
  0xe6   : > { %946 = vst.msk [vmem:[#allocation2 + $0x38] sm:$0xff] %vm938_vm3, %v877_v24  ;;  %v875_v32 = vmax.f32 %v551_v19, %v807_v25  ;;  %v812_v33 = vmul.f32 0.2, %v572_v26  ;;  %v564_v34 = vadd.f32 %v14788_v50, %v563_v28  ;;  %v910_v19 = vmax.f32 %v692_v60, %v842_v10  ;;  %v1538_v27 = vld [vmem:[#allocation2 + $0x11] sm:$0xff]  ;;  %v14362_v28 = vld [vmem:[%s17335_s3 + $0x48] sm:$0xff]  }
  0xe7   : > { %v13284_v37 = vpop.f32.mrf.mxu0  ;;  %v1008_v38 = vld [vmem:[#allocation2 + $0x8] sm:$0xff]  ;;  %981 = vst.msk [vmem:[#allocation2 + $0x150] sm:$0xff] %vm938_vm3, %v912_v9  ;;  %v845_v20 = vmul.f32 0.2, %v703_v11  ;;  %v695_v21 = vadd.f32 %v14788_v50, %v694_v12  ;;  %v13319_v22 = vpop.f32.mrf.mxu1 }
  0xe8   : > { %v1536_v39 = vld [vmem:[#allocation2 + $0x1] sm:$0xff]  ;;  %v1537_v40 = vld [vmem:[#allocation2 + $0x9] sm:$0xff]  ;;  %944 = vst.msk [vmem:[#allocation2 + $0x28] sm:$0xff] %vm938_vm3, %v875_v32  ;;  %v880_v45 = vmax.f32 %v572_v26, %v812_v33  ;;  %v810_v46 = vmul.f32 0.2, %v564_v34  ;;  %v575_v47 = vadd.f32 %v13284_v37, %v14788_v50  ;;  %v1065_v48 = vpack.c.bf16 %v1008_v38, %v1007_v35  ;;  %979 = vst.msk [vmem:[#allocation2 + $0x140] sm:$0xff] %vm938_vm3, %v910_v19 }
  0xe9   : > { %v566_v49 = vpop.f32.mrf.mxu0  ;;  %v1594_v51 = vpack.c.bf16 %v1537_v40, %v1536_v39  ;;  %v1066_v26 = vpack.c.bf16 %v1010_v7, %v1009_v18  ;;  %v913_v31 = vmax.f32 %v703_v11, %v845_v20  ;;  %v843_v32 = vmul.f32 0.2, %v695_v21  ;;  %v14363_v33 = vld [vmem:[%s17335_s3 + $0x68] sm:$0xff]   ;;  %v707_v35 = vpop.f32.mrf.mxu1 }
  0xea   : > { %949 = vst.msk [vmem:[#allocation2 + $0x50] sm:$0xff] %vm938_vm3, %v880_v45  ;;  %v878_v57 = vmax.f32 %v564_v34, %v810_v46  ;;  %v813_v58 = vmul.f32 0.2, %v575_v47  ;;  %v567_v59 = vadd.f32 %v14788_v50, %v566_v49  ;;  %13350 = vmatmul.mubr.msk.bf16.vlgmr.msra.gmra.mxu1 %vm938_vm3, %v1065_v48  ;;  %v716_v34 = vadd.f32 %v13319_v22, %v14788_v50 }
  0xeb   : > { %13474 = vmatmul.mubr.msk.bf16.vlgmr.msra.gmra.mxu0 %vm938_vm3, %v1594_v51  ;;  %13590 = vmatpush3.bf16.msra.mxu1 %v14358_v36  ;;  %v13287_v61 = vpop.f32.mrf.mxu0  ;;  %v1539_v16 = vld [vmem:[#allocation2 + $0x19] sm:$0xff]  ;;  %v708_v39 = vadd.f32 %v14788_v50, %v707_v35  ;;  %982 = vst.msk [vmem:[#allocation2 + $0x158] sm:$0xff] %vm938_vm3, %v913_v31  ;;  %v911_v41 = vmax.f32 %v695_v21, %v843_v32  ;;  %v13320_v43 = vpop.f32.mrf.mxu1 }
  0xec   : > { %947 = vst.msk [vmem:[#allocation2 + $0x40] sm:$0xff] %vm938_vm3, %v878_v57  ;;  %v881_v3 = vmax.f32 %v575_v47, %v813_v58  ;;  %v811_v4 = vmul.f32 0.2, %v567_v59  ;;  %v588_v5 = vadd.f32 %v13287_v61, %v14788_v50  ;;  %13353 = vmatprep.mubr.msk.bf16.mxu1 %vm14584_vm2, %v14583_v2  ;;  %13477 = vmatprep.mubr.msk.bf16.mxu0 %vm14584_vm2, %v14583_v2  ;;  %v848_v42 = vmul.f32 0.2, %v716_v34 }
  0xed   : > { %v579_v6 = vpop.f32.mrf.mxu0  ;;  %13714 = vmatpush3.bf16.msra.mxu0 %v14359_v52  ;;  %13591 = vmatprep.subr.bf16.mxu1 %v14583_v2  ;;  %v1595_v30 = vpack.c.bf16 %v1539_v16, %v1538_v27  ;;  %980 = vst.msk [vmem:[#allocation2 + $0x148] sm:$0xff] %vm938_vm3, %v911_v41  ;;  %v846_v51 = vmul.f32 0.2, %v708_v39  ;;  %v719_v52 = vadd.f32 %v13320_v43, %v14788_v50  ;;  %v710_v53 = vpop.f32.mrf.mxu1 }
  0xee   : > { %950 = vst.msk [vmem:[#allocation2 + $0x58] sm:$0xff] %vm938_vm3, %v881_v3  ;;  %v879_v13 = vmax.f32 %v567_v59, %v811_v4  ;;  %v816_v14 = vmul.f32 0.2, %v588_v5  ;;  %v580_v15 = vadd.f32 %v14788_v50, %v579_v6  ;;  %13715 = vmatprep.subr.bf16.mxu0 %v14583_v2  ;;  %v916_v49 = vmax.f32 %v716_v34, %v848_v42  ;;  %v1011_v59 = vld [vmem:[#allocation2 + $0x20] sm:$0xff] }
  0xef   : > { %v13288_v17 = vpop.f32.mrf.mxu0  ;;  %13592 = vmatpush3.bf16.msra.mxu1 %v14360_v62  ;;  %v1012_v47 = vld [vmem:[#allocation2 + $0x28] sm:$0xff]  ;;  %v914_v61 = vmax.f32 %v708_v39, %v846_v51  ;;  %v849_v62 = vmul.f32 0.2, %v719_v52  ;;  %v711_v63 = vadd.f32 %v14788_v50, %v710_v53  ;;  %v13323_v0 = vpop.f32.mrf.mxu1 }
  0xf0   : > { %948 = vst.msk [vmem:[#allocation2 + $0x48] sm:$0xff] %vm938_vm3, %v879_v13  ;;  %v884_v23 = vmax.f32 %v588_v5, %v816_v14  ;;  %v814_v24 = vmul.f32 0.2, %v580_v15  ;;  %v591_v25 = vadd.f32 %v13288_v17, %v14788_v50  ;;  %13593 = vmatprep.subr.bf16.mxu1 %v14583_v2  ;;  %v1540_v55 = vld [vmem:[#allocation2 + $0x21] sm:$0xff]  ;;  %v1541_v56 = vld [vmem:[#allocation2 + $0x29] sm:$0xff]  ;;  %985 = vst.msk [vmem:[#allocation2 + $0x170] sm:$0xff] %vm938_vm3, %v916_v49 }
  0xf1   : > { %v582_v29 = vpop.f32.mrf.mxu0  ;;  %13716 = vmatpush3.bf16.msra.mxu0 %v14361_v8  ;;  %v1067_v1 = vpack.c.bf16 %v1012_v47, %v1011_v59  ;;  %v1596_v6 = vpack.c.bf16 %v1541_v56, %v1540_v55  ;;  %983 = vst.msk [vmem:[#allocation2 + $0x160] sm:$0xff] %vm938_vm3, %v914_v61  ;;  %v917_v8 = vmax.f32 %v719_v52, %v849_v62  ;;  %v847_v9 = vmul.f32 0.2, %v711_v63  ;;  %v723_v11 = vpop.f32.mrf.mxu1 }
  0xf2   : > { %953 = vst.msk [vmem:[#allocation2 + $0x70] sm:$0xff] %vm938_vm3, %v884_v23  ;;  %v882_v36 = vmax.f32 %v580_v15, %v814_v24  ;;  %v817_v37 = vmul.f32 0.2, %v591_v25  ;;  %v583_v38 = vadd.f32 %v14788_v50, %v582_v29  ;;  %13354 = vmatmul.mubr.msk.bf16.gmra.mxu1 %vm938_vm3, %v1066_v26  ;;  %13717 = vmatprep.subr.bf16.mxu0 %v14583_v2  ;;  %v1013_v23 = vld [vmem:[#allocation2 + $0x30] sm:$0xff]  ;;  %v1014_v24 = vld [vmem:[#allocation2 + $0x38] sm:$0xff] }
  0xf3   : > { %13478 = vmatmul.mubr.msk.bf16.gmra.mxu0 %vm938_vm3, %v1595_v30  ;;  %13357 = vmatprep.mubr.msk.bf16.mxu1 %vm14584_vm2, %v14583_v2  ;;  %v13291_v40 = vpop.f32.mrf.mxu0  ;;  %v732_v10 = vadd.f32 %v13323_v0, %v14788_v50  ;;  %v724_v15 = vadd.f32 %v14788_v50, %v723_v11  ;;  %986 = vst.msk [vmem:[#allocation2 + $0x178] sm:$0xff] %vm938_vm3, %v917_v8  ;;  %v13324_v19 = vpop.f32.mrf.mxu1  ;;  %v1543_v31 = vld [vmem:[#allocation2 + $0x39] sm:$0xff] }
  0xf4   : > { %951 = vst.msk [vmem:[#allocation2 + $0x60] sm:$0xff] %vm938_vm3, %v882_v36  ;;  %v885_v44 = vmax.f32 %v591_v25, %v817_v37  ;;  %v815_v45 = vmul.f32 0.2, %v583_v38  ;;  %13481 = vmatprep.mubr.msk.bf16.mxu0 %vm14584_vm2, %v14583_v2  ;;  %v604_v46 = vadd.f32 %v13291_v40, %v14788_v50  ;;  %13594 = vmatpush3.bf16.msra.mxu1 %v14362_v28  ;;  %v1542_v40 = vld [vmem:[#allocation2 + $0x31] sm:$0xff]  ;;  %v1015_v62 = vld [vmem:[#allocation2 + $0x40] sm:$0xff] }
  0xf5   : > { %v595_v48 = vpop.f32.mrf.mxu0  ;;  %13718 = vmatpush3.bf16.msra.mxu0 %v14363_v33  ;;  %13595 = vmatprep.subr.bf16.mxu1 %v14583_v2  ;;  %v915_v17 = vmax.f32 %v711_v63, %v847_v9  ;;  %v852_v18 = vmul.f32 0.2, %v732_v10  ;;  %v850_v27 = vmul.f32 0.2, %v724_v15  ;;  %v735_v28 = vadd.f32 %v13324_v19, %v14788_v50  ;;  %v726_v29 = vpop.f32.mrf.mxu1 }
  0xf6   : > { %954 = vst.msk [vmem:[#allocation2 + $0x78] sm:$0xff] %vm938_vm3, %v885_v44  ;;  %v883_v54 = vmax.f32 %v583_v38, %v815_v45  ;;  %v820_v57 = vmul.f32 0.2, %v604_v46  ;;  %v596_v58 = vadd.f32 %v14788_v50, %v595_v48  ;;  %13719 = vmatprep.subr.bf16.mxu0 %v14583_v2  ;;  %v727_v37 = vadd.f32 %v14788_v50, %v726_v29 }
  0xf7   : > { %v13292_v60 = vpop.f32.mrf.mxu0  ;;  %984 = vst.msk [vmem:[#allocation2 + $0x168] sm:$0xff] %vm938_vm3, %v915_v17  ;;  %v920_v26 = vmax.f32 %v732_v10, %v852_v18  ;;  %v918_v35 = vmax.f32 %v724_v15, %v850_v27  ;;  %v853_v36 = vmul.f32 0.2, %v735_v28  ;;  %v13327_v38 = vpop.f32.mrf.mxu1  ;;  %v1068_v39 = vpack.c.bf16 %v1014_v24, %v1013_v23  ;;  %v1016_v63 = vld [vmem:[#allocation2 + $0x48] sm:$0xff] }
  0xf8   : > { %952 = vst.msk [vmem:[#allocation2 + $0x68] sm:$0xff] %vm938_vm3, %v883_v54  ;;  %v888_v3 = vmax.f32 %v604_v46, %v820_v57  ;;  %v818_v4 = vmul.f32 0.2, %v596_v58  ;;  %v607_v5 = vadd.f32 %v13292_v60, %v14788_v50  ;;  %v1597_v44 = vpack.c.bf16 %v1543_v31, %v1542_v40 }
  0xf9   : > { %v598_v7 = vpop.f32.mrf.mxu0  ;;  %989 = vst.msk [vmem:[#allocation2 + $0x190] sm:$0xff] %vm938_vm3, %v920_v26  ;;  %987 = vst.msk [vmem:[#allocation2 + $0x180] sm:$0xff] %vm938_vm3, %v918_v35  ;;  %v921_v46 = vmax.f32 %v735_v28, %v853_v36  ;;  %v851_v47 = vmul.f32 0.2, %v727_v37  ;;  %v748_v48 = vadd.f32 %v13327_v38, %v14788_v50  ;;  %v739_v49 = vpop.f32.mrf.mxu1  ;;  %v1018_v38 = vld [vmem:[#allocation2 + $0x58] sm:$0xff] }
  0xfa   : > { %13358 = vmatmul.mubr.msk.bf16.gmra.mxu1 %vm938_vm3, %v1067_v1  ;;  %957 = vst.msk [vmem:[#allocation2 + $0x90] sm:$0xff] %vm938_vm3, %v888_v3  ;;  %v886_v12 = vmax.f32 %v596_v58, %v818_v4  ;;  %v821_v13 = vmul.f32 0.2, %v607_v5  ;;  %v599_v14 = vadd.f32 %v14788_v50, %v598_v7  ;;  %v740_v54 = vadd.f32 %v14788_v50, %v739_v49  ;;  %v1545_v7 = vld [vmem:[#allocation2 + $0x49] sm:$0xff] }
  0xfb   : > { %13482 = vmatmul.mubr.msk.bf16.gmra.mxu0 %vm938_vm3, %v1596_v6  ;;  %13361 = vmatprep.mubr.msk.bf16.mxu1 %vm14584_vm2, %v14583_v2  ;;  %v13295_v16 = vpop.f32.mrf.mxu0  ;;  %990 = vst.msk [vmem:[#allocation2 + $0x198] sm:$0xff] %vm938_vm3, %v921_v46  ;;  %v919_v56 = vmax.f32 %v727_v37, %v851_v47  ;;  %v856_v57 = vmul.f32 0.2, %v748_v48  ;;  %v13328_v58 = vpop.f32.mrf.mxu1  ;;  %v1544_v6 = vld [vmem:[#allocation2 + $0x41] sm:$0xff]  ;;  %v1017_v37 = vld [vmem:[#allocation2 + $0x50] sm:$0xff] }
  0xfc   : > { %955 = vst.msk [vmem:[#allocation2 + $0x80] sm:$0xff] %vm938_vm3, %v886_v12  ;;  %v889_v20 = vmax.f32 %v607_v5, %v821_v13  ;;  %v819_v21 = vmul.f32 0.2, %v599_v14  ;;  %13485 = vmatprep.mubr.msk.bf16.mxu0 %vm14584_vm2, %v14583_v2  ;;  %v620_v22 = vadd.f32 %v13295_v16, %v14788_v50  ;;  %v854_v3 = vmul.f32 0.2, %v740_v54 }
  0xfd   : > { %v611_v25 = vpop.f32.mrf.mxu0  ;;  %988 = vst.msk [vmem:[#allocation2 + $0x188] sm:$0xff] %vm938_vm3, %v919_v56  ;;  %v924_v1 = vmax.f32 %v748_v48, %v856_v57  ;;  %v751_v4 = vadd.f32 %v13328_v58, %v14788_v50  ;;  %v742_v5 = vpop.f32.mrf.mxu1  ;;  %v1069_v16 = vpack.c.bf16 %v1016_v63, %v1015_v62 }
  0xfe   : > { %958 = vst.msk [vmem:[#allocation2 + $0x98] sm:$0xff] %vm938_vm3, %v889_v20  ;;  %v887_v30 = vmax.f32 %v599_v14, %v819_v21  ;;  %v824_v32 = vmul.f32 0.2, %v620_v22  ;;  %v612_v33 = vadd.f32 %v14788_v50, %v611_v25  ;;  %v922_v12 = vmax.f32 %v740_v54, %v854_v3 }
  0xff   : > { %v13296_v34 = vpop.f32.mrf.mxu0  ;;  %993 = vst.msk [vmem:[#allocation2 + $0x1b0] sm:$0xff] %vm938_vm3, %v924_v1  ;;  %v857_v13 = vmul.f32 0.2, %v751_v4  ;;  %v743_v14 = vadd.f32 %v14788_v50, %v742_v5  ;;  %v13331_v15 = vpop.f32.mrf.mxu1  ;;  %v1598_v20 = vpack.c.bf16 %v1545_v7, %v1544_v6 }
 0x100   : > { %956 = vst.msk [vmem:[#allocation2 + $0x88] sm:$0xff] %vm938_vm3, %v887_v30  ;;  %v892_v41 = vmax.f32 %v620_v22, %v824_v32  ;;  %v822_v42 = vmul.f32 0.2, %v612_v33  ;;  %v623_v43 = vadd.f32 %v13296_v34, %v14788_v50  ;;  %991 = vst.msk [vmem:[#allocation2 + $0x1a0] sm:$0xff] %vm938_vm3, %v922_v12  ;;  %v764_v24 = vadd.f32 %v13331_v15, %v14788_v50  ;;  %v1020_v15 = vld [vmem:[#allocation2 + $0x68] sm:$0xff] }
 0x101   : > { %v614_v45 = vpop.f32.mrf.mxu0  ;;  %v925_v22 = vmax.f32 %v751_v4, %v857_v13  ;;  %v855_v23 = vmul.f32 0.2, %v743_v14  ;;  %v755_v25 = vpop.f32.mrf.mxu1 }
 0x102   : > { %13362 = vmatmul.mubr.msk.bf16.gmra.mxu1 %vm938_vm3, %v1068_v39  ;;  %961 = vst.msk [vmem:[#allocation2 + $0xb0] sm:$0xff] %vm938_vm3, %v892_v41  ;;  %v890_v51 = vmax.f32 %v612_v33, %v822_v42  ;;  %v825_v52 = vmul.f32 0.2, %v623_v43  ;;  %v615_v53 = vadd.f32 %v14788_v50, %v614_v45  ;;  %v756_v29 = vadd.f32 %v14788_v50, %v755_v25  ;;  %v1547_v45 = vld [vmem:[#allocation2 + $0x59] sm:$0xff] }
 0x103   : > { %13486 = vmatmul.mubr.msk.bf16.gmra.mxu0 %vm938_vm3, %v1597_v44  ;;  %13365 = vmatprep.mubr.msk.bf16.mxu1 %vm14584_vm2, %v14583_v2  ;;  %v13299_v55 = vpop.f32.mrf.mxu0  ;;  %994 = vst.msk [vmem:[#allocation2 + $0x1b8] sm:$0xff] %vm938_vm3, %v925_v22  ;;  %v923_v31 = vmax.f32 %v743_v14, %v855_v23  ;;  %v860_v32 = vmul.f32 0.2, %v764_v24  ;;  %v13332_v33 = vpop.f32.mrf.mxu1  ;;  %v1546_v44 = vld [vmem:[#allocation2 + $0x51] sm:$0xff]  ;;  %v1019_v14 = vld [vmem:[#allocation2 + $0x60] sm:$0xff]  ;;  %v1549_v22 = vld [vmem:[#allocation2 + $0x69] sm:$0xff] }
 0x104   : > { %13489 = vmatprep.mubr.msk.bf16.mxu0 %vm14584_vm2, %v14583_v2  ;;  %959 = vst.msk [vmem:[#allocation2 + $0xa0] sm:$0xff] %vm938_vm3, %v890_v51  ;;  %v893_v59 = vmax.f32 %v623_v43, %v825_v52  ;;  %v823_v60 = vmul.f32 0.2, %v615_v53  ;;  %v636_v61 = vadd.f32 %v13299_v55, %v14788_v50  ;;  %v858_v41 = vmul.f32 0.2, %v756_v29 }
 0x105   : > { %v627_v0 = vpop.f32.mrf.mxu0  ;;  %992 = vst.msk [vmem:[#allocation2 + $0x1a8] sm:$0xff] %vm938_vm3, %v923_v31  ;;  %v928_v40 = vmax.f32 %v764_v24, %v860_v32  ;;  %v767_v42 = vadd.f32 %v13332_v33, %v14788_v50  ;;  %v758_v43 = vpop.f32.mrf.mxu1  ;;  %v1070_v55 = vpack.c.bf16 %v1018_v38, %v1017_v37  ;;  %v1071_v31 = vpack.c.bf16 %v1020_v15, %v1019_v14 }
 0x106   : > { %962 = vst.msk [vmem:[#allocation2 + $0xb8] sm:$0xff] %vm938_vm3, %v893_v59  ;;  %v891_v8 = vmax.f32 %v615_v53, %v823_v60  ;;  %v828_v9 = vmul.f32 0.2, %v636_v61  ;;  %v628_v10 = vadd.f32 %v14788_v50, %v627_v0  ;;  %v926_v51 = vmax.f32 %v756_v29, %v858_v41 }
 0x107   : > { %v13300_v11 = vpop.f32.mrf.mxu0  ;;  %997 = vst.msk [vmem:[#allocation2 + $0x1d0] sm:$0xff] %vm938_vm3, %v928_v40  ;;  %v861_v52 = vmul.f32 0.2, %v767_v42  ;;  %v759_v53 = vadd.f32 %v14788_v50, %v758_v43  ;;  %v13335_v54 = vpop.f32.mrf.mxu1  ;;  %v1599_v59 = vpack.c.bf16 %v1547_v45, %v1546_v44 }
 0x108   : > { %960 = vst.msk [vmem:[#allocation2 + $0xa8] sm:$0xff] %vm938_vm3, %v891_v8  ;;  %v896_v17 = vmax.f32 %v636_v61, %v828_v9  ;;  %v826_v18 = vmul.f32 0.2, %v628_v10  ;;  %v639_v19 = vadd.f32 %v13300_v11, %v14788_v50  ;;  %995 = vst.msk [vmem:[#allocation2 + $0x1c0] sm:$0xff] %vm938_vm3, %v926_v51  ;;  %v780_v63 = vadd.f32 %v13335_v54, %v14788_v50 }
 0x109   : > { %v630_v21 = vpop.f32.mrf.mxu0  ;;  %v929_v61 = vmax.f32 %v767_v42, %v861_v52  ;;  %v859_v62 = vmul.f32 0.2, %v759_v53  ;;  %v771_v0 = vpop.f32.mrf.mxu1  ;;  %v1021_v52 = vld [vmem:[#allocation2 + $0x70] sm:$0xff] }
 0x10a   : > { %13366 = vmatmul.mubr.msk.bf16.gmra.mxu1 %vm938_vm3, %v1069_v16  ;;  %965 = vst.msk [vmem:[#allocation2 + $0xd0] sm:$0xff] %vm938_vm3, %v896_v17  ;;  %v894_v26 = vmax.f32 %v628_v10, %v826_v18  ;;  %v829_v27 = vmul.f32 0.2, %v639_v19  ;;  %v631_v28 = vadd.f32 %v14788_v50, %v630_v21  ;;  %v772_v5 = vadd.f32 %v14788_v50, %v771_v0  ;;  %v14364_v10 = vld [vmem:[%s17335_s3 + $0x40] sm:$0xff]  }
 0x10b   : > { %13490 = vmatmul.mubr.msk.bf16.gmra.mxu0 %vm938_vm3, %v1598_v20  ;;  %13369 = vmatprep.mubr.msk.bf16.mxu1 %vm14584_vm2, %v14583_v2  ;;  %v13303_v30 = vpop.f32.mrf.mxu0  ;;  %998 = vst.msk [vmem:[#allocation2 + $0x1d8] sm:$0xff] %vm938_vm3, %v929_v61  ;;  %v927_v7 = vmax.f32 %v759_v53, %v859_v62  ;;  %v864_v8 = vmul.f32 0.2, %v780_v63  ;;  %v13336_v9 = vpop.f32.mrf.mxu1  ;;  %v1548_v21 = vld [vmem:[#allocation2 + $0x61] sm:$0xff]  ;;  %v1022_v53 = vld [vmem:[#allocation2 + $0x78] sm:$0xff] }
 0x10c   : > { %13493 = vmatprep.mubr.msk.bf16.mxu0 %vm14584_vm2, %v14583_v2  ;;  %963 = vst.msk [vmem:[#allocation2 + $0xc0] sm:$0xff] %vm938_vm3, %v894_v26  ;;  %v897_v34 = vmax.f32 %v639_v19, %v829_v27  ;;  %v827_v35 = vmul.f32 0.2, %v631_v28  ;;  %v652_v36 = vadd.f32 %v13303_v30, %v14788_v50  ;;  %v862_v18 = vmul.f32 0.2, %v772_v5  ;;  %13596 = vmatpush3.bf16.msra.mxu1 %v14364_v10  ;;  %v1555_v14 = vld [vmem:[#allocation2 + $0x99] sm:$0xff] }
 0x10d   : > { %v643_v39 = vpop.f32.mrf.mxu0  ;;  %996 = vst.msk [vmem:[#allocation2 + $0x1c8] sm:$0xff] %vm938_vm3, %v927_v7  ;;  %v932_v17 = vmax.f32 %v780_v63, %v864_v8  ;;  %v783_v19 = vadd.f32 %v13336_v9, %v14788_v50  ;;  %v774_v20 = vpop.f32.mrf.mxu1  ;;  %13837 = vmatprep.subr.bf16.mxu1 %v14583_v2  ;;  %v1072_v63 = vpack.c.bf16 %v1022_v53, %v1021_v52  ;;  %v1552_v7 = vld [vmem:[#allocation2 + $0x81] sm:$0xff]  ;;  %v1553_v8 = vld [vmem:[#allocation2 + $0x89] sm:$0xff] }
 0x10e   : > { %966 = vst.msk [vmem:[#allocation2 + $0xd8] sm:$0xff] %vm938_vm3, %v897_v34  ;;  %v895_v46 = vmax.f32 %v631_v28, %v827_v35  ;;  %v832_v47 = vmul.f32 0.2, %v652_v36  ;;  %v644_v48 = vadd.f32 %v14788_v50, %v643_v39  ;;  %v930_v27 = vmax.f32 %v772_v5, %v862_v18  ;;  %v1023_v5 = vld [vmem:[#allocation2 + $0x80] sm:$0xff] }
 0x10f   : > { %v13304_v49 = vpop.f32.mrf.mxu0  ;;  %1001 = vst.msk [vmem:[#allocation2 + $0x1f0] sm:$0xff] %vm938_vm3, %v932_v17  ;;  %v865_v28 = vmul.f32 0.2, %v783_v19  ;;  %v775_v29 = vadd.f32 %v14788_v50, %v774_v20  ;;  %v13339_v30 = vpop.f32.mrf.mxu1  ;;  %v1600_v35 = vpack.c.bf16 %v1549_v22, %v1548_v21  ;;  %v1602_v10 = vpack.c.bf16 %v1553_v8, %v1552_v7  ;;  %v1027_v17 = vld [vmem:[#allocation2 + $0xa0] sm:$0xff]  ;;  %v1028_v18 = vld [vmem:[#allocation2 + $0xa8] sm:$0xff]  ;;  %v1045_v8 = vld [vmem:[#allocation2 + $0x130] sm:$0xff] }
 0x110   : > { %964 = vst.msk [vmem:[#allocation2 + $0xc8] sm:$0xff] %vm938_vm3, %v895_v46  ;;  %v900_v56 = vmax.f32 %v652_v36, %v832_v47  ;;  %v830_v57 = vmul.f32 0.2, %v644_v48  ;;  %v655_v58 = vadd.f32 %v13304_v49, %v14788_v50  ;;  %999 = vst.msk [vmem:[#allocation2 + $0x1e0] sm:$0xff] %vm938_vm3, %v930_v27  ;;  %v796_v39 = vadd.f32 %v13339_v30, %v14788_v50  ;;  %v1557_v20 = vld [vmem:[#allocation2 + $0xa9] sm:$0xff] }
 0x111   : > { %v646_v60 = vpop.f32.mrf.mxu0  ;;  %v933_v37 = vmax.f32 %v783_v19, %v865_v28  ;;  %v863_v38 = vmul.f32 0.2, %v775_v29  ;;  %v787_v40 = vpop.f32.mrf.mxu1  ;;  %v1556_v19 = vld [vmem:[#allocation2 + $0xa1] sm:$0xff]  ;;  %v1075_v21 = vpack.c.bf16 %v1028_v18, %v1027_v17  ;;  %v1577_v17 = vld [vmem:[#allocation2 + $0x149] sm:$0xff] }
 0x112   : > { %13370 = vmatmul.mubr.msk.bf16.gmra.mxu1 %vm938_vm3, %v1070_v55  ;;  %969 = vst.msk [vmem:[#allocation2 + $0xf0] sm:$0xff] %vm938_vm3, %v900_v56  ;;  %v898_v1 = vmax.f32 %v644_v48, %v830_v57  ;;  %v833_v3 = vmul.f32 0.2, %v655_v58  ;;  %v647_v4 = vadd.f32 %v14788_v50, %v646_v60  ;;  %v788_v44 = vadd.f32 %v14788_v50, %v787_v40  ;;  %v1550_v57 = vld [vmem:[#allocation2 + $0x71] sm:$0xff] }
 0x113   : > { %13494 = vmatmul.mubr.msk.bf16.gmra.mxu0 %vm938_vm3, %v1599_v59  ;;  %13373 = vmatprep.mubr.msk.bf16.mxu1 %vm14584_vm2, %v14583_v2  ;;  %v13307_v6 = vpop.f32.mrf.mxu0  ;;  %1002 = vst.msk [vmem:[#allocation2 + $0x1f8] sm:$0xff] %vm938_vm3, %v933_v37  ;;  %v931_v45 = vmax.f32 %v775_v29, %v863_v38  ;;  %v868_v46 = vmul.f32 0.2, %v796_v39  ;;  %v13340_v47 = vpop.f32.mrf.mxu1  ;;  %v1604_v22 = vpack.c.bf16 %v1557_v20, %v1556_v19  ;;  %v1031_v29 = vld [vmem:[#allocation2 + $0xc0] sm:$0xff]  ;;  %v1049_v20 = vld [vmem:[#allocation2 + $0x150] sm:$0xff] }
 0x114   : > { %13497 = vmatprep.mubr.msk.bf16.mxu0 %vm14584_vm2, %v14583_v2  ;;  %967 = vst.msk [vmem:[#allocation2 + $0xe0] sm:$0xff] %vm938_vm3, %v898_v1  ;;  %v901_v11 = vmax.f32 %v655_v58, %v833_v3  ;;  %v831_v12 = vmul.f32 0.2, %v647_v4  ;;  %v668_v13 = vadd.f32 %v13307_v6, %v14788_v50  ;;  %v866_v51 = vmul.f32 0.2, %v788_v44  ;;  %v1551_v58 = vld [vmem:[#allocation2 + $0x79] sm:$0xff] }
 0x115   : > { %v659_v16 = vpop.f32.mrf.mxu0  ;;  %1000 = vst.msk [vmem:[#allocation2 + $0x1e8] sm:$0xff] %vm938_vm3, %v931_v45  ;;  %v936_v54 = vmax.f32 %v796_v39, %v868_v46  ;;  %v799_v55 = vadd.f32 %v13340_v47, %v14788_v50  ;;  %v790_v56 = vpop.f32.mrf.mxu1  ;;  %v1601_v1 = vpack.c.bf16 %v1551_v58, %v1550_v57  ;;  %v1024_v6 = vld [vmem:[#allocation2 + $0x88] sm:$0xff]  ;;  %v1562_v37 = vld [vmem:[#allocation2 + $0xd1] sm:$0xff] }
 0x116   : > { %970 = vst.msk [vmem:[#allocation2 + $0xf8] sm:$0xff] %vm938_vm3, %v901_v11  ;;  %v899_v23 = vmax.f32 %v647_v4, %v831_v12  ;;  %v836_v24 = vmul.f32 0.2, %v668_v13  ;;  %v660_v25 = vadd.f32 %v14788_v50, %v659_v16  ;;  %v934_v60 = vmax.f32 %v788_v44, %v866_v51  ;;  %v1025_v11 = vld [vmem:[#allocation2 + $0x90] sm:$0xff]  ;;  %v1026_v12 = vld [vmem:[#allocation2 + $0x98] sm:$0xff] }
 0x117   : > { %v13308_v26 = vpop.f32.mrf.mxu0  ;;  %v791_v61 = vadd.f32 %v14788_v50, %v790_v56  ;;  %1005 = vst.msk [vmem:[#allocation2 + $0x210] sm:$0xff] %vm938_vm3, %v936_v54  ;;  %v869_v62 = vmul.f32 0.2, %v799_v55  ;;  %v1073_v9 = vpack.c.bf16 %v1024_v6, %v1023_v5  ;;  %v1074_v15 = vpack.c.bf16 %v1026_v12, %v1025_v11  ;;  %v1032_v30 = vld [vmem:[#allocation2 + $0xc8] sm:$0xff]  ;;  %v1575_v11 = vld [vmem:[#allocation2 + $0x139] sm:$0xff] }
 0x118   : > { %968 = vst.msk [vmem:[#allocation2 + $0xe8] sm:$0xff] %vm938_vm3, %v899_v23  ;;  %v904_v32 = vmax.f32 %v668_v13, %v836_v24  ;;  %v834_v33 = vmul.f32 0.2, %v660_v25  ;;  %v671_v34 = vadd.f32 %v13308_v26, %v14788_v50  ;;  %1003 = vst.msk [vmem:[#allocation2 + $0x200] sm:$0xff] %vm938_vm3, %v934_v60  ;;  %v1554_v13 = vld [vmem:[#allocation2 + $0x91] sm:$0xff]  ;;  %v1559_v26 = vld [vmem:[#allocation2 + $0xb9] sm:$0xff] }
 0x119   : > { %v662_v36 = vpop.f32.mrf.mxu0  ;;  %v867_v0 = vmul.f32 0.2, %v791_v61  ;;  %v937_v3 = vmax.f32 %v799_v55, %v869_v62  ;;  %v1603_v16 = vpack.c.bf16 %v1555_v14, %v1554_v13  ;;  %v1029_v23 = vld [vmem:[#allocation2 + $0xb0] sm:$0xff]  ;;  %v1030_v24 = vld [vmem:[#allocation2 + $0xb8] sm:$0xff]  ;;  %v1047_v14 = vld [vmem:[#allocation2 + $0x140] sm:$0xff] }
 0x11a   : > { %13374 = vmatmul.mubr.msk.bf16.gmra.mxu1 %vm938_vm3, %v1071_v31  ;;  %973 = vst.msk [vmem:[#allocation2 + $0x110] sm:$0xff] %vm938_vm3, %v904_v32  ;;  %v902_v41 = vmax.f32 %v660_v25, %v834_v33  ;;  %v837_v42 = vmul.f32 0.2, %v671_v34  ;;  %v663_v43 = vadd.f32 %v14788_v50, %v662_v36  ;;  %v14365_v50 = vld [vmem:[%s17335_s3 + $0x60] sm:$0xff]   ;;  %v1558_v25 = vld [vmem:[#allocation2 + $0xb1] sm:$0xff]  ;;  %v1076_v27 = vpack.c.bf16 %v1030_v24, %v1029_v23  ;;  %v1561_v32 = vld [vmem:[#allocation2 + $0xc9] sm:$0xff] }
 0x11b   : > { %13498 = vmatmul.mubr.msk.bf16.gmra.mxu0 %vm938_vm3, %v1600_v35  ;;  %13377 = vmatprep.mubr.msk.bf16.mxu1 %vm14584_vm2, %v14583_v2  ;;  %v935_v4 = vmax.f32 %v791_v61, %v867_v0  ;;  %1006 = vst.msk [vmem:[#allocation2 + $0x218] sm:$0xff] %vm938_vm3, %v937_v3  ;;  %v1605_v28 = vpack.c.bf16 %v1559_v26, %v1558_v25  ;;  %v1560_v31 = vld [vmem:[#allocation2 + $0xc1] sm:$0xff]  ;;  %v1033_v35 = vld [vmem:[#allocation2 + $0xd0] sm:$0xff]  ;;  %v1034_v36 = vld [vmem:[#allocation2 + $0xd8] sm:$0xff] }
 0x11c   : > { %13501 = vmatprep.mubr.msk.bf16.mxu0 %vm14584_vm2, %v14583_v2  ;;  %971 = vst.msk [vmem:[#allocation2 + $0x100] sm:$0xff] %vm938_vm3, %v902_v41  ;;  %v905_v48 = vmax.f32 %v671_v34, %v837_v42  ;;  %v835_v49 = vmul.f32 0.2, %v663_v43  ;;  %13720 = vmatpush3.bf16.msra.mxu0 %v14365_v50  ;;  %v1077_v33 = vpack.c.bf16 %v1032_v30, %v1031_v29  ;;  %v1563_v38 = vld [vmem:[#allocation2 + $0xd9] sm:$0xff]  ;;  %v1037_v47 = vld [vmem:[#allocation2 + $0xf0] sm:$0xff]  ;;  %v1572_v50 = vld [vmem:[#allocation2 + $0x121] sm:$0xff] }
 0x11d   : > { %1004 = vst.msk [vmem:[#allocation2 + $0x208] sm:$0xff] %vm938_vm3, %v935_v4  ;;  %13961 = vmatprep.subr.bf16.mxu0 %v14583_v2  ;;  %v1606_v34 = vpack.c.bf16 %v1561_v32, %v1560_v31  ;;  %v1078_v39 = vpack.c.bf16 %v1034_v36, %v1033_v35  ;;  %v1607_v40 = vpack.c.bf16 %v1563_v38, %v1562_v37  ;;  %v1035_v41 = vld [vmem:[#allocation2 + $0xe0] sm:$0xff]  ;;  %v1044_v4 = vld [vmem:[#allocation2 + $0x128] sm:$0xff]  ;;  %v1053_v32 = vld [vmem:[#allocation2 + $0x170] sm:$0xff] }
 0x11e   : > { %974 = vst.msk [vmem:[#allocation2 + $0x118] sm:$0xff] %vm938_vm3, %v905_v48  ;;  %v903_v59 = vmax.f32 %v663_v43, %v835_v49  ;;  %v1038_v48 = vld [vmem:[#allocation2 + $0xf8] sm:$0xff]  ;;  %v1043_v3 = vld [vmem:[#allocation2 + $0x120] sm:$0xff]  ;;  %v1573_v5 = vld [vmem:[#allocation2 + $0x129] sm:$0xff] }
 0x11f   : > { %v1036_v42 = vld [vmem:[#allocation2 + $0xe8] sm:$0xff]  ;;  %v1566_v49 = vld [vmem:[#allocation2 + $0xf1] sm:$0xff]  ;;  %v1080_v52 = vpack.c.bf16 %v1038_v48, %v1037_v47  ;;  %v1083_v6 = vpack.c.bf16 %v1044_v4, %v1043_v3  ;;  %v1612_v7 = vpack.c.bf16 %v1573_v5, %v1572_v50  ;;  %v1579_v23 = vld [vmem:[#allocation2 + $0x159] sm:$0xff] }
 0x120   : > { %972 = vst.msk [vmem:[#allocation2 + $0x108] sm:$0xff] %vm938_vm3, %v903_v59  ;;  %v1564_v43 = vld [vmem:[#allocation2 + $0xe1] sm:$0xff]  ;;  %v1565_v44 = vld [vmem:[#allocation2 + $0xe9] sm:$0xff]  ;;  %v1079_v45 = vpack.c.bf16 %v1036_v42, %v1035_v41  ;;  %v1583_v35 = vld [vmem:[#allocation2 + $0x179] sm:$0xff] }
 0x121   : > { %v1608_v46 = vpack.c.bf16 %v1565_v44, %v1564_v43  ;;  %v1041_v60 = vld [vmem:[#allocation2 + $0x110] sm:$0xff]  ;;  %v1051_v26 = vld [vmem:[#allocation2 + $0x160] sm:$0xff]  ;;  %v1060_v4 = vld [vmem:[#allocation2 + $0x1a8] sm:$0xff] }
 0x122   : > { %13378 = vmatmul.mubr.msk.bf16.gmra.mxu1 %vm938_vm3, %v1072_v63  ;;  %v1581_v29 = vld [vmem:[#allocation2 + $0x169] sm:$0xff]  ;;  %v1055_v38 = vld [vmem:[#allocation2 + $0x180] sm:$0xff] }
 0x123   : > { %13502 = vmatmul.mubr.msk.bf16.gmra.mxu0 %vm938_vm3, %v1601_v1  ;;  %13381 = vmatprep.mubr.msk.bf16.mxu1 %vm14584_vm2, %v14583_v2  ;;  %v1567_v51 = vld [vmem:[#allocation2 + $0xf9] sm:$0xff]  ;;  %v1585_v41 = vld [vmem:[#allocation2 + $0x189] sm:$0xff]  ;;  %v1588_v5 = vld [vmem:[#allocation2 + $0x1a1] sm:$0xff] }
 0x124   : > { %13505 = vmatprep.mubr.msk.bf16.mxu0 %vm14584_vm2, %v14583_v2  ;;  %v1609_v53 = vpack.c.bf16 %v1567_v51, %v1566_v49  ;;  %v1039_v54 = vld [vmem:[#allocation2 + $0x100] sm:$0xff]  ;;  %v1057_v49 = vld [vmem:[#allocation2 + $0x190] sm:$0xff]  ;;  %v1058_v51 = vld [vmem:[#allocation2 + $0x198] sm:$0xff] }
 0x125   : > { %v1042_v61 = vld [vmem:[#allocation2 + $0x118] sm:$0xff]  ;;  %v1059_v3 = vld [vmem:[#allocation2 + $0x1a0] sm:$0xff] }
 0x126   : > { %v1570_v62 = vld [vmem:[#allocation2 + $0x111] sm:$0xff]  ;;  %v1571_v63 = vld [vmem:[#allocation2 + $0x119] sm:$0xff]  ;;  %v1082_v0 = vpack.c.bf16 %v1042_v61, %v1041_v60 }
 0x127   : > { %v1040_v55 = vld [vmem:[#allocation2 + $0x108] sm:$0xff]  ;;  %v1611_v1 = vpack.c.bf16 %v1571_v63, %v1570_v62 }
 0x128   : > { %v1568_v56 = vld [vmem:[#allocation2 + $0x101] sm:$0xff]  ;;  %v1569_v57 = vld [vmem:[#allocation2 + $0x109] sm:$0xff]  ;;  %v1081_v58 = vpack.c.bf16 %v1040_v55, %v1039_v54  ;;  %v1587_v54 = vld [vmem:[#allocation2 + $0x199] sm:$0xff] }
 0x129   : > { %v1610_v59 = vpack.c.bf16 %v1569_v57, %v1568_v56 }
 0x12a   : > { %13382 = vmatmul.mubr.msk.bf16.gmra.mxu1 %vm938_vm3, %v1073_v9  ;;  %v1046_v9 = vld [vmem:[#allocation2 + $0x138] sm:$0xff] }
 0x12b   : > { %13506 = vmatmul.mubr.msk.bf16.gmra.mxu0 %vm938_vm3, %v1602_v10  ;;  %13385 = vmatprep.mubr.msk.bf16.mxu1 %vm14584_vm2, %v14583_v2  ;;  %v1574_v10 = vld [vmem:[#allocation2 + $0x131] sm:$0xff]  ;;  %v1084_v12 = vpack.c.bf16 %v1046_v9, %v1045_v8 }
 0x12c   : > { %13509 = vmatprep.mubr.msk.bf16.mxu0 %vm14584_vm2, %v14583_v2  ;;  %v1613_v13 = vpack.c.bf16 %v1575_v11, %v1574_v10  ;;  %v1091_v10 = vpack.c.bf16 %v1060_v4, %v1059_v3  ;;  %v14368_v3 = vld [vmem:[%s17335_s3 + $0x90] sm:$0xff]  }
 0x132   : > { %13386 = vmatmul.mubr.msk.bf16.gmra.mxu1 %vm938_vm3, %v1074_v15  ;;  %v1048_v15 = vld [vmem:[#allocation2 + $0x148] sm:$0xff] }
 0x133   : > { %13510 = vmatmul.mubr.msk.bf16.gmra.mxu0 %vm938_vm3, %v1603_v16  ;;  %13389 = vmatprep.mubr.msk.bf16.mxu1 %vm14584_vm2, %v14583_v2  ;;  %v1576_v16 = vld [vmem:[#allocation2 + $0x141] sm:$0xff]  ;;  %v1085_v18 = vpack.c.bf16 %v1048_v15, %v1047_v14 }
 0x134   : > { %13513 = vmatprep.mubr.msk.bf16.mxu0 %vm14584_vm2, %v14583_v2  ;;  %v1614_v19 = vpack.c.bf16 %v1577_v17, %v1576_v16 }
 0x13a   : > { %13390 = vmatmul.mubr.msk.bf16.gmra.mxu1 %vm938_vm3, %v1075_v21  ;;  %v1050_v21 = vld [vmem:[#allocation2 + $0x158] sm:$0xff] }
 0x13b   : > { %13514 = vmatmul.mubr.msk.bf16.gmra.mxu0 %vm938_vm3, %v1604_v22  ;;  %13393 = vmatprep.mubr.msk.bf16.mxu1 %vm14584_vm2, %v14583_v2  ;;  %v1578_v22 = vld [vmem:[#allocation2 + $0x151] sm:$0xff]  ;;  %v1086_v24 = vpack.c.bf16 %v1050_v21, %v1049_v20 }
 0x13c   : > { %13517 = vmatprep.mubr.msk.bf16.mxu0 %vm14584_vm2, %v14583_v2  ;;  %v1615_v25 = vpack.c.bf16 %v1579_v23, %v1578_v22  ;;  %v1590_v21 = vld [vmem:[#allocation2 + $0x1b1] sm:$0xff]  ;;  %v1591_v22 = vld [vmem:[#allocation2 + $0x1b9] sm:$0xff] }
 0x142   : > { %13394 = vmatmul.mubr.msk.bf16.gmra.mxu1 %vm938_vm3, %v1076_v27  ;;  %v1052_v27 = vld [vmem:[#allocation2 + $0x168] sm:$0xff] }
 0x143   : > { %13518 = vmatmul.mubr.msk.bf16.gmra.mxu0 %vm938_vm3, %v1605_v28  ;;  %13397 = vmatprep.mubr.msk.bf16.mxu1 %vm14584_vm2, %v14583_v2  ;;  %v1580_v28 = vld [vmem:[#allocation2 + $0x161] sm:$0xff]  ;;  %v1087_v30 = vpack.c.bf16 %v1052_v27, %v1051_v26 }
 0x144   : > { %13521 = vmatprep.mubr.msk.bf16.mxu0 %vm14584_vm2, %v14583_v2  ;;  %v1616_v31 = vpack.c.bf16 %v1581_v29, %v1580_v28  ;;  %v1621_v28 = vpack.c.bf16 %v1591_v22, %v1590_v21 }
 0x14a   : > { %13398 = vmatmul.mubr.msk.bf16.gmra.mxu1 %vm938_vm3, %v1077_v33  ;;  %v1054_v33 = vld [vmem:[#allocation2 + $0x178] sm:$0xff] }
 0x14b   : > { %13522 = vmatmul.mubr.msk.bf16.gmra.mxu0 %vm938_vm3, %v1606_v34  ;;  %13401 = vmatprep.mubr.msk.bf16.mxu1 %vm14584_vm2, %v14583_v2  ;;  %v1582_v34 = vld [vmem:[#allocation2 + $0x171] sm:$0xff]  ;;  %v1088_v36 = vpack.c.bf16 %v1054_v33, %v1053_v32 }
 0x14c   : > { %13525 = vmatprep.mubr.msk.bf16.mxu0 %vm14584_vm2, %v14583_v2  ;;  %v1617_v37 = vpack.c.bf16 %v1583_v35, %v1582_v34  ;;  %v1063_v34 = vld [vmem:[#allocation2 + $0x1c0] sm:$0xff]  ;;  %v1064_v35 = vld [vmem:[#allocation2 + $0x1c8] sm:$0xff] }
 0x152   : > { %13402 = vmatmul.mubr.msk.bf16.gmra.mxu1 %vm938_vm3, %v1078_v39  ;;  %v1056_v39 = vld [vmem:[#allocation2 + $0x188] sm:$0xff] }
 0x153   : > { %13526 = vmatmul.mubr.msk.bf16.gmra.mxu0 %vm938_vm3, %v1607_v40  ;;  %13405 = vmatprep.mubr.msk.bf16.mxu1 %vm14584_vm2, %v14583_v2  ;;  %v1584_v40 = vld [vmem:[#allocation2 + $0x181] sm:$0xff]  ;;  %v1089_v42 = vpack.c.bf16 %v1056_v39, %v1055_v38  ;;  %v1593_v38 = vld [vmem:[#allocation2 + $0x1c9] sm:$0xff] }
 0x154   : > { %13529 = vmatprep.mubr.msk.bf16.mxu0 %vm14584_vm2, %v14583_v2  ;;  %v1618_v43 = vpack.c.bf16 %v1585_v41, %v1584_v40 }
 0x15a   : > { %13406 = vmatmul.mubr.msk.bf16.gmra.mxu1 %vm938_vm3, %v1079_v45 }
 0x15b   : > { %13530 = vmatmul.mubr.msk.bf16.gmra.mxu0 %vm938_vm3, %v1608_v46  ;;  %13409 = vmatprep.mubr.msk.bf16.mxu1 %vm14584_vm2, %v14583_v2 }
 0x15c   : > { %13533 = vmatprep.mubr.msk.bf16.mxu0 %vm14584_vm2, %v14583_v2 }
 0x162   : > { %13410 = vmatmul.mubr.msk.bf16.gmra.mxu1 %vm938_vm3, %v1080_v52 }
 0x163   : > { %13534 = vmatmul.mubr.msk.bf16.gmra.mxu0 %vm938_vm3, %v1609_v53  ;;  %13413 = vmatprep.mubr.msk.bf16.mxu1 %vm14584_vm2, %v14583_v2  ;;  %v1586_v53 = vld [vmem:[#allocation2 + $0x191] sm:$0xff] }
 0x164   : > { %13537 = vmatprep.mubr.msk.bf16.mxu0 %vm14584_vm2, %v14583_v2  ;;  %v1619_v60 = vpack.c.bf16 %v1587_v54, %v1586_v53  ;;  %v2826_v53 = vld [vmem:[#allocation2 + $0x9] sm:$0xff] }
 0x16a   : > { %13414 = vmatmul.mubr.msk.bf16.gmra.mxu1 %vm938_vm3, %v1081_v58  ;;  %v1090_v58 = vpack.c.bf16 %v1058_v51, %v1057_v49  ;;  %v2181_v51 = vld [vmem:[#allocation2 + $0x8] sm:$0xff] }
 0x16b   : > { %13538 = vmatmul.mubr.msk.bf16.gmra.mxu0 %vm938_vm3, %v1610_v59  ;;  %13417 = vmatprep.mubr.msk.bf16.mxu1 %vm14584_vm2, %v14583_v2 }
 0x16c   : > { %13541 = vmatprep.mubr.msk.bf16.mxu0 %vm14584_vm2, %v14583_v2 }
 0x172   : > { %13418 = vmatmul.mubr.msk.bf16.gmra.mxu1 %vm938_vm3, %v1082_v0 }
 0x173   : > { %13542 = vmatmul.mubr.msk.bf16.gmra.mxu0 %vm938_vm3, %v1611_v1  ;;  %13421 = vmatprep.mubr.msk.bf16.mxu1 %vm14584_vm2, %v14583_v2 }
 0x174   : > { %13545 = vmatprep.mubr.msk.bf16.mxu0 %vm14584_vm2, %v14583_v2 }
 0x17a   : > { %13422 = vmatmul.mubr.msk.bf16.gmra.mxu1 %vm938_vm3, %v1083_v6  ;;  %v1589_v6 = vld [vmem:[#allocation2 + $0x1a9] sm:$0xff] }
 0x17b   : > { %13546 = vmatmul.mubr.msk.bf16.gmra.mxu0 %vm938_vm3, %v1612_v7  ;;  %13425 = vmatprep.mubr.msk.bf16.mxu1 %vm14584_vm2, %v14583_v2 }
 0x17c   : > { %13549 = vmatprep.mubr.msk.bf16.mxu0 %vm14584_vm2, %v14583_v2 }
 0x182   : > { %13426 = vmatmul.mubr.msk.bf16.gmra.mxu1 %vm938_vm3, %v1084_v12  ;;  %v1620_v12 = vpack.c.bf16 %v1589_v6, %v1588_v5  ;;  %v2184_v6 = vld [vmem:[#allocation2 + $0x20] sm:$0xff] }
 0x183   : > { %13550 = vmatmul.mubr.msk.bf16.gmra.mxu0 %vm938_vm3, %v1613_v13  ;;  %13429 = vmatprep.mubr.msk.bf16.mxu1 %vm14584_vm2, %v14583_v2 }
 0x184   : > { %13553 = vmatprep.mubr.msk.bf16.mxu0 %vm14584_vm2, %v14583_v2 }
 0x18a   : > { %13430 = vmatmul.mubr.msk.bf16.gmra.mxu1 %vm938_vm3, %v1085_v18  ;;  %v1061_v18 = vld [vmem:[#allocation2 + $0x1b0] sm:$0xff] }
 0x18b   : > { %13554 = vmatmul.mubr.msk.bf16.gmra.mxu0 %vm938_vm3, %v1614_v19  ;;  %13433 = vmatprep.mubr.msk.bf16.mxu1 %vm14584_vm2, %v14583_v2  ;;  %v1062_v19 = vld [vmem:[#allocation2 + $0x1b8] sm:$0xff] }
 0x18c   : > { %13557 = vmatprep.mubr.msk.bf16.mxu0 %vm14584_vm2, %v14583_v2  ;;  %v1092_v26 = vpack.c.bf16 %v1062_v19, %v1061_v18  ;;  %v14371_v19 = vld [vmem:[%s17335_s3 + $0xa8] sm:$0xff]  }
 0x192   : > { %13434 = vmatmul.mubr.msk.bf16.gmra.mxu1 %vm938_vm3, %v1086_v24 }
 0x193   : > { %13558 = vmatmul.mubr.msk.bf16.gmra.mxu0 %vm938_vm3, %v1615_v25  ;;  %13437 = vmatprep.mubr.msk.bf16.mxu1 %vm14584_vm2, %v14583_v2 }
 0x194   : > { %13561 = vmatprep.mubr.msk.bf16.mxu0 %vm14584_vm2, %v14583_v2 }
 0x19a   : > { %13438 = vmatmul.mubr.msk.bf16.gmra.mxu1 %vm938_vm3, %v1087_v30 }
 0x19b   : > { %13562 = vmatmul.mubr.msk.bf16.gmra.mxu0 %vm938_vm3, %v1616_v31  ;;  %13441 = vmatprep.mubr.msk.bf16.mxu1 %vm14584_vm2, %v14583_v2 }
 0x19c   : > { %13565 = vmatprep.mubr.msk.bf16.mxu0 %vm14584_vm2, %v14583_v2 }
 0x1a2   : > { %13442 = vmatmul.mubr.msk.bf16.gmra.mxu1 %vm938_vm3, %v1088_v36 }
 0x1a3   : > { %13566 = vmatmul.mubr.msk.bf16.gmra.mxu0 %vm938_vm3, %v1617_v37  ;;  %13445 = vmatprep.mubr.msk.bf16.mxu1 %vm14584_vm2, %v14583_v2  ;;  %v1592_v37 = vld [vmem:[#allocation2 + $0x1c1] sm:$0xff] }
 0x1a4   : > { %13569 = vmatprep.mubr.msk.bf16.mxu0 %vm14584_vm2, %v14583_v2 }
 0x1aa   : > { %v1247_v44 = vpop.f32.mrf.mxu1  ;;  %13446 = vmatmul.mubr.msk.bf16.gmra.mxu1 %vm938_vm3, %v1089_v42  ;;  %v1093_v42 = vpack.c.bf16 %v1064_v35, %v1063_v34 }
 0x1ab   : > { %v1776_v45 = vpop.f32.mrf.mxu0  ;;  %13570 = vmatmul.mubr.msk.bf16.gmra.mxu0 %vm938_vm3, %v1618_v43  ;;  %13449 = vmatprep.mubr.msk.bf16.mxu1 %vm14584_vm2, %v14583_v2 }
 0x1ac   : > { %v2065_v46 = vadd.f32 %v1776_v45, %v1247_v44  ;;  %v13351_v47 = vpop.f32.mrf.mxu1  ;;  %13573 = vmatprep.mubr.msk.bf16.mxu0 %vm14584_vm2, %v14583_v2  ;;  %v1622_v44 = vpack.c.bf16 %v1593_v38, %v1592_v37 }
 0x1ad   : > { %v13475_v48 = vpop.f32.mrf.mxu0 }
 0x1ae   : > { %2123 = vst [vmem:[#allocation3] sm:$0xff] %v2065_v46  ;;  %v1250_v52 = vpop.f32.mrf.mxu1 }
 0x1af   : > { %v1779_v55 = vpop.f32.mrf.mxu0 }
 0x1b0   : > { %v2066_v56 = vadd.f32 %v1779_v55, %v1250_v52  ;;  %v13352_v57 = vpop.f32.mrf.mxu1  ;;  %v2182_v55 = vld [vmem:[#allocation2 + $0x10] sm:$0xff] }
 0x1b1   : > { %v13476_v59 = vpop.f32.mrf.mxu0 }
 0x1b2   : > { %2124 = vst [vmem:[#allocation3 + $0x8] sm:$0xff] %v2066_v56  ;;  %v1255_v61 = vpop.f32.mrf.mxu1  ;;  %13450 = vmatmul.mubr.msk.bf16.gmra.mxu1 %vm938_vm3, %v1090_v58  ;;  %v14366_v56 = vld [vmem:[%s17335_s3 + $0x98] sm:$0xff]   ;;  %v2239_v59 = vpack.c.bf16 %v2182_v55, %v2181_v51 }
 0x1b3   : > { %v1784_v62 = vpop.f32.mrf.mxu0  ;;  %13574 = vmatmul.mubr.msk.bf16.gmra.mxu0 %vm938_vm3, %v1619_v60  ;;  %13453 = vmatprep.mubr.msk.bf16.mxu1 %vm14584_vm2, %v14583_v2  ;;  %v2827_v60 = vld [vmem:[#allocation2 + $0x11] sm:$0xff] }
 0x1b4   : > { %v2067_v63 = vadd.f32 %v1784_v62, %v1255_v61  ;;  %v13355_v0 = vpop.f32.mrf.mxu1  ;;  %13577 = vmatprep.mubr.msk.bf16.mxu0 %vm14584_vm2, %v14583_v2  ;;  %v2884_v62 = vpack.c.bf16 %v2827_v60, %v2826_v53 }
 0x1b5   : > { %v13479_v1 = vpop.f32.mrf.mxu0 }
 0x1b6   : > { %2125 = vst [vmem:[#allocation3 + $0x10] sm:$0xff] %v2067_v63  ;;  %v1258_v50 = vpop.f32.mrf.mxu1  ;;  %v14367_v63 = vld [vmem:[%s17335_s3 + $0xb8] sm:$0xff]  }
 0x1b7   : > { %v1787_v7 = vpop.f32.mrf.mxu0 }
 0x1b8   : > { %v2068_v8 = vadd.f32 %v1787_v7, %v1258_v50  ;;  %v13356_v9 = vpop.f32.mrf.mxu1  ;;  %v14369_v7 = vld [vmem:[%s17335_s3 + $0xb0] sm:$0xff]  }
 0x1b9   : > { %v13480_v11 = vpop.f32.mrf.mxu0  ;;  %v2829_v9 = vld [vmem:[#allocation2 + $0x21] sm:$0xff] }
 0x1ba   : > { %2126 = vst [vmem:[#allocation3 + $0x18] sm:$0xff] %v2068_v8  ;;  %v1263_v13 = vpop.f32.mrf.mxu1  ;;  %13454 = vmatmul.mubr.msk.bf16.gmra.mxu1 %vm938_vm3, %v1091_v10  ;;  %v2183_v11 = vld [vmem:[#allocation2 + $0x18] sm:$0xff] }
 0x1bb   : > { %v1792_v14 = vpop.f32.mrf.mxu0  ;;  %13578 = vmatmul.mubr.msk.bf16.gmra.mxu0 %vm938_vm3, %v1620_v12  ;;  %13457 = vmatprep.mubr.msk.bf16.mxu1 %vm14584_vm2, %v14583_v2 }
 0x1bc   : > { %v2069_v15 = vadd.f32 %v1792_v14, %v1263_v13  ;;  %v13359_v16 = vpop.f32.mrf.mxu1  ;;  %13581 = vmatprep.mubr.msk.bf16.mxu0 %vm14584_vm2, %v14583_v2  ;;  %v2240_v14 = vpack.c.bf16 %v2184_v6, %v2183_v11  ;;  %v2192_v11 = vld [vmem:[#allocation2 + $0x60] sm:$0xff] }
 0x1bd   : > { %v13483_v17 = vpop.f32.mrf.mxu0  ;;  %v14370_v16 = vld [vmem:[%s17335_s3 + $0x88] sm:$0xff]  }
 0x1be   : > { %2127 = vst [vmem:[#allocation3 + $0x20] sm:$0xff] %v2069_v15  ;;  %v1266_v20 = vpop.f32.mrf.mxu1  ;;  %v2828_v15 = vld [vmem:[#allocation2 + $0x19] sm:$0xff] }
 0x1bf   : > { %v1795_v23 = vpop.f32.mrf.mxu0  ;;  %v2885_v18 = vpack.c.bf16 %v2829_v9, %v2828_v15 }
 0x1c0   : > { %v2070_v24 = vadd.f32 %v1795_v23, %v1266_v20  ;;  %v13360_v25 = vpop.f32.mrf.mxu1 }
 0x1c1   : > { %v13484_v27 = vpop.f32.mrf.mxu0  ;;  %v2185_v25 = vld [vmem:[#allocation2 + $0x28] sm:$0xff] }
 0x1c2   : > { %2128 = vst [vmem:[#allocation3 + $0x28] sm:$0xff] %v2070_v24  ;;  %v1271_v29 = vpop.f32.mrf.mxu1  ;;  %13458 = vmatmul.mubr.msk.bf16.gmra.mxu1 %vm938_vm3, %v1092_v26  ;;  %v2830_v27 = vld [vmem:[#allocation2 + $0x29] sm:$0xff] }
 0x1c3   : > { %v1800_v30 = vpop.f32.mrf.mxu0  ;;  %13582 = vmatmul.mubr.msk.bf16.gmra.mxu0 %vm938_vm3, %v1621_v28  ;;  %13461 = vmatprep.mubr.msk.bf16.mxu1 %vm14584_vm2, %v14583_v2 }
 0x1c4   : > { %v2071_v31 = vadd.f32 %v1800_v30, %v1271_v29  ;;  %v13363_v32 = vpop.f32.mrf.mxu1  ;;  %13585 = vmatprep.mubr.msk.bf16.mxu0 %vm14584_vm2, %v14583_v2  ;;  %v2186_v29 = vld [vmem:[#allocation2 + $0x30] sm:$0xff] }
 0x1c5   : > { %v13487_v33 = vpop.f32.mrf.mxu0  ;;  %v2241_v32 = vpack.c.bf16 %v2186_v29, %v2185_v25  ;;  %v2838_v29 = vld [vmem:[#allocation2 + $0x69] sm:$0xff] }
 0x1c6   : > { %2129 = vst [vmem:[#allocation3 + $0x30] sm:$0xff] %v2071_v31  ;;  %v1274_v36 = vpop.f32.mrf.mxu1  ;;  %v2831_v33 = vld [vmem:[#allocation2 + $0x31] sm:$0xff] }
 0x1c7   : > { %v1803_v39 = vpop.f32.mrf.mxu0  ;;  %v2886_v35 = vpack.c.bf16 %v2831_v33, %v2830_v27  ;;  %v2194_v27 = vld [vmem:[#allocation2 + $0x70] sm:$0xff] }
 0x1c8   : > { %v2072_v40 = vadd.f32 %v1803_v39, %v1274_v36  ;;  %v13364_v41 = vpop.f32.mrf.mxu1 }
 0x1c9   : > { %v13488_v43 = vpop.f32.mrf.mxu0  ;;  %v2188_v41 = vld [vmem:[#allocation2 + $0x40] sm:$0xff] }
 0x1ca   : > { %2130 = vst [vmem:[#allocation3 + $0x38] sm:$0xff] %v2072_v40  ;;  %v1279_v45 = vpop.f32.mrf.mxu1  ;;  %13462 = vmatmul.mubr.msk.bf16.gmra.mxu1 %vm938_vm3, %v1093_v42  ;;  %v2833_v43 = vld [vmem:[#allocation2 + $0x41] sm:$0xff] }
 0x1cb   : > { %v1808_v46 = vpop.f32.mrf.mxu0  ;;  %13586 = vmatmul.mubr.msk.bf16.gmra.mxu0 %vm938_vm3, %v1622_v44  ;;  %13597 = vmatprep.mubr.msk.bf16.mxu1 %vm14584_vm2, %v14583_v2 }
 0x1cc   : > { %v2073_v47 = vadd.f32 %v1808_v46, %v1279_v45  ;;  %v13367_v48 = vpop.f32.mrf.mxu1  ;;  %13721 = vmatprep.mubr.msk.bf16.mxu0 %vm14584_vm2, %v14583_v2  ;;  %v2187_v45 = vld [vmem:[#allocation2 + $0x38] sm:$0xff] }
 0x1cd   : > { %v13491_v49 = vpop.f32.mrf.mxu0  ;;  %v2242_v48 = vpack.c.bf16 %v2188_v41, %v2187_v45 }
 0x1ce   : > { %2131 = vst [vmem:[#allocation3 + $0x40] sm:$0xff] %v2073_v47  ;;  %v1282_v52 = vpop.f32.mrf.mxu1  ;;  %v2832_v49 = vld [vmem:[#allocation2 + $0x39] sm:$0xff] }
 0x1cf   : > { %v1811_v54 = vpop.f32.mrf.mxu0 }
 0x1d0   : > { %v2074_v57 = vadd.f32 %v1811_v54, %v1282_v52  ;;  %v13368_v58 = vpop.f32.mrf.mxu1  ;;  %v2887_v52 = vpack.c.bf16 %v2833_v43, %v2832_v49  ;;  %v2195_v43 = vld [vmem:[#allocation2 + $0x78] sm:$0xff] }
 0x1d1   : > { %v13492_v61 = vpop.f32.mrf.mxu0  ;;  %v2189_v58 = vld [vmem:[#allocation2 + $0x48] sm:$0xff] }
 0x1d2   : > { %2132 = vst [vmem:[#allocation3 + $0x48] sm:$0xff] %v2074_v57  ;;  %v1287_v0 = vpop.f32.mrf.mxu1  ;;  %13598 = vmatmul.mubr.msk.bf16.vlgmr.msra.gmra.mxu1 %vm938_vm3, %v2239_v59  ;;  %v2190_v59 = vld [vmem:[#allocation2 + $0x50] sm:$0xff] }
 0x1d3   : > { %v1816_v1 = vpop.f32.mrf.mxu0  ;;  %13722 = vmatmul.mubr.msk.bf16.vlgmr.msra.gmra.mxu0 %vm938_vm3, %v2884_v62  ;;  %13838 = vmatpush3.bf16.msra.mxu1 %v14366_v56  ;;  %v2834_v61 = vld [vmem:[#allocation2 + $0x49] sm:$0xff]  ;;  %v2835_v62 = vld [vmem:[#allocation2 + $0x51] sm:$0xff] }
 0x1d4   : > { %v2075_v4 = vadd.f32 %v1816_v1, %v1287_v0  ;;  %v13371_v50 = vpop.f32.mrf.mxu1  ;;  %13601 = vmatprep.mubr.msk.bf16.mxu1 %vm14584_vm2, %v14583_v2  ;;  %13725 = vmatprep.mubr.msk.bf16.mxu0 %vm14584_vm2, %v14583_v2 }
 0x1d5   : > { %v13495_v5 = vpop.f32.mrf.mxu0  ;;  %13962 = vmatpush3.bf16.msra.mxu0 %v14367_v63  ;;  %13839 = vmatprep.subr.bf16.mxu1 %v14583_v2  ;;  %v2888_v50 = vpack.c.bf16 %v2835_v62, %v2834_v61  ;;  %v2198_v61 = vld [vmem:[#allocation2 + $0x90] sm:$0xff] }
 0x1d6   : > { %2133 = vst [vmem:[#allocation3 + $0x50] sm:$0xff] %v2075_v4  ;;  %v1290_v8 = vpop.f32.mrf.mxu1  ;;  %13963 = vmatprep.subr.bf16.mxu0 %v14583_v2 }
 0x1d7   : > { %v1819_v10 = vpop.f32.mrf.mxu0  ;;  %13840 = vmatpush3.bf16.msra.mxu1 %v14368_v3  ;;  %v2243_v3 = vpack.c.bf16 %v2190_v59, %v2189_v58 }
 0x1d8   : > { %v2076_v12 = vadd.f32 %v1819_v10, %v1290_v8  ;;  %v13372_v13 = vpop.f32.mrf.mxu1  ;;  %13841 = vmatprep.subr.bf16.mxu1 %v14583_v2  ;;  %v2191_v10 = vld [vmem:[#allocation2 + $0x58] sm:$0xff] }
 0x1d9   : > { %v13496_v17 = vpop.f32.mrf.mxu0  ;;  %13964 = vmatpush3.bf16.msra.mxu0 %v14369_v7  ;;  %v2837_v13 = vld [vmem:[#allocation2 + $0x61] sm:$0xff] }
 0x1da   : > { %2134 = vst [vmem:[#allocation3 + $0x58] sm:$0xff] %v2076_v12  ;;  %v1295_v20 = vpop.f32.mrf.mxu1  ;;  %13602 = vmatmul.mubr.msk.bf16.gmra.mxu1 %vm938_vm3, %v2240_v14  ;;  %13965 = vmatprep.subr.bf16.mxu0 %v14583_v2  ;;  %v2244_v17 = vpack.c.bf16 %v2192_v11, %v2191_v10 }
 0x1db   : > { %v1824_v21 = vpop.f32.mrf.mxu0  ;;  %13726 = vmatmul.mubr.msk.bf16.gmra.mxu0 %vm938_vm3, %v2885_v18  ;;  %13605 = vmatprep.mubr.msk.bf16.mxu1 %vm14584_vm2, %v14583_v2  ;;  %v2836_v18 = vld [vmem:[#allocation2 + $0x59] sm:$0xff] }
 0x1dc   : > { %v2077_v22 = vadd.f32 %v1824_v21, %v1295_v20  ;;  %v13375_v23 = vpop.f32.mrf.mxu1  ;;  %13729 = vmatprep.mubr.msk.bf16.mxu0 %vm14584_vm2, %v14583_v2  ;;  %13842 = vmatpush3.bf16.msra.mxu1 %v14370_v16  ;;  %v2889_v20 = vpack.c.bf16 %v2837_v13, %v2836_v18  ;;  %v2199_v13 = vld [vmem:[#allocation2 + $0x98] sm:$0xff] }
 0x1dd   : > { %v13499_v24 = vpop.f32.mrf.mxu0  ;;  %13966 = vmatpush3.bf16.msra.mxu0 %v14371_v19  ;;  %13843 = vmatprep.subr.bf16.mxu1 %v14583_v2 }
 0x1de   : > { %2135 = vst [vmem:[#allocation3 + $0x60] sm:$0xff] %v2077_v22  ;;  %v1298_v26 = vpop.f32.mrf.mxu1  ;;  %13967 = vmatprep.subr.bf16.mxu0 %v14583_v2 }
 0x1df   : > { %v1827_v28 = vpop.f32.mrf.mxu0 }
 0x1e0   : > { %v2078_v30 = vadd.f32 %v1827_v28, %v1298_v26  ;;  %v13376_v31 = vpop.f32.mrf.mxu1  ;;  %v2193_v26 = vld [vmem:[#allocation2 + $0x68] sm:$0xff] }
 0x1e1   : > { %v13500_v34 = vpop.f32.mrf.mxu0 }
 0x1e2   : > { %2136 = vst [vmem:[#allocation3 + $0x68] sm:$0xff] %v2078_v30  ;;  %v1303_v36 = vpop.f32.mrf.mxu1  ;;  %13606 = vmatmul.mubr.msk.bf16.gmra.mxu1 %vm938_vm3, %v2241_v32  ;;  %v2839_v30 = vld [vmem:[#allocation2 + $0x71] sm:$0xff]  ;;  %v2245_v34 = vpack.c.bf16 %v2194_v27, %v2193_v26 }
 0x1e3   : > { %v1832_v37 = vpop.f32.mrf.mxu0  ;;  %13730 = vmatmul.mubr.msk.bf16.gmra.mxu0 %vm938_vm3, %v2886_v35  ;;  %13609 = vmatprep.mubr.msk.bf16.mxu1 %vm14584_vm2, %v14583_v2 }
 0x1e4   : > { %v2079_v38 = vadd.f32 %v1832_v37, %v1303_v36  ;;  %v13379_v39 = vpop.f32.mrf.mxu1  ;;  %13733 = vmatprep.mubr.msk.bf16.mxu0 %vm14584_vm2, %v14583_v2  ;;  %v2890_v36 = vpack.c.bf16 %v2839_v30, %v2838_v29  ;;  %v2201_v29 = vld [vmem:[#allocation2 + $0xa8] sm:$0xff]  ;;  %v2202_v30 = vld [vmem:[#allocation2 + $0xb0] sm:$0xff] }
 0x1e5   : > { %v13503_v40 = vpop.f32.mrf.mxu0 }
 0x1e6   : > { %2137 = vst [vmem:[#allocation3 + $0x70] sm:$0xff] %v2079_v38  ;;  %v1306_v42 = vpop.f32.mrf.mxu1  ;;  %v14372_v38 = vld [vmem:[%s17335_s3 + $0x80] sm:$0xff]  }
 0x1e7   : > { %v1835_v44 = vpop.f32.mrf.mxu0  ;;  %13844 = vmatpush3.bf16.msra.mxu1 %v14372_v38 }
 0x1e8   : > { %v2080_v46 = vadd.f32 %v1835_v44, %v1306_v42  ;;  %v13380_v47 = vpop.f32.mrf.mxu1  ;;  %v2196_v44 = vld [vmem:[#allocation2 + $0x80] sm:$0xff]  ;;  %14085 = vmatprep.subr.bf16.mxu1 %v14583_v2 }
 0x1e9   : > { %v13504_v51 = vpop.f32.mrf.mxu0  ;;  %v2841_v47 = vld [vmem:[#allocation2 + $0x81] sm:$0xff] }
 0x1ea   : > { %2138 = vst [vmem:[#allocation3 + $0x78] sm:$0xff] %v2080_v46  ;;  %v1311_v53 = vpop.f32.mrf.mxu1  ;;  %13610 = vmatmul.mubr.msk.bf16.gmra.mxu1 %vm938_vm3, %v2242_v48  ;;  %v2840_v46 = vld [vmem:[#allocation2 + $0x79] sm:$0xff] }
 0x1eb   : > { %v1840_v54 = vpop.f32.mrf.mxu0  ;;  %13734 = vmatmul.mubr.msk.bf16.gmra.mxu0 %vm938_vm3, %v2887_v52  ;;  %13613 = vmatprep.mubr.msk.bf16.mxu1 %vm14584_vm2, %v14583_v2  ;;  %v2246_v52 = vpack.c.bf16 %v2196_v44, %v2195_v43 }
 0x1ec   : > { %v2081_v55 = vadd.f32 %v1840_v54, %v1311_v53  ;;  %v13383_v56 = vpop.f32.mrf.mxu1  ;;  %13737 = vmatprep.mubr.msk.bf16.mxu0 %vm14584_vm2, %v14583_v2  ;;  %v2891_v54 = vpack.c.bf16 %v2841_v47, %v2840_v46  ;;  %v2204_v46 = vld [vmem:[#allocation2 + $0xc0] sm:$0xff] }
 0x1ed   : > { %v13507_v57 = vpop.f32.mrf.mxu0 }
 0x1ee   : > { %2139 = vst [vmem:[#allocation3 + $0x80] sm:$0xff] %v2081_v55  ;;  %v1314_v60 = vpop.f32.mrf.mxu1 }
 0x1ef   : > { %v1843_v63 = vpop.f32.mrf.mxu0 }
 0x1f0   : > { %v2082_v0 = vadd.f32 %v1843_v63, %v1314_v60  ;;  %v13384_v1 = vpop.f32.mrf.mxu1  ;;  %v2197_v60 = vld [vmem:[#allocation2 + $0x88] sm:$0xff] }
 0x1f1   : > { %v13508_v4 = vpop.f32.mrf.mxu0  ;;  %v2842_v63 = vld [vmem:[#allocation2 + $0x89] sm:$0xff]  ;;  %v14373_v1 = vld [vmem:[%s17335_s3 + $0xa0] sm:$0xff]  }
 0x1f2   : > { %2140 = vst [vmem:[#allocation3 + $0x88] sm:$0xff] %v2082_v0  ;;  %v1319_v5 = vpop.f32.mrf.mxu1  ;;  %13614 = vmatmul.mubr.msk.bf16.gmra.mxu1 %vm938_vm3, %v2243_v3  ;;  %v2843_v0 = vld [vmem:[#allocation2 + $0x91] sm:$0xff]  ;;  %13968 = vmatpush3.bf16.msra.mxu0 %v14373_v1  ;;  %v2850_v1 = vld [vmem:[#allocation2 + $0xc9] sm:$0xff] }
 0x1f3   : > { %v1848_v6 = vpop.f32.mrf.mxu0  ;;  %13738 = vmatmul.mubr.msk.bf16.gmra.mxu0 %vm938_vm3, %v2888_v50  ;;  %13617 = vmatprep.mubr.msk.bf16.mxu1 %vm14584_vm2, %v14583_v2 }
 0x1f4   : > { %v2083_v7 = vadd.f32 %v1848_v6, %v1319_v5  ;;  %v13387_v8 = vpop.f32.mrf.mxu1  ;;  %13741 = vmatprep.mubr.msk.bf16.mxu0 %vm14584_vm2, %v14583_v2  ;;  %v2247_v5 = vpack.c.bf16 %v2198_v61, %v2197_v60  ;;  %14209 = vmatprep.subr.bf16.mxu0 %v14583_v2 }
 0x1f5   : > { %v13511_v9 = vpop.f32.mrf.mxu0 }
 0x1f6   : > { %2141 = vst [vmem:[#allocation3 + $0x90] sm:$0xff] %v2083_v7  ;;  %v1322_v12 = vpop.f32.mrf.mxu1  ;;  %v2892_v7 = vpack.c.bf16 %v2843_v0, %v2842_v63  ;;  %v2206_v63 = vld [vmem:[#allocation2 + $0xd0] sm:$0xff] }
 0x1f7   : > { %v1851_v14 = vpop.f32.mrf.mxu0 }
 0x1f8   : > { %v2084_v15 = vadd.f32 %v1851_v14, %v1322_v12  ;;  %v13388_v16 = vpop.f32.mrf.mxu1  ;;  %v2200_v14 = vld [vmem:[#allocation2 + $0xa0] sm:$0xff] }
 0x1f9   : > { %v13512_v19 = vpop.f32.mrf.mxu0  ;;  %v2844_v16 = vld [vmem:[#allocation2 + $0x99] sm:$0xff] }
 0x1fa   : > { %2142 = vst [vmem:[#allocation3 + $0x98] sm:$0xff] %v2084_v15  ;;  %v1327_v21 = vpop.f32.mrf.mxu1  ;;  %13618 = vmatmul.mubr.msk.bf16.gmra.mxu1 %vm938_vm3, %v2244_v17  ;;  %v2845_v17 = vld [vmem:[#allocation2 + $0xa1] sm:$0xff] }
 0x1fb   : > { %v1856_v22 = vpop.f32.mrf.mxu0  ;;  %13742 = vmatmul.mubr.msk.bf16.gmra.mxu0 %vm938_vm3, %v2889_v20  ;;  %13621 = vmatprep.mubr.msk.bf16.mxu1 %vm14584_vm2, %v14583_v2 }
 0x1fc   : > { %v2085_v23 = vadd.f32 %v1856_v22, %v1327_v21  ;;  %v13391_v24 = vpop.f32.mrf.mxu1  ;;  %13745 = vmatprep.mubr.msk.bf16.mxu0 %vm14584_vm2, %v14583_v2  ;;  %v2248_v21 = vpack.c.bf16 %v2200_v14, %v2199_v13  ;;  %v2207_v14 = vld [vmem:[#allocation2 + $0xd8] sm:$0xff] }
 0x1fd   : > { %v13515_v25 = vpop.f32.mrf.mxu0 }
 0x1fe   : > { %2143 = vst [vmem:[#allocation3 + $0xa0] sm:$0xff] %v2085_v23  ;;  %v1330_v28 = vpop.f32.mrf.mxu1  ;;  %v2893_v23 = vpack.c.bf16 %v2845_v17, %v2844_v16  ;;  %v2852_v17 = vld [vmem:[#allocation2 + $0xd9] sm:$0xff] }
 0x1ff   : > { %v1859_v31 = vpop.f32.mrf.mxu0 }
 0x200   : > { %v2086_v32 = vadd.f32 %v1859_v31, %v1330_v28  ;;  %v13392_v33 = vpop.f32.mrf.mxu1 }
 0x201   : > { %v13516_v35 = vpop.f32.mrf.mxu0  ;;  %v2847_v33 = vld [vmem:[#allocation2 + $0xb1] sm:$0xff] }
 0x202   : > { %2144 = vst [vmem:[#allocation3 + $0xa8] sm:$0xff] %v2086_v32  ;;  %v1335_v37 = vpop.f32.mrf.mxu1  ;;  %13622 = vmatmul.mubr.msk.bf16.gmra.mxu1 %vm938_vm3, %v2245_v34  ;;  %v2846_v32 = vld [vmem:[#allocation2 + $0xa9] sm:$0xff] }
 0x203   : > { %v1864_v39 = vpop.f32.mrf.mxu0  ;;  %13746 = vmatmul.mubr.msk.bf16.gmra.mxu0 %vm938_vm3, %v2890_v36  ;;  %13625 = vmatprep.mubr.msk.bf16.mxu1 %vm14584_vm2, %v14583_v2 }
 0x204   : > { %v2087_v40 = vadd.f32 %v1864_v39, %v1335_v37  ;;  %v13395_v41 = vpop.f32.mrf.mxu1  ;;  %13749 = vmatprep.mubr.msk.bf16.mxu0 %vm14584_vm2, %v14583_v2  ;;  %v2249_v37 = vpack.c.bf16 %v2202_v30, %v2201_v29  ;;  %v2894_v39 = vpack.c.bf16 %v2847_v33, %v2846_v32  ;;  %v2209_v30 = vld [vmem:[#allocation2 + $0xe8] sm:$0xff] }
 0x205   : > { %v13519_v42 = vpop.f32.mrf.mxu0  ;;  %v2854_v33 = vld [vmem:[#allocation2 + $0xe9] sm:$0xff] }
 0x206   : > { %2145 = vst [vmem:[#allocation3 + $0xb0] sm:$0xff] %v2087_v40  ;;  %v1338_v45 = vpop.f32.mrf.mxu1 }
 0x207   : > { %v1867_v48 = vpop.f32.mrf.mxu0 }
 0x208   : > { %v2088_v49 = vadd.f32 %v1867_v48, %v1338_v45  ;;  %v13396_v51 = vpop.f32.mrf.mxu1  ;;  %v2203_v45 = vld [vmem:[#allocation2 + $0xb8] sm:$0xff] }
 0x209   : > { %v13520_v53 = vpop.f32.mrf.mxu0  ;;  %v2848_v48 = vld [vmem:[#allocation2 + $0xb9] sm:$0xff] }
 0x20a   : > { %2146 = vst [vmem:[#allocation3 + $0xb8] sm:$0xff] %v2088_v49  ;;  %v1343_v55 = vpop.f32.mrf.mxu1  ;;  %13626 = vmatmul.mubr.msk.bf16.gmra.mxu1 %vm938_vm3, %v2246_v52  ;;  %v2849_v49 = vld [vmem:[#allocation2 + $0xc1] sm:$0xff] }
 0x20b   : > { %v1872_v56 = vpop.f32.mrf.mxu0  ;;  %13750 = vmatmul.mubr.msk.bf16.gmra.mxu0 %vm938_vm3, %v2891_v54  ;;  %13629 = vmatprep.mubr.msk.bf16.mxu1 %vm14584_vm2, %v14583_v2  ;;  %v2250_v54 = vpack.c.bf16 %v2204_v46, %v2203_v45  ;;  %v2211_v46 = vld [vmem:[#allocation2 + $0xf8] sm:$0xff] }
 0x20c   : > { %v2089_v57 = vadd.f32 %v1872_v56, %v1343_v55  ;;  %v13399_v58 = vpop.f32.mrf.mxu1  ;;  %13753 = vmatprep.mubr.msk.bf16.mxu0 %vm14584_vm2, %v14583_v2  ;;  %v2895_v56 = vpack.c.bf16 %v2849_v49, %v2848_v48  ;;  %v2856_v49 = vld [vmem:[#allocation2 + $0xf9] sm:$0xff] }
 0x20d   : > { %v13523_v59 = vpop.f32.mrf.mxu0 }
 0x20e   : > { %2147 = vst [vmem:[#allocation3 + $0xc0] sm:$0xff] %v2089_v57  ;;  %v1346_v62 = vpop.f32.mrf.mxu1 }
 0x20f   : > { %v1875_v3 = vpop.f32.mrf.mxu0 }
 0x210   : > { %v2090_v4 = vadd.f32 %v1875_v3, %v1346_v62  ;;  %v13400_v50 = vpop.f32.mrf.mxu1  ;;  %v2205_v62 = vld [vmem:[#allocation2 + $0xc8] sm:$0xff]  ;;  %v2851_v3 = vld [vmem:[#allocation2 + $0xd1] sm:$0xff] }
 0x211   : > { %v13524_v6 = vpop.f32.mrf.mxu0 }
 0x212   : > { %2148 = vst [vmem:[#allocation3 + $0xc8] sm:$0xff] %v2090_v4  ;;  %v1351_v8 = vpop.f32.mrf.mxu1  ;;  %13630 = vmatmul.mubr.msk.bf16.gmra.mxu1 %vm938_vm3, %v2247_v5  ;;  %v2251_v6 = vpack.c.bf16 %v2206_v63, %v2205_v62  ;;  %v2213_v63 = vld [vmem:[#allocation2 + $0x108] sm:$0xff] }
 0x213   : > { %v1880_v9 = vpop.f32.mrf.mxu0  ;;  %13754 = vmatmul.mubr.msk.bf16.gmra.mxu0 %vm938_vm3, %v2892_v7  ;;  %13633 = vmatprep.mubr.msk.bf16.mxu1 %vm14584_vm2, %v14583_v2 }
 0x214   : > { %v2091_v10 = vadd.f32 %v1880_v9, %v1351_v8  ;;  %v13403_v11 = vpop.f32.mrf.mxu1  ;;  %13757 = vmatprep.mubr.msk.bf16.mxu0 %vm14584_vm2, %v14583_v2  ;;  %v2896_v8 = vpack.c.bf16 %v2851_v3, %v2850_v1  ;;  %v2858_v3 = vld [vmem:[#allocation2 + $0x109] sm:$0xff] }
 0x215   : > { %v13527_v12 = vpop.f32.mrf.mxu0 }
 0x216   : > { %2149 = vst [vmem:[#allocation3 + $0xd0] sm:$0xff] %v2091_v10  ;;  %v1354_v15 = vpop.f32.mrf.mxu1 }
 0x217   : > { %v1883_v18 = vpop.f32.mrf.mxu0 }
 0x218   : > { %v2092_v19 = vadd.f32 %v1883_v18, %v1354_v15  ;;  %v13404_v20 = vpop.f32.mrf.mxu1  ;;  %v2208_v15 = vld [vmem:[#allocation2 + $0xe0] sm:$0xff] }
 0x219   : > { %v13528_v22 = vpop.f32.mrf.mxu0  ;;  %v2853_v18 = vld [vmem:[#allocation2 + $0xe1] sm:$0xff] }
 0x21a   : > { %2150 = vst [vmem:[#allocation3 + $0xd8] sm:$0xff] %v2092_v19  ;;  %v1359_v24 = vpop.f32.mrf.mxu1  ;;  %13634 = vmatmul.mubr.msk.bf16.gmra.mxu1 %vm938_vm3, %v2248_v21  ;;  %v2252_v22 = vpack.c.bf16 %v2208_v15, %v2207_v14  ;;  %v2215_v15 = vld [vmem:[#allocation2 + $0x118] sm:$0xff] }
 0x21b   : > { %v1888_v25 = vpop.f32.mrf.mxu0  ;;  %13758 = vmatmul.mubr.msk.bf16.gmra.mxu0 %vm938_vm3, %v2893_v23  ;;  %13637 = vmatprep.mubr.msk.bf16.mxu1 %vm14584_vm2, %v14583_v2 }
 0x21c   : > { %v2093_v26 = vadd.f32 %v1888_v25, %v1359_v24  ;;  %v13407_v27 = vpop.f32.mrf.mxu1  ;;  %13761 = vmatprep.mubr.msk.bf16.mxu0 %vm14584_vm2, %v14583_v2  ;;  %v2897_v24 = vpack.c.bf16 %v2853_v18, %v2852_v17  ;;  %v2860_v18 = vld [vmem:[#allocation2 + $0x119] sm:$0xff] }
 0x21d   : > { %v13531_v28 = vpop.f32.mrf.mxu0 }
 0x21e   : > { %2151 = vst [vmem:[#allocation3 + $0xe0] sm:$0xff] %v2093_v26  ;;  %v1362_v31 = vpop.f32.mrf.mxu1 }
 0x21f   : > { %v1891_v34 = vpop.f32.mrf.mxu0 }
 0x220   : > { %v2094_v35 = vadd.f32 %v1891_v34, %v1362_v31  ;;  %v13408_v36 = vpop.f32.mrf.mxu1  ;;  %v2210_v31 = vld [vmem:[#allocation2 + $0xf0] sm:$0xff] }
 0x221   : > { %v13532_v38 = vpop.f32.mrf.mxu0  ;;  %v2855_v34 = vld [vmem:[#allocation2 + $0xf1] sm:$0xff] }
 0x222   : > { %2152 = vst [vmem:[#allocation3 + $0xe8] sm:$0xff] %v2094_v35  ;;  %v1367_v40 = vpop.f32.mrf.mxu1  ;;  %13638 = vmatmul.mubr.msk.bf16.gmra.mxu1 %vm938_vm3, %v2249_v37  ;;  %v2253_v38 = vpack.c.bf16 %v2210_v31, %v2209_v30  ;;  %v2217_v31 = vld [vmem:[#allocation2 + $0x128] sm:$0xff] }
 0x223   : > { %v1896_v41 = vpop.f32.mrf.mxu0  ;;  %13762 = vmatmul.mubr.msk.bf16.gmra.mxu0 %vm938_vm3, %v2894_v39  ;;  %13641 = vmatprep.mubr.msk.bf16.mxu1 %vm14584_vm2, %v14583_v2 }
 0x224   : > { %v2095_v42 = vadd.f32 %v1896_v41, %v1367_v40  ;;  %v13411_v43 = vpop.f32.mrf.mxu1  ;;  %13765 = vmatprep.mubr.msk.bf16.mxu0 %vm14584_vm2, %v14583_v2  ;;  %v2898_v40 = vpack.c.bf16 %v2855_v34, %v2854_v33  ;;  %v2862_v34 = vld [vmem:[#allocation2 + $0x129] sm:$0xff] }
 0x225   : > { %v13535_v44 = vpop.f32.mrf.mxu0 }
 0x226   : > { %2153 = vst [vmem:[#allocation3 + $0xf0] sm:$0xff] %v2095_v42  ;;  %v1370_v47 = vpop.f32.mrf.mxu1 }
 0x227   : > { %v1899_v51 = vpop.f32.mrf.mxu0 }
 0x228   : > { %v2096_v52 = vadd.f32 %v1899_v51, %v1370_v47  ;;  %v13412_v53 = vpop.f32.mrf.mxu1  ;;  %v2212_v47 = vld [vmem:[#allocation2 + $0x100] sm:$0xff] }
 0x229   : > { %v13536_v55 = vpop.f32.mrf.mxu0  ;;  %v2857_v51 = vld [vmem:[#allocation2 + $0x101] sm:$0xff] }
 0x22a   : > { %2154 = vst [vmem:[#allocation3 + $0xf8] sm:$0xff] %v2096_v52  ;;  %v1375_v57 = vpop.f32.mrf.mxu1  ;;  %13642 = vmatmul.mubr.msk.bf16.gmra.mxu1 %vm938_vm3, %v2250_v54  ;;  %v2254_v55 = vpack.c.bf16 %v2212_v47, %v2211_v46  ;;  %v2219_v47 = vld [vmem:[#allocation2 + $0x138] sm:$0xff] }
 0x22b   : > { %v1904_v58 = vpop.f32.mrf.mxu0  ;;  %13766 = vmatmul.mubr.msk.bf16.gmra.mxu0 %vm938_vm3, %v2895_v56  ;;  %13645 = vmatprep.mubr.msk.bf16.mxu1 %vm14584_vm2, %v14583_v2 }
 0x22c   : > { %v2097_v59 = vadd.f32 %v1904_v58, %v1375_v57  ;;  %v13415_v60 = vpop.f32.mrf.mxu1  ;;  %13769 = vmatprep.mubr.msk.bf16.mxu0 %vm14584_vm2, %v14583_v2  ;;  %v2899_v57 = vpack.c.bf16 %v2857_v51, %v2856_v49  ;;  %v2864_v51 = vld [vmem:[#allocation2 + $0x139] sm:$0xff] }
 0x22d   : > { %v13539_v61 = vpop.f32.mrf.mxu0 }
 0x22e   : > { %2155 = vst [vmem:[#allocation3 + $0x100] sm:$0xff] %v2097_v59  ;;  %v1378_v0 = vpop.f32.mrf.mxu1 }
 0x22f   : > { %v1907_v4 = vpop.f32.mrf.mxu0 }
 0x230   : > { %v2098_v50 = vadd.f32 %v1907_v4, %v1378_v0  ;;  %v13416_v5 = vpop.f32.mrf.mxu1  ;;  %v2214_v0 = vld [vmem:[#allocation2 + $0x110] sm:$0xff] }
 0x231   : > { %v13540_v7 = vpop.f32.mrf.mxu0  ;;  %v2859_v4 = vld [vmem:[#allocation2 + $0x111] sm:$0xff] }
 0x232   : > { %2156 = vst [vmem:[#allocation3 + $0x108] sm:$0xff] %v2098_v50  ;;  %v1383_v9 = vpop.f32.mrf.mxu1  ;;  %13646 = vmatmul.mubr.msk.bf16.gmra.mxu1 %vm938_vm3, %v2251_v6  ;;  %v2255_v7 = vpack.c.bf16 %v2214_v0, %v2213_v63  ;;  %v2221_v0 = vld [vmem:[#allocation2 + $0x148] sm:$0xff] }
 0x233   : > { %v1912_v10 = vpop.f32.mrf.mxu0  ;;  %13770 = vmatmul.mubr.msk.bf16.gmra.mxu0 %vm938_vm3, %v2896_v8  ;;  %13649 = vmatprep.mubr.msk.bf16.mxu1 %vm14584_vm2, %v14583_v2 }
 0x234   : > { %v2099_v11 = vadd.f32 %v1912_v10, %v1383_v9  ;;  %v13419_v12 = vpop.f32.mrf.mxu1  ;;  %13773 = vmatprep.mubr.msk.bf16.mxu0 %vm14584_vm2, %v14583_v2  ;;  %v2900_v9 = vpack.c.bf16 %v2859_v4, %v2858_v3  ;;  %v2866_v4 = vld [vmem:[#allocation2 + $0x149] sm:$0xff] }
 0x235   : > { %v13543_v13 = vpop.f32.mrf.mxu0 }
 0x236   : > { %2157 = vst [vmem:[#allocation3 + $0x110] sm:$0xff] %v2099_v11  ;;  %v1386_v16 = vpop.f32.mrf.mxu1 }
 0x237   : > { %v1915_v19 = vpop.f32.mrf.mxu0 }
 0x238   : > { %v2100_v20 = vadd.f32 %v1915_v19, %v1386_v16  ;;  %v13420_v21 = vpop.f32.mrf.mxu1  ;;  %v2216_v16 = vld [vmem:[#allocation2 + $0x120] sm:$0xff] }
 0x239   : > { %v13544_v23 = vpop.f32.mrf.mxu0  ;;  %v2861_v19 = vld [vmem:[#allocation2 + $0x121] sm:$0xff] }
 0x23a   : > { %2158 = vst [vmem:[#allocation3 + $0x118] sm:$0xff] %v2100_v20  ;;  %v1391_v25 = vpop.f32.mrf.mxu1  ;;  %13650 = vmatmul.mubr.msk.bf16.gmra.mxu1 %vm938_vm3, %v2252_v22  ;;  %v2256_v23 = vpack.c.bf16 %v2216_v16, %v2215_v15  ;;  %v2223_v16 = vld [vmem:[#allocation2 + $0x158] sm:$0xff] }
 0x23b   : > { %v1920_v26 = vpop.f32.mrf.mxu0  ;;  %13774 = vmatmul.mubr.msk.bf16.gmra.mxu0 %vm938_vm3, %v2897_v24  ;;  %13653 = vmatprep.mubr.msk.bf16.mxu1 %vm14584_vm2, %v14583_v2 }
 0x23c   : > { %v2101_v27 = vadd.f32 %v1920_v26, %v1391_v25  ;;  %v13423_v28 = vpop.f32.mrf.mxu1  ;;  %13777 = vmatprep.mubr.msk.bf16.mxu0 %vm14584_vm2, %v14583_v2  ;;  %v2901_v25 = vpack.c.bf16 %v2861_v19, %v2860_v18  ;;  %v2868_v19 = vld [vmem:[#allocation2 + $0x159] sm:$0xff] }
 0x23d   : > { %v13547_v29 = vpop.f32.mrf.mxu0 }
 0x23e   : > { %2159 = vst [vmem:[#allocation3 + $0x120] sm:$0xff] %v2101_v27  ;;  %v1394_v32 = vpop.f32.mrf.mxu1 }
 0x23f   : > { %v1923_v35 = vpop.f32.mrf.mxu0 }
 0x240   : > { %v2102_v36 = vadd.f32 %v1923_v35, %v1394_v32  ;;  %v13424_v37 = vpop.f32.mrf.mxu1  ;;  %v2218_v32 = vld [vmem:[#allocation2 + $0x130] sm:$0xff] }
 0x241   : > { %v13548_v39 = vpop.f32.mrf.mxu0  ;;  %v2863_v35 = vld [vmem:[#allocation2 + $0x131] sm:$0xff] }
 0x242   : > { %2160 = vst [vmem:[#allocation3 + $0x128] sm:$0xff] %v2102_v36  ;;  %v1399_v41 = vpop.f32.mrf.mxu1  ;;  %13654 = vmatmul.mubr.msk.bf16.gmra.mxu1 %vm938_vm3, %v2253_v38  ;;  %v2257_v39 = vpack.c.bf16 %v2218_v32, %v2217_v31  ;;  %v2225_v32 = vld [vmem:[#allocation2 + $0x168] sm:$0xff] }
 0x243   : > { %v1928_v42 = vpop.f32.mrf.mxu0  ;;  %13778 = vmatmul.mubr.msk.bf16.gmra.mxu0 %vm938_vm3, %v2898_v40  ;;  %13657 = vmatprep.mubr.msk.bf16.mxu1 %vm14584_vm2, %v14583_v2 }
 0x244   : > { %v2103_v43 = vadd.f32 %v1928_v42, %v1399_v41  ;;  %v13427_v44 = vpop.f32.mrf.mxu1  ;;  %13781 = vmatprep.mubr.msk.bf16.mxu0 %vm14584_vm2, %v14583_v2  ;;  %v2902_v41 = vpack.c.bf16 %v2863_v35, %v2862_v34  ;;  %v2870_v35 = vld [vmem:[#allocation2 + $0x169] sm:$0xff] }
 0x245   : > { %v13551_v45 = vpop.f32.mrf.mxu0 }
 0x246   : > { %2161 = vst [vmem:[#allocation3 + $0x130] sm:$0xff] %v2103_v43  ;;  %v1402_v48 = vpop.f32.mrf.mxu1 }
 0x247   : > { %v1931_v52 = vpop.f32.mrf.mxu0 }
 0x248   : > { %v2104_v53 = vadd.f32 %v1931_v52, %v1402_v48  ;;  %v13428_v54 = vpop.f32.mrf.mxu1  ;;  %v2220_v48 = vld [vmem:[#allocation2 + $0x140] sm:$0xff] }
 0x249   : > { %v13552_v56 = vpop.f32.mrf.mxu0  ;;  %v2865_v52 = vld [vmem:[#allocation2 + $0x141] sm:$0xff] }
 0x24a   : > { %2162 = vst [vmem:[#allocation3 + $0x138] sm:$0xff] %v2104_v53  ;;  %v1407_v58 = vpop.f32.mrf.mxu1  ;;  %13658 = vmatmul.mubr.msk.bf16.gmra.mxu1 %vm938_vm3, %v2254_v55  ;;  %v2258_v56 = vpack.c.bf16 %v2220_v48, %v2219_v47  ;;  %v2227_v48 = vld [vmem:[#allocation2 + $0x178] sm:$0xff] }
 0x24b   : > { %v1936_v59 = vpop.f32.mrf.mxu0  ;;  %13782 = vmatmul.mubr.msk.bf16.gmra.mxu0 %vm938_vm3, %v2899_v57  ;;  %13661 = vmatprep.mubr.msk.bf16.mxu1 %vm14584_vm2, %v14583_v2 }
 0x24c   : > { %v2105_v60 = vadd.f32 %v1936_v59, %v1407_v58  ;;  %v13431_v61 = vpop.f32.mrf.mxu1  ;;  %13785 = vmatprep.mubr.msk.bf16.mxu0 %vm14584_vm2, %v14583_v2  ;;  %v2903_v58 = vpack.c.bf16 %v2865_v52, %v2864_v51  ;;  %v2872_v52 = vld [vmem:[#allocation2 + $0x179] sm:$0xff] }
 0x24d   : > { %v13555_v62 = vpop.f32.mrf.mxu0 }
 0x24e   : > { %2163 = vst [vmem:[#allocation3 + $0x140] sm:$0xff] %v2105_v60  ;;  %v1410_v1 = vpop.f32.mrf.mxu1 }
 0x24f   : > { %v1939_v50 = vpop.f32.mrf.mxu0 }
 0x250   : > { %v2106_v5 = vadd.f32 %v1939_v50, %v1410_v1  ;;  %v13432_v6 = vpop.f32.mrf.mxu1  ;;  %v2222_v1 = vld [vmem:[#allocation2 + $0x150] sm:$0xff] }
 0x251   : > { %v13556_v8 = vpop.f32.mrf.mxu0  ;;  %v2867_v50 = vld [vmem:[#allocation2 + $0x151] sm:$0xff] }
 0x252   : > { %2164 = vst [vmem:[#allocation3 + $0x148] sm:$0xff] %v2106_v5  ;;  %v1415_v10 = vpop.f32.mrf.mxu1  ;;  %13662 = vmatmul.mubr.msk.bf16.gmra.mxu1 %vm938_vm3, %v2255_v7  ;;  %v2259_v8 = vpack.c.bf16 %v2222_v1, %v2221_v0  ;;  %v2229_v1 = vld [vmem:[#allocation2 + $0x188] sm:$0xff] }
 0x253   : > { %v1944_v11 = vpop.f32.mrf.mxu0  ;;  %13786 = vmatmul.mubr.msk.bf16.gmra.mxu0 %vm938_vm3, %v2900_v9  ;;  %13665 = vmatprep.mubr.msk.bf16.mxu1 %vm14584_vm2, %v14583_v2 }
 0x254   : > { %v2107_v12 = vadd.f32 %v1944_v11, %v1415_v10  ;;  %v13435_v13 = vpop.f32.mrf.mxu1  ;;  %13789 = vmatprep.mubr.msk.bf16.mxu0 %vm14584_vm2, %v14583_v2  ;;  %v2904_v10 = vpack.c.bf16 %v2867_v50, %v2866_v4  ;;  %v2874_v50 = vld [vmem:[#allocation2 + $0x189] sm:$0xff] }
 0x255   : > { %v13559_v14 = vpop.f32.mrf.mxu0 }
 0x256   : > { %2165 = vst [vmem:[#allocation3 + $0x150] sm:$0xff] %v2107_v12  ;;  %v1418_v17 = vpop.f32.mrf.mxu1 }
 0x257   : > { %v1947_v20 = vpop.f32.mrf.mxu0 }
 0x258   : > { %v2108_v21 = vadd.f32 %v1947_v20, %v1418_v17  ;;  %v13436_v22 = vpop.f32.mrf.mxu1  ;;  %v2224_v17 = vld [vmem:[#allocation2 + $0x160] sm:$0xff] }
 0x259   : > { %v13560_v24 = vpop.f32.mrf.mxu0  ;;  %v2869_v20 = vld [vmem:[#allocation2 + $0x161] sm:$0xff] }
 0x25a   : > { %2166 = vst [vmem:[#allocation3 + $0x158] sm:$0xff] %v2108_v21  ;;  %v1423_v26 = vpop.f32.mrf.mxu1  ;;  %13666 = vmatmul.mubr.msk.bf16.gmra.mxu1 %vm938_vm3, %v2256_v23  ;;  %v2260_v24 = vpack.c.bf16 %v2224_v17, %v2223_v16 }
 0x25b   : > { %v1952_v27 = vpop.f32.mrf.mxu0  ;;  %13790 = vmatmul.mubr.msk.bf16.gmra.mxu0 %vm938_vm3, %v2901_v25  ;;  %13669 = vmatprep.mubr.msk.bf16.mxu1 %vm14584_vm2, %v14583_v2 }
 0x25c   : > { %v2109_v28 = vadd.f32 %v1952_v27, %v1423_v26  ;;  %v13439_v29 = vpop.f32.mrf.mxu1  ;;  %13793 = vmatprep.mubr.msk.bf16.mxu0 %vm14584_vm2, %v14583_v2  ;;  %v2905_v26 = vpack.c.bf16 %v2869_v20, %v2868_v19  ;;  %v2231_v19 = vld [vmem:[#allocation2 + $0x198] sm:$0xff]  ;;  %v2232_v20 = vld [vmem:[#allocation2 + $0x1a0] sm:$0xff] }
 0x25d   : > { %v13563_v30 = vpop.f32.mrf.mxu0 }
 0x25e   : > { %2167 = vst [vmem:[#allocation3 + $0x160] sm:$0xff] %v2109_v28  ;;  %v1426_v33 = vpop.f32.mrf.mxu1 }
 0x25f   : > { %v1955_v36 = vpop.f32.mrf.mxu0 }
 0x260   : > { %v2110_v37 = vadd.f32 %v1955_v36, %v1426_v33  ;;  %v13440_v38 = vpop.f32.mrf.mxu1  ;;  %v2226_v33 = vld [vmem:[#allocation2 + $0x170] sm:$0xff] }
 0x261   : > { %v13564_v40 = vpop.f32.mrf.mxu0  ;;  %v2871_v36 = vld [vmem:[#allocation2 + $0x171] sm:$0xff] }
 0x262   : > { %2168 = vst [vmem:[#allocation3 + $0x168] sm:$0xff] %v2110_v37  ;;  %v1431_v42 = vpop.f32.mrf.mxu1  ;;  %13670 = vmatmul.mubr.msk.bf16.gmra.mxu1 %vm938_vm3, %v2257_v39  ;;  %v2261_v40 = vpack.c.bf16 %v2226_v33, %v2225_v32  ;;  %v2654_v33 = vld [vmem:[#allocation3 + $0x10] sm:$0xff] }
 0x263   : > { %v1960_v43 = vpop.f32.mrf.mxu0  ;;  %13794 = vmatmul.mubr.msk.bf16.gmra.mxu0 %vm938_vm3, %v2902_v41  ;;  %13673 = vmatprep.mubr.msk.bf16.mxu1 %vm14584_vm2, %v14583_v2 }
 0x264   : > { %v2111_v44 = vadd.f32 %v1960_v43, %v1431_v42  ;;  %v13443_v45 = vpop.f32.mrf.mxu1  ;;  %13797 = vmatprep.mubr.msk.bf16.mxu0 %vm14584_vm2, %v14583_v2  ;;  %v2906_v42 = vpack.c.bf16 %v2871_v36, %v2870_v35 }
 0x265   : > { %v13567_v46 = vpop.f32.mrf.mxu0 }
 0x266   : > { %2169 = vst [vmem:[#allocation3 + $0x170] sm:$0xff] %v2111_v44  ;;  %v1434_v49 = vpop.f32.mrf.mxu1 }
 0x267   : > { %v1963_v53 = vpop.f32.mrf.mxu0 }
 0x268   : > { %v2112_v54 = vadd.f32 %v1963_v53, %v1434_v49  ;;  %v13444_v55 = vpop.f32.mrf.mxu1  ;;  %v2228_v49 = vld [vmem:[#allocation2 + $0x180] sm:$0xff] }
 0x269   : > { %v13568_v57 = vpop.f32.mrf.mxu0  ;;  %v2873_v53 = vld [vmem:[#allocation2 + $0x181] sm:$0xff] }
 0x26a   : > { %2170 = vst [vmem:[#allocation3 + $0x178] sm:$0xff] %v2112_v54  ;;  %v1439_v59 = vpop.f32.mrf.mxu1  ;;  %13674 = vmatmul.mubr.msk.bf16.gmra.mxu1 %vm938_vm3, %v2258_v56  ;;  %v2262_v57 = vpack.c.bf16 %v2228_v49, %v2227_v48 }
 0x26b   : > { %v1968_v60 = vpop.f32.mrf.mxu0  ;;  %13798 = vmatmul.mubr.msk.bf16.gmra.mxu0 %vm938_vm3, %v2903_v58  ;;  %13677 = vmatprep.mubr.msk.bf16.mxu1 %vm14584_vm2, %v14583_v2 }
 0x26c   : > { %v2113_v61 = vadd.f32 %v1968_v60, %v1439_v59  ;;  %v13447_v62 = vpop.f32.mrf.mxu1  ;;  %13801 = vmatprep.mubr.msk.bf16.mxu0 %vm14584_vm2, %v14583_v2  ;;  %v2907_v59 = vpack.c.bf16 %v2873_v53, %v2872_v52 }
 0x26d   : > { %v13571_v63 = vpop.f32.mrf.mxu0 }
 0x26e   : > { %2171 = vst [vmem:[#allocation3 + $0x180] sm:$0xff] %v2113_v61  ;;  %v1442_v3 = vpop.f32.mrf.mxu1 }
 0x26f   : > { %v1971_v5 = vpop.f32.mrf.mxu0 }
 0x270   : > { %v2114_v6 = vadd.f32 %v1971_v5, %v1442_v3  ;;  %v13448_v7 = vpop.f32.mrf.mxu1  ;;  %v2230_v3 = vld [vmem:[#allocation2 + $0x190] sm:$0xff] }
 0x271   : > { %v13572_v9 = vpop.f32.mrf.mxu0  ;;  %v2875_v5 = vld [vmem:[#allocation2 + $0x191] sm:$0xff] }
 0x272   : > { %2172 = vst [vmem:[#allocation3 + $0x188] sm:$0xff] %v2114_v6  ;;  %v1447_v11 = vpop.f32.mrf.mxu1  ;;  %13678 = vmatmul.mubr.msk.bf16.gmra.mxu1 %vm938_vm3, %v2259_v8  ;;  %v2263_v9 = vpack.c.bf16 %v2230_v3, %v2229_v1  ;;  %v2881_v1 = vld [vmem:[#allocation2 + $0x1c1] sm:$0xff] }
 0x273   : > { %v1976_v12 = vpop.f32.mrf.mxu0  ;;  %13802 = vmatmul.mubr.msk.bf16.gmra.mxu0 %vm938_vm3, %v2904_v10  ;;  %13681 = vmatprep.mubr.msk.bf16.mxu1 %vm14584_vm2, %v14583_v2 }
 0x274   : > { %v2115_v13 = vadd.f32 %v1976_v12, %v1447_v11  ;;  %v13451_v14 = vpop.f32.mrf.mxu1  ;;  %13805 = vmatprep.mubr.msk.bf16.mxu0 %vm14584_vm2, %v14583_v2  ;;  %v2908_v11 = vpack.c.bf16 %v2875_v5, %v2874_v50 }
 0x275   : > { %v13575_v15 = vpop.f32.mrf.mxu0 }
 0x276   : > { %2173 = vst [vmem:[#allocation3 + $0x190] sm:$0xff] %v2115_v13  ;;  %v1450_v18 = vpop.f32.mrf.mxu1  ;;  %v2652_v13 = vld [vmem:[#allocation3] sm:$0xff] }
 0x277   : > { %v1979_v21 = vpop.f32.mrf.mxu0 }
 0x278   : > { %v2116_v22 = vadd.f32 %v1979_v21, %v1450_v18  ;;  %v13452_v23 = vpop.f32.mrf.mxu1 }
 0x279   : > { %v13576_v25 = vpop.f32.mrf.mxu0  ;;  %v2876_v23 = vld [vmem:[#allocation2 + $0x199] sm:$0xff] }
 0x27a   : > { %2174 = vst [vmem:[#allocation3 + $0x198] sm:$0xff] %v2116_v22  ;;  %v1455_v27 = vpop.f32.mrf.mxu1  ;;  %13682 = vmatmul.mubr.msk.bf16.gmra.mxu1 %vm938_vm3, %v2260_v24  ;;  %v2653_v22 = vld [vmem:[#allocation3 + $0x8] sm:$0xff] }
 0x27b   : > { %v1984_v28 = vpop.f32.mrf.mxu0  ;;  %13806 = vmatmul.mubr.msk.bf16.gmra.mxu0 %vm938_vm3, %v2905_v26  ;;  %13685 = vmatprep.mubr.msk.bf16.mxu1 %vm14584_vm2, %v14583_v2  ;;  %v2877_v24 = vld [vmem:[#allocation2 + $0x1a1] sm:$0xff] }
 0x27c   : > { %v2117_v29 = vadd.f32 %v1984_v28, %v1455_v27  ;;  %v13455_v30 = vpop.f32.mrf.mxu1  ;;  %13809 = vmatprep.mubr.msk.bf16.mxu0 %vm14584_vm2, %v14583_v2  ;;  %v2264_v28 = vpack.c.bf16 %v2232_v20, %v2231_v19  ;;  %v2659_v19 = vld [vmem:[#allocation3 + $0x38] sm:$0xff]  ;;  %v2882_v20 = vld [vmem:[#allocation2 + $0x1c9] sm:$0xff] }
 0x27d   : > { %v13579_v31 = vpop.f32.mrf.mxu0 }
 0x27e   : > { %2175 = vst [vmem:[#allocation3 + $0x1a0] sm:$0xff] %v2117_v29  ;;  %v1458_v34 = vpop.f32.mrf.mxu1  ;;  %v2909_v31 = vpack.c.bf16 %v2877_v24, %v2876_v23 }
 0x27f   : > { %v1987_v37 = vpop.f32.mrf.mxu0 }
 0x280   : > { %v2118_v38 = vadd.f32 %v1987_v37, %v1458_v34  ;;  %v13456_v39 = vpop.f32.mrf.mxu1 }
 0x281   : > { %v13580_v41 = vpop.f32.mrf.mxu0  ;;  %v2233_v39 = vld [vmem:[#allocation2 + $0x1a8] sm:$0xff] }
 0x282   : > { %2176 = vst [vmem:[#allocation3 + $0x1a8] sm:$0xff] %v2118_v38  ;;  %v1463_v43 = vpop.f32.mrf.mxu1  ;;  %13686 = vmatmul.mubr.msk.bf16.gmra.mxu1 %vm938_vm3, %v2261_v40  ;;  %v2234_v40 = vld [vmem:[#allocation2 + $0x1b0] sm:$0xff] }
 0x283   : > { %v1992_v44 = vpop.f32.mrf.mxu0  ;;  %13810 = vmatmul.mubr.msk.bf16.gmra.mxu0 %vm938_vm3, %v2906_v42  ;;  %13689 = vmatprep.mubr.msk.bf16.mxu1 %vm14584_vm2, %v14583_v2  ;;  %v2655_v42 = vld [vmem:[#allocation3 + $0x18] sm:$0xff]  ;;  %v2265_v48 = vpack.c.bf16 %v2234_v40, %v2233_v39  ;;  %v2661_v39 = vld [vmem:[#allocation3 + $0x48] sm:$0xff] }
 0x284   : > { %v2119_v45 = vadd.f32 %v1992_v44, %v1463_v43  ;;  %v13459_v46 = vpop.f32.mrf.mxu1  ;;  %13813 = vmatprep.mubr.msk.bf16.mxu0 %vm14584_vm2, %v14583_v2  ;;  %v2878_v43 = vld [vmem:[#allocation2 + $0x1a9] sm:$0xff]  ;;  %v2879_v44 = vld [vmem:[#allocation2 + $0x1b1] sm:$0xff]  ;;  %v4116_v40 = vld [vmem:[#allocation2 + $0x41] sm:$0xff] }
 0x285   : > { %v13583_v47 = vpop.f32.mrf.mxu0  ;;  %v2910_v52 = vpack.c.bf16 %v2879_v44, %v2878_v43  ;;  %v14374_v44 = vld [vmem:[%s17335_s3 + $0xd8] sm:$0xff]  }
 0x286   : > { %2177 = vst [vmem:[#allocation3 + $0x1b0] sm:$0xff] %v2119_v45  ;;  %v1466_v51 = vpop.f32.mrf.mxu1 }
 0x287   : > { %v1995_v54 = vpop.f32.mrf.mxu0 }
 0x288   : > { %v2120_v55 = vadd.f32 %v1995_v54, %v1466_v51  ;;  %v13460_v56 = vpop.f32.mrf.mxu1  ;;  %v2656_v54 = vld [vmem:[#allocation3 + $0x20] sm:$0xff] }
 0x289   : > { %v13584_v58 = vpop.f32.mrf.mxu0 }
 0x28a   : > { %2178 = vst [vmem:[#allocation3 + $0x1b8] sm:$0xff] %v2120_v55  ;;  %v1471_v60 = vpop.f32.mrf.mxu1  ;;  %13690 = vmatmul.mubr.msk.bf16.gmra.mxu1 %vm938_vm3, %v2262_v57 }
 0x28b   : > { %v2000_v61 = vpop.f32.mrf.mxu0  ;;  %13814 = vmatmul.mubr.msk.bf16.gmra.mxu0 %vm938_vm3, %v2907_v59  ;;  %13693 = vmatprep.mubr.msk.bf16.mxu1 %vm14584_vm2, %v14583_v2 }
 0x28c   : > { %v2121_v62 = vadd.f32 %v2000_v61, %v1471_v60  ;;  %v13463_v63 = vpop.f32.mrf.mxu1  ;;  %13817 = vmatprep.mubr.msk.bf16.mxu0 %vm14584_vm2, %v14583_v2  ;;  %v2235_v60 = vld [vmem:[#allocation2 + $0x1b8] sm:$0xff]  ;;  %v2236_v61 = vld [vmem:[#allocation2 + $0x1c0] sm:$0xff] }
 0x28d   : > { %v13587_v0 = vpop.f32.mrf.mxu0  ;;  %v2657_v63 = vld [vmem:[#allocation3 + $0x28] sm:$0xff]  ;;  %v2266_v5 = vpack.c.bf16 %v2236_v61, %v2235_v60  ;;  %v3473_v60 = vld [vmem:[#allocation2 + $0x50] sm:$0xff]  ;;  %v3474_v61 = vld [vmem:[#allocation2 + $0x58] sm:$0xff] }
 0x28e   : > { %2179 = vst [vmem:[#allocation3 + $0x1c0] sm:$0xff] %v2121_v62  ;;  %v1474_v4 = vpop.f32.mrf.mxu1  ;;  %v2880_v0 = vld [vmem:[#allocation2 + $0x1b9] sm:$0xff] }
 0x28f   : > { %v2003_v6 = vpop.f32.mrf.mxu0 }
 0x290   : > { %v2122_v7 = vadd.f32 %v2003_v6, %v1474_v4  ;;  %v13464_v8 = vpop.f32.mrf.mxu1 }
 0x291   : > { %v13588_v10 = vpop.f32.mrf.mxu0  ;;  %v2911_v8 = vpack.c.bf16 %v2881_v1, %v2880_v0  ;;  %v2663_v0 = vld [vmem:[#allocation3 + $0x58] sm:$0xff] }
 0x292   : > { %2180 = vst [vmem:[#allocation3 + $0x1c8] sm:$0xff] %v2122_v7  ;;  %v2421_v12 = vpop.f32.mrf.mxu1  ;;  %13694 = vmatmul.mubr.msk.bf16.gmra.mxu1 %vm938_vm3, %v2263_v9  ;;  %v2658_v10 = vld [vmem:[#allocation3 + $0x30] sm:$0xff] }
 0x293   : > { %v2710_v14 = vadd.f32 %v2652_v13, %v2421_v12  ;;  %v3066_v15 = vpop.f32.mrf.mxu0  ;;  %13818 = vmatmul.mubr.msk.bf16.gmra.mxu0 %vm938_vm3, %v2908_v11  ;;  %13697 = vmatprep.mubr.msk.bf16.mxu1 %vm14584_vm2, %v14583_v2  ;;  %v4118_v1 = vld [vmem:[#allocation2 + $0x51] sm:$0xff] }
 0x294   : > { %v13599_v16 = vpop.f32.mrf.mxu1  ;;  %13821 = vmatprep.mubr.msk.bf16.mxu0 %vm14584_vm2, %v14583_v2 }
 0x295   : > { %v3355_v17 = vadd.f32 %v3066_v15, %v2710_v14  ;;  %v13723_v18 = vpop.f32.mrf.mxu0  ;;  %v2237_v16 = vld [vmem:[#allocation2 + $0x1c8] sm:$0xff] }
 0x296   : > { %v2424_v21 = vpop.f32.mrf.mxu1 }
 0x297   : > { %3413 = vst [vmem:[#allocation3] sm:$0xff] %v3355_v17  ;;  %v2711_v25 = vadd.f32 %v2653_v22, %v2424_v21  ;;  %v3069_v26 = vpop.f32.mrf.mxu0  ;;  %v2238_v17 = vld [vmem:[#allocation2 + $0x1d0] sm:$0xff] }
 0x298   : > { %v13600_v27 = vpop.f32.mrf.mxu1  ;;  %v2883_v21 = vld [vmem:[#allocation2 + $0x1d1] sm:$0xff] }
 0x299   : > { %v3356_v29 = vadd.f32 %v3069_v26, %v2711_v25  ;;  %v13724_v30 = vpop.f32.mrf.mxu0  ;;  %v2267_v25 = vpack.c.bf16 %v2238_v17, %v2237_v16 }
 0x29a   : > { %v2429_v32 = vpop.f32.mrf.mxu1  ;;  %13698 = vmatmul.mubr.msk.bf16.gmra.mxu1 %vm938_vm3, %v2264_v28  ;;  %v2912_v28 = vpack.c.bf16 %v2883_v21, %v2882_v20  ;;  %v2660_v30 = vld [vmem:[#allocation3 + $0x40] sm:$0xff]  ;;  %v3476_v20 = vld [vmem:[#allocation2 + $0x68] sm:$0xff] }
 0x29b   : > { %3414 = vst [vmem:[#allocation3 + $0x8] sm:$0xff] %v3356_v29  ;;  %v2712_v34 = vadd.f32 %v2654_v33, %v2429_v32  ;;  %v3074_v35 = vpop.f32.mrf.mxu0  ;;  %13822 = vmatmul.mubr.msk.bf16.gmra.mxu0 %vm938_vm3, %v2909_v31  ;;  %13701 = vmatprep.mubr.msk.bf16.mxu1 %vm14584_vm2, %v14583_v2 }
 0x29c   : > { %v13603_v36 = vpop.f32.mrf.mxu1  ;;  %13825 = vmatprep.mubr.msk.bf16.mxu0 %vm14584_vm2, %v14583_v2 }
 0x29d   : > { %v3357_v37 = vadd.f32 %v3074_v35, %v2712_v34  ;;  %v13727_v38 = vpop.f32.mrf.mxu0  ;;  %v3471_v36 = vld [vmem:[#allocation2 + $0x40] sm:$0xff] }
 0x29e   : > { %v2432_v41 = vpop.f32.mrf.mxu1 }
 0x29f   : > { %3415 = vst [vmem:[#allocation3 + $0x10] sm:$0xff] %v3357_v37  ;;  %v2713_v45 = vadd.f32 %v2655_v42, %v2432_v41  ;;  %v3077_v46 = vpop.f32.mrf.mxu0  ;;  %v3472_v37 = vld [vmem:[#allocation2 + $0x48] sm:$0xff] }
 0x2a0   : > { %v13604_v47 = vpop.f32.mrf.mxu1  ;;  %v4117_v41 = vld [vmem:[#allocation2 + $0x49] sm:$0xff] }
 0x2a1   : > { %v3358_v49 = vadd.f32 %v3077_v46, %v2713_v45  ;;  %v13728_v51 = vpop.f32.mrf.mxu0  ;;  %v3529_v46 = vpack.c.bf16 %v3472_v37, %v3471_v36 }
 0x2a2   : > { %v2437_v53 = vpop.f32.mrf.mxu1  ;;  %13702 = vmatmul.mubr.msk.bf16.gmra.mxu1 %vm938_vm3, %v2265_v48  ;;  %v14375_v51 = vld [vmem:[%s17335_s3 + $0xf8] sm:$0xff]  }
 0x2a3   : > { %3416 = vst [vmem:[#allocation3 + $0x18] sm:$0xff] %v3358_v49  ;;  %v2714_v55 = vadd.f32 %v2656_v54, %v2437_v53  ;;  %v3082_v56 = vpop.f32.mrf.mxu0  ;;  %13826 = vmatmul.mubr.msk.bf16.gmra.mxu0 %vm938_vm3, %v2910_v52  ;;  %13705 = vmatprep.mubr.msk.bf16.mxu1 %vm14584_vm2, %v14583_v2  ;;  %v4174_v49 = vpack.c.bf16 %v4117_v41, %v4116_v40  ;;  %v2662_v53 = vld [vmem:[#allocation3 + $0x50] sm:$0xff]  ;;  %v3478_v40 = vld [vmem:[#allocation2 + $0x78] sm:$0xff] }
 0x2a4   : > { %v13607_v57 = vpop.f32.mrf.mxu1  ;;  %13829 = vmatprep.mubr.msk.bf16.mxu0 %vm14584_vm2, %v14583_v2 }
 0x2a5   : > { %v3359_v58 = vadd.f32 %v3082_v56, %v2714_v55  ;;  %v13731_v59 = vpop.f32.mrf.mxu0  ;;  %v14376_v56 = vld [vmem:[%s17335_s3 + $0xd0] sm:$0xff]  }
 0x2a6   : > { %v2440_v62 = vpop.f32.mrf.mxu1 }
 0x2a7   : > { %3417 = vst [vmem:[#allocation3 + $0x20] sm:$0xff] %v3359_v58  ;;  %v2715_v3 = vadd.f32 %v2657_v63, %v2440_v62  ;;  %v3085_v4 = vpop.f32.mrf.mxu0  ;;  %v14377_v62 = vld [vmem:[%s17335_s3 + $0xf0] sm:$0xff]  }
 0x2a8   : > { %v13608_v50 = vpop.f32.mrf.mxu1 }
 0x2a9   : > { %v3360_v6 = vadd.f32 %v3085_v4, %v2715_v3  ;;  %v13732_v7 = vpop.f32.mrf.mxu0  ;;  %v4119_v3 = vld [vmem:[#allocation2 + $0x59] sm:$0xff] }
 0x2aa   : > { %v2445_v9 = vpop.f32.mrf.mxu1  ;;  %13706 = vmatmul.mubr.msk.bf16.gmra.mxu1 %vm938_vm3, %v2266_v5  ;;  %v14378_v7 = vld [vmem:[%s17335_s3 + $0xc8] sm:$0xff]  }
 0x2ab   : > { %3418 = vst [vmem:[#allocation3 + $0x28] sm:$0xff] %v3360_v6  ;;  %v2716_v11 = vadd.f32 %v2658_v10, %v2445_v9  ;;  %v3090_v12 = vpop.f32.mrf.mxu0  ;;  %13830 = vmatmul.mubr.msk.bf16.gmra.mxu0 %vm938_vm3, %v2911_v8  ;;  %13709 = vmatprep.mubr.msk.bf16.mxu1 %vm14584_vm2, %v14583_v2  ;;  %v3530_v6 = vpack.c.bf16 %v3474_v61, %v3473_v60  ;;  %v3479_v60 = vld [vmem:[#allocation2 + $0x80] sm:$0xff]  ;;  %v3480_v61 = vld [vmem:[#allocation2 + $0x88] sm:$0xff] }
 0x2ac   : > { %v13611_v13 = vpop.f32.mrf.mxu1  ;;  %13833 = vmatprep.mubr.msk.bf16.mxu0 %vm14584_vm2, %v14583_v2  ;;  %v4175_v10 = vpack.c.bf16 %v4119_v3, %v4118_v1  ;;  %v4125_v1 = vld [vmem:[#allocation2 + $0x89] sm:$0xff] }
 0x2ad   : > { %v3361_v14 = vadd.f32 %v3090_v12, %v2716_v11  ;;  %v13735_v15 = vpop.f32.mrf.mxu0  ;;  %v14379_v11 = vld [vmem:[%s17335_s3 + $0xe8] sm:$0xff]   ;;  %v2664_v13 = vld [vmem:[#allocation3 + $0x60] sm:$0xff] }
 0x2ae   : > { %v2448_v18 = vpop.f32.mrf.mxu1 }
 0x2af   : > { %3419 = vst [vmem:[#allocation3 + $0x30] sm:$0xff] %v3361_v14  ;;  %v2717_v22 = vadd.f32 %v2659_v19, %v2448_v18  ;;  %v3093_v23 = vpop.f32.mrf.mxu0  ;;  %v3475_v19 = vld [vmem:[#allocation2 + $0x60] sm:$0xff] }
 0x2b0   : > { %v13612_v24 = vpop.f32.mrf.mxu1 }
 0x2b1   : > { %v3362_v26 = vadd.f32 %v3093_v23, %v2717_v22  ;;  %v13736_v27 = vpop.f32.mrf.mxu0  ;;  %v2665_v22 = vld [vmem:[#allocation3 + $0x68] sm:$0xff] }
 0x2b2   : > { %v2453_v29 = vpop.f32.mrf.mxu1  ;;  %13710 = vmatmul.mubr.msk.bf16.gmra.mxu1 %vm938_vm3, %v2267_v25  ;;  %v4120_v23 = vld [vmem:[#allocation2 + $0x61] sm:$0xff]  ;;  %v4121_v24 = vld [vmem:[#allocation2 + $0x69] sm:$0xff] }
 0x2b3   : > { %3420 = vst [vmem:[#allocation3 + $0x38] sm:$0xff] %v3362_v26  ;;  %v2718_v31 = vadd.f32 %v2660_v30, %v2453_v29  ;;  %v3098_v32 = vpop.f32.mrf.mxu0  ;;  %13834 = vmatmul.mubr.msk.bf16.gmra.mxu0 %vm938_vm3, %v2912_v28  ;;  %13845 = vmatprep.mubr.msk.bf16.mxu1 %vm14584_vm2, %v14583_v2  ;;  %v3531_v28 = vpack.c.bf16 %v3476_v20, %v3475_v19  ;;  %v2671_v19 = vld [vmem:[#allocation3 + $0x98] sm:$0xff] }
 0x2b4   : > { %v13615_v33 = vpop.f32.mrf.mxu1  ;;  %13969 = vmatprep.mubr.msk.bf16.mxu0 %vm14584_vm2, %v14583_v2  ;;  %v4126_v20 = vld [vmem:[#allocation2 + $0x91] sm:$0xff] }
 0x2b5   : > { %v3363_v34 = vadd.f32 %v3098_v32, %v2718_v31  ;;  %v13739_v35 = vpop.f32.mrf.mxu0  ;;  %v4176_v31 = vpack.c.bf16 %v4121_v24, %v4120_v23  ;;  %v2666_v33 = vld [vmem:[#allocation3 + $0x70] sm:$0xff] }
 0x2b6   : > { %v2456_v38 = vpop.f32.mrf.mxu1 }
 0x2b7   : > { %3421 = vst [vmem:[#allocation3 + $0x40] sm:$0xff] %v3363_v34  ;;  %v2719_v42 = vadd.f32 %v2661_v39, %v2456_v38  ;;  %v3101_v43 = vpop.f32.mrf.mxu0  ;;  %v3477_v39 = vld [vmem:[#allocation2 + $0x70] sm:$0xff] }
 0x2b8   : > { %v13616_v45 = vpop.f32.mrf.mxu1 }
 0x2b9   : > { %v3364_v47 = vadd.f32 %v3101_v43, %v2719_v42  ;;  %v13740_v48 = vpop.f32.mrf.mxu0  ;;  %v2667_v42 = vld [vmem:[#allocation3 + $0x78] sm:$0xff] }
 0x2ba   : > { %v2461_v52 = vpop.f32.mrf.mxu1  ;;  %13846 = vmatmul.mubr.msk.bf16.vlgmr.msra.gmra.mxu1 %vm938_vm3, %v3529_v46  ;;  %v4122_v43 = vld [vmem:[#allocation2 + $0x71] sm:$0xff]  ;;  %v3532_v48 = vpack.c.bf16 %v3478_v40, %v3477_v39  ;;  %v2673_v39 = vld [vmem:[#allocation3 + $0xa8] sm:$0xff] }
 0x2bb   : > { %3422 = vst [vmem:[#allocation3 + $0x48] sm:$0xff] %v3364_v47  ;;  %v2720_v54 = vadd.f32 %v2662_v53, %v2461_v52  ;;  %v3106_v55 = vpop.f32.mrf.mxu0  ;;  %13970 = vmatmul.mubr.msk.bf16.vlgmr.msra.gmra.mxu0 %vm938_vm3, %v4174_v49  ;;  %14086 = vmatpush3.bf16.msra.mxu1 %v14374_v44  ;;  %v4123_v44 = vld [vmem:[#allocation2 + $0x79] sm:$0xff]  ;;  %v4128_v40 = vld [vmem:[#allocation2 + $0xa1] sm:$0xff] }
 0x2bc   : > { %v13619_v57 = vpop.f32.mrf.mxu1  ;;  %13849 = vmatprep.mubr.msk.bf16.mxu1 %vm14584_vm2, %v14583_v2  ;;  %13973 = vmatprep.mubr.msk.bf16.mxu0 %vm14584_vm2, %v14583_v2  ;;  %v4177_v52 = vpack.c.bf16 %v4123_v44, %v4122_v43 }
 0x2bd   : > { %v3365_v58 = vadd.f32 %v3106_v55, %v2720_v54  ;;  %v13743_v59 = vpop.f32.mrf.mxu0  ;;  %14210 = vmatpush3.bf16.msra.mxu0 %v14375_v51  ;;  %14087 = vmatprep.subr.bf16.mxu1 %v14583_v2  ;;  %v2668_v54 = vld [vmem:[#allocation3 + $0x80] sm:$0xff] }
 0x2be   : > { %v2464_v63 = vpop.f32.mrf.mxu1  ;;  %14211 = vmatprep.subr.bf16.mxu0 %v14583_v2 }
 0x2bf   : > { %3423 = vst [vmem:[#allocation3 + $0x50] sm:$0xff] %v3365_v58  ;;  %v2721_v4 = vadd.f32 %v2663_v0, %v2464_v63  ;;  %v3109_v50 = vpop.f32.mrf.mxu0  ;;  %14088 = vmatpush3.bf16.msra.mxu1 %v14376_v56  ;;  %v2669_v63 = vld [vmem:[#allocation3 + $0x88] sm:$0xff] }
 0x2c0   : > { %v13620_v5 = vpop.f32.mrf.mxu1  ;;  %14089 = vmatprep.subr.bf16.mxu1 %v14583_v2  ;;  %v4124_v0 = vld [vmem:[#allocation2 + $0x81] sm:$0xff] }
 0x2c1   : > { %v3366_v8 = vadd.f32 %v3109_v50, %v2721_v4  ;;  %v13744_v9 = vpop.f32.mrf.mxu0  ;;  %14212 = vmatpush3.bf16.msra.mxu0 %v14377_v62  ;;  %v3533_v5 = vpack.c.bf16 %v3480_v61, %v3479_v60  ;;  %v2675_v61 = vld [vmem:[#allocation3 + $0xb8] sm:$0xff] }
 0x2c2   : > { %v2469_v12 = vpop.f32.mrf.mxu1  ;;  %13850 = vmatmul.mubr.msk.bf16.gmra.mxu1 %vm938_vm3, %v3530_v6  ;;  %14213 = vmatprep.subr.bf16.mxu0 %v14583_v2 }
 0x2c3   : > { %3424 = vst [vmem:[#allocation3 + $0x58] sm:$0xff] %v3366_v8  ;;  %v2722_v14 = vadd.f32 %v2664_v13, %v2469_v12  ;;  %v3114_v15 = vpop.f32.mrf.mxu0  ;;  %13974 = vmatmul.mubr.msk.bf16.gmra.mxu0 %vm938_vm3, %v4175_v10  ;;  %13853 = vmatprep.mubr.msk.bf16.mxu1 %vm14584_vm2, %v14583_v2  ;;  %v4178_v8 = vpack.c.bf16 %v4125_v1, %v4124_v0  ;;  %v2670_v10 = vld [vmem:[#allocation3 + $0x90] sm:$0xff] }
 0x2c4   : > { %v13623_v16 = vpop.f32.mrf.mxu1  ;;  %13977 = vmatprep.mubr.msk.bf16.mxu0 %vm14584_vm2, %v14583_v2  ;;  %14090 = vmatpush3.bf16.msra.mxu1 %v14378_v7 }
 0x2c5   : > { %v3367_v17 = vadd.f32 %v3114_v15, %v2722_v14  ;;  %v13747_v18 = vpop.f32.mrf.mxu0  ;;  %14214 = vmatpush3.bf16.msra.mxu0 %v14379_v11  ;;  %14091 = vmatprep.subr.bf16.mxu1 %v14583_v2  ;;  %v3481_v16 = vld [vmem:[#allocation2 + $0x90] sm:$0xff] }
 0x2c6   : > { %v2472_v21 = vpop.f32.mrf.mxu1  ;;  %14215 = vmatprep.subr.bf16.mxu0 %v14583_v2 }
 0x2c7   : > { %3425 = vst [vmem:[#allocation3 + $0x60] sm:$0xff] %v3367_v17  ;;  %v2723_v25 = vadd.f32 %v2665_v22, %v2472_v21  ;;  %v3117_v26 = vpop.f32.mrf.mxu0  ;;  %v3482_v17 = vld [vmem:[#allocation2 + $0x98] sm:$0xff] }
 0x2c8   : > { %v13624_v27 = vpop.f32.mrf.mxu1  ;;  %v4127_v21 = vld [vmem:[#allocation2 + $0x99] sm:$0xff] }
 0x2c9   : > { %v3368_v29 = vadd.f32 %v3117_v26, %v2723_v25  ;;  %v13748_v30 = vpop.f32.mrf.mxu0  ;;  %v3534_v25 = vpack.c.bf16 %v3482_v17, %v3481_v16  ;;  %v2677_v17 = vld [vmem:[#allocation3 + $0xc8] sm:$0xff] }
 0x2ca   : > { %v2477_v32 = vpop.f32.mrf.mxu1  ;;  %13854 = vmatmul.mubr.msk.bf16.gmra.mxu1 %vm938_vm3, %v3531_v28  ;;  %v4179_v28 = vpack.c.bf16 %v4127_v21, %v4126_v20  ;;  %v2672_v30 = vld [vmem:[#allocation3 + $0xa0] sm:$0xff] }
 0x2cb   : > { %3426 = vst [vmem:[#allocation3 + $0x68] sm:$0xff] %v3368_v29  ;;  %v2724_v34 = vadd.f32 %v2666_v33, %v2477_v32  ;;  %v3122_v35 = vpop.f32.mrf.mxu0  ;;  %13978 = vmatmul.mubr.msk.bf16.gmra.mxu0 %vm938_vm3, %v4176_v31  ;;  %13857 = vmatprep.mubr.msk.bf16.mxu1 %vm14584_vm2, %v14583_v2 }
 0x2cc   : > { %v13627_v36 = vpop.f32.mrf.mxu1  ;;  %13981 = vmatprep.mubr.msk.bf16.mxu0 %vm14584_vm2, %v14583_v2 }
 0x2cd   : > { %v3369_v37 = vadd.f32 %v3122_v35, %v2724_v34  ;;  %v13751_v38 = vpop.f32.mrf.mxu0  ;;  %v3483_v36 = vld [vmem:[#allocation2 + $0xa0] sm:$0xff] }
 0x2ce   : > { %v2480_v41 = vpop.f32.mrf.mxu1 }
 0x2cf   : > { %3427 = vst [vmem:[#allocation3 + $0x70] sm:$0xff] %v3369_v37  ;;  %v2725_v45 = vadd.f32 %v2667_v42, %v2480_v41  ;;  %v3125_v46 = vpop.f32.mrf.mxu0  ;;  %v3484_v37 = vld [vmem:[#allocation2 + $0xa8] sm:$0xff] }
 0x2d0   : > { %v13628_v47 = vpop.f32.mrf.mxu1  ;;  %v4129_v41 = vld [vmem:[#allocation2 + $0xa9] sm:$0xff] }
 0x2d1   : > { %v3370_v49 = vadd.f32 %v3125_v46, %v2725_v45  ;;  %v13752_v51 = vpop.f32.mrf.mxu0  ;;  %v3535_v45 = vpack.c.bf16 %v3484_v37, %v3483_v36  ;;  %v3490_v36 = vld [vmem:[#allocation2 + $0xd8] sm:$0xff] }
 0x2d2   : > { %v2485_v53 = vpop.f32.mrf.mxu1  ;;  %13858 = vmatmul.mubr.msk.bf16.gmra.mxu1 %vm938_vm3, %v3532_v48  ;;  %v4180_v48 = vpack.c.bf16 %v4129_v41, %v4128_v40  ;;  %v2674_v51 = vld [vmem:[#allocation3 + $0xb0] sm:$0xff]  ;;  %v4135_v40 = vld [vmem:[#allocation2 + $0xd9] sm:$0xff] }
 0x2d3   : > { %3428 = vst [vmem:[#allocation3 + $0x78] sm:$0xff] %v3370_v49  ;;  %v2726_v55 = vadd.f32 %v2668_v54, %v2485_v53  ;;  %v3130_v56 = vpop.f32.mrf.mxu0  ;;  %13982 = vmatmul.mubr.msk.bf16.gmra.mxu0 %vm938_vm3, %v4177_v52  ;;  %13861 = vmatprep.mubr.msk.bf16.mxu1 %vm14584_vm2, %v14583_v2  ;;  %v14380_v54 = vld [vmem:[%s17335_s3 + $0xc0] sm:$0xff]  }
 0x2d4   : > { %v13631_v57 = vpop.f32.mrf.mxu1  ;;  %13985 = vmatprep.mubr.msk.bf16.mxu0 %vm14584_vm2, %v14583_v2  ;;  %14092 = vmatpush3.bf16.msra.mxu1 %v14380_v54 }
 0x2d5   : > { %v3371_v58 = vadd.f32 %v3130_v56, %v2726_v55  ;;  %v13755_v59 = vpop.f32.mrf.mxu0 }
 0x2d6   : > { %v2488_v62 = vpop.f32.mrf.mxu1  ;;  %v3486_v59 = vld [vmem:[#allocation2 + $0xb8] sm:$0xff] }
 0x2d7   : > { %3429 = vst [vmem:[#allocation3 + $0x80] sm:$0xff] %v3371_v58  ;;  %v2727_v3 = vadd.f32 %v2669_v63, %v2488_v62  ;;  %v3133_v4 = vpop.f32.mrf.mxu0  ;;  %v3485_v58 = vld [vmem:[#allocation2 + $0xb0] sm:$0xff]  ;;  %v4131_v63 = vld [vmem:[#allocation2 + $0xb9] sm:$0xff] }
 0x2d8   : > { %v13632_v50 = vpop.f32.mrf.mxu1  ;;  %v4130_v62 = vld [vmem:[#allocation2 + $0xb1] sm:$0xff] }
 0x2d9   : > { %v3372_v6 = vadd.f32 %v3133_v4, %v2727_v3  ;;  %v13756_v7 = vpop.f32.mrf.mxu0  ;;  %v3536_v4 = vpack.c.bf16 %v3486_v59, %v3485_v58  ;;  %v2681_v59 = vld [vmem:[#allocation3 + $0xe8] sm:$0xff] }
 0x2da   : > { %v2493_v9 = vpop.f32.mrf.mxu1  ;;  %13862 = vmatmul.mubr.msk.bf16.gmra.mxu1 %vm938_vm3, %v3533_v5 }
 0x2db   : > { %3430 = vst [vmem:[#allocation3 + $0x88] sm:$0xff] %v3372_v6  ;;  %v2728_v11 = vadd.f32 %v2670_v10, %v2493_v9  ;;  %v3138_v12 = vpop.f32.mrf.mxu0  ;;  %13986 = vmatmul.mubr.msk.bf16.gmra.mxu0 %vm938_vm3, %v4178_v8  ;;  %13865 = vmatprep.mubr.msk.bf16.mxu1 %vm14584_vm2, %v14583_v2  ;;  %v4181_v6 = vpack.c.bf16 %v4131_v63, %v4130_v62  ;;  %v2676_v8 = vld [vmem:[#allocation3 + $0xc0] sm:$0xff] }
 0x2dc   : > { %v13635_v13 = vpop.f32.mrf.mxu1  ;;  %13989 = vmatprep.mubr.msk.bf16.mxu0 %vm14584_vm2, %v14583_v2 }
 0x2dd   : > { %v3373_v14 = vadd.f32 %v3138_v12, %v2728_v11  ;;  %v13759_v15 = vpop.f32.mrf.mxu0 }
 0x2de   : > { %v2496_v18 = vpop.f32.mrf.mxu1  ;;  %v3488_v15 = vld [vmem:[#allocation2 + $0xc8] sm:$0xff] }
 0x2df   : > { %3431 = vst [vmem:[#allocation3 + $0x90] sm:$0xff] %v3373_v14  ;;  %v2729_v22 = vadd.f32 %v2671_v19, %v2496_v18  ;;  %v3141_v23 = vpop.f32.mrf.mxu0  ;;  %v3487_v14 = vld [vmem:[#allocation2 + $0xc0] sm:$0xff]  ;;  %v4133_v19 = vld [vmem:[#allocation2 + $0xc9] sm:$0xff] }
 0x2e0   : > { %v13636_v24 = vpop.f32.mrf.mxu1  ;;  %v4132_v18 = vld [vmem:[#allocation2 + $0xc1] sm:$0xff] }
 0x2e1   : > { %v3374_v26 = vadd.f32 %v3141_v23, %v2729_v22  ;;  %v13760_v27 = vpop.f32.mrf.mxu0  ;;  %v14381_v22 = vld [vmem:[%s17335_s3 + $0xe0] sm:$0xff]   ;;  %v3537_v24 = vpack.c.bf16 %v3488_v15, %v3487_v14  ;;  %v2683_v15 = vld [vmem:[#allocation3 + $0xf8] sm:$0xff] }
 0x2e2   : > { %v2501_v29 = vpop.f32.mrf.mxu1  ;;  %13866 = vmatmul.mubr.msk.bf16.gmra.mxu1 %vm938_vm3, %v3534_v25  ;;  %v4182_v27 = vpack.c.bf16 %v4133_v19, %v4132_v18  ;;  %14216 = vmatpush3.bf16.msra.mxu0 %v14381_v22 }
 0x2e3   : > { %3432 = vst [vmem:[#allocation3 + $0x98] sm:$0xff] %v3374_v26  ;;  %v2730_v31 = vadd.f32 %v2672_v30, %v2501_v29  ;;  %v3146_v32 = vpop.f32.mrf.mxu0  ;;  %13990 = vmatmul.mubr.msk.bf16.gmra.mxu0 %vm938_vm3, %v4179_v28  ;;  %13869 = vmatprep.mubr.msk.bf16.mxu1 %vm14584_vm2, %v14583_v2  ;;  %v2678_v29 = vld [vmem:[#allocation3 + $0xd0] sm:$0xff] }
 0x2e4   : > { %v13639_v33 = vpop.f32.mrf.mxu1  ;;  %13993 = vmatprep.mubr.msk.bf16.mxu0 %vm14584_vm2, %v14583_v2 }
 0x2e5   : > { %v3375_v34 = vadd.f32 %v3146_v32, %v2730_v31  ;;  %v13763_v35 = vpop.f32.mrf.mxu0 }
 0x2e6   : > { %v2504_v38 = vpop.f32.mrf.mxu1  ;;  %v3489_v35 = vld [vmem:[#allocation2 + $0xd0] sm:$0xff] }
 0x2e7   : > { %3433 = vst [vmem:[#allocation3 + $0xa0] sm:$0xff] %v3375_v34  ;;  %v2731_v42 = vadd.f32 %v2673_v39, %v2504_v38  ;;  %v3149_v43 = vpop.f32.mrf.mxu0  ;;  %v2679_v38 = vld [vmem:[#allocation3 + $0xd8] sm:$0xff] }
 0x2e8   : > { %v13640_v44 = vpop.f32.mrf.mxu1  ;;  %v4134_v39 = vld [vmem:[#allocation2 + $0xd1] sm:$0xff] }
 0x2e9   : > { %v3376_v46 = vadd.f32 %v3149_v43, %v2731_v42  ;;  %v13764_v47 = vpop.f32.mrf.mxu0  ;;  %v3538_v44 = vpack.c.bf16 %v3490_v36, %v3489_v35  ;;  %v2685_v35 = vld [vmem:[#allocation3 + $0x108] sm:$0xff] }
 0x2ea   : > { %v2509_v49 = vpop.f32.mrf.mxu1  ;;  %13870 = vmatmul.mubr.msk.bf16.gmra.mxu1 %vm938_vm3, %v3535_v45  ;;  %v4183_v47 = vpack.c.bf16 %v4135_v40, %v4134_v39  ;;  %v4140_v36 = vld [vmem:[#allocation2 + $0x101] sm:$0xff] }
 0x2eb   : > { %3434 = vst [vmem:[#allocation3 + $0xa8] sm:$0xff] %v3376_v46  ;;  %v2732_v52 = vadd.f32 %v2674_v51, %v2509_v49  ;;  %v3154_v53 = vpop.f32.mrf.mxu0  ;;  %13994 = vmatmul.mubr.msk.bf16.gmra.mxu0 %vm938_vm3, %v4180_v48  ;;  %13873 = vmatprep.mubr.msk.bf16.mxu1 %vm14584_vm2, %v14583_v2  ;;  %v2680_v49 = vld [vmem:[#allocation3 + $0xe0] sm:$0xff] }
 0x2ec   : > { %v13643_v55 = vpop.f32.mrf.mxu1  ;;  %13997 = vmatprep.mubr.msk.bf16.mxu0 %vm14584_vm2, %v14583_v2 }
 0x2ed   : > { %v3377_v56 = vadd.f32 %v3154_v53, %v2732_v52  ;;  %v13767_v57 = vpop.f32.mrf.mxu0 }
 0x2ee   : > { %v2512_v60 = vpop.f32.mrf.mxu1  ;;  %v3492_v57 = vld [vmem:[#allocation2 + $0xe8] sm:$0xff] }
 0x2ef   : > { %3435 = vst [vmem:[#allocation3 + $0xb0] sm:$0xff] %v3377_v56  ;;  %v2733_v0 = vadd.f32 %v2675_v61, %v2512_v60  ;;  %v3157_v1 = vpop.f32.mrf.mxu0  ;;  %v3491_v56 = vld [vmem:[#allocation2 + $0xe0] sm:$0xff]  ;;  %v4137_v61 = vld [vmem:[#allocation2 + $0xe9] sm:$0xff] }
 0x2f0   : > { %v13644_v3 = vpop.f32.mrf.mxu1  ;;  %v4136_v60 = vld [vmem:[#allocation2 + $0xe1] sm:$0xff] }
 0x2f1   : > { %v3378_v50 = vadd.f32 %v3157_v1, %v2733_v0  ;;  %v13768_v5 = vpop.f32.mrf.mxu0  ;;  %v3539_v1 = vpack.c.bf16 %v3492_v57, %v3491_v56  ;;  %v2687_v56 = vld [vmem:[#allocation3 + $0x118] sm:$0xff] }
 0x2f2   : > { %v2517_v7 = vpop.f32.mrf.mxu1  ;;  %13874 = vmatmul.mubr.msk.bf16.gmra.mxu1 %vm938_vm3, %v3536_v4  ;;  %v4142_v57 = vld [vmem:[#allocation2 + $0x111] sm:$0xff] }
 0x2f3   : > { %3436 = vst [vmem:[#allocation3 + $0xb8] sm:$0xff] %v3378_v50  ;;  %v2734_v9 = vadd.f32 %v2676_v8, %v2517_v7  ;;  %v3162_v10 = vpop.f32.mrf.mxu0  ;;  %13998 = vmatmul.mubr.msk.bf16.gmra.mxu0 %vm938_vm3, %v4181_v6  ;;  %13877 = vmatprep.mubr.msk.bf16.mxu1 %vm14584_vm2, %v14583_v2  ;;  %v4184_v50 = vpack.c.bf16 %v4137_v61, %v4136_v60  ;;  %v2682_v6 = vld [vmem:[#allocation3 + $0xf0] sm:$0xff] }
 0x2f4   : > { %v13647_v11 = vpop.f32.mrf.mxu1  ;;  %14001 = vmatprep.mubr.msk.bf16.mxu0 %vm14584_vm2, %v14583_v2 }
 0x2f5   : > { %v3379_v12 = vadd.f32 %v3162_v10, %v2734_v9  ;;  %v13771_v13 = vpop.f32.mrf.mxu0 }
 0x2f6   : > { %v2520_v16 = vpop.f32.mrf.mxu1  ;;  %v3494_v13 = vld [vmem:[#allocation2 + $0xf8] sm:$0xff] }
 0x2f7   : > { %3437 = vst [vmem:[#allocation3 + $0xc0] sm:$0xff] %v3379_v12  ;;  %v2735_v20 = vadd.f32 %v2677_v17, %v2520_v16  ;;  %v3165_v21 = vpop.f32.mrf.mxu0  ;;  %v3493_v12 = vld [vmem:[#allocation2 + $0xf0] sm:$0xff]  ;;  %v4139_v17 = vld [vmem:[#allocation2 + $0xf9] sm:$0xff] }
 0x2f8   : > { %v13648_v23 = vpop.f32.mrf.mxu1  ;;  %v4138_v16 = vld [vmem:[#allocation2 + $0xf1] sm:$0xff] }
 0x2f9   : > { %v3380_v25 = vadd.f32 %v3165_v21, %v2735_v20  ;;  %v13772_v26 = vpop.f32.mrf.mxu0  ;;  %v3540_v21 = vpack.c.bf16 %v3494_v13, %v3493_v12  ;;  %v2689_v12 = vld [vmem:[#allocation3 + $0x128] sm:$0xff] }
 0x2fa   : > { %v2525_v28 = vpop.f32.mrf.mxu1  ;;  %13878 = vmatmul.mubr.msk.bf16.gmra.mxu1 %vm938_vm3, %v3537_v24  ;;  %v4185_v24 = vpack.c.bf16 %v4139_v17, %v4138_v16  ;;  %v2684_v26 = vld [vmem:[#allocation3 + $0x100] sm:$0xff]  ;;  %v14384_v17 = vld [vmem:[%s17337_s5 + $0x74] ss:$8 sps:$4 sm:$0xff]  }
 0x2fb   : > { %3438 = vst [vmem:[#allocation3 + $0xc8] sm:$0xff] %v3380_v25  ;;  %v2736_v30 = vadd.f32 %v2678_v29, %v2525_v28  ;;  %v3170_v31 = vpop.f32.mrf.mxu0  ;;  %14002 = vmatmul.mubr.msk.bf16.gmra.mxu0 %vm938_vm3, %v4182_v27  ;;  %13881 = vmatprep.mubr.msk.bf16.mxu1 %vm14584_vm2, %v14583_v2  ;;  %v4144_v13 = vld [vmem:[#allocation2 + $0x121] sm:$0xff] }
 0x2fc   : > { %v13651_v32 = vpop.f32.mrf.mxu1  ;;  %14005 = vmatprep.mubr.msk.bf16.mxu0 %vm14584_vm2, %v14583_v2  ;;  %6516 = vmatprep.subr.bf16.mxu1 %v14384_v17 }
 0x2fd   : > { %v3381_v33 = vadd.f32 %v3170_v31, %v2736_v30  ;;  %v13775_v34 = vpop.f32.mrf.mxu0  ;;  %v3495_v32 = vld [vmem:[#allocation2 + $0x100] sm:$0xff] }
 0x2fe   : > { %v2528_v37 = vpop.f32.mrf.mxu1 }
 0x2ff   : > { %3439 = vst [vmem:[#allocation3 + $0xd0] sm:$0xff] %v3381_v33  ;;  %v2737_v41 = vadd.f32 %v2679_v38, %v2528_v37  ;;  %v3173_v42 = vpop.f32.mrf.mxu0  ;;  %v3496_v33 = vld [vmem:[#allocation2 + $0x108] sm:$0xff] }
 0x300   : > { %v13652_v43 = vpop.f32.mrf.mxu1  ;;  %v4141_v37 = vld [vmem:[#allocation2 + $0x109] sm:$0xff] }
 0x301   : > { %v3382_v45 = vadd.f32 %v3173_v42, %v2737_v41  ;;  %v13776_v46 = vpop.f32.mrf.mxu0  ;;  %v3541_v41 = vpack.c.bf16 %v3496_v33, %v3495_v32  ;;  %v2691_v33 = vld [vmem:[#allocation3 + $0x138] sm:$0xff] }
 0x302   : > { %v2533_v48 = vpop.f32.mrf.mxu1  ;;  %13882 = vmatmul.mubr.msk.bf16.gmra.mxu1 %vm938_vm3, %v3538_v44  ;;  %v4186_v44 = vpack.c.bf16 %v4141_v37, %v4140_v36  ;;  %v2686_v46 = vld [vmem:[#allocation3 + $0x110] sm:$0xff] }
 0x303   : > { %3440 = vst [vmem:[#allocation3 + $0xd8] sm:$0xff] %v3382_v45  ;;  %v2738_v51 = vadd.f32 %v2680_v49, %v2533_v48  ;;  %v3178_v52 = vpop.f32.mrf.mxu0  ;;  %14006 = vmatmul.mubr.msk.bf16.gmra.mxu0 %vm938_vm3, %v4183_v47  ;;  %13885 = vmatprep.mubr.msk.bf16.mxu1 %vm14584_vm2, %v14583_v2 }
 0x304   : > { %v13655_v53 = vpop.f32.mrf.mxu1  ;;  %14009 = vmatprep.mubr.msk.bf16.mxu0 %vm14584_vm2, %v14583_v2 }
 0x305   : > { %v3383_v54 = vadd.f32 %v3178_v52, %v2738_v51  ;;  %v13779_v55 = vpop.f32.mrf.mxu0  ;;  %v3497_v53 = vld [vmem:[#allocation2 + $0x110] sm:$0xff] }
 0x306   : > { %v2536_v58 = vpop.f32.mrf.mxu1 }
 0x307   : > { %3441 = vst [vmem:[#allocation3 + $0xe0] sm:$0xff] %v3383_v54  ;;  %v2739_v62 = vadd.f32 %v2681_v59, %v2536_v58  ;;  %v3181_v63 = vpop.f32.mrf.mxu0  ;;  %v3498_v54 = vld [vmem:[#allocation2 + $0x118] sm:$0xff] }
 0x308   : > { %v13656_v0 = vpop.f32.mrf.mxu1  ;;  %v4143_v58 = vld [vmem:[#allocation2 + $0x119] sm:$0xff] }
 0x309   : > { %v3384_v3 = vadd.f32 %v3181_v63, %v2739_v62  ;;  %v13780_v4 = vpop.f32.mrf.mxu0  ;;  %v3542_v62 = vpack.c.bf16 %v3498_v54, %v3497_v53  ;;  %v3504_v53 = vld [vmem:[#allocation2 + $0x148] sm:$0xff] }
 0x30a   : > { %v2541_v5 = vpop.f32.mrf.mxu1  ;;  %13886 = vmatmul.mubr.msk.bf16.gmra.mxu1 %vm938_vm3, %v3539_v1  ;;  %v4187_v1 = vpack.c.bf16 %v4143_v58, %v4142_v57  ;;  %v2688_v4 = vld [vmem:[#allocation3 + $0x120] sm:$0xff]  ;;  %v4149_v57 = vld [vmem:[#allocation2 + $0x149] sm:$0xff] }
 0x30b   : > { %3442 = vst [vmem:[#allocation3 + $0xe8] sm:$0xff] %v3384_v3  ;;  %v2740_v7 = vadd.f32 %v2682_v6, %v2541_v5  ;;  %v3186_v8 = vpop.f32.mrf.mxu0  ;;  %14010 = vmatmul.mubr.msk.bf16.gmra.mxu0 %vm938_vm3, %v4184_v50  ;;  %13889 = vmatprep.mubr.msk.bf16.mxu1 %vm14584_vm2, %v14583_v2 }
 0x30c   : > { %v13659_v9 = vpop.f32.mrf.mxu1  ;;  %14013 = vmatprep.mubr.msk.bf16.mxu0 %vm14584_vm2, %v14583_v2 }
 0x30d   : > { %v3385_v10 = vadd.f32 %v3186_v8, %v2740_v7  ;;  %v13783_v11 = vpop.f32.mrf.mxu0  ;;  %v3499_v9 = vld [vmem:[#allocation2 + $0x120] sm:$0xff] }
 0x30e   : > { %v2544_v14 = vpop.f32.mrf.mxu1 }
 0x30f   : > { %3443 = vst [vmem:[#allocation3 + $0xf0] sm:$0xff] %v3385_v10  ;;  %v2741_v18 = vadd.f32 %v2683_v15, %v2544_v14  ;;  %v3189_v19 = vpop.f32.mrf.mxu0  ;;  %v3500_v10 = vld [vmem:[#allocation2 + $0x128] sm:$0xff] }
 0x310   : > { %v13660_v20 = vpop.f32.mrf.mxu1  ;;  %v4145_v14 = vld [vmem:[#allocation2 + $0x129] sm:$0xff] }
 0x311   : > { %v3386_v22 = vadd.f32 %v3189_v19, %v2741_v18  ;;  %v13784_v23 = vpop.f32.mrf.mxu0  ;;  %v3543_v19 = vpack.c.bf16 %v3500_v10, %v3499_v9  ;;  %v3506_v9 = vld [vmem:[#allocation2 + $0x158] sm:$0xff] }
 0x312   : > { %v2549_v25 = vpop.f32.mrf.mxu1  ;;  %13890 = vmatmul.mubr.msk.bf16.gmra.mxu1 %vm938_vm3, %v3540_v21 }
 0x313   : > { %3444 = vst [vmem:[#allocation3 + $0xf8] sm:$0xff] %v3386_v22  ;;  %v2742_v27 = vadd.f32 %v2684_v26, %v2549_v25  ;;  %v3194_v28 = vpop.f32.mrf.mxu0  ;;  %14014 = vmatmul.mubr.msk.bf16.gmra.mxu0 %vm938_vm3, %v4185_v24  ;;  %13893 = vmatprep.mubr.msk.bf16.mxu1 %vm14584_vm2, %v14583_v2  ;;  %v4188_v22 = vpack.c.bf16 %v4145_v14, %v4144_v13  ;;  %v2690_v24 = vld [vmem:[#allocation3 + $0x130] sm:$0xff]  ;;  %v4151_v13 = vld [vmem:[#allocation2 + $0x159] sm:$0xff] }
 0x314   : > { %v13663_v29 = vpop.f32.mrf.mxu1  ;;  %14017 = vmatprep.mubr.msk.bf16.mxu0 %vm14584_vm2, %v14583_v2 }
 0x315   : > { %v3387_v30 = vadd.f32 %v3194_v28, %v2742_v27  ;;  %v13787_v31 = vpop.f32.mrf.mxu0 }
 0x316   : > { %v2552_v34 = vpop.f32.mrf.mxu1  ;;  %v3502_v31 = vld [vmem:[#allocation2 + $0x138] sm:$0xff] }
 0x317   : > { %3445 = vst [vmem:[#allocation3 + $0x100] sm:$0xff] %v3387_v30  ;;  %v2743_v38 = vadd.f32 %v2685_v35, %v2552_v34  ;;  %v3197_v39 = vpop.f32.mrf.mxu0  ;;  %v3501_v30 = vld [vmem:[#allocation2 + $0x130] sm:$0xff]  ;;  %v4147_v35 = vld [vmem:[#allocation2 + $0x139] sm:$0xff] }
 0x318   : > { %v13664_v40 = vpop.f32.mrf.mxu1  ;;  %v4146_v34 = vld [vmem:[#allocation2 + $0x131] sm:$0xff] }
 0x319   : > { %v3388_v42 = vadd.f32 %v3197_v39, %v2743_v38  ;;  %v13788_v43 = vpop.f32.mrf.mxu0  ;;  %v14387_v38 = vld [vmem:[%s17337_s5 + $0xf4] ss:$8 sps:$4 sm:$0xff]   ;;  %v3544_v40 = vpack.c.bf16 %v3502_v31, %v3501_v30  ;;  %v2697_v31 = vld [vmem:[#allocation3 + $0x168] sm:$0xff] }
 0x31a   : > { %v2557_v45 = vpop.f32.mrf.mxu1  ;;  %13894 = vmatmul.mubr.msk.bf16.gmra.mxu1 %vm938_vm3, %v3541_v41  ;;  %v4189_v43 = vpack.c.bf16 %v4147_v35, %v4146_v34  ;;  %7053 = vmatprep.subr.bf16.mxu0 %v14387_v38 }
 0x31b   : > { %3446 = vst [vmem:[#allocation3 + $0x108] sm:$0xff] %v3388_v42  ;;  %v2744_v47 = vadd.f32 %v2686_v46, %v2557_v45  ;;  %v3202_v48 = vpop.f32.mrf.mxu0  ;;  %14018 = vmatmul.mubr.msk.bf16.gmra.mxu0 %vm938_vm3, %v4186_v44  ;;  %13897 = vmatprep.mubr.msk.bf16.mxu1 %vm14584_vm2, %v14583_v2  ;;  %v2692_v45 = vld [vmem:[#allocation3 + $0x140] sm:$0xff] }
 0x31c   : > { %v13667_v49 = vpop.f32.mrf.mxu1  ;;  %14021 = vmatprep.mubr.msk.bf16.mxu0 %vm14584_vm2, %v14583_v2 }
 0x31d   : > { %v3389_v51 = vadd.f32 %v3202_v48, %v2744_v47  ;;  %v13791_v52 = vpop.f32.mrf.mxu0 }
 0x31e   : > { %v2560_v55 = vpop.f32.mrf.mxu1  ;;  %v3503_v52 = vld [vmem:[#allocation2 + $0x140] sm:$0xff] }
 0x31f   : > { %3447 = vst [vmem:[#allocation3 + $0x110] sm:$0xff] %v3389_v51  ;;  %v2745_v59 = vadd.f32 %v2687_v56, %v2560_v55  ;;  %v3205_v60 = vpop.f32.mrf.mxu0  ;;  %v2693_v55 = vld [vmem:[#allocation3 + $0x148] sm:$0xff] }
 0x320   : > { %v13668_v61 = vpop.f32.mrf.mxu1  ;;  %v4148_v56 = vld [vmem:[#allocation2 + $0x141] sm:$0xff] }
 0x321   : > { %v3390_v63 = vadd.f32 %v3205_v60, %v2745_v59  ;;  %v13792_v0 = vpop.f32.mrf.mxu0  ;;  %v3545_v61 = vpack.c.bf16 %v3504_v53, %v3503_v52  ;;  %v2699_v52 = vld [vmem:[#allocation3 + $0x178] sm:$0xff] }
 0x322   : > { %v2565_v3 = vpop.f32.mrf.mxu1  ;;  %13898 = vmatmul.mubr.msk.bf16.gmra.mxu1 %vm938_vm3, %v3542_v62  ;;  %v4190_v0 = vpack.c.bf16 %v4149_v57, %v4148_v56  ;;  %v4154_v53 = vld [vmem:[#allocation2 + $0x171] sm:$0xff] }
 0x323   : > { %3448 = vst [vmem:[#allocation3 + $0x118] sm:$0xff] %v3390_v63  ;;  %v2746_v50 = vadd.f32 %v2688_v4, %v2565_v3  ;;  %v3210_v5 = vpop.f32.mrf.mxu0  ;;  %14022 = vmatmul.mubr.msk.bf16.gmra.mxu0 %vm938_vm3, %v4187_v1  ;;  %13901 = vmatprep.mubr.msk.bf16.mxu1 %vm14584_vm2, %v14583_v2  ;;  %v2694_v3 = vld [vmem:[#allocation3 + $0x150] sm:$0xff] }
 0x324   : > { %v13671_v6 = vpop.f32.mrf.mxu1  ;;  %14025 = vmatprep.mubr.msk.bf16.mxu0 %vm14584_vm2, %v14583_v2 }
 0x325   : > { %v3391_v7 = vadd.f32 %v3210_v5, %v2746_v50  ;;  %v13795_v8 = vpop.f32.mrf.mxu0 }
 0x326   : > { %v2568_v11 = vpop.f32.mrf.mxu1  ;;  %v3505_v8 = vld [vmem:[#allocation2 + $0x150] sm:$0xff] }
 0x327   : > { %3449 = vst [vmem:[#allocation3 + $0x120] sm:$0xff] %v3391_v7  ;;  %v2747_v15 = vadd.f32 %v2689_v12, %v2568_v11  ;;  %v3213_v16 = vpop.f32.mrf.mxu0  ;;  %v2695_v11 = vld [vmem:[#allocation3 + $0x158] sm:$0xff]  ;;  %v3546_v17 = vpack.c.bf16 %v3506_v9, %v3505_v8  ;;  %v2701_v8 = vld [vmem:[#allocation3 + $0x188] sm:$0xff] }
 0x328   : > { %v13672_v18 = vpop.f32.mrf.mxu1  ;;  %v4150_v12 = vld [vmem:[#allocation2 + $0x151] sm:$0xff]  ;;  %v4156_v9 = vld [vmem:[#allocation2 + $0x181] sm:$0xff] }
 0x329   : > { %v3392_v20 = vadd.f32 %v3213_v16, %v2747_v15  ;;  %v13796_v21 = vpop.f32.mrf.mxu0 }
 0x32a   : > { %v2573_v23 = vpop.f32.mrf.mxu1  ;;  %13902 = vmatmul.mubr.msk.bf16.gmra.mxu1 %vm938_vm3, %v3543_v19 }
 0x32b   : > { %3450 = vst [vmem:[#allocation3 + $0x128] sm:$0xff] %v3392_v20  ;;  %v2748_v25 = vadd.f32 %v2690_v24, %v2573_v23  ;;  %v3218_v26 = vpop.f32.mrf.mxu0  ;;  %14026 = vmatmul.mubr.msk.bf16.gmra.mxu0 %vm938_vm3, %v4188_v22  ;;  %13905 = vmatprep.mubr.msk.bf16.mxu1 %vm14584_vm2, %v14583_v2  ;;  %v4191_v20 = vpack.c.bf16 %v4151_v13, %v4150_v12  ;;  %v2696_v22 = vld [vmem:[#allocation3 + $0x160] sm:$0xff] }
 0x32c   : > { %v13675_v27 = vpop.f32.mrf.mxu1  ;;  %14029 = vmatprep.mubr.msk.bf16.mxu0 %vm14584_vm2, %v14583_v2 }
 0x32d   : > { %v3393_v28 = vadd.f32 %v3218_v26, %v2748_v25  ;;  %v13799_v29 = vpop.f32.mrf.mxu0 }
 0x32e   : > { %v2576_v32 = vpop.f32.mrf.mxu1  ;;  %v3508_v29 = vld [vmem:[#allocation2 + $0x168] sm:$0xff] }
 0x32f   : > { %3451 = vst [vmem:[#allocation3 + $0x130] sm:$0xff] %v3393_v28  ;;  %v2749_v36 = vadd.f32 %v2691_v33, %v2576_v32  ;;  %v3221_v37 = vpop.f32.mrf.mxu0  ;;  %v3507_v28 = vld [vmem:[#allocation2 + $0x160] sm:$0xff]  ;;  %v4153_v33 = vld [vmem:[#allocation2 + $0x169] sm:$0xff] }
 0x330   : > { %v13676_v39 = vpop.f32.mrf.mxu1  ;;  %v4152_v32 = vld [vmem:[#allocation2 + $0x161] sm:$0xff] }
 0x331   : > { %v3394_v41 = vadd.f32 %v3221_v37, %v2749_v36  ;;  %v13800_v42 = vpop.f32.mrf.mxu0  ;;  %v3547_v37 = vpack.c.bf16 %v3508_v29, %v3507_v28  ;;  %v2703_v28 = vld [vmem:[#allocation3 + $0x198] sm:$0xff] }
 0x332   : > { %v2581_v44 = vpop.f32.mrf.mxu1  ;;  %13906 = vmatmul.mubr.msk.bf16.gmra.mxu1 %vm938_vm3, %v3544_v40  ;;  %v4192_v40 = vpack.c.bf16 %v4153_v33, %v4152_v32  ;;  %v2698_v42 = vld [vmem:[#allocation3 + $0x170] sm:$0xff] }
 0x333   : > { %3452 = vst [vmem:[#allocation3 + $0x138] sm:$0xff] %v3394_v41  ;;  %v2750_v46 = vadd.f32 %v2692_v45, %v2581_v44  ;;  %v3226_v47 = vpop.f32.mrf.mxu0  ;;  %14030 = vmatmul.mubr.msk.bf16.gmra.mxu0 %vm938_vm3, %v4189_v43  ;;  %13909 = vmatprep.mubr.msk.bf16.mxu1 %vm14584_vm2, %v14583_v2  ;;  %v4158_v29 = vld [vmem:[#allocation2 + $0x191] sm:$0xff] }
 0x334   : > { %v13679_v48 = vpop.f32.mrf.mxu1  ;;  %14033 = vmatprep.mubr.msk.bf16.mxu0 %vm14584_vm2, %v14583_v2 }
 0x335   : > { %v3395_v49 = vadd.f32 %v3226_v47, %v2750_v46  ;;  %v13803_v51 = vpop.f32.mrf.mxu0  ;;  %v3509_v48 = vld [vmem:[#allocation2 + $0x170] sm:$0xff] }
 0x336   : > { %v2584_v54 = vpop.f32.mrf.mxu1 }
 0x337   : > { %3453 = vst [vmem:[#allocation3 + $0x140] sm:$0xff] %v3395_v49  ;;  %v2751_v58 = vadd.f32 %v2693_v55, %v2584_v54  ;;  %v3229_v59 = vpop.f32.mrf.mxu0  ;;  %v3510_v49 = vld [vmem:[#allocation2 + $0x178] sm:$0xff] }
 0x338   : > { %v13680_v60 = vpop.f32.mrf.mxu1  ;;  %v4155_v54 = vld [vmem:[#allocation2 + $0x179] sm:$0xff] }
 0x339   : > { %v3396_v62 = vadd.f32 %v3229_v59, %v2751_v58  ;;  %v13804_v63 = vpop.f32.mrf.mxu0  ;;  %v3548_v58 = vpack.c.bf16 %v3510_v49, %v3509_v48  ;;  %v2705_v48 = vld [vmem:[#allocation3 + $0x1a8] sm:$0xff] }
 0x33a   : > { %v2589_v1 = vpop.f32.mrf.mxu1  ;;  %13910 = vmatmul.mubr.msk.bf16.gmra.mxu1 %vm938_vm3, %v3545_v61  ;;  %v4193_v61 = vpack.c.bf16 %v4155_v54, %v4154_v53  ;;  %v2700_v63 = vld [vmem:[#allocation3 + $0x180] sm:$0xff] }
 0x33b   : > { %3454 = vst [vmem:[#allocation3 + $0x148] sm:$0xff] %v3396_v62  ;;  %v2752_v4 = vadd.f32 %v2694_v3, %v2589_v1  ;;  %v3234_v50 = vpop.f32.mrf.mxu0  ;;  %14034 = vmatmul.mubr.msk.bf16.gmra.mxu0 %vm938_vm3, %v4190_v0  ;;  %13913 = vmatprep.mubr.msk.bf16.mxu1 %vm14584_vm2, %v14583_v2  ;;  %v4160_v49 = vld [vmem:[#allocation2 + $0x1a1] sm:$0xff] }
 0x33c   : > { %v13683_v5 = vpop.f32.mrf.mxu1  ;;  %14037 = vmatprep.mubr.msk.bf16.mxu0 %vm14584_vm2, %v14583_v2 }
 0x33d   : > { %v3397_v6 = vadd.f32 %v3234_v50, %v2752_v4  ;;  %v13807_v7 = vpop.f32.mrf.mxu0  ;;  %v3511_v5 = vld [vmem:[#allocation2 + $0x180] sm:$0xff] }
 0x33e   : > { %v2592_v10 = vpop.f32.mrf.mxu1 }
 0x33f   : > { %3455 = vst [vmem:[#allocation3 + $0x150] sm:$0xff] %v3397_v6  ;;  %v2753_v14 = vadd.f32 %v2695_v11, %v2592_v10  ;;  %v3237_v15 = vpop.f32.mrf.mxu0  ;;  %v3512_v6 = vld [vmem:[#allocation2 + $0x188] sm:$0xff] }
 0x340   : > { %v13684_v16 = vpop.f32.mrf.mxu1  ;;  %v4157_v10 = vld [vmem:[#allocation2 + $0x189] sm:$0xff] }
 0x341   : > { %v3398_v18 = vadd.f32 %v3237_v15, %v2753_v14  ;;  %v13808_v19 = vpop.f32.mrf.mxu0  ;;  %v3549_v14 = vpack.c.bf16 %v3512_v6, %v3511_v5  ;;  %v2707_v5 = vld [vmem:[#allocation3 + $0x1b8] sm:$0xff] }
 0x342   : > { %v2597_v21 = vpop.f32.mrf.mxu1  ;;  %13914 = vmatmul.mubr.msk.bf16.gmra.mxu1 %vm938_vm3, %v3546_v17  ;;  %v4194_v17 = vpack.c.bf16 %v4157_v10, %v4156_v9  ;;  %v2702_v19 = vld [vmem:[#allocation3 + $0x190] sm:$0xff] }
 0x343   : > { %3456 = vst [vmem:[#allocation3 + $0x158] sm:$0xff] %v3398_v18  ;;  %v2754_v23 = vadd.f32 %v2696_v22, %v2597_v21  ;;  %v3242_v24 = vpop.f32.mrf.mxu0  ;;  %14038 = vmatmul.mubr.msk.bf16.gmra.mxu0 %vm938_vm3, %v4191_v20  ;;  %13917 = vmatprep.mubr.msk.bf16.mxu1 %vm14584_vm2, %v14583_v2  ;;  %v4162_v6 = vld [vmem:[#allocation2 + $0x1b1] sm:$0xff] }
 0x344   : > { %v13687_v25 = vpop.f32.mrf.mxu1  ;;  %14041 = vmatprep.mubr.msk.bf16.mxu0 %vm14584_vm2, %v14583_v2 }
 0x345   : > { %v3399_v26 = vadd.f32 %v3242_v24, %v2754_v23  ;;  %v13811_v27 = vpop.f32.mrf.mxu0  ;;  %v3513_v25 = vld [vmem:[#allocation2 + $0x190] sm:$0xff] }
 0x346   : > { %v2600_v30 = vpop.f32.mrf.mxu1 }
 0x347   : > { %3457 = vst [vmem:[#allocation3 + $0x160] sm:$0xff] %v3399_v26  ;;  %v2755_v34 = vadd.f32 %v2697_v31, %v2600_v30  ;;  %v3245_v35 = vpop.f32.mrf.mxu0  ;;  %v3514_v26 = vld [vmem:[#allocation2 + $0x198] sm:$0xff] }
 0x348   : > { %v13688_v36 = vpop.f32.mrf.mxu1  ;;  %v4159_v30 = vld [vmem:[#allocation2 + $0x199] sm:$0xff] }
 0x349   : > { %v3400_v38 = vadd.f32 %v3245_v35, %v2755_v34  ;;  %v13812_v39 = vpop.f32.mrf.mxu0  ;;  %v3550_v34 = vpack.c.bf16 %v3514_v26, %v3513_v25  ;;  %v2709_v25 = vld [vmem:[#allocation3 + $0x1c8] sm:$0xff] }
 0x34a   : > { %v2605_v41 = vpop.f32.mrf.mxu1  ;;  %13918 = vmatmul.mubr.msk.bf16.gmra.mxu1 %vm938_vm3, %v3547_v37  ;;  %v4195_v37 = vpack.c.bf16 %v4159_v30, %v4158_v29  ;;  %v2704_v39 = vld [vmem:[#allocation3 + $0x1a0] sm:$0xff] }
 0x34b   : > { %3458 = vst [vmem:[#allocation3 + $0x168] sm:$0xff] %v3400_v38  ;;  %v2756_v43 = vadd.f32 %v2698_v42, %v2605_v41  ;;  %v3250_v44 = vpop.f32.mrf.mxu0  ;;  %14042 = vmatmul.mubr.msk.bf16.gmra.mxu0 %vm938_vm3, %v4192_v40  ;;  %13921 = vmatprep.mubr.msk.bf16.mxu1 %vm14584_vm2, %v14583_v2  ;;  %v4164_v26 = vld [vmem:[#allocation2 + $0x1c1] sm:$0xff] }
 0x34c   : > { %v13691_v45 = vpop.f32.mrf.mxu1  ;;  %14045 = vmatprep.mubr.msk.bf16.mxu0 %vm14584_vm2, %v14583_v2 }
 0x34d   : > { %v3401_v46 = vadd.f32 %v3250_v44, %v2756_v43  ;;  %v13815_v47 = vpop.f32.mrf.mxu0  ;;  %v3515_v45 = vld [vmem:[#allocation2 + $0x1a0] sm:$0xff] }
 0x34e   : > { %v2608_v51 = vpop.f32.mrf.mxu1 }
 0x34f   : > { %3459 = vst [vmem:[#allocation3 + $0x170] sm:$0xff] %v3401_v46  ;;  %v2757_v55 = vadd.f32 %v2699_v52, %v2608_v51  ;;  %v3253_v56 = vpop.f32.mrf.mxu0  ;;  %v3516_v46 = vld [vmem:[#allocation2 + $0x1a8] sm:$0xff] }
 0x350   : > { %v13692_v57 = vpop.f32.mrf.mxu1  ;;  %v4161_v51 = vld [vmem:[#allocation2 + $0x1a9] sm:$0xff] }
 0x351   : > { %v3402_v59 = vadd.f32 %v3253_v56, %v2757_v55  ;;  %v13816_v60 = vpop.f32.mrf.mxu0  ;;  %v3551_v55 = vpack.c.bf16 %v3516_v46, %v3515_v45  ;;  %v3943_v45 = vld [vmem:[#allocation3 + $0x8] sm:$0xff]  ;;  %v4166_v46 = vld [vmem:[#allocation2 + $0x1d1] sm:$0xff] }
 0x352   : > { %v2613_v62 = vpop.f32.mrf.mxu1  ;;  %13922 = vmatmul.mubr.msk.bf16.gmra.mxu1 %vm938_vm3, %v3548_v58  ;;  %v4196_v58 = vpack.c.bf16 %v4161_v51, %v4160_v49  ;;  %v2706_v60 = vld [vmem:[#allocation3 + $0x1b0] sm:$0xff] }
 0x353   : > { %3460 = vst [vmem:[#allocation3 + $0x178] sm:$0xff] %v3402_v59  ;;  %v2758_v0 = vadd.f32 %v2700_v63, %v2613_v62  ;;  %v3258_v1 = vpop.f32.mrf.mxu0  ;;  %14046 = vmatmul.mubr.msk.bf16.gmra.mxu0 %vm938_vm3, %v4193_v61  ;;  %13925 = vmatprep.mubr.msk.bf16.mxu1 %vm14584_vm2, %v14583_v2 }
 0x354   : > { %v13695_v3 = vpop.f32.mrf.mxu1  ;;  %14049 = vmatprep.mubr.msk.bf16.mxu0 %vm14584_vm2, %v14583_v2 }
 0x355   : > { %v3403_v4 = vadd.f32 %v3258_v1, %v2758_v0  ;;  %v13819_v50 = vpop.f32.mrf.mxu0  ;;  %v3517_v3 = vld [vmem:[#allocation2 + $0x1b0] sm:$0xff] }
 0x356   : > { %v2616_v7 = vpop.f32.mrf.mxu1 }
 0x357   : > { %3461 = vst [vmem:[#allocation3 + $0x180] sm:$0xff] %v3403_v4  ;;  %v2759_v11 = vadd.f32 %v2701_v8, %v2616_v7  ;;  %v3261_v12 = vpop.f32.mrf.mxu0  ;;  %v3518_v4 = vld [vmem:[#allocation2 + $0x1b8] sm:$0xff] }
 0x358   : > { %v13696_v13 = vpop.f32.mrf.mxu1  ;;  %v4163_v7 = vld [vmem:[#allocation2 + $0x1b9] sm:$0xff] }
 0x359   : > { %v3404_v15 = vadd.f32 %v3261_v12, %v2759_v11  ;;  %v13820_v16 = vpop.f32.mrf.mxu0  ;;  %v3552_v11 = vpack.c.bf16 %v3518_v4, %v3517_v3  ;;  %v3945_v3 = vld [vmem:[#allocation3 + $0x18] sm:$0xff]  ;;  %v4168_v4 = vld [vmem:[#allocation2 + $0x1e1] sm:$0xff] }
 0x35a   : > { %v2621_v18 = vpop.f32.mrf.mxu1  ;;  %13926 = vmatmul.mubr.msk.bf16.gmra.mxu1 %vm938_vm3, %v3549_v14  ;;  %v4197_v14 = vpack.c.bf16 %v4163_v7, %v4162_v6  ;;  %v2708_v16 = vld [vmem:[#allocation3 + $0x1c0] sm:$0xff] }
 0x35b   : > { %3462 = vst [vmem:[#allocation3 + $0x188] sm:$0xff] %v3404_v15  ;;  %v2760_v20 = vadd.f32 %v2702_v19, %v2621_v18  ;;  %v3266_v21 = vpop.f32.mrf.mxu0  ;;  %14050 = vmatmul.mubr.msk.bf16.gmra.mxu0 %vm938_vm3, %v4194_v17  ;;  %13929 = vmatprep.mubr.msk.bf16.mxu1 %vm14584_vm2, %v14583_v2 }
 0x35c   : > { %v13699_v22 = vpop.f32.mrf.mxu1  ;;  %14053 = vmatprep.mubr.msk.bf16.mxu0 %vm14584_vm2, %v14583_v2 }
 0x35d   : > { %v3405_v23 = vadd.f32 %v3266_v21, %v2760_v20  ;;  %v13823_v24 = vpop.f32.mrf.mxu0  ;;  %v3519_v22 = vld [vmem:[#allocation2 + $0x1c0] sm:$0xff] }
 0x35e   : > { %v2624_v27 = vpop.f32.mrf.mxu1 }
 0x35f   : > { %3463 = vst [vmem:[#allocation3 + $0x190] sm:$0xff] %v3405_v23  ;;  %v2761_v31 = vadd.f32 %v2703_v28, %v2624_v27  ;;  %v3269_v32 = vpop.f32.mrf.mxu0  ;;  %v3520_v23 = vld [vmem:[#allocation2 + $0x1c8] sm:$0xff] }
 0x360   : > { %v13700_v33 = vpop.f32.mrf.mxu1  ;;  %v4165_v27 = vld [vmem:[#allocation2 + $0x1c9] sm:$0xff] }
 0x361   : > { %v3406_v35 = vadd.f32 %v3269_v32, %v2761_v31  ;;  %v13824_v36 = vpop.f32.mrf.mxu0  ;;  %v3553_v31 = vpack.c.bf16 %v3520_v23, %v3519_v22  ;;  %v3947_v22 = vld [vmem:[#allocation3 + $0x28] sm:$0xff]  ;;  %v4170_v23 = vld [vmem:[#allocation2 + $0x1f1] sm:$0xff] }
 0x362   : > { %v2629_v38 = vpop.f32.mrf.mxu1  ;;  %13930 = vmatmul.mubr.msk.bf16.gmra.mxu1 %vm938_vm3, %v3550_v34  ;;  %v4198_v34 = vpack.c.bf16 %v4165_v27, %v4164_v26  ;;  %v3942_v36 = vld [vmem:[#allocation3] sm:$0xff] }
 0x363   : > { %3464 = vst [vmem:[#allocation3 + $0x198] sm:$0xff] %v3406_v35  ;;  %v2762_v40 = vadd.f32 %v2704_v39, %v2629_v38  ;;  %v3274_v41 = vpop.f32.mrf.mxu0  ;;  %14054 = vmatmul.mubr.msk.bf16.gmra.mxu0 %vm938_vm3, %v4195_v37  ;;  %13933 = vmatprep.mubr.msk.bf16.mxu1 %vm14584_vm2, %v14583_v2 }
 0x364   : > { %v13703_v42 = vpop.f32.mrf.mxu1  ;;  %14057 = vmatprep.mubr.msk.bf16.mxu0 %vm14584_vm2, %v14583_v2 }
 0x365   : > { %v3407_v43 = vadd.f32 %v3274_v41, %v2762_v40  ;;  %v13827_v44 = vpop.f32.mrf.mxu0  ;;  %v3521_v42 = vld [vmem:[#allocation2 + $0x1d0] sm:$0xff] }
 0x366   : > { %v2632_v47 = vpop.f32.mrf.mxu1 }
 0x367   : > { %3465 = vst [vmem:[#allocation3 + $0x1a0] sm:$0xff] %v3407_v43  ;;  %v2763_v52 = vadd.f32 %v2705_v48, %v2632_v47  ;;  %v3277_v53 = vpop.f32.mrf.mxu0  ;;  %v3522_v43 = vld [vmem:[#allocation2 + $0x1d8] sm:$0xff] }
 0x368   : > { %v13704_v54 = vpop.f32.mrf.mxu1  ;;  %v4167_v47 = vld [vmem:[#allocation2 + $0x1d9] sm:$0xff] }
 0x369   : > { %v3408_v56 = vadd.f32 %v3277_v53, %v2763_v52  ;;  %v13828_v57 = vpop.f32.mrf.mxu0  ;;  %v3554_v52 = vpack.c.bf16 %v3522_v43, %v3521_v42  ;;  %v3949_v42 = vld [vmem:[#allocation3 + $0x38] sm:$0xff]  ;;  %v4172_v43 = vld [vmem:[#allocation2 + $0x201] sm:$0xff] }
 0x36a   : > { %v2637_v59 = vpop.f32.mrf.mxu1  ;;  %13934 = vmatmul.mubr.msk.bf16.gmra.mxu1 %vm938_vm3, %v3551_v55  ;;  %v4199_v55 = vpack.c.bf16 %v4167_v47, %v4166_v46  ;;  %v3944_v57 = vld [vmem:[#allocation3 + $0x10] sm:$0xff] }
 0x36b   : > { %3466 = vst [vmem:[#allocation3 + $0x1a8] sm:$0xff] %v3408_v56  ;;  %v2764_v61 = vadd.f32 %v2706_v60, %v2637_v59  ;;  %v3282_v62 = vpop.f32.mrf.mxu0  ;;  %14058 = vmatmul.mubr.msk.bf16.gmra.mxu0 %vm938_vm3, %v4196_v58  ;;  %13937 = vmatprep.mubr.msk.bf16.mxu1 %vm14584_vm2, %v14583_v2 }
 0x36c   : > { %v13707_v63 = vpop.f32.mrf.mxu1  ;;  %14061 = vmatprep.mubr.msk.bf16.mxu0 %vm14584_vm2, %v14583_v2 }
 0x36d   : > { %v3409_v0 = vadd.f32 %v3282_v62, %v2764_v61  ;;  %v13831_v1 = vpop.f32.mrf.mxu0  ;;  %v3523_v63 = vld [vmem:[#allocation2 + $0x1e0] sm:$0xff] }
 0x36e   : > { %v2640_v50 = vpop.f32.mrf.mxu1 }
 0x36f   : > { %3467 = vst [vmem:[#allocation3 + $0x1b0] sm:$0xff] %v3409_v0  ;;  %v2765_v8 = vadd.f32 %v2707_v5, %v2640_v50  ;;  %v3285_v9 = vpop.f32.mrf.mxu0  ;;  %v3524_v0 = vld [vmem:[#allocation2 + $0x1e8] sm:$0xff] }
 0x370   : > { %v13708_v10 = vpop.f32.mrf.mxu1  ;;  %v4169_v50 = vld [vmem:[#allocation2 + $0x1e9] sm:$0xff] }
 0x371   : > { %v3410_v12 = vadd.f32 %v3285_v9, %v2765_v8  ;;  %v13832_v13 = vpop.f32.mrf.mxu0  ;;  %v3555_v8 = vpack.c.bf16 %v3524_v0, %v3523_v63  ;;  %v3951_v63 = vld [vmem:[#allocation3 + $0x48] sm:$0xff] }
 0x372   : > { %v2645_v15 = vpop.f32.mrf.mxu1  ;;  %13938 = vmatmul.mubr.msk.bf16.gmra.mxu1 %vm938_vm3, %v3552_v11  ;;  %v4200_v11 = vpack.c.bf16 %v4169_v50, %v4168_v4  ;;  %v3946_v13 = vld [vmem:[#allocation3 + $0x20] sm:$0xff]  ;;  %v5406_v0 = vld [vmem:[#allocation2 + $0x49] sm:$0xff] }
 0x373   : > { %3468 = vst [vmem:[#allocation3 + $0x1b8] sm:$0xff] %v3410_v12  ;;  %v2766_v17 = vadd.f32 %v2708_v16, %v2645_v15  ;;  %v3290_v18 = vpop.f32.mrf.mxu0  ;;  %14062 = vmatmul.mubr.msk.bf16.gmra.mxu0 %vm938_vm3, %v4197_v14  ;;  %13941 = vmatprep.mubr.msk.bf16.mxu1 %vm14584_vm2, %v14583_v2  ;;  %v14382_v50 = vld [vmem:[%s17337_s5 + $0x70] ss:$8 sps:$4 sm:$0xff]  }
 0x374   : > { %v13711_v19 = vpop.f32.mrf.mxu1  ;;  %14065 = vmatprep.mubr.msk.bf16.mxu0 %vm14584_vm2, %v14583_v2 }
 0x375   : > { %v3411_v20 = vadd.f32 %v3290_v18, %v2766_v17  ;;  %v13835_v21 = vpop.f32.mrf.mxu0  ;;  %v3525_v19 = vld [vmem:[#allocation2 + $0x1f0] sm:$0xff] }
 0x376   : > { %v2648_v24 = vpop.f32.mrf.mxu1 }
 0x377   : > { %3469 = vst [vmem:[#allocation3 + $0x1c0] sm:$0xff] %v3411_v20  ;;  %v2767_v28 = vadd.f32 %v2709_v25, %v2648_v24  ;;  %v3293_v29 = vpop.f32.mrf.mxu0  ;;  %v3526_v20 = vld [vmem:[#allocation2 + $0x1f8] sm:$0xff] }
 0x378   : > { %v13712_v30 = vpop.f32.mrf.mxu1  ;;  %v4171_v24 = vld [vmem:[#allocation2 + $0x1f9] sm:$0xff] }
 0x379   : > { %v3412_v32 = vadd.f32 %v3293_v29, %v2767_v28  ;;  %v13836_v33 = vpop.f32.mrf.mxu0  ;;  %v3556_v28 = vpack.c.bf16 %v3526_v20, %v3525_v19  ;;  %v14396_v19 = vld [vmem:[%s17337_s5 + $0x54] ss:$8 sps:$4 sm:$0xff]  }
 0x37a   : > { %v3711_v35 = vpop.f32.mrf.mxu1  ;;  %13942 = vmatmul.mubr.msk.bf16.gmra.mxu1 %vm938_vm3, %v3553_v31  ;;  %v4201_v31 = vpack.c.bf16 %v4171_v24, %v4170_v23  ;;  %v3948_v33 = vld [vmem:[#allocation3 + $0x30] sm:$0xff]  ;;  %v4764_v23 = vld [vmem:[#allocation2 + $0x60] sm:$0xff] }
 0x37b   : > { %3470 = vst [vmem:[#allocation3 + $0x1c8] sm:$0xff] %v3412_v32  ;;  %v4000_v37 = vadd.f32 %v3942_v36, %v3711_v35  ;;  %v4356_v38 = vpop.f32.mrf.mxu0  ;;  %14066 = vmatmul.mubr.msk.bf16.gmra.mxu0 %vm938_vm3, %v4198_v34  ;;  %13945 = vmatprep.mubr.msk.bf16.mxu1 %vm14584_vm2, %v14583_v2  ;;  %v14391_v24 = vld [vmem:[%s17337_s5 + $0xe0] ss:$8 sps:$4 sm:$0xff]  }
 0x37c   : > { %v13847_v39 = vpop.f32.mrf.mxu1  ;;  %14069 = vmatprep.mubr.msk.bf16.mxu0 %vm14584_vm2, %v14583_v2 }
 0x37d   : > { %v4645_v40 = vadd.f32 %v4356_v38, %v4000_v37  ;;  %v13971_v41 = vpop.f32.mrf.mxu0  ;;  %v3527_v39 = vld [vmem:[#allocation2 + $0x200] sm:$0xff] }
 0x37e   : > { %v3714_v44 = vpop.f32.mrf.mxu1 }
 0x37f   : > { %4703 = vst [vmem:[#allocation3] sm:$0xff] %v4645_v40  ;;  %v4001_v48 = vadd.f32 %v3943_v45, %v3714_v44  ;;  %v4359_v49 = vpop.f32.mrf.mxu0  ;;  %v3528_v40 = vld [vmem:[#allocation2 + $0x208] sm:$0xff] }
 0x380   : > { %v13848_v51 = vpop.f32.mrf.mxu1  ;;  %v4173_v44 = vld [vmem:[#allocation2 + $0x209] sm:$0xff] }
 0x381   : > { %v4646_v53 = vadd.f32 %v4359_v49, %v4001_v48  ;;  %v13972_v54 = vpop.f32.mrf.mxu0  ;;  %v3557_v48 = vpack.c.bf16 %v3528_v40, %v3527_v39  ;;  %v14402_v39 = vld [vmem:[%s17337_s5 + $0x44] ss:$8 sps:$4 sm:$0xff]  }
 0x382   : > { %v3719_v56 = vpop.f32.mrf.mxu1  ;;  %13946 = vmatmul.mubr.msk.bf16.gmra.mxu1 %vm938_vm3, %v3554_v52  ;;  %v4202_v52 = vpack.c.bf16 %v4173_v44, %v4172_v43  ;;  %v3950_v54 = vld [vmem:[#allocation3 + $0x40] sm:$0xff] }
 0x383   : > { %4704 = vst [vmem:[#allocation3 + $0x8] sm:$0xff] %v4646_v53  ;;  %v4002_v58 = vadd.f32 %v3944_v57, %v3719_v56  ;;  %v4364_v59 = vpop.f32.mrf.mxu0  ;;  %14070 = vmatmul.mubr.msk.bf16.gmra.mxu0 %vm938_vm3, %v4199_v55  ;;  %13949 = vmatprep.mubr.msk.bf16.mxu1 %vm14584_vm2, %v14583_v2 }
 0x384   : > { %v13851_v60 = vpop.f32.mrf.mxu1  ;;  %14073 = vmatprep.mubr.msk.bf16.mxu0 %vm14584_vm2, %v14583_v2 }
 0x385   : > { %v4647_v61 = vadd.f32 %v4364_v59, %v4002_v58  ;;  %v13975_v62 = vpop.f32.mrf.mxu0  ;;  %v4761_v60 = vld [vmem:[#allocation2 + $0x48] sm:$0xff] }
 0x386   : > { %v3722_v1 = vpop.f32.mrf.mxu1 }
 0x387   : > { %4705 = vst [vmem:[#allocation3 + $0x10] sm:$0xff] %v4647_v61  ;;  %v4003_v5 = vadd.f32 %v3945_v3, %v3722_v1  ;;  %v4367_v6 = vpop.f32.mrf.mxu0  ;;  %v4762_v61 = vld [vmem:[#allocation2 + $0x50] sm:$0xff] }
 0x388   : > { %v13852_v7 = vpop.f32.mrf.mxu1  ;;  %v5407_v1 = vld [vmem:[#allocation2 + $0x51] sm:$0xff] }
 0x389   : > { %v4648_v9 = vadd.f32 %v4367_v6, %v4003_v5  ;;  %v13976_v10 = vpop.f32.mrf.mxu0  ;;  %v4819_v6 = vpack.c.bf16 %v4762_v61, %v4761_v60 }
 0x38a   : > { %v3727_v12 = vpop.f32.mrf.mxu1  ;;  %13950 = vmatmul.mubr.msk.bf16.gmra.mxu1 %vm938_vm3, %v3555_v8  ;;  %v14385_v10 = vld [vmem:[%s17337_s5 + $0xf0] ss:$8 sps:$4 sm:$0xff]  }
 0x38b   : > { %4706 = vst [vmem:[#allocation3 + $0x18] sm:$0xff] %v4648_v9  ;;  %v4004_v14 = vadd.f32 %v3946_v13, %v3727_v12  ;;  %v4372_v15 = vpop.f32.mrf.mxu0  ;;  %14074 = vmatmul.mubr.msk.bf16.gmra.mxu0 %vm938_vm3, %v4200_v11  ;;  %13953 = vmatprep.mubr.msk.bf16.mxu1 %vm14584_vm2, %v14583_v2  ;;  %v5464_v9 = vpack.c.bf16 %v5407_v1, %v5406_v0  ;;  %v14390_v11 = vld [vmem:[%s17337_s5 + $0x64] ss:$8 sps:$4 sm:$0xff]   ;;  %v3952_v13 = vld [vmem:[#allocation3 + $0x50] sm:$0xff] }
 0x38c   : > { %v13855_v16 = vpop.f32.mrf.mxu1  ;;  %14077 = vmatprep.mubr.msk.bf16.mxu0 %vm14584_vm2, %v14583_v2 }
 0x38d   : > { %v4649_v17 = vadd.f32 %v4372_v15, %v4004_v14  ;;  %v13979_v18 = vpop.f32.mrf.mxu0  ;;  %v14393_v14 = vld [vmem:[%s17337_s5 + $0xe4] ss:$8 sps:$4 sm:$0xff]  }
 0x38e   : > { %v3730_v21 = vpop.f32.mrf.mxu1 }
 0x38f   : > { %4707 = vst [vmem:[#allocation3 + $0x20] sm:$0xff] %v4649_v17  ;;  %v4005_v25 = vadd.f32 %v3947_v22, %v3730_v21  ;;  %v4375_v26 = vpop.f32.mrf.mxu0  ;;  %v14388_v17 = vld [vmem:[%s17337_s5 + $0x60] ss:$8 sps:$4 sm:$0xff]   ;;  %v4763_v22 = vld [vmem:[#allocation2 + $0x58] sm:$0xff] }
 0x390   : > { %v13856_v27 = vpop.f32.mrf.mxu1 }
 0x391   : > { %v4650_v29 = vadd.f32 %v4375_v26, %v4005_v25  ;;  %v13980_v30 = vpop.f32.mrf.mxu0  ;;  %v3953_v26 = vld [vmem:[#allocation3 + $0x58] sm:$0xff]  ;;  %v5409_v27 = vld [vmem:[#allocation2 + $0x61] sm:$0xff] }
 0x392   : > { %v3735_v32 = vpop.f32.mrf.mxu1  ;;  %13954 = vmatmul.mubr.msk.bf16.gmra.mxu1 %vm938_vm3, %v3556_v28  ;;  %v14399_v28 = vld [vmem:[%s17337_s5 + $0xd4] ss:$8 sps:$4 sm:$0xff]  }
 0x393   : > { %4708 = vst [vmem:[#allocation3 + $0x28] sm:$0xff] %v4650_v29  ;;  %v4006_v34 = vadd.f32 %v3948_v33, %v3735_v32  ;;  %v4380_v35 = vpop.f32.mrf.mxu0  ;;  %14078 = vmatmul.mubr.msk.bf16.gmra.mxu0 %vm938_vm3, %v4201_v31  ;;  %13957 = vmatprep.mubr.msk.bf16.mxu1 %vm14584_vm2, %v14583_v2  ;;  %v4820_v32 = vpack.c.bf16 %v4764_v23, %v4763_v22  ;;  %v5408_v33 = vld [vmem:[#allocation2 + $0x59] sm:$0xff] }
 0x394   : > { %v13859_v36 = vpop.f32.mrf.mxu1  ;;  %14081 = vmatprep.mubr.msk.bf16.mxu0 %vm14584_vm2, %v14583_v2  ;;  %v14412_v22 = vld [vmem:[%s17337_s5 + $0x20] ss:$8 sps:$4 sm:$0xff]  }
 0x395   : > { %v4651_v37 = vadd.f32 %v4380_v35, %v4006_v34  ;;  %v13983_v38 = vpop.f32.mrf.mxu0  ;;  %v14394_v34 = vld [vmem:[%s17337_s5 + $0x50] ss:$8 sps:$4 sm:$0xff]  }
 0x396   : > { %v3738_v41 = vpop.f32.mrf.mxu1  ;;  %v14397_v38 = vld [vmem:[%s17337_s5 + $0xd0] ss:$8 sps:$4 sm:$0xff]  }
 0x397   : > { %4709 = vst [vmem:[#allocation3 + $0x30] sm:$0xff] %v4651_v37  ;;  %v4007_v45 = vadd.f32 %v3949_v42, %v3738_v41  ;;  %v4383_v46 = vpop.f32.mrf.mxu0  ;;  %v5465_v37 = vpack.c.bf16 %v5409_v27, %v5408_v33  ;;  %v3954_v41 = vld [vmem:[#allocation3 + $0x60] sm:$0xff]  ;;  %v4769_v33 = vld [vmem:[#allocation2 + $0x88] sm:$0xff] }
 0x398   : > { %v13860_v47 = vpop.f32.mrf.mxu1  ;;  %v14405_v42 = vld [vmem:[%s17337_s5 + $0xc4] ss:$8 sps:$4 sm:$0xff]  }
 0x399   : > { %v4652_v49 = vadd.f32 %v4383_v46, %v4007_v45  ;;  %v13984_v51 = vpop.f32.mrf.mxu0  ;;  %v4765_v46 = vld [vmem:[#allocation2 + $0x68] sm:$0xff]  ;;  %v4766_v47 = vld [vmem:[#allocation2 + $0x70] sm:$0xff]  ;;  %v3958_v27 = vld [vmem:[#allocation3 + $0x80] sm:$0xff] }
 0x39a   : > { %v3743_v53 = vpop.f32.mrf.mxu1  ;;  %13958 = vmatmul.mubr.msk.bf16.gmra.mxu1 %vm938_vm3, %v3557_v48  ;;  %v14400_v48 = vld [vmem:[%s17337_s5 + $0x40] ss:$8 sps:$4 sm:$0xff]  }
 0x39b   : > { %4710 = vst [vmem:[#allocation3 + $0x38] sm:$0xff] %v4652_v49  ;;  %v4008_v55 = vadd.f32 %v3950_v54, %v3743_v53  ;;  %v4388_v56 = vpop.f32.mrf.mxu0  ;;  %14082 = vmatmul.mubr.msk.bf16.gmra.mxu0 %vm938_vm3, %v4202_v52  ;;  %14093 = vmatprep.mubr.msk.bf16.mxu1 %vm14584_vm2, %v14583_v2  ;;  %v5410_v52 = vld [vmem:[#allocation2 + $0x69] sm:$0xff]  ;;  %v14408_v54 = vld [vmem:[%s17337_s5 + $0x34] ss:$8 sps:$4 sm:$0xff]  }
 0x39c   : > { %v13863_v57 = vpop.f32.mrf.mxu1  ;;  %14217 = vmatprep.mubr.msk.bf16.mxu0 %vm14584_vm2, %v14583_v2  ;;  %v14403_v53 = vld [vmem:[%s17337_s5 + $0xc0] ss:$8 sps:$4 sm:$0xff]  }
 0x39d   : > { %v4653_v58 = vadd.f32 %v4388_v56, %v4008_v55  ;;  %v13987_v59 = vpop.f32.mrf.mxu0  ;;  %v3955_v56 = vld [vmem:[#allocation3 + $0x68] sm:$0xff]  ;;  %v5411_v57 = vld [vmem:[#allocation2 + $0x71] sm:$0xff] }
 0x39e   : > { %v3746_v62 = vpop.f32.mrf.mxu1 }
 0x39f   : > { %4711 = vst [vmem:[#allocation3 + $0x40] sm:$0xff] %v4653_v58  ;;  %v4009_v3 = vadd.f32 %v3951_v63, %v3746_v62  ;;  %v4391_v4 = vpop.f32.mrf.mxu0  ;;  %v14411_v58 = vld [vmem:[%s17337_s5 + $0xb4] ss:$8 sps:$4 sm:$0xff]   ;;  %v4821_v62 = vpack.c.bf16 %v4766_v47, %v4765_v46  ;;  %v14406_v63 = vld [vmem:[%s17337_s5 + $0x30] ss:$8 sps:$4 sm:$0xff]  }
 0x3a0   : > { %v13864_v5 = vpop.f32.mrf.mxu1 }
 0x3a1   : > { %v4654_v7 = vadd.f32 %v4391_v4, %v4009_v3  ;;  %v13988_v8 = vpop.f32.mrf.mxu0  ;;  %v5466_v3 = vpack.c.bf16 %v5411_v57, %v5410_v52  ;;  %v14409_v4 = vld [vmem:[%s17337_s5 + $0xb0] ss:$8 sps:$4 sm:$0xff]   ;;  %v4772_v57 = vld [vmem:[#allocation2 + $0xa0] sm:$0xff] }
 0x3a2   : > { %v3751_v12 = vpop.f32.mrf.mxu1  ;;  %14094 = vmatmul.mubr.msk.bf16.vlgmr.msra.gmra.mxu1 %vm938_vm3, %v4819_v6  ;;  %v3956_v5 = vld [vmem:[#allocation3 + $0x70] sm:$0xff] }
 0x3a3   : > { %4712 = vst [vmem:[#allocation3 + $0x48] sm:$0xff] %v4654_v7  ;;  %v4010_v15 = vadd.f32 %v3952_v13, %v3751_v12  ;;  %v4396_v16 = vpop.f32.mrf.mxu0  ;;  %14218 = vmatmul.mubr.msk.bf16.vlgmr.msra.gmra.mxu0 %vm938_vm3, %v5464_v9  ;;  %6517 = vmatpush1.bf16.msra.mxu1 %v14382_v50  ;;  %v4768_v12 = vld [vmem:[#allocation2 + $0x80] sm:$0xff] }
 0x3a4   : > { %v13867_v18 = vpop.f32.mrf.mxu1  ;;  %14097 = vmatprep.mubr.msk.bf16.mxu1 %vm14584_vm2, %v14583_v2  ;;  %14221 = vmatprep.mubr.msk.bf16.mxu0 %vm14584_vm2, %v14583_v2 }
 0x3a5   : > { %v4655_v20 = vadd.f32 %v4396_v16, %v4010_v15  ;;  %v13991_v21 = vpop.f32.mrf.mxu0  ;;  %7054 = vmatpush1.bf16.msra.mxu0 %v14385_v10  ;;  %6518 = vmatprep.subr.bf16.mxu1 %v14390_v11  ;;  %v4767_v11 = vld [vmem:[#allocation2 + $0x78] sm:$0xff]  ;;  %v5413_v16 = vld [vmem:[#allocation2 + $0x81] sm:$0xff] }
 0x3a6   : > { %v3754_v25 = vpop.f32.mrf.mxu1  ;;  %7055 = vmatprep.subr.bf16.mxu0 %v14393_v14  ;;  %v3957_v14 = vld [vmem:[#allocation3 + $0x78] sm:$0xff]  ;;  %v4822_v21 = vpack.c.bf16 %v4768_v12, %v4767_v11  ;;  %v4773_v12 = vld [vmem:[#allocation2 + $0xa8] sm:$0xff] }
 0x3a7   : > { %4713 = vst [vmem:[#allocation3 + $0x50] sm:$0xff] %v4655_v20  ;;  %v4011_v29 = vadd.f32 %v3953_v26, %v3754_v25  ;;  %v4399_v30 = vpop.f32.mrf.mxu0  ;;  %6519 = vmatpush1.bf16.msra.mxu1 %v14388_v17  ;;  %v5412_v15 = vld [vmem:[#allocation2 + $0x79] sm:$0xff] }
 0x3a8   : > { %v13868_v31 = vpop.f32.mrf.mxu1  ;;  %6520 = vmatprep.subr.bf16.mxu1 %v14396_v19  ;;  %v14414_v19 = vld [vmem:[%s17337_s5 + $0x24] ss:$8 sps:$4 sm:$0xff]   ;;  %v5467_v25 = vpack.c.bf16 %v5413_v16, %v5412_v15 }
 0x3a9   : > { %v4656_v35 = vadd.f32 %v4399_v30, %v4011_v29  ;;  %v13992_v36 = vpop.f32.mrf.mxu0  ;;  %7056 = vmatpush1.bf16.msra.mxu0 %v14391_v24  ;;  %v3963_v15 = vld [vmem:[#allocation3 + $0xa8] sm:$0xff] }
 0x3aa   : > { %v3759_v40 = vpop.f32.mrf.mxu1  ;;  %14098 = vmatmul.mubr.msk.bf16.gmra.mxu1 %vm938_vm3, %v4820_v32  ;;  %7057 = vmatprep.subr.bf16.mxu0 %v14399_v28  ;;  %v3959_v36 = vld [vmem:[#allocation3 + $0x88] sm:$0xff] }
 0x3ab   : > { %4714 = vst [vmem:[#allocation3 + $0x58] sm:$0xff] %v4656_v35  ;;  %v4012_v43 = vadd.f32 %v3954_v41, %v3759_v40  ;;  %v4404_v44 = vpop.f32.mrf.mxu0  ;;  %14222 = vmatmul.mubr.msk.bf16.gmra.mxu0 %vm938_vm3, %v5465_v37  ;;  %14101 = vmatprep.mubr.msk.bf16.mxu1 %vm14584_vm2, %v14583_v2  ;;  %v5414_v37 = vld [vmem:[#allocation2 + $0x89] sm:$0xff] }
 0x3ac   : > { %v13871_v45 = vpop.f32.mrf.mxu1  ;;  %14225 = vmatprep.mubr.msk.bf16.mxu0 %vm14584_vm2, %v14583_v2  ;;  %6521 = vmatpush1.bf16.msra.mxu1 %v14394_v34  ;;  %v4770_v34 = vld [vmem:[#allocation2 + $0x90] sm:$0xff]  ;;  %v14415_v41 = vld [vmem:[%s17337_s5 + $0xa0] ss:$8 sps:$4 sm:$0xff]  }
 0x3ad   : > { %v4657_v49 = vadd.f32 %v4404_v44, %v4012_v43  ;;  %v13995_v51 = vpop.f32.mrf.mxu0  ;;  %7058 = vmatpush1.bf16.msra.mxu0 %v14397_v38  ;;  %6522 = vmatprep.subr.bf16.mxu1 %v14402_v39  ;;  %v5415_v38 = vld [vmem:[#allocation2 + $0x91] sm:$0xff]  ;;  %v4823_v44 = vpack.c.bf16 %v4770_v34, %v4769_v33  ;;  %v5418_v16 = vld [vmem:[#allocation2 + $0xa9] sm:$0xff] }
 0x3ae   : > { %v3762_v55 = vpop.f32.mrf.mxu1  ;;  %7059 = vmatprep.subr.bf16.mxu0 %v14405_v42  ;;  %v14417_v42 = vld [vmem:[%s17337_s5 + $0xa4] ss:$8 sps:$4 sm:$0xff]   ;;  %v5468_v47 = vpack.c.bf16 %v5415_v38, %v5414_v37  ;;  %v4775_v34 = vld [vmem:[#allocation2 + $0xb8] sm:$0xff] }
 0x3af   : > { %4715 = vst [vmem:[#allocation3 + $0x60] sm:$0xff] %v4657_v49  ;;  %v4013_v59 = vadd.f32 %v3955_v56, %v3762_v55  ;;  %v4407_v60 = vpop.f32.mrf.mxu0  ;;  %v3960_v49 = vld [vmem:[#allocation3 + $0x90] sm:$0xff]  ;;  %v4771_v56 = vld [vmem:[#allocation2 + $0x98] sm:$0xff] }
 0x3b0   : > { %v13872_v61 = vpop.f32.mrf.mxu1  ;;  %6523 = vmatpush1.bf16.msra.mxu1 %v14400_v48  ;;  %v3965_v37 = vld [vmem:[#allocation3 + $0xb8] sm:$0xff] }
 0x3b1   : > { %v4658_v0 = vadd.f32 %v4407_v60, %v4013_v59  ;;  %v13996_v1 = vpop.f32.mrf.mxu0  ;;  %7060 = vmatpush1.bf16.msra.mxu0 %v14403_v53  ;;  %6524 = vmatprep.subr.bf16.mxu1 %v14408_v54  ;;  %v3961_v59 = vld [vmem:[#allocation3 + $0x98] sm:$0xff]  ;;  %v5417_v61 = vld [vmem:[#allocation2 + $0xa1] sm:$0xff] }
 0x3b2   : > { %v3767_v50 = vpop.f32.mrf.mxu1  ;;  %14102 = vmatmul.mubr.msk.bf16.gmra.mxu1 %vm938_vm3, %v4821_v62  ;;  %7061 = vmatprep.subr.bf16.mxu0 %v14411_v58  ;;  %v5416_v60 = vld [vmem:[#allocation2 + $0x99] sm:$0xff]  ;;  %v4824_v1 = vpack.c.bf16 %v4772_v57, %v4771_v56  ;;  %v4778_v56 = vld [vmem:[#allocation2 + $0xd0] sm:$0xff] }
 0x3b3   : > { %4716 = vst [vmem:[#allocation3 + $0x68] sm:$0xff] %v4658_v0  ;;  %v4014_v6 = vadd.f32 %v3956_v5, %v3767_v50  ;;  %v4412_v7 = vpop.f32.mrf.mxu0  ;;  %14226 = vmatmul.mubr.msk.bf16.gmra.mxu0 %vm938_vm3, %v5466_v3  ;;  %14105 = vmatprep.mubr.msk.bf16.mxu1 %vm14584_vm2, %v14583_v2  ;;  %v5469_v50 = vpack.c.bf16 %v5417_v61, %v5416_v60  ;;  %v5420_v38 = vld [vmem:[#allocation2 + $0xb9] sm:$0xff]  ;;  %v5423_v60 = vld [vmem:[#allocation2 + $0xd1] sm:$0xff] }
 0x3b4   : > { %v13875_v8 = vpop.f32.mrf.mxu1  ;;  %14229 = vmatprep.mubr.msk.bf16.mxu0 %vm14584_vm2, %v14583_v2  ;;  %6525 = vmatpush1.bf16.msra.mxu1 %v14406_v63 }
 0x3b5   : > { %v4659_v9 = vadd.f32 %v4412_v7, %v4014_v6  ;;  %v13999_v10 = vpop.f32.mrf.mxu0  ;;  %7062 = vmatpush1.bf16.msra.mxu0 %v14409_v4  ;;  %6526 = vmatprep.subr.bf16.mxu1 %v14414_v19  ;;  %v3962_v6 = vld [vmem:[#allocation3 + $0xa0] sm:$0xff] }
 0x3b6   : > { %v3770_v13 = vpop.f32.mrf.mxu1  ;;  %7063 = vmatprep.subr.bf16.mxu0 %v14417_v42 }
 0x3b7   : > { %4717 = vst [vmem:[#allocation3 + $0x70] sm:$0xff] %v4659_v9  ;;  %v4015_v17 = vadd.f32 %v3957_v14, %v3770_v13  ;;  %v4415_v18 = vpop.f32.mrf.mxu0  ;;  %v4774_v13 = vld [vmem:[#allocation2 + $0xb0] sm:$0xff] }
 0x3b8   : > { %v13876_v20 = vpop.f32.mrf.mxu1  ;;  %6527 = vmatpush1.bf16.msra.mxu1 %v14412_v22 }
 0x3b9   : > { %v4660_v23 = vadd.f32 %v4415_v18, %v4015_v17  ;;  %v14000_v24 = vpop.f32.mrf.mxu0  ;;  %7064 = vmatpush1.bf16.msra.mxu0 %v14415_v41  ;;  %v5419_v17 = vld [vmem:[#allocation2 + $0xb1] sm:$0xff] }
 0x3ba   : > { %v3775_v26 = vpop.f32.mrf.mxu1  ;;  %14106 = vmatmul.mubr.msk.bf16.gmra.mxu1 %vm938_vm3, %v4822_v21  ;;  %v4825_v21 = vpack.c.bf16 %v4774_v13, %v4773_v12  ;;  %v5470_v24 = vpack.c.bf16 %v5419_v17, %v5418_v16  ;;  %v4779_v13 = vld [vmem:[#allocation2 + $0xd8] sm:$0xff] }
 0x3bb   : > { %4718 = vst [vmem:[#allocation3 + $0x78] sm:$0xff] %v4660_v23  ;;  %v4016_v28 = vadd.f32 %v3958_v27, %v3775_v26  ;;  %v4420_v29 = vpop.f32.mrf.mxu0  ;;  %14230 = vmatmul.mubr.msk.bf16.gmra.mxu0 %vm938_vm3, %v5467_v25  ;;  %14109 = vmatprep.mubr.msk.bf16.mxu1 %vm14584_vm2, %v14583_v2  ;;  %v3964_v26 = vld [vmem:[#allocation3 + $0xb0] sm:$0xff]  ;;  %v3969_v16 = vld [vmem:[#allocation3 + $0xd8] sm:$0xff] }
 0x3bc   : > { %v13879_v30 = vpop.f32.mrf.mxu1  ;;  %14233 = vmatprep.mubr.msk.bf16.mxu0 %vm14584_vm2, %v14583_v2  ;;  %v5424_v17 = vld [vmem:[#allocation2 + $0xd9] sm:$0xff] }
 0x3bd   : > { %v4661_v31 = vadd.f32 %v4420_v29, %v4016_v28  ;;  %v14003_v32 = vpop.f32.mrf.mxu0  ;;  %v14418_v29 = vld [vmem:[%s17337_s5 + $0x10] ss:$8 sps:$4 sm:$0xff]   ;;  %v14420_v30 = vld [vmem:[%s17337_s5 + $0x14] ss:$8 sps:$4 sm:$0xff]  }
 0x3be   : > { %v3778_v35 = vpop.f32.mrf.mxu1  ;;  %6528 = vmatprep.subr.bf16.mxu1 %v14420_v30 }
 0x3bf   : > { %4719 = vst [vmem:[#allocation3 + $0x80] sm:$0xff] %v4661_v31  ;;  %v4017_v39 = vadd.f32 %v3959_v36, %v3778_v35  ;;  %v4423_v40 = vpop.f32.mrf.mxu0  ;;  %v4776_v35 = vld [vmem:[#allocation2 + $0xc0] sm:$0xff]  ;;  %6529 = vmatpush1.bf16.msra.mxu1 %v14418_v29 }
 0x3c0   : > { %v13880_v43 = vpop.f32.mrf.mxu1 }
 0x3c1   : > { %v4662_v45 = vadd.f32 %v4423_v40, %v4017_v39  ;;  %v14004_v46 = vpop.f32.mrf.mxu0  ;;  %v5421_v39 = vld [vmem:[#allocation2 + $0xc1] sm:$0xff]  ;;  %v4826_v43 = vpack.c.bf16 %v4776_v35, %v4775_v34  ;;  %v4782_v34 = vld [vmem:[#allocation2 + $0xf0] sm:$0xff] }
 0x3c2   : > { %v3783_v48 = vpop.f32.mrf.mxu1  ;;  %14110 = vmatmul.mubr.msk.bf16.gmra.mxu1 %vm938_vm3, %v4823_v44  ;;  %v5471_v46 = vpack.c.bf16 %v5421_v39, %v5420_v38  ;;  %v5427_v38 = vld [vmem:[#allocation2 + $0xf1] sm:$0xff] }
 0x3c3   : > { %4720 = vst [vmem:[#allocation3 + $0x88] sm:$0xff] %v4662_v45  ;;  %v4018_v51 = vadd.f32 %v3960_v49, %v3783_v48  ;;  %v4428_v52 = vpop.f32.mrf.mxu0  ;;  %14234 = vmatmul.mubr.msk.bf16.gmra.mxu0 %vm938_vm3, %v5468_v47  ;;  %14113 = vmatprep.mubr.msk.bf16.mxu1 %vm14584_vm2, %v14583_v2  ;;  %v3966_v48 = vld [vmem:[#allocation3 + $0xc0] sm:$0xff] }
 0x3c4   : > { %v13883_v53 = vpop.f32.mrf.mxu1  ;;  %14237 = vmatprep.mubr.msk.bf16.mxu0 %vm14584_vm2, %v14583_v2 }
 0x3c5   : > { %v4663_v54 = vadd.f32 %v4428_v52, %v4018_v51  ;;  %v14007_v55 = vpop.f32.mrf.mxu0 }
 0x3c6   : > { %v3786_v58 = vpop.f32.mrf.mxu1  ;;  %v4777_v55 = vld [vmem:[#allocation2 + $0xc8] sm:$0xff] }
 0x3c7   : > { %4721 = vst [vmem:[#allocation3 + $0x90] sm:$0xff] %v4663_v54  ;;  %v4019_v62 = vadd.f32 %v3961_v59, %v3786_v58  ;;  %v4431_v63 = vpop.f32.mrf.mxu0  ;;  %v3967_v58 = vld [vmem:[#allocation3 + $0xc8] sm:$0xff] }
 0x3c8   : > { %v13884_v0 = vpop.f32.mrf.mxu1  ;;  %v5422_v59 = vld [vmem:[#allocation2 + $0xc9] sm:$0xff] }
 0x3c9   : > { %v4664_v3 = vadd.f32 %v4431_v63, %v4019_v62  ;;  %v14008_v4 = vpop.f32.mrf.mxu0  ;;  %v14421_v63 = vld [vmem:[%s17337_s5 + $0x90] ss:$8 sps:$4 sm:$0xff]   ;;  %v14423_v0 = vld [vmem:[%s17337_s5 + $0x94] ss:$8 sps:$4 sm:$0xff]  }
 0x3ca   : > { %v3791_v5 = vpop.f32.mrf.mxu1  ;;  %14114 = vmatmul.mubr.msk.bf16.gmra.mxu1 %vm938_vm3, %v4824_v1  ;;  %7065 = vmatprep.subr.bf16.mxu0 %v14423_v0 }
 0x3cb   : > { %4722 = vst [vmem:[#allocation3 + $0x98] sm:$0xff] %v4664_v3  ;;  %v4020_v7 = vadd.f32 %v3962_v6, %v3791_v5  ;;  %v4436_v8 = vpop.f32.mrf.mxu0  ;;  %14238 = vmatmul.mubr.msk.bf16.gmra.mxu0 %vm938_vm3, %v5469_v50  ;;  %14117 = vmatprep.mubr.msk.bf16.mxu1 %vm14584_vm2, %v14583_v2  ;;  %v4827_v3 = vpack.c.bf16 %v4778_v56, %v4777_v55  ;;  %v4784_v55 = vld [vmem:[#allocation2 + $0x100] sm:$0xff] }
 0x3cc   : > { %v13887_v9 = vpop.f32.mrf.mxu1  ;;  %14241 = vmatprep.mubr.msk.bf16.mxu0 %vm14584_vm2, %v14583_v2  ;;  %v5472_v5 = vpack.c.bf16 %v5423_v60, %v5422_v59  ;;  %7066 = vmatpush1.bf16.msra.mxu0 %v14421_v63  ;;  %v14424_v56 = vld [vmem:[%s17337_s5] ss:$8 sps:$4 sm:$0xff]   ;;  %v3973_v59 = vld [vmem:[#allocation3 + $0xf8] sm:$0xff] }
 0x3cd   : > { %v4665_v10 = vadd.f32 %v4436_v8, %v4020_v7  ;;  %v14011_v11 = vpop.f32.mrf.mxu0  ;;  %v3968_v7 = vld [vmem:[#allocation3 + $0xd0] sm:$0xff]  ;;  %v5428_v60 = vld [vmem:[#allocation2 + $0xf9] sm:$0xff] }
 0x3ce   : > { %v3794_v14 = vpop.f32.mrf.mxu1 }
 0x3cf   : > { %4723 = vst [vmem:[#allocation3 + $0xa0] sm:$0xff] %v4665_v10  ;;  %v4021_v18 = vadd.f32 %v3963_v15, %v3794_v14  ;;  %v4439_v19 = vpop.f32.mrf.mxu0  ;;  %v4780_v14 = vld [vmem:[#allocation2 + $0xe0] sm:$0xff] }
 0x3d0   : > { %v13888_v20 = vpop.f32.mrf.mxu1 }
 0x3d1   : > { %v4666_v22 = vadd.f32 %v4439_v19, %v4021_v18  ;;  %v14012_v23 = vpop.f32.mrf.mxu0  ;;  %v5425_v18 = vld [vmem:[#allocation2 + $0xe1] sm:$0xff] }
 0x3d2   : > { %v3799_v25 = vpop.f32.mrf.mxu1  ;;  %14118 = vmatmul.mubr.msk.bf16.gmra.mxu1 %vm938_vm3, %v4825_v21 }
 0x3d3   : > { %4724 = vst [vmem:[#allocation3 + $0xa8] sm:$0xff] %v4666_v22  ;;  %v4022_v27 = vadd.f32 %v3964_v26, %v3799_v25  ;;  %v4444_v28 = vpop.f32.mrf.mxu0  ;;  %14242 = vmatmul.mubr.msk.bf16.gmra.mxu0 %vm938_vm3, %v5470_v24  ;;  %14121 = vmatprep.mubr.msk.bf16.mxu1 %vm14584_vm2, %v14583_v2  ;;  %v4828_v22 = vpack.c.bf16 %v4780_v14, %v4779_v13  ;;  %v4786_v13 = vld [vmem:[#allocation2 + $0x110] sm:$0xff] }
 0x3d4   : > { %v13891_v31 = vpop.f32.mrf.mxu1  ;;  %14245 = vmatprep.mubr.msk.bf16.mxu0 %vm14584_vm2, %v14583_v2  ;;  %v5473_v25 = vpack.c.bf16 %v5425_v18, %v5424_v17  ;;  %v5431_v17 = vld [vmem:[#allocation2 + $0x111] sm:$0xff] }
 0x3d5   : > { %v4667_v32 = vadd.f32 %v4444_v28, %v4022_v27  ;;  %v14015_v33 = vpop.f32.mrf.mxu0  ;;  %v3970_v27 = vld [vmem:[#allocation3 + $0xe0] sm:$0xff] }
 0x3d6   : > { %v3802_v36 = vpop.f32.mrf.mxu1  ;;  %v4781_v33 = vld [vmem:[#allocation2 + $0xe8] sm:$0xff] }
 0x3d7   : > { %4725 = vst [vmem:[#allocation3 + $0xb0] sm:$0xff] %v4667_v32  ;;  %v4023_v40 = vadd.f32 %v3965_v37, %v3802_v36  ;;  %v4447_v41 = vpop.f32.mrf.mxu0  ;;  %v3971_v36 = vld [vmem:[#allocation3 + $0xe8] sm:$0xff] }
 0x3d8   : > { %v13892_v42 = vpop.f32.mrf.mxu1  ;;  %v5426_v37 = vld [vmem:[#allocation2 + $0xe9] sm:$0xff] }
 0x3d9   : > { %v4668_v44 = vadd.f32 %v4447_v41, %v4023_v40  ;;  %v14016_v45 = vpop.f32.mrf.mxu0  ;;  %v4829_v42 = vpack.c.bf16 %v4782_v34, %v4781_v33  ;;  %v4787_v34 = vld [vmem:[#allocation2 + $0x118] sm:$0xff] }
 0x3da   : > { %v3807_v47 = vpop.f32.mrf.mxu1  ;;  %14122 = vmatmul.mubr.msk.bf16.gmra.mxu1 %vm938_vm3, %v4826_v43  ;;  %v5474_v45 = vpack.c.bf16 %v5427_v38, %v5426_v37  ;;  %v3977_v37 = vld [vmem:[#allocation3 + $0x118] sm:$0xff] }
 0x3db   : > { %4726 = vst [vmem:[#allocation3 + $0xb8] sm:$0xff] %v4668_v44  ;;  %v4024_v49 = vadd.f32 %v3966_v48, %v3807_v47  ;;  %v4452_v51 = vpop.f32.mrf.mxu0  ;;  %14246 = vmatmul.mubr.msk.bf16.gmra.mxu0 %vm938_vm3, %v5471_v46  ;;  %14125 = vmatprep.mubr.msk.bf16.mxu1 %vm14584_vm2, %v14583_v2  ;;  %v3972_v47 = vld [vmem:[#allocation3 + $0xf0] sm:$0xff]  ;;  %v5432_v38 = vld [vmem:[#allocation2 + $0x119] sm:$0xff] }
 0x3dc   : > { %v13895_v52 = vpop.f32.mrf.mxu1  ;;  %14249 = vmatprep.mubr.msk.bf16.mxu0 %vm14584_vm2, %v14583_v2 }
 0x3dd   : > { %v4669_v53 = vadd.f32 %v4452_v51, %v4024_v49  ;;  %v14019_v54 = vpop.f32.mrf.mxu0  ;;  %v4783_v52 = vld [vmem:[#allocation2 + $0xf8] sm:$0xff] }
 0x3de   : > { %v3810_v57 = vpop.f32.mrf.mxu1 }
 0x3df   : > { %4727 = vst [vmem:[#allocation3 + $0xc0] sm:$0xff] %v4669_v53  ;;  %v4025_v61 = vadd.f32 %v3967_v58, %v3810_v57  ;;  %v4455_v62 = vpop.f32.mrf.mxu0  ;;  %v14426_v57 = vld [vmem:[%s17337_s5 + $0x4] ss:$8 sps:$4 sm:$0xff]  }
 0x3e0   : > { %v13896_v1 = vpop.f32.mrf.mxu1  ;;  %6530 = vmatprep.subr.bf16.mxu1 %v14426_v57 }
 0x3e1   : > { %v4670_v4 = vadd.f32 %v4455_v62, %v4025_v61  ;;  %v14020_v50 = vpop.f32.mrf.mxu0  ;;  %v5429_v61 = vld [vmem:[#allocation2 + $0x101] sm:$0xff]  ;;  %v4830_v1 = vpack.c.bf16 %v4784_v55, %v4783_v52  ;;  %6531 = vmatpush1.bf16.msra.mxu1 %v14424_v56  ;;  %v4790_v56 = vld [vmem:[#allocation2 + $0x130] sm:$0xff] }
 0x3e2   : > { %v3815_v6 = vpop.f32.mrf.mxu1  ;;  %14126 = vmatmul.mubr.msk.bf16.gmra.mxu1 %vm938_vm3, %v4827_v3  ;;  %v5475_v50 = vpack.c.bf16 %v5429_v61, %v5428_v60  ;;  %v4789_v55 = vld [vmem:[#allocation2 + $0x128] sm:$0xff]  ;;  %v5435_v60 = vld [vmem:[#allocation2 + $0x131] sm:$0xff] }
 0x3e3   : > { %4728 = vst [vmem:[#allocation3 + $0xc8] sm:$0xff] %v4670_v4  ;;  %v4026_v8 = vadd.f32 %v3968_v7, %v3815_v6  ;;  %v4460_v9 = vpop.f32.mrf.mxu0  ;;  %14250 = vmatmul.mubr.msk.bf16.gmra.mxu0 %vm938_vm3, %v5472_v5  ;;  %14129 = vmatprep.mubr.msk.bf16.mxu1 %vm14584_vm2, %v14583_v2  ;;  %v3974_v6 = vld [vmem:[#allocation3 + $0x100] sm:$0xff] }
 0x3e4   : > { %v13899_v10 = vpop.f32.mrf.mxu1  ;;  %14253 = vmatprep.mubr.msk.bf16.mxu0 %vm14584_vm2, %v14583_v2 }
 0x3e5   : > { %v4671_v11 = vadd.f32 %v4460_v9, %v4026_v8  ;;  %v14023_v12 = vpop.f32.mrf.mxu0 }
 0x3e6   : > { %v3818_v15 = vpop.f32.mrf.mxu1  ;;  %v4785_v12 = vld [vmem:[#allocation2 + $0x108] sm:$0xff] }
 0x3e7   : > { %4729 = vst [vmem:[#allocation3 + $0xd0] sm:$0xff] %v4671_v11  ;;  %v4027_v19 = vadd.f32 %v3969_v16, %v3818_v15  ;;  %v4463_v20 = vpop.f32.mrf.mxu0  ;;  %v3975_v15 = vld [vmem:[#allocation3 + $0x108] sm:$0xff] }
 0x3e8   : > { %v13900_v21 = vpop.f32.mrf.mxu1  ;;  %v5430_v16 = vld [vmem:[#allocation2 + $0x109] sm:$0xff] }
 0x3e9   : > { %v4672_v23 = vadd.f32 %v4463_v20, %v4027_v19  ;;  %v14024_v24 = vpop.f32.mrf.mxu0  ;;  %v4831_v21 = vpack.c.bf16 %v4786_v13, %v4785_v12  ;;  %v4792_v12 = vld [vmem:[#allocation2 + $0x140] sm:$0xff]  ;;  %v14432_v13 = vld [vmem:[%s17337_s5 + $0x174] ss:$8 sps:$4 sm:$0xff]  }
 0x3ea   : > { %v3823_v26 = vpop.f32.mrf.mxu1  ;;  %14130 = vmatmul.mubr.msk.bf16.gmra.mxu1 %vm938_vm3, %v4828_v22  ;;  %v5476_v24 = vpack.c.bf16 %v5431_v17, %v5430_v16  ;;  %v5436_v16 = vld [vmem:[#allocation2 + $0x139] sm:$0xff]  ;;  %v5437_v17 = vld [vmem:[#allocation2 + $0x141] sm:$0xff]  ;;  %7782 = vmatprep.subr.bf16.mxu1 %v14432_v13 }
 0x3eb   : > { %4730 = vst [vmem:[#allocation3 + $0xd8] sm:$0xff] %v4672_v23  ;;  %v4028_v28 = vadd.f32 %v3970_v27, %v3823_v26  ;;  %v4468_v29 = vpop.f32.mrf.mxu0  ;;  %14254 = vmatmul.mubr.msk.bf16.gmra.mxu0 %vm938_vm3, %v5473_v25  ;;  %14133 = vmatprep.mubr.msk.bf16.mxu1 %vm14584_vm2, %v14583_v2  ;;  %v14427_v25 = vld [vmem:[%s17337_s5 + $0x80] ss:$8 sps:$4 sm:$0xff]   ;;  %v14429_v26 = vld [vmem:[%s17337_s5 + $0x84] ss:$8 sps:$4 sm:$0xff]  }
 0x3ec   : > { %v13903_v30 = vpop.f32.mrf.mxu1  ;;  %14257 = vmatprep.mubr.msk.bf16.mxu0 %vm14584_vm2, %v14583_v2  ;;  %7067 = vmatprep.subr.bf16.mxu0 %v14429_v26  ;;  %v3982_v26 = vld [vmem:[#allocation3 + $0x140] sm:$0xff]  ;;  %v3987_v13 = vld [vmem:[#allocation3 + $0x168] sm:$0xff] }
 0x3ed   : > { %v4673_v31 = vadd.f32 %v4468_v29, %v4028_v28  ;;  %v14027_v32 = vpop.f32.mrf.mxu0  ;;  %v3976_v28 = vld [vmem:[#allocation3 + $0x110] sm:$0xff]  ;;  %7068 = vmatpush1.bf16.msra.mxu0 %v14427_v25 }
 0x3ee   : > { %v3826_v35 = vpop.f32.mrf.mxu1 }
 0x3ef   : > { %4731 = vst [vmem:[#allocation3 + $0xe0] sm:$0xff] %v4673_v31  ;;  %v4029_v39 = vadd.f32 %v3971_v36, %v3826_v35  ;;  %v4471_v40 = vpop.f32.mrf.mxu0  ;;  %v4788_v35 = vld [vmem:[#allocation2 + $0x120] sm:$0xff] }
 0x3f0   : > { %v13904_v41 = vpop.f32.mrf.mxu1 }
 0x3f1   : > { %v4674_v43 = vadd.f32 %v4471_v40, %v4029_v39  ;;  %v14028_v44 = vpop.f32.mrf.mxu0  ;;  %v5433_v39 = vld [vmem:[#allocation2 + $0x121] sm:$0xff] }
 0x3f2   : > { %v3831_v46 = vpop.f32.mrf.mxu1  ;;  %14134 = vmatmul.mubr.msk.bf16.gmra.mxu1 %vm938_vm3, %v4829_v42 }
 0x3f3   : > { %4732 = vst [vmem:[#allocation3 + $0xe8] sm:$0xff] %v4674_v43  ;;  %v4030_v48 = vadd.f32 %v3972_v47, %v3831_v46  ;;  %v4476_v49 = vpop.f32.mrf.mxu0  ;;  %14258 = vmatmul.mubr.msk.bf16.gmra.mxu0 %vm938_vm3, %v5474_v45  ;;  %14137 = vmatprep.mubr.msk.bf16.mxu1 %vm14584_vm2, %v14583_v2  ;;  %v4832_v43 = vpack.c.bf16 %v4788_v35, %v4787_v34  ;;  %v14435_v34 = vld [vmem:[%s17337_s5 + $0x1f4] ss:$8 sps:$4 sm:$0xff]  }
 0x3f4   : > { %v13907_v51 = vpop.f32.mrf.mxu1  ;;  %14261 = vmatprep.mubr.msk.bf16.mxu0 %vm14584_vm2, %v14583_v2  ;;  %v5477_v46 = vpack.c.bf16 %v5433_v39, %v5432_v38  ;;  %v5439_v38 = vld [vmem:[#allocation2 + $0x151] sm:$0xff]  ;;  %8511 = vmatprep.subr.bf16.mxu0 %v14435_v34  ;;  %v5444_v34 = vld [vmem:[#allocation2 + $0x179] sm:$0xff] }
 0x3f5   : > { %v4675_v53 = vadd.f32 %v4476_v49, %v4030_v48  ;;  %v14031_v54 = vpop.f32.mrf.mxu0  ;;  %v3978_v48 = vld [vmem:[#allocation3 + $0x120] sm:$0xff] }
 0x3f6   : > { %v3834_v58 = vpop.f32.mrf.mxu1 }
 0x3f7   : > { %4733 = vst [vmem:[#allocation3 + $0xf0] sm:$0xff] %v4675_v53  ;;  %v4031_v62 = vadd.f32 %v3973_v59, %v3834_v58  ;;  %v4479_v63 = vpop.f32.mrf.mxu0  ;;  %v3979_v58 = vld [vmem:[#allocation3 + $0x128] sm:$0xff] }
 0x3f8   : > { %v13908_v0 = vpop.f32.mrf.mxu1  ;;  %v5434_v59 = vld [vmem:[#allocation2 + $0x129] sm:$0xff] }
 0x3f9   : > { %v4676_v3 = vadd.f32 %v4479_v63, %v4031_v62  ;;  %v14032_v4 = vpop.f32.mrf.mxu0  ;;  %v4833_v0 = vpack.c.bf16 %v4790_v56, %v4789_v55  ;;  %v4796_v55 = vld [vmem:[#allocation2 + $0x160] sm:$0xff] }
 0x3fa   : > { %v3839_v5 = vpop.f32.mrf.mxu1  ;;  %14138 = vmatmul.mubr.msk.bf16.gmra.mxu1 %vm938_vm3, %v4830_v1  ;;  %v5478_v4 = vpack.c.bf16 %v5435_v60, %v5434_v59  ;;  %v5441_v59 = vld [vmem:[#allocation2 + $0x161] sm:$0xff] }
 0x3fb   : > { %4734 = vst [vmem:[#allocation3 + $0xf8] sm:$0xff] %v4676_v3  ;;  %v4032_v7 = vadd.f32 %v3974_v6, %v3839_v5  ;;  %v4484_v8 = vpop.f32.mrf.mxu0  ;;  %14262 = vmatmul.mubr.msk.bf16.gmra.mxu0 %vm938_vm3, %v5475_v50  ;;  %14141 = vmatprep.mubr.msk.bf16.mxu1 %vm14584_vm2, %v14583_v2  ;;  %v3980_v5 = vld [vmem:[#allocation3 + $0x130] sm:$0xff] }
 0x3fc   : > { %v13911_v9 = vpop.f32.mrf.mxu1  ;;  %14265 = vmatprep.mubr.msk.bf16.mxu0 %vm14584_vm2, %v14583_v2 }
 0x3fd   : > { %v4677_v10 = vadd.f32 %v4484_v8, %v4032_v7  ;;  %v14035_v11 = vpop.f32.mrf.mxu0 }
 0x3fe   : > { %v3842_v14 = vpop.f32.mrf.mxu1  ;;  %v4791_v11 = vld [vmem:[#allocation2 + $0x138] sm:$0xff] }
 0x3ff   : > { %4735 = vst [vmem:[#allocation3 + $0x100] sm:$0xff] %v4677_v10  ;;  %v4033_v18 = vadd.f32 %v3975_v15, %v3842_v14  ;;  %v4487_v19 = vpop.f32.mrf.mxu0  ;;  %v3981_v15 = vld [vmem:[#allocation3 + $0x138] sm:$0xff] }
 0x400   : > { %v13912_v20 = vpop.f32.mrf.mxu1 }
 0x401   : > { %v4678_v22 = vadd.f32 %v4487_v19, %v4033_v18  ;;  %v14036_v23 = vpop.f32.mrf.mxu0 }
 0x402   : > { %v3847_v27 = vpop.f32.mrf.mxu1  ;;  %14142 = vmatmul.mubr.msk.bf16.gmra.mxu1 %vm938_vm3, %v4831_v21  ;;  %v4834_v21 = vpack.c.bf16 %v4792_v12, %v4791_v11  ;;  %v4798_v11 = vld [vmem:[#allocation2 + $0x170] sm:$0xff] }
 0x403   : > { %4736 = vst [vmem:[#allocation3 + $0x108] sm:$0xff] %v4678_v22  ;;  %v4034_v29 = vadd.f32 %v3976_v28, %v3847_v27  ;;  %v4492_v30 = vpop.f32.mrf.mxu0  ;;  %14266 = vmatmul.mubr.msk.bf16.gmra.mxu0 %vm938_vm3, %v5476_v24  ;;  %14145 = vmatprep.mubr.msk.bf16.mxu1 %vm14584_vm2, %v14583_v2  ;;  %v5479_v24 = vpack.c.bf16 %v5437_v17, %v5436_v16 }
 0x404   : > { %v13915_v31 = vpop.f32.mrf.mxu1  ;;  %14269 = vmatprep.mubr.msk.bf16.mxu0 %vm14584_vm2, %v14583_v2 }
 0x405   : > { %v4679_v32 = vadd.f32 %v4492_v30, %v4034_v29  ;;  %v14039_v33 = vpop.f32.mrf.mxu0 }
 0x406   : > { %v3850_v36 = vpop.f32.mrf.mxu1  ;;  %v4794_v33 = vld [vmem:[#allocation2 + $0x150] sm:$0xff] }
 0x407   : > { %4737 = vst [vmem:[#allocation3 + $0x110] sm:$0xff] %v4679_v32  ;;  %v4035_v40 = vadd.f32 %v3977_v37, %v3850_v36  ;;  %v4495_v41 = vpop.f32.mrf.mxu0  ;;  %v4793_v32 = vld [vmem:[#allocation2 + $0x148] sm:$0xff] }
 0x408   : > { %v13916_v42 = vpop.f32.mrf.mxu1  ;;  %v3983_v36 = vld [vmem:[#allocation3 + $0x148] sm:$0xff] }
 0x409   : > { %v4680_v44 = vadd.f32 %v4495_v41, %v4035_v40  ;;  %v14040_v45 = vpop.f32.mrf.mxu0  ;;  %v5438_v37 = vld [vmem:[#allocation2 + $0x149] sm:$0xff]  ;;  %v4835_v42 = vpack.c.bf16 %v4794_v33, %v4793_v32  ;;  %v3989_v33 = vld [vmem:[#allocation3 + $0x178] sm:$0xff] }
 0x40a   : > { %v3855_v47 = vpop.f32.mrf.mxu1  ;;  %14146 = vmatmul.mubr.msk.bf16.gmra.mxu1 %vm938_vm3, %v4832_v43  ;;  %v5480_v45 = vpack.c.bf16 %v5439_v38, %v5438_v37 }
 0x40b   : > { %4738 = vst [vmem:[#allocation3 + $0x118] sm:$0xff] %v4680_v44  ;;  %v4036_v49 = vadd.f32 %v3978_v48, %v3855_v47  ;;  %v4500_v51 = vpop.f32.mrf.mxu0  ;;  %14270 = vmatmul.mubr.msk.bf16.gmra.mxu0 %vm938_vm3, %v5477_v46  ;;  %14149 = vmatprep.mubr.msk.bf16.mxu1 %vm14584_vm2, %v14583_v2  ;;  %v3984_v47 = vld [vmem:[#allocation3 + $0x150] sm:$0xff] }
 0x40c   : > { %v13919_v52 = vpop.f32.mrf.mxu1  ;;  %14273 = vmatprep.mubr.msk.bf16.mxu0 %vm14584_vm2, %v14583_v2 }
 0x40d   : > { %v4681_v53 = vadd.f32 %v4500_v51, %v4036_v49  ;;  %v14043_v54 = vpop.f32.mrf.mxu0 }
 0x40e   : > { %v3858_v57 = vpop.f32.mrf.mxu1  ;;  %v4795_v54 = vld [vmem:[#allocation2 + $0x158] sm:$0xff] }
 0x40f   : > { %4739 = vst [vmem:[#allocation3 + $0x120] sm:$0xff] %v4681_v53  ;;  %v4037_v61 = vadd.f32 %v3979_v58, %v3858_v57  ;;  %v4503_v62 = vpop.f32.mrf.mxu0  ;;  %v3985_v57 = vld [vmem:[#allocation3 + $0x158] sm:$0xff] }
 0x410   : > { %v13920_v63 = vpop.f32.mrf.mxu1  ;;  %v5440_v58 = vld [vmem:[#allocation2 + $0x159] sm:$0xff] }
 0x411   : > { %v4682_v1 = vadd.f32 %v4503_v62, %v4037_v61  ;;  %v14044_v3 = vpop.f32.mrf.mxu0  ;;  %v4836_v63 = vpack.c.bf16 %v4796_v55, %v4795_v54  ;;  %v3991_v54 = vld [vmem:[#allocation3 + $0x188] sm:$0xff] }
 0x412   : > { %v3863_v50 = vpop.f32.mrf.mxu1  ;;  %14150 = vmatmul.mubr.msk.bf16.gmra.mxu1 %vm938_vm3, %v4833_v0  ;;  %v5481_v3 = vpack.c.bf16 %v5441_v59, %v5440_v58  ;;  %v5446_v55 = vld [vmem:[#allocation2 + $0x189] sm:$0xff] }
 0x413   : > { %4740 = vst [vmem:[#allocation3 + $0x128] sm:$0xff] %v4682_v1  ;;  %v4038_v6 = vadd.f32 %v3980_v5, %v3863_v50  ;;  %v4508_v7 = vpop.f32.mrf.mxu0  ;;  %14274 = vmatmul.mubr.msk.bf16.gmra.mxu0 %vm938_vm3, %v5478_v4  ;;  %14153 = vmatprep.mubr.msk.bf16.mxu1 %vm14584_vm2, %v14583_v2  ;;  %v3986_v50 = vld [vmem:[#allocation3 + $0x160] sm:$0xff] }
 0x414   : > { %v13923_v8 = vpop.f32.mrf.mxu1  ;;  %14277 = vmatprep.mubr.msk.bf16.mxu0 %vm14584_vm2, %v14583_v2 }
 0x415   : > { %v4683_v9 = vadd.f32 %v4508_v7, %v4038_v6  ;;  %v14047_v10 = vpop.f32.mrf.mxu0 }
 0x416   : > { %v3866_v14 = vpop.f32.mrf.mxu1  ;;  %v4797_v10 = vld [vmem:[#allocation2 + $0x168] sm:$0xff] }
 0x417   : > { %4741 = vst [vmem:[#allocation3 + $0x130] sm:$0xff] %v4683_v9  ;;  %v4039_v18 = vadd.f32 %v3981_v15, %v3866_v14  ;;  %v4511_v19 = vpop.f32.mrf.mxu0  ;;  %v5442_v14 = vld [vmem:[#allocation2 + $0x169] sm:$0xff]  ;;  %v5443_v15 = vld [vmem:[#allocation2 + $0x171] sm:$0xff] }
 0x418   : > { %v13924_v20 = vpop.f32.mrf.mxu1 }
 0x419   : > { %v4684_v22 = vadd.f32 %v4511_v19, %v4039_v18  ;;  %v14048_v23 = vpop.f32.mrf.mxu0  ;;  %v4837_v19 = vpack.c.bf16 %v4798_v11, %v4797_v10  ;;  %v3993_v10 = vld [vmem:[#allocation3 + $0x198] sm:$0xff] }
 0x41a   : > { %v3871_v25 = vpop.f32.mrf.mxu1  ;;  %14154 = vmatmul.mubr.msk.bf16.gmra.mxu1 %vm938_vm3, %v4834_v21  ;;  %v5448_v11 = vld [vmem:[#allocation2 + $0x199] sm:$0xff] }
 0x41b   : > { %4742 = vst [vmem:[#allocation3 + $0x138] sm:$0xff] %v4684_v22  ;;  %v4040_v27 = vadd.f32 %v3982_v26, %v3871_v25  ;;  %v4516_v28 = vpop.f32.mrf.mxu0  ;;  %14278 = vmatmul.mubr.msk.bf16.gmra.mxu0 %vm938_vm3, %v5479_v24  ;;  %14157 = vmatprep.mubr.msk.bf16.mxu1 %vm14584_vm2, %v14583_v2  ;;  %v5482_v22 = vpack.c.bf16 %v5443_v15, %v5442_v14  ;;  %v3988_v24 = vld [vmem:[#allocation3 + $0x170] sm:$0xff] }
 0x41c   : > { %v13927_v29 = vpop.f32.mrf.mxu1  ;;  %14281 = vmatprep.mubr.msk.bf16.mxu0 %vm14584_vm2, %v14583_v2 }
 0x41d   : > { %v4685_v30 = vadd.f32 %v4516_v28, %v4040_v27  ;;  %v14051_v31 = vpop.f32.mrf.mxu0 }
 0x41e   : > { %v3874_v35 = vpop.f32.mrf.mxu1  ;;  %v4800_v31 = vld [vmem:[#allocation2 + $0x180] sm:$0xff] }
 0x41f   : > { %4743 = vst [vmem:[#allocation3 + $0x140] sm:$0xff] %v4685_v30  ;;  %v4041_v39 = vadd.f32 %v3983_v36, %v3874_v35  ;;  %v4519_v40 = vpop.f32.mrf.mxu0  ;;  %v4799_v30 = vld [vmem:[#allocation2 + $0x178] sm:$0xff]  ;;  %v5445_v35 = vld [vmem:[#allocation2 + $0x181] sm:$0xff] }
 0x420   : > { %v13928_v41 = vpop.f32.mrf.mxu1 }
 0x421   : > { %v4686_v43 = vadd.f32 %v4519_v40, %v4041_v39  ;;  %v14052_v44 = vpop.f32.mrf.mxu0  ;;  %v4838_v39 = vpack.c.bf16 %v4800_v31, %v4799_v30  ;;  %v3995_v30 = vld [vmem:[#allocation3 + $0x1a8] sm:$0xff] }
 0x422   : > { %v3879_v46 = vpop.f32.mrf.mxu1  ;;  %14158 = vmatmul.mubr.msk.bf16.gmra.mxu1 %vm938_vm3, %v4835_v42  ;;  %v5483_v42 = vpack.c.bf16 %v5445_v35, %v5444_v34  ;;  %v3990_v44 = vld [vmem:[#allocation3 + $0x180] sm:$0xff]  ;;  %v5450_v31 = vld [vmem:[#allocation2 + $0x1a9] sm:$0xff] }
 0x423   : > { %4744 = vst [vmem:[#allocation3 + $0x148] sm:$0xff] %v4686_v43  ;;  %v4042_v48 = vadd.f32 %v3984_v47, %v3879_v46  ;;  %v4524_v49 = vpop.f32.mrf.mxu0  ;;  %14282 = vmatmul.mubr.msk.bf16.gmra.mxu0 %vm938_vm3, %v5480_v45  ;;  %14161 = vmatprep.mubr.msk.bf16.mxu1 %vm14584_vm2, %v14583_v2 }
 0x424   : > { %v13931_v51 = vpop.f32.mrf.mxu1  ;;  %14285 = vmatprep.mubr.msk.bf16.mxu0 %vm14584_vm2, %v14583_v2 }
 0x425   : > { %v4687_v52 = vadd.f32 %v4524_v49, %v4042_v48  ;;  %v14055_v53 = vpop.f32.mrf.mxu0  ;;  %v4801_v51 = vld [vmem:[#allocation2 + $0x188] sm:$0xff] }
 0x426   : > { %v3882_v56 = vpop.f32.mrf.mxu1 }
 0x427   : > { %4745 = vst [vmem:[#allocation3 + $0x150] sm:$0xff] %v4687_v52  ;;  %v4043_v60 = vadd.f32 %v3985_v57, %v3882_v56  ;;  %v4527_v61 = vpop.f32.mrf.mxu0  ;;  %v4802_v52 = vld [vmem:[#allocation2 + $0x190] sm:$0xff] }
 0x428   : > { %v13932_v62 = vpop.f32.mrf.mxu1  ;;  %v5447_v56 = vld [vmem:[#allocation2 + $0x191] sm:$0xff] }
 0x429   : > { %v4688_v0 = vadd.f32 %v4527_v61, %v4043_v60  ;;  %v14056_v1 = vpop.f32.mrf.mxu0  ;;  %v4839_v60 = vpack.c.bf16 %v4802_v52, %v4801_v51  ;;  %v3997_v51 = vld [vmem:[#allocation3 + $0x1b8] sm:$0xff] }
 0x42a   : > { %v3887_v4 = vpop.f32.mrf.mxu1  ;;  %14162 = vmatmul.mubr.msk.bf16.gmra.mxu1 %vm938_vm3, %v4836_v63  ;;  %v5484_v63 = vpack.c.bf16 %v5447_v56, %v5446_v55  ;;  %v3992_v1 = vld [vmem:[#allocation3 + $0x190] sm:$0xff]  ;;  %v5452_v52 = vld [vmem:[#allocation2 + $0x1b9] sm:$0xff] }
 0x42b   : > { %4746 = vst [vmem:[#allocation3 + $0x158] sm:$0xff] %v4688_v0  ;;  %v4044_v5 = vadd.f32 %v3986_v50, %v3887_v4  ;;  %v4532_v6 = vpop.f32.mrf.mxu0  ;;  %14286 = vmatmul.mubr.msk.bf16.gmra.mxu0 %vm938_vm3, %v5481_v3  ;;  %14165 = vmatprep.mubr.msk.bf16.mxu1 %vm14584_vm2, %v14583_v2 }
 0x42c   : > { %v13935_v7 = vpop.f32.mrf.mxu1  ;;  %14289 = vmatprep.mubr.msk.bf16.mxu0 %vm14584_vm2, %v14583_v2 }
 0x42d   : > { %v4689_v8 = vadd.f32 %v4532_v6, %v4044_v5  ;;  %v14059_v9 = vpop.f32.mrf.mxu0  ;;  %v4803_v7 = vld [vmem:[#allocation2 + $0x198] sm:$0xff] }
 0x42e   : > { %v3890_v12 = vpop.f32.mrf.mxu1 }
 0x42f   : > { %4747 = vst [vmem:[#allocation3 + $0x160] sm:$0xff] %v4689_v8  ;;  %v4045_v16 = vadd.f32 %v3987_v13, %v3890_v12  ;;  %v4535_v17 = vpop.f32.mrf.mxu0  ;;  %v4804_v8 = vld [vmem:[#allocation2 + $0x1a0] sm:$0xff] }
 0x430   : > { %v13936_v18 = vpop.f32.mrf.mxu1  ;;  %v5449_v12 = vld [vmem:[#allocation2 + $0x1a1] sm:$0xff] }
 0x431   : > { %v4690_v20 = vadd.f32 %v4535_v17, %v4045_v16  ;;  %v14060_v21 = vpop.f32.mrf.mxu0  ;;  %v4840_v16 = vpack.c.bf16 %v4804_v8, %v4803_v7  ;;  %v3999_v7 = vld [vmem:[#allocation3 + $0x1c8] sm:$0xff] }
 0x432   : > { %v3895_v23 = vpop.f32.mrf.mxu1  ;;  %14166 = vmatmul.mubr.msk.bf16.gmra.mxu1 %vm938_vm3, %v4837_v19  ;;  %v5485_v19 = vpack.c.bf16 %v5449_v12, %v5448_v11  ;;  %v3994_v21 = vld [vmem:[#allocation3 + $0x1a0] sm:$0xff]  ;;  %v5454_v8 = vld [vmem:[#allocation2 + $0x1c9] sm:$0xff] }
 0x433   : > { %4748 = vst [vmem:[#allocation3 + $0x168] sm:$0xff] %v4690_v20  ;;  %v4046_v25 = vadd.f32 %v3988_v24, %v3895_v23  ;;  %v4540_v26 = vpop.f32.mrf.mxu0  ;;  %14290 = vmatmul.mubr.msk.bf16.gmra.mxu0 %vm938_vm3, %v5482_v22  ;;  %14169 = vmatprep.mubr.msk.bf16.mxu1 %vm14584_vm2, %v14583_v2 }
 0x434   : > { %v13939_v27 = vpop.f32.mrf.mxu1  ;;  %14293 = vmatprep.mubr.msk.bf16.mxu0 %vm14584_vm2, %v14583_v2 }
 0x435   : > { %v4691_v28 = vadd.f32 %v4540_v26, %v4046_v25  ;;  %v14063_v29 = vpop.f32.mrf.mxu0  ;;  %v4805_v27 = vld [vmem:[#allocation2 + $0x1a8] sm:$0xff] }
 0x436   : > { %v3898_v32 = vpop.f32.mrf.mxu1 }
 0x437   : > { %4749 = vst [vmem:[#allocation3 + $0x170] sm:$0xff] %v4691_v28  ;;  %v4047_v36 = vadd.f32 %v3989_v33, %v3898_v32  ;;  %v4543_v37 = vpop.f32.mrf.mxu0  ;;  %v4806_v28 = vld [vmem:[#allocation2 + $0x1b0] sm:$0xff] }
 0x438   : > { %v13940_v38 = vpop.f32.mrf.mxu1  ;;  %v5451_v32 = vld [vmem:[#allocation2 + $0x1b1] sm:$0xff] }
 0x439   : > { %v4692_v40 = vadd.f32 %v4543_v37, %v4047_v36  ;;  %v14064_v41 = vpop.f32.mrf.mxu0  ;;  %v4841_v36 = vpack.c.bf16 %v4806_v28, %v4805_v27  ;;  %v5233_v28 = vld [vmem:[#allocation3 + $0x8] sm:$0xff] }
 0x43a   : > { %v3903_v43 = vpop.f32.mrf.mxu1  ;;  %14170 = vmatmul.mubr.msk.bf16.gmra.mxu1 %vm938_vm3, %v4838_v39  ;;  %v5486_v39 = vpack.c.bf16 %v5451_v32, %v5450_v31  ;;  %v3996_v41 = vld [vmem:[#allocation3 + $0x1b0] sm:$0xff] }
 0x43b   : > { %4750 = vst [vmem:[#allocation3 + $0x178] sm:$0xff] %v4692_v40  ;;  %v4048_v45 = vadd.f32 %v3990_v44, %v3903_v43  ;;  %v4548_v46 = vpop.f32.mrf.mxu0  ;;  %14294 = vmatmul.mubr.msk.bf16.gmra.mxu0 %vm938_vm3, %v5483_v42  ;;  %14173 = vmatprep.mubr.msk.bf16.mxu1 %vm14584_vm2, %v14583_v2 }
 0x43c   : > { %v13943_v47 = vpop.f32.mrf.mxu1  ;;  %14297 = vmatprep.mubr.msk.bf16.mxu0 %vm14584_vm2, %v14583_v2 }
 0x43d   : > { %v4693_v48 = vadd.f32 %v4548_v46, %v4048_v45  ;;  %v14067_v49 = vpop.f32.mrf.mxu0  ;;  %v4807_v47 = vld [vmem:[#allocation2 + $0x1b8] sm:$0xff] }
 0x43e   : > { %v3906_v53 = vpop.f32.mrf.mxu1 }
 0x43f   : > { %4751 = vst [vmem:[#allocation3 + $0x180] sm:$0xff] %v4693_v48  ;;  %v4049_v57 = vadd.f32 %v3991_v54, %v3906_v53  ;;  %v4551_v58 = vpop.f32.mrf.mxu0  ;;  %v4808_v48 = vld [vmem:[#allocation2 + $0x1c0] sm:$0xff] }
 0x440   : > { %v13944_v59 = vpop.f32.mrf.mxu1  ;;  %v5453_v53 = vld [vmem:[#allocation2 + $0x1c1] sm:$0xff] }
 0x441   : > { %v4694_v61 = vadd.f32 %v4551_v58, %v4049_v57  ;;  %v14068_v62 = vpop.f32.mrf.mxu0  ;;  %v4842_v57 = vpack.c.bf16 %v4808_v48, %v4807_v47 }
 0x442   : > { %v3911_v0 = vpop.f32.mrf.mxu1  ;;  %14174 = vmatmul.mubr.msk.bf16.gmra.mxu1 %vm938_vm3, %v4839_v60  ;;  %v5487_v60 = vpack.c.bf16 %v5453_v53, %v5452_v52  ;;  %v3998_v62 = vld [vmem:[#allocation3 + $0x1c0] sm:$0xff]  ;;  %v4814_v52 = vld [vmem:[#allocation2 + $0x1f0] sm:$0xff] }
 0x443   : > { %4752 = vst [vmem:[#allocation3 + $0x188] sm:$0xff] %v4694_v61  ;;  %v4050_v3 = vadd.f32 %v3992_v1, %v3911_v0  ;;  %v4556_v4 = vpop.f32.mrf.mxu0  ;;  %14298 = vmatmul.mubr.msk.bf16.gmra.mxu0 %vm938_vm3, %v5484_v63  ;;  %14177 = vmatprep.mubr.msk.bf16.mxu1 %vm14584_vm2, %v14583_v2 }
 0x444   : > { %v13947_v50 = vpop.f32.mrf.mxu1  ;;  %14301 = vmatprep.mubr.msk.bf16.mxu0 %vm14584_vm2, %v14583_v2 }
 0x445   : > { %v4695_v5 = vadd.f32 %v4556_v4, %v4050_v3  ;;  %v14071_v6 = vpop.f32.mrf.mxu0  ;;  %v4809_v50 = vld [vmem:[#allocation2 + $0x1c8] sm:$0xff] }
 0x446   : > { %v3914_v9 = vpop.f32.mrf.mxu1 }
 0x447   : > { %4753 = vst [vmem:[#allocation3 + $0x190] sm:$0xff] %v4695_v5  ;;  %v4051_v13 = vadd.f32 %v3993_v10, %v3914_v9  ;;  %v4559_v14 = vpop.f32.mrf.mxu0  ;;  %v4810_v5 = vld [vmem:[#allocation2 + $0x1d0] sm:$0xff] }
 0x448   : > { %v13948_v15 = vpop.f32.mrf.mxu1  ;;  %v5455_v9 = vld [vmem:[#allocation2 + $0x1d1] sm:$0xff] }
 0x449   : > { %v4696_v17 = vadd.f32 %v4559_v14, %v4051_v13  ;;  %v14072_v18 = vpop.f32.mrf.mxu0  ;;  %v4843_v13 = vpack.c.bf16 %v4810_v5, %v4809_v50  ;;  %v5236_v50 = vld [vmem:[#allocation3 + $0x20] sm:$0xff] }
 0x44a   : > { %v3919_v20 = vpop.f32.mrf.mxu1  ;;  %14178 = vmatmul.mubr.msk.bf16.gmra.mxu1 %vm938_vm3, %v4840_v16  ;;  %v5488_v16 = vpack.c.bf16 %v5455_v9, %v5454_v8  ;;  %v5232_v18 = vld [vmem:[#allocation3] sm:$0xff] }
 0x44b   : > { %4754 = vst [vmem:[#allocation3 + $0x198] sm:$0xff] %v4696_v17  ;;  %v4052_v22 = vadd.f32 %v3994_v21, %v3919_v20  ;;  %v4564_v23 = vpop.f32.mrf.mxu0  ;;  %14302 = vmatmul.mubr.msk.bf16.gmra.mxu0 %vm938_vm3, %v5485_v19  ;;  %14181 = vmatprep.mubr.msk.bf16.mxu1 %vm14584_vm2, %v14583_v2  ;;  %v15795_v21 = vld [vmem:[%s17336_s4] ss:$0 sm:$0xff] }
 0x44c   : > { %v13951_v24 = vpop.f32.mrf.mxu1  ;;  %14305 = vmatprep.mubr.msk.bf16.mxu0 %vm14584_vm2, %v14583_v2 }
 0x44d   : > { %v4697_v25 = vadd.f32 %v4564_v23, %v4052_v22  ;;  %v14075_v26 = vpop.f32.mrf.mxu0 }
 0x44e   : > { %v3922_v29 = vpop.f32.mrf.mxu1  ;;  %v4812_v26 = vld [vmem:[#allocation2 + $0x1e0] sm:$0xff] }
 0x44f   : > { %4755 = vst [vmem:[#allocation3 + $0x1a0] sm:$0xff] %v4697_v25  ;;  %v4053_v33 = vadd.f32 %v3995_v30, %v3922_v29  ;;  %v4567_v34 = vpop.f32.mrf.mxu0  ;;  %v4811_v25 = vld [vmem:[#allocation2 + $0x1d8] sm:$0xff]  ;;  %v5457_v30 = vld [vmem:[#allocation2 + $0x1e1] sm:$0xff] }
 0x450   : > { %v13952_v35 = vpop.f32.mrf.mxu1  ;;  %v5456_v29 = vld [vmem:[#allocation2 + $0x1d9] sm:$0xff] }
 0x451   : > { %v4698_v37 = vadd.f32 %v4567_v34, %v4053_v33  ;;  %v14076_v38 = vpop.f32.mrf.mxu0  ;;  %v4844_v35 = vpack.c.bf16 %v4812_v26, %v4811_v25 }
 0x452   : > { %v3927_v40 = vpop.f32.mrf.mxu1  ;;  %14182 = vmatmul.mubr.msk.bf16.gmra.mxu1 %vm938_vm3, %v4841_v36 }
 0x453   : > { %4756 = vst [vmem:[#allocation3 + $0x1a8] sm:$0xff] %v4698_v37  ;;  %v4054_v42 = vadd.f32 %v3996_v41, %v3927_v40  ;;  %v4572_v43 = vpop.f32.mrf.mxu0  ;;  %14306 = vmatmul.mubr.msk.bf16.gmra.mxu0 %vm938_vm3, %v5486_v39  ;;  %14185 = vmatprep.mubr.msk.bf16.mxu1 %vm14584_vm2, %v14583_v2  ;;  %v5489_v39 = vpack.c.bf16 %v5457_v30, %v5456_v29  ;;  %v5234_v41 = vld [vmem:[#allocation3 + $0x10] sm:$0xff] }
 0x454   : > { %v13955_v44 = vpop.f32.mrf.mxu1  ;;  %14309 = vmatprep.mubr.msk.bf16.mxu0 %vm14584_vm2, %v14583_v2 }
 0x455   : > { %v4699_v45 = vadd.f32 %v4572_v43, %v4054_v42  ;;  %v14079_v46 = vpop.f32.mrf.mxu0 }
 0x456   : > { %v3930_v49 = vpop.f32.mrf.mxu1 }
 0x457   : > { %4757 = vst [vmem:[#allocation3 + $0x1b0] sm:$0xff] %v4699_v45  ;;  %v4055_v54 = vadd.f32 %v3997_v51, %v3930_v49  ;;  %v4575_v55 = vpop.f32.mrf.mxu0  ;;  %v4813_v51 = vld [vmem:[#allocation2 + $0x1e8] sm:$0xff] }
 0x458   : > { %v13956_v56 = vpop.f32.mrf.mxu1 }
 0x459   : > { %v4700_v58 = vadd.f32 %v4575_v55, %v4055_v54  ;;  %v14080_v59 = vpop.f32.mrf.mxu0  ;;  %v5235_v54 = vld [vmem:[#allocation3 + $0x18] sm:$0xff]  ;;  %v5458_v55 = vld [vmem:[#allocation2 + $0x1e9] sm:$0xff] }
 0x45a   : > { %v3935_v61 = vpop.f32.mrf.mxu1  ;;  %14186 = vmatmul.mubr.msk.bf16.gmra.mxu1 %vm938_vm3, %v4842_v57  ;;  %v5459_v56 = vld [vmem:[#allocation2 + $0x1f1] sm:$0xff] }
 0x45b   : > { %4758 = vst [vmem:[#allocation3 + $0x1b8] sm:$0xff] %v4700_v58  ;;  %v4056_v63 = vadd.f32 %v3998_v62, %v3935_v61  ;;  %v4580_v0 = vpop.f32.mrf.mxu0  ;;  %14310 = vmatmul.mubr.msk.bf16.gmra.mxu0 %vm938_vm3, %v5487_v60  ;;  %14189 = vmatprep.mubr.msk.bf16.mxu1 %vm14584_vm2, %v14583_v2  ;;  %v4845_v62 = vpack.c.bf16 %v4814_v52, %v4813_v51 }
 0x45c   : > { %v13959_v1 = vpop.f32.mrf.mxu1  ;;  %14313 = vmatprep.mubr.msk.bf16.mxu0 %vm14584_vm2, %v14583_v2 }
 0x45d   : > { %v4701_v3 = vadd.f32 %v4580_v0, %v4056_v63  ;;  %v14083_v4 = vpop.f32.mrf.mxu0 }
 0x45e   : > { %v3938_v6 = vpop.f32.mrf.mxu1 }
 0x45f   : > { %4759 = vst [vmem:[#allocation3 + $0x1c0] sm:$0xff] %v4701_v3  ;;  %v4057_v10 = vadd.f32 %v3999_v7, %v3938_v6  ;;  %v4583_v11 = vpop.f32.mrf.mxu0  ;;  %v5490_v3 = vpack.c.bf16 %v5459_v56, %v5458_v55 }
 0x460   : > { %v13960_v12 = vpop.f32.mrf.mxu1 }
 0x461   : > { %v4702_v14 = vadd.f32 %v4583_v11, %v4057_v10  ;;  %v14084_v15 = vpop.f32.mrf.mxu0 }
 0x462   : > { %v5001_v17 = vpop.f32.mrf.mxu1  ;;  %14190 = vmatmul.mubr.msk.bf16.gmra.mxu1 %vm938_vm3, %v4843_v13  ;;  %v4815_v13 = vld [vmem:[#allocation2 + $0x1f8] sm:$0xff] }
 0x463   : > { %4760 = vst [vmem:[#allocation3 + $0x1c8] sm:$0xff] %v4702_v14  ;;  %v5290_v19 = vadd.f32 %v5232_v18, %v5001_v17  ;;  %v5646_v20 = vpop.f32.mrf.mxu0  ;;  %14314 = vmatmul.mubr.msk.bf16.gmra.mxu0 %vm938_vm3, %v5488_v16  ;;  %14193 = vmatprep.mubr.msk.bf16.mxu1 %vm14584_vm2, %v14583_v2  ;;  %v4816_v14 = vld [vmem:[#allocation2 + $0x200] sm:$0xff]  ;;  %v5237_v16 = vld [vmem:[#allocation3 + $0x28] sm:$0xff] }
 0x464   : > { %v14095_v22 = vpop.f32.mrf.mxu1  ;;  %14317 = vmatprep.mubr.msk.bf16.mxu0 %vm14584_vm2, %v14583_v2  ;;  %v5460_v17 = vld [vmem:[#allocation2 + $0x1f9] sm:$0xff]  ;;  %v5461_v18 = vld [vmem:[#allocation2 + $0x201] sm:$0xff]  ;;  %v4846_v25 = vpack.c.bf16 %v4816_v14, %v4815_v13 }
 0x465   : > { %v5935_v23 = vadd.f32 %v5646_v20, %v5290_v19  ;;  %v14219_v24 = vpop.f32.mrf.mxu0  ;;  %v5491_v29 = vpack.c.bf16 %v5461_v18, %v5460_v17  ;;  %v14430_v13 = vld [vmem:[%s17337_s5 + $0x170] ss:$8 sps:$4 sm:$0xff]  }
 0x466   : > { %v5004_v27 = vpop.f32.mrf.mxu1  ;;  %v14433_v17 = vld [vmem:[%s17337_s5 + $0x1f0] ss:$8 sps:$4 sm:$0xff]  }
 0x467   : > { %v6116_v31 = vadd.f32 %v15795_v21, %v5935_v23  ;;  %v5291_v32 = vadd.f32 %v5233_v28, %v5004_v27  ;;  %v5649_v33 = vpop.f32.mrf.mxu0 }
 0x468   : > { %v14096_v34 = vpop.f32.mrf.mxu1 }
 0x469   : > { %v6174_v36 = vmul.f32 0.2, %v6116_v31  ;;  %v5936_v37 = vadd.f32 %v5649_v33, %v5291_v32  ;;  %v14220_v38 = vpop.f32.mrf.mxu0 }
 0x46a   : > { %v5009_v40 = vpop.f32.mrf.mxu1  ;;  %14194 = vmatmul.mubr.msk.bf16.gmra.mxu1 %vm938_vm3, %v4844_v35 }
 0x46b   : > { %v15801_v42 = vmax.f32 %v6116_v31, %v6174_v36  ;;  %v6117_v43 = vadd.f32 %v15795_v21, %v5936_v37  ;;  %v5292_v44 = vadd.f32 %v5234_v41, %v5009_v40  ;;  %v5654_v45 = vpop.f32.mrf.mxu0  ;;  %14318 = vmatmul.mubr.msk.bf16.gmra.mxu0 %vm938_vm3, %v5489_v39  ;;  %14197 = vmatprep.mubr.msk.bf16.mxu1 %vm14584_vm2, %v14583_v2  ;;  %v5238_v31 = vld [vmem:[#allocation3 + $0x30] sm:$0xff]  ;;  %v4817_v40 = vld [vmem:[#allocation2 + $0x208] sm:$0xff] }
 0x46c   : > { %v14099_v46 = vpop.f32.mrf.mxu1  ;;  %14321 = vmatprep.mubr.msk.bf16.mxu0 %vm14584_vm2, %v14583_v2  ;;  %v4818_v41 = vld [vmem:[#allocation2 + $0x210] sm:$0xff] }
 0x46d   : > { %6290 = vst [vmem:[#allocation3] sm:$0xff] %v15801_v42  ;;  %v6175_v47 = vmul.f32 0.2, %v6117_v43  ;;  %v5937_v48 = vadd.f32 %v5654_v45, %v5292_v44  ;;  %v14223_v49 = vpop.f32.mrf.mxu0  ;;  %v5239_v44 = vld [vmem:[#allocation3 + $0x38] sm:$0xff]  ;;  %v5462_v45 = vld [vmem:[#allocation2 + $0x209] sm:$0xff] }
 0x46e   : > { %v5012_v53 = vpop.f32.mrf.mxu1  ;;  %v5463_v46 = vld [vmem:[#allocation2 + $0x211] sm:$0xff] }
 0x46f   : > { %v15810_v57 = vmax.f32 %v6117_v43, %v6175_v47  ;;  %v6118_v58 = vadd.f32 %v15795_v21, %v5937_v48  ;;  %v5293_v59 = vadd.f32 %v5235_v54, %v5012_v53  ;;  %v5657_v60 = vpop.f32.mrf.mxu0  ;;  %v4847_v53 = vpack.c.bf16 %v4818_v41, %v4817_v40  ;;  %v5243_v40 = vld [vmem:[#allocation3 + $0x58] sm:$0xff] }
 0x470   : > { %v14100_v61 = vpop.f32.mrf.mxu1  ;;  %v5492_v56 = vpack.c.bf16 %v5463_v46, %v5462_v45 }
 0x471   : > { %6291 = vst [vmem:[#allocation3 + $0x8] sm:$0xff] %v15810_v57  ;;  %v6176_v63 = vmul.f32 0.2, %v6118_v58  ;;  %v5938_v0 = vadd.f32 %v5657_v60, %v5293_v59  ;;  %v14224_v1 = vpop.f32.mrf.mxu0  ;;  %v5240_v59 = vld [vmem:[#allocation3 + $0x40] sm:$0xff] }
 0x472   : > { %v5017_v4 = vpop.f32.mrf.mxu1  ;;  %14198 = vmatmul.mubr.msk.bf16.gmra.mxu1 %vm938_vm3, %v4845_v62 }
 0x473   : > { %v15815_v5 = vmax.f32 %v6118_v58, %v6176_v63  ;;  %v6119_v6 = vadd.f32 %v15795_v21, %v5938_v0  ;;  %v5294_v7 = vadd.f32 %v5236_v50, %v5017_v4  ;;  %v5662_v8 = vpop.f32.mrf.mxu0  ;;  %14322 = vmatmul.mubr.msk.bf16.gmra.mxu0 %vm938_vm3, %v5490_v3  ;;  %14201 = vmatprep.mubr.msk.bf16.mxu1 %vm14584_vm2, %v14583_v2  ;;  %v14585_v0 = vmov 0  }
 0x474   : > { %v14103_v9 = vpop.f32.mrf.mxu1  ;;  %14325 = vmatprep.mubr.msk.bf16.mxu0 %vm14584_vm2, %v14583_v2 }
 0x475   : > { %6292 = vst [vmem:[#allocation3 + $0x10] sm:$0xff] %v15815_v5  ;;  %v6177_v10 = vmul.f32 0.2, %v6119_v6  ;;  %v5939_v11 = vadd.f32 %v5662_v8, %v5294_v7  ;;  %v14227_v12 = vpop.f32.mrf.mxu0  ;;  %v5241_v7 = vld [vmem:[#allocation3 + $0x48] sm:$0xff] }
 0x476   : > { %v5020_v15 = vpop.f32.mrf.mxu1 }
 0x477   : > { %v15824_v19 = vmax.f32 %v6119_v6, %v6177_v10  ;;  %v6120_v20 = vadd.f32 %v15795_v21, %v5939_v11  ;;  %v5295_v22 = vadd.f32 %v5237_v16, %v5020_v15  ;;  %v5665_v23 = vpop.f32.mrf.mxu0  ;;  %v6396_v15 = vpack.c.bf16 %v15810_v57, %v15801_v42  ;;  %v14441_v42 = vld [vmem:[%s17337_s5 + $0x1e4] ss:$8 sps:$4 sm:$0xff]  }
 0x478   : > { %v14104_v24 = vpop.f32.mrf.mxu1  ;;  %v6885_v16 = vld [vmem:[#allocation3 + $0x1] sm:$0xff] }
 0x479   : > { %6293 = vst [vmem:[#allocation3 + $0x18] sm:$0xff] %v15824_v19  ;;  %v6178_v26 = vmul.f32 0.2, %v6120_v20  ;;  %v5940_v27 = vadd.f32 %v5665_v23, %v5295_v22  ;;  %v14228_v28 = vpop.f32.mrf.mxu0  ;;  %v14438_v24 = vld [vmem:[%s17337_s5 + $0x164] ss:$8 sps:$4 sm:$0xff]  }
 0x47a   : > { %v5025_v30 = vpop.f32.mrf.mxu1  ;;  %14202 = vmatmul.mubr.msk.bf16.gmra.mxu1 %vm938_vm3, %v4846_v25 }
 0x47b   : > { %v15829_v32 = vmax.f32 %v6120_v20, %v6178_v26  ;;  %v6121_v33 = vadd.f32 %v15795_v21, %v5940_v27  ;;  %v5296_v34 = vadd.f32 %v5238_v31, %v5025_v30  ;;  %v5670_v35 = vpop.f32.mrf.mxu0  ;;  %14326 = vmatmul.mubr.msk.bf16.gmra.mxu0 %vm938_vm3, %v5491_v29  ;;  %14205 = vmatprep.mubr.msk.bf16.mxu1 %vm14584_vm2, %v14583_v2  ;;  %v5242_v26 = vld [vmem:[#allocation3 + $0x50] sm:$0xff]  ;;  %v14436_v30 = vld [vmem:[%s17337_s5 + $0x160] ss:$8 sps:$4 sm:$0xff]  }
 0x47c   : > { %v14107_v36 = vpop.f32.mrf.mxu1  ;;  %14329 = vmatprep.mubr.msk.bf16.mxu0 %vm14584_vm2, %v14583_v2  ;;  %v6886_v8 = vld [vmem:[#allocation3 + $0x9] sm:$0xff] }
 0x47d   : > { %6294 = vst [vmem:[#allocation3 + $0x20] sm:$0xff] %v15829_v32  ;;  %v6179_v37 = vmul.f32 0.2, %v6121_v33  ;;  %v5941_v38 = vadd.f32 %v5670_v35, %v5296_v34  ;;  %v14231_v39 = vpop.f32.mrf.mxu0  ;;  %v6933_v23 = vpack.c.bf16 %v6886_v8, %v6885_v16  ;;  %v14444_v34 = vld [vmem:[%s17337_s5 + $0x154] ss:$8 sps:$4 sm:$0xff]  }
 0x47e   : > { %v5028_v43 = vpop.f32.mrf.mxu1  ;;  %v14451_v8 = vld [vmem:[%s17337_s5 + $0x1c0] ss:$8 sps:$4 sm:$0xff]  }
 0x47f   : > { %v15838_v47 = vmax.f32 %v6121_v33, %v6179_v37  ;;  %v6122_v48 = vadd.f32 %v15795_v21, %v5941_v38  ;;  %v5297_v49 = vadd.f32 %v5239_v44, %v5028_v43  ;;  %v5673_v51 = vpop.f32.mrf.mxu0  ;;  %v14439_v33 = vld [vmem:[%s17337_s5 + $0x1e0] ss:$8 sps:$4 sm:$0xff]   ;;  %v14447_v38 = vld [vmem:[%s17337_s5 + $0x1d4] ss:$8 sps:$4 sm:$0xff]  }
 0x480   : > { %v14108_v52 = vpop.f32.mrf.mxu1 }
 0x481   : > { %6295 = vst [vmem:[#allocation3 + $0x28] sm:$0xff] %v15838_v47  ;;  %v6180_v2 = vmul.f32 0.2, %v6122_v48  ;;  %v5942_v54 = vadd.f32 %v5673_v51, %v5297_v49  ;;  %v14232_v55 = vpop.f32.mrf.mxu0  ;;  %v6397_v49 = vpack.c.bf16 %v15824_v19, %v15815_v5  ;;  %v6887_v51 = vld [vmem:[#allocation3 + $0x11] sm:$0xff]  ;;  %v14450_v5 = vld [vmem:[%s17337_s5 + $0x144] ss:$8 sps:$4 sm:$0xff]  }
 0x482   : > { %v5033_v58 = vpop.f32.mrf.mxu1  ;;  %14206 = vmatmul.mubr.msk.bf16.gmra.mxu1 %vm938_vm3, %v4847_v53  ;;  %v14442_v52 = vld [vmem:[%s17337_s5 + $0x150] ss:$8 sps:$4 sm:$0xff]  }
 0x483   : > { %v15843_v60 = vmax.f32 %v6122_v48, %v6180_v2  ;;  %v6123_v61 = vadd.f32 %v15795_v21, %v5942_v54  ;;  %v5298_v62 = vadd.f32 %v5240_v59, %v5033_v58  ;;  %v5678_v63 = vpop.f32.mrf.mxu0  ;;  %14330 = vmatmul.mubr.msk.bf16.gmra.mxu0 %vm938_vm3, %v5492_v56  ;;  %6548 = vmatprep.mubr.bf16.mxu1 %v14585_v0  ;;  %v14445_v56 = vld [vmem:[%s17337_s5 + $0x1d0] ss:$8 sps:$4 sm:$0xff]   ;;  %v5244_v58 = vld [vmem:[#allocation3 + $0x60] sm:$0xff] }
 0x484   : > { %v14111_v1 = vpop.f32.mrf.mxu1  ;;  %7085 = vmatprep.mubr.bf16.mxu0 %v14585_v0  ;;  %v6888_v41 = vld [vmem:[#allocation3 + $0x19] sm:$0xff]  ;;  %v14453_v59 = vld [vmem:[%s17337_s5 + $0x1c4] ss:$8 sps:$4 sm:$0xff]  }
 0x485   : > { %6296 = vst [vmem:[#allocation3 + $0x30] sm:$0xff] %v15843_v60  ;;  %v6181_v3 = vmul.f32 0.2, %v6123_v61  ;;  %v5943_v4 = vadd.f32 %v5678_v63, %v5298_v62  ;;  %v14235_v50 = vpop.f32.mrf.mxu0  ;;  %v6934_v55 = vpack.c.bf16 %v6888_v41, %v6887_v51  ;;  %v14463_v41 = vld [vmem:[%s17337_s5 + $0x1a0] ss:$8 sps:$4 sm:$0xff]  }
 0x486   : > { %v5036_v6 = vpop.f32.mrf.mxu1 }
 0x487   : > { %v15850_v9 = vmax.f32 %v6123_v61, %v6181_v3  ;;  %v6124_v10 = vadd.f32 %v15795_v21, %v5943_v4  ;;  %v5299_v11 = vadd.f32 %v5241_v7, %v5036_v6  ;;  %v5681_v12 = vpop.f32.mrf.mxu0  ;;  %v14448_v4 = vld [vmem:[%s17337_s5 + $0x140] ss:$8 sps:$4 sm:$0xff]  }
 0x488   : > { %v14112_v14 = vpop.f32.mrf.mxu1 }
 0x489   : > { %6297 = vst [vmem:[#allocation3 + $0x38] sm:$0xff] %v15850_v9  ;;  %v6182_v18 = vmul.f32 0.2, %v6124_v10  ;;  %v5944_v20 = vadd.f32 %v5681_v12, %v5299_v11  ;;  %v14236_v22 = vpop.f32.mrf.mxu0  ;;  %v5245_v12 = vld [vmem:[#allocation3 + $0x68] sm:$0xff]  ;;  %v14459_v14 = vld [vmem:[%s17337_s5 + $0x1b4] ss:$8 sps:$4 sm:$0xff]  }
 0x48a   : > { %v5041_v25 = vpop.f32.mrf.mxu1  ;;  %6549 = vmatmul.mubr.bf16.vlgmr.msra.gmra.mxu1 %v6396_v15  ;;  %v6398_v22 = vpack.c.bf16 %v15838_v47, %v15829_v32  ;;  %v14462_v32 = vld [vmem:[%s17337_s5 + $0x124] ss:$8 sps:$4 sm:$0xff]  }
 0x48b   : > { %v15868_v57 = vmax.f32 %v6124_v10, %v6182_v18  ;;  %v6125_v27 = vadd.f32 %v15795_v21, %v5944_v20  ;;  %v5300_v28 = vadd.f32 %v5242_v26, %v5041_v25  ;;  %v5686_v29 = vpop.f32.mrf.mxu0  ;;  %7783 = vmatpush1.bf16.msra.mxu1 %v14430_v13  ;;  %7086 = vmatmul.mubr.bf16.vlgmr.msra.gmra.mxu0 %v6933_v23  ;;  %v14456_v10 = vld [vmem:[%s17337_s5 + $0x134] ss:$8 sps:$4 sm:$0xff]   ;;  %v6889_v23 = vld [vmem:[#allocation3 + $0x21] sm:$0xff] }
 0x48c   : > { %v14115_v31 = vpop.f32.mrf.mxu1  ;;  %6558 = vmatprep.mubr.bf16.mxu1 %v14585_v0  ;;  %8512 = vmatpush1.bf16.msra.mxu0 %v14433_v17  ;;  %v6890_v13 = vld [vmem:[#allocation3 + $0x29] sm:$0xff] }
 0x48d   : > { %6298 = vst [vmem:[#allocation3 + $0x40] sm:$0xff] %v15868_v57  ;;  %v6183_v35 = vmul.f32 0.2, %v6125_v27  ;;  %v5945_v36 = vadd.f32 %v5686_v29, %v5300_v28  ;;  %v14239_v37 = vpop.f32.mrf.mxu0  ;;  %7095 = vmatprep.mubr.bf16.mxu0 %v14585_v0  ;;  %7784 = vmatprep.subr.bf16.mxu1 %v14438_v24  ;;  %v14454_v24 = vld [vmem:[%s17337_s5 + $0x130] ss:$8 sps:$4 sm:$0xff]  }
 0x48e   : > { %v5044_v39 = vpop.f32.mrf.mxu1  ;;  %8513 = vmatprep.subr.bf16.mxu0 %v14441_v42  ;;  %v14457_v28 = vld [vmem:[%s17337_s5 + $0x1b0] ss:$8 sps:$4 sm:$0xff]   ;;  %v14460_v37 = vld [vmem:[%s17337_s5 + $0x120] ss:$8 sps:$4 sm:$0xff]  }
 0x48f   : > { %v15886_v43 = vmax.f32 %v6125_v27, %v6183_v35  ;;  %v6126_v44 = vadd.f32 %v15795_v21, %v5945_v36  ;;  %v5301_v45 = vadd.f32 %v5243_v40, %v5044_v39  ;;  %v5689_v46 = vpop.f32.mrf.mxu0  ;;  %7785 = vmatpush1.bf16.msra.mxu1 %v14436_v30  ;;  %v6935_v27 = vpack.c.bf16 %v6890_v13, %v6889_v23  ;;  %v5246_v29 = vld [vmem:[#allocation3 + $0x70] sm:$0xff]  ;;  %v14465_v30 = vld [vmem:[%s17337_s5 + $0x1a4] ss:$8 sps:$4 sm:$0xff]  }
 0x490   : > { %v14116_v48 = vpop.f32.mrf.mxu1  ;;  %8514 = vmatpush1.bf16.msra.mxu0 %v14439_v33  ;;  %7786 = vmatprep.subr.bf16.mxu1 %v14444_v34 }
 0x491   : > { %6299 = vst [vmem:[#allocation3 + $0x48] sm:$0xff] %v15886_v43  ;;  %v6184_v53 = vmul.f32 0.2, %v6126_v44  ;;  %v5946_v2 = vadd.f32 %v5689_v46, %v5301_v45  ;;  %v14240_v54 = vpop.f32.mrf.mxu0  ;;  %8515 = vmatprep.subr.bf16.mxu0 %v14447_v38  ;;  %v5247_v45 = vld [vmem:[#allocation3 + $0x78] sm:$0xff] }
 0x492   : > { %v5049_v19 = vpop.f32.mrf.mxu1  ;;  %6559 = vmatmul.mubr.bf16.gmra.mxu1 %v6397_v49  ;;  %v6891_v54 = vld [vmem:[#allocation3 + $0x31] sm:$0xff] }
 0x493   : > { %v15904_v61 = vmax.f32 %v6126_v44, %v6184_v53  ;;  %v6127_v62 = vadd.f32 %v15795_v21, %v5946_v2  ;;  %v5302_v63 = vadd.f32 %v5244_v58, %v5049_v19  ;;  %v5694_v1 = vpop.f32.mrf.mxu0  ;;  %7096 = vmatmul.mubr.bf16.gmra.mxu0 %v6934_v55  ;;  %6568 = vmatprep.mubr.bf16.mxu1 %v14585_v0 }
 0x494   : > { %v14119_v3 = vpop.f32.mrf.mxu1  ;;  %7105 = vmatprep.mubr.bf16.mxu0 %v14585_v0  ;;  %7787 = vmatpush1.bf16.msra.mxu1 %v14442_v52  ;;  %v6892_v46 = vld [vmem:[#allocation3 + $0x39] sm:$0xff]  ;;  %v6399_v2 = vpack.c.bf16 %v15850_v9, %v15843_v60 }
 0x495   : > { %6300 = vst [vmem:[#allocation3 + $0x50] sm:$0xff] %v15904_v61  ;;  %v6185_v50 = vmul.f32 0.2, %v6127_v62  ;;  %v5947_v6 = vadd.f32 %v5694_v1, %v5302_v63  ;;  %v14243_v7 = vpop.f32.mrf.mxu0  ;;  %8516 = vmatpush1.bf16.msra.mxu0 %v14445_v56  ;;  %7788 = vmatprep.subr.bf16.mxu1 %v14450_v5  ;;  %v6936_v19 = vpack.c.bf16 %v6892_v46, %v6891_v54  ;;  %v5252_v54 = vld [vmem:[#allocation3 + $0xa0] sm:$0xff] }
 0x496   : > { %v5052_v11 = vpop.f32.mrf.mxu1  ;;  %8517 = vmatprep.subr.bf16.mxu0 %v14453_v59  ;;  %v5248_v59 = vld [vmem:[#allocation3 + $0x80] sm:$0xff]  ;;  %v14468_v7 = vld [vmem:[%s17337_s5 + $0x114] ss:$8 sps:$4 sm:$0xff]  }
 0x497   : > { %v15922_v15 = vmax.f32 %v6127_v62, %v6185_v50  ;;  %v6128_v16 = vadd.f32 %v15795_v21, %v5947_v6  ;;  %v5303_v17 = vadd.f32 %v5245_v12, %v5052_v11  ;;  %v5697_v18 = vpop.f32.mrf.mxu0  ;;  %v14466_v6 = vld [vmem:[%s17337_s5 + $0x110] ss:$8 sps:$4 sm:$0xff]  }
 0x498   : > { %v14120_v20 = vpop.f32.mrf.mxu1  ;;  %7789 = vmatpush1.bf16.msra.mxu1 %v14448_v4 }
 0x499   : > { %6301 = vst [vmem:[#allocation3 + $0x58] sm:$0xff] %v15922_v15  ;;  %v6186_v25 = vmul.f32 0.2, %v6128_v16  ;;  %v5948_v26 = vadd.f32 %v5697_v18, %v5303_v17  ;;  %v14244_v42 = vpop.f32.mrf.mxu0  ;;  %8518 = vmatpush1.bf16.msra.mxu0 %v14451_v8  ;;  %7790 = vmatprep.subr.bf16.mxu1 %v14456_v10  ;;  %v5249_v10 = vld [vmem:[#allocation3 + $0x88] sm:$0xff]  ;;  %v6400_v18 = vpack.c.bf16 %v15886_v43, %v15868_v57 }
 0x49a   : > { %v5057_v47 = vpop.f32.mrf.mxu1  ;;  %6569 = vmatmul.mubr.bf16.gmra.mxu1 %v6398_v22  ;;  %8519 = vmatprep.subr.bf16.mxu0 %v14459_v14  ;;  %v6893_v20 = vld [vmem:[#allocation3 + $0x41] sm:$0xff]  ;;  %v5250_v42 = vld [vmem:[#allocation3 + $0x90] sm:$0xff] }
 0x49b   : > { %v15940_v31 = vmax.f32 %v6128_v16, %v6186_v25  ;;  %v6129_v33 = vadd.f32 %v15795_v21, %v5948_v26  ;;  %v5304_v34 = vadd.f32 %v5246_v29, %v5057_v47  ;;  %v5702_v35 = vpop.f32.mrf.mxu0  ;;  %7106 = vmatmul.mubr.bf16.gmra.mxu0 %v6935_v27  ;;  %6578 = vmatprep.mubr.bf16.mxu1 %v14585_v0 }
 0x49c   : > { %v14123_v36 = vpop.f32.mrf.mxu1  ;;  %7115 = vmatprep.mubr.bf16.mxu0 %v14585_v0  ;;  %7791 = vmatpush1.bf16.msra.mxu1 %v14454_v24  ;;  %v6894_v11 = vld [vmem:[#allocation3 + $0x49] sm:$0xff] }
 0x49d   : > { %6302 = vst [vmem:[#allocation3 + $0x60] sm:$0xff] %v15940_v31  ;;  %v6187_v38 = vmul.f32 0.2, %v6129_v33  ;;  %v5949_v39 = vadd.f32 %v5702_v35, %v5304_v34  ;;  %v14247_v40 = vpop.f32.mrf.mxu0  ;;  %8520 = vmatpush1.bf16.msra.mxu0 %v14457_v28  ;;  %7792 = vmatprep.subr.bf16.mxu1 %v14462_v32  ;;  %v6937_v25 = vpack.c.bf16 %v6894_v11, %v6893_v20  ;;  %v14471_v34 = vld [vmem:[%s17337_s5 + $0x194] ss:$8 sps:$4 sm:$0xff]  }
 0x49e   : > { %v5060_v44 = vpop.f32.mrf.mxu1  ;;  %8521 = vmatprep.subr.bf16.mxu0 %v14465_v30  ;;  %v5251_v36 = vld [vmem:[#allocation3 + $0x98] sm:$0xff] }
 0x49f   : > { %v15952_v48 = vmax.f32 %v6129_v33, %v6187_v38  ;;  %v6130_v49 = vadd.f32 %v15795_v21, %v5949_v39  ;;  %v5305_v51 = vadd.f32 %v5247_v45, %v5060_v44  ;;  %v5705_v52 = vpop.f32.mrf.mxu0  ;;  %v14469_v33 = vld [vmem:[%s17337_s5 + $0x190] ss:$8 sps:$4 sm:$0xff]   ;;  %v6401_v45 = vpack.c.bf16 %v15922_v15, %v15904_v61 }
 0x4a0   : > { %v14124_v53 = vpop.f32.mrf.mxu1  ;;  %7793 = vmatpush1.bf16.msra.mxu1 %v14460_v37  ;;  %v6895_v46 = vld [vmem:[#allocation3 + $0x51] sm:$0xff] }
 0x4a1   : > { %6303 = vst [vmem:[#allocation3 + $0x68] sm:$0xff] %v15952_v48  ;;  %v6188_v55 = vmul.f32 0.2, %v6130_v49  ;;  %v5950_v56 = vadd.f32 %v5705_v52, %v5305_v51  ;;  %v14248_v5 = vpop.f32.mrf.mxu0  ;;  %8522 = vmatpush1.bf16.msra.mxu0 %v14463_v41  ;;  %7794 = vmatprep.subr.bf16.mxu1 %v14468_v7  ;;  %v6402_v7 = vpack.c.bf16 %v15952_v48, %v15940_v31 }
 0x4a2   : > { %v5065_v58 = vpop.f32.mrf.mxu1  ;;  %6579 = vmatmul.mubr.bf16.gmra.mxu1 %v6399_v2  ;;  %8523 = vmatprep.subr.bf16.mxu0 %v14471_v34 }
 0x4a3   : > { %v15958_v62 = vmax.f32 %v6130_v49, %v6188_v55  ;;  %v6131_v63 = vadd.f32 %v15795_v21, %v5950_v56  ;;  %v5306_v1 = vadd.f32 %v5248_v59, %v5065_v58  ;;  %v5710_v3 = vpop.f32.mrf.mxu0  ;;  %7116 = vmatmul.mubr.bf16.gmra.mxu0 %v6936_v19  ;;  %6588 = vmatprep.mubr.bf16.mxu1 %v14585_v0 }
 0x4a4   : > { %v14127_v60 = vpop.f32.mrf.mxu1  ;;  %7125 = vmatprep.mubr.bf16.mxu0 %v14585_v0  ;;  %7795 = vmatpush1.bf16.msra.mxu1 %v14466_v6  ;;  %v6896_v37 = vld [vmem:[#allocation3 + $0x59] sm:$0xff] }
 0x4a5   : > { %6304 = vst [vmem:[#allocation3 + $0x70] sm:$0xff] %v15958_v62  ;;  %v6189_v9 = vmul.f32 0.2, %v6131_v63  ;;  %v5951_v4 = vadd.f32 %v5710_v3, %v5306_v1  ;;  %v14251_v50 = vpop.f32.mrf.mxu0  ;;  %8524 = vmatpush1.bf16.msra.mxu0 %v14469_v33  ;;  %v6938_v53 = vpack.c.bf16 %v6896_v37, %v6895_v46  ;;  %v5253_v1 = vld [vmem:[#allocation3 + $0xa8] sm:$0xff] }
 0x4a6   : > { %v5068_v8 = vpop.f32.mrf.mxu1 }
 0x4a7   : > { %v15970_v12 = vmax.f32 %v6131_v63, %v6189_v9  ;;  %v6132_v13 = vadd.f32 %v15795_v21, %v5951_v4  ;;  %v5307_v14 = vadd.f32 %v5249_v10, %v5068_v8  ;;  %v5713_v16 = vpop.f32.mrf.mxu0 }
 0x4a8   : > { %v14128_v17 = vpop.f32.mrf.mxu1  ;;  %v6897_v8 = vld [vmem:[#allocation3 + $0x61] sm:$0xff] }
 0x4a9   : > { %6305 = vst [vmem:[#allocation3 + $0x78] sm:$0xff] %v15970_v12  ;;  %v6190_v22 = vmul.f32 0.2, %v6132_v13  ;;  %v5952_v23 = vadd.f32 %v5713_v16, %v5307_v14  ;;  %v14252_v24 = vpop.f32.mrf.mxu0  ;;  %v5254_v17 = vld [vmem:[#allocation3 + $0xb0] sm:$0xff]  ;;  %v6403_v34 = vpack.c.bf16 %v15970_v12, %v15958_v62 }
 0x4aa   : > { %v5073_v26 = vpop.f32.mrf.mxu1  ;;  %6589 = vmatmul.mubr.bf16.gmra.mxu1 %v6400_v18 }
 0x4ab   : > { %v15976_v27 = vmax.f32 %v6132_v13, %v6190_v22  ;;  %v6133_v28 = vadd.f32 %v15795_v21, %v5952_v23  ;;  %v5308_v32 = vadd.f32 %v5250_v42, %v5073_v26  ;;  %v5718_v47 = vpop.f32.mrf.mxu0  ;;  %7126 = vmatmul.mubr.bf16.gmra.mxu0 %v6937_v25  ;;  %6598 = vmatprep.mubr.bf16.mxu1 %v14585_v0  ;;  %v14472_v26 = vld [vmem:[%s17337_s5 + $0x100] ss:$8 sps:$4 sm:$0xff]   ;;  %v14474_v42 = vld [vmem:[%s17337_s5 + $0x104] ss:$8 sps:$4 sm:$0xff]  }
 0x4ac   : > { %v14131_v57 = vpop.f32.mrf.mxu1  ;;  %7135 = vmatprep.mubr.bf16.mxu0 %v14585_v0  ;;  %v6898_v3 = vld [vmem:[#allocation3 + $0x69] sm:$0xff]  ;;  %7796 = vmatprep.subr.bf16.mxu1 %v14474_v42 }
 0x4ad   : > { %6306 = vst [vmem:[#allocation3 + $0x80] sm:$0xff] %v15976_v27  ;;  %v6191_v43 = vmul.f32 0.2, %v6133_v28  ;;  %v5953_v29 = vadd.f32 %v5718_v47, %v5308_v32  ;;  %v14255_v30 = vpop.f32.mrf.mxu0  ;;  %v6939_v14 = vpack.c.bf16 %v6898_v3, %v6897_v8  ;;  %v5255_v32 = vld [vmem:[#allocation3 + $0xb8] sm:$0xff]  ;;  %7797 = vmatpush1.bf16.msra.mxu1 %v14472_v26  ;;  %v5258_v8 = vld [vmem:[#allocation3 + $0xd0] sm:$0xff] }
 0x4ae   : > { %v5076_v35 = vpop.f32.mrf.mxu1 }
 0x4af   : > { %v15988_v38 = vmax.f32 %v6133_v28, %v6191_v43  ;;  %v6134_v39 = vadd.f32 %v15795_v21, %v5953_v29  ;;  %v5309_v40 = vadd.f32 %v5251_v36, %v5076_v35  ;;  %v5721_v41 = vpop.f32.mrf.mxu0 }
 0x4b0   : > { %v14132_v44 = vpop.f32.mrf.mxu1  ;;  %v6899_v35 = vld [vmem:[#allocation3 + $0x71] sm:$0xff] }
 0x4b1   : > { %6307 = vst [vmem:[#allocation3 + $0x88] sm:$0xff] %v15988_v38  ;;  %v6192_v49 = vmul.f32 0.2, %v6134_v39  ;;  %v5954_v51 = vadd.f32 %v5721_v41, %v5309_v40  ;;  %v14256_v52 = vpop.f32.mrf.mxu0  ;;  %v5256_v44 = vld [vmem:[#allocation3 + $0xc0] sm:$0xff] }
 0x4b2   : > { %v5081_v2 = vpop.f32.mrf.mxu1  ;;  %6599 = vmatmul.mubr.bf16.gmra.mxu1 %v6401_v45 }
 0x4b3   : > { %v15994_v55 = vmax.f32 %v6134_v39, %v6192_v49  ;;  %v6135_v56 = vadd.f32 %v15795_v21, %v5954_v51  ;;  %v5310_v5 = vadd.f32 %v5252_v54, %v5081_v2  ;;  %v5726_v19 = vpop.f32.mrf.mxu0  ;;  %7136 = vmatmul.mubr.bf16.gmra.mxu0 %v6938_v53  ;;  %6608 = vmatprep.mubr.bf16.mxu1 %v14585_v0  ;;  %v14475_v2 = vld [vmem:[%s17337_s5 + $0x180] ss:$8 sps:$4 sm:$0xff]   ;;  %v14477_v54 = vld [vmem:[%s17337_s5 + $0x184] ss:$8 sps:$4 sm:$0xff]  }
 0x4b4   : > { %v14135_v61 = vpop.f32.mrf.mxu1  ;;  %7145 = vmatprep.mubr.bf16.mxu0 %v14585_v0  ;;  %v6900_v47 = vld [vmem:[#allocation3 + $0x79] sm:$0xff]  ;;  %8525 = vmatprep.subr.bf16.mxu0 %v14477_v54 }
 0x4b5   : > { %6308 = vst [vmem:[#allocation3 + $0x90] sm:$0xff] %v15994_v55  ;;  %v6193_v15 = vmul.f32 0.2, %v6135_v56  ;;  %v5955_v58 = vadd.f32 %v5726_v19, %v5310_v5  ;;  %v14259_v59 = vpop.f32.mrf.mxu0  ;;  %v6940_v40 = vpack.c.bf16 %v6900_v47, %v6899_v35  ;;  %v5257_v5 = vld [vmem:[#allocation3 + $0xc8] sm:$0xff]  ;;  %8526 = vmatpush1.bf16.msra.mxu0 %v14475_v2  ;;  %v14483_v35 = vld [vmem:[%s17337_s5 + $0x2f4] ss:$8 sps:$4 sm:$0xff]  }
 0x4b6   : > { %v5084_v63 = vpop.f32.mrf.mxu1  ;;  %9969 = vmatprep.subr.bf16.mxu0 %v14483_v35 }
 0x4b7   : > { %v16000_v60 = vmax.f32 %v6135_v56, %v6193_v15  ;;  %v6136_v9 = vadd.f32 %v15795_v21, %v5955_v58  ;;  %v5311_v4 = vadd.f32 %v5253_v1, %v5084_v63  ;;  %v5729_v50 = vpop.f32.mrf.mxu0  ;;  %v6404_v1 = vpack.c.bf16 %v15988_v38, %v15976_v27 }
 0x4b8   : > { %v14136_v6 = vpop.f32.mrf.mxu1  ;;  %v6901_v3 = vld [vmem:[#allocation3 + $0x81] sm:$0xff] }
 0x4b9   : > { %6309 = vst [vmem:[#allocation3 + $0x98] sm:$0xff] %v16000_v60  ;;  %v6194_v10 = vmul.f32 0.2, %v6136_v9  ;;  %v5956_v11 = vadd.f32 %v5729_v50, %v5311_v4  ;;  %v14260_v13 = vpop.f32.mrf.mxu0  ;;  %v6405_v42 = vpack.c.bf16 %v16000_v60, %v15994_v55 }
 0x4ba   : > { %v5089_v16 = vpop.f32.mrf.mxu1  ;;  %6609 = vmatmul.mubr.bf16.gmra.mxu1 %v6402_v7 }
 0x4bb   : > { %v16006_v18 = vmax.f32 %v6136_v9, %v6194_v10  ;;  %v6137_v20 = vadd.f32 %v15795_v21, %v5956_v11  ;;  %v5312_v22 = vadd.f32 %v5254_v17, %v5089_v16  ;;  %v5734_v23 = vpop.f32.mrf.mxu0  ;;  %7146 = vmatmul.mubr.bf16.gmra.mxu0 %v6939_v14  ;;  %6618 = vmatprep.mubr.bf16.mxu1 %v14585_v0 }
 0x4bc   : > { %v14139_v31 = vpop.f32.mrf.mxu1  ;;  %7155 = vmatprep.mubr.bf16.mxu0 %v14585_v0  ;;  %v6902_v19 = vld [vmem:[#allocation3 + $0x89] sm:$0xff] }
 0x4bd   : > { %6310 = vst [vmem:[#allocation3 + $0xa0] sm:$0xff] %v16006_v18  ;;  %v6195_v48 = vmul.f32 0.2, %v6137_v20  ;;  %v5957_v24 = vadd.f32 %v5734_v23, %v5312_v22  ;;  %v14263_v25 = vpop.f32.mrf.mxu0  ;;  %v6941_v6 = vpack.c.bf16 %v6902_v19, %v6901_v3  ;;  %v5259_v22 = vld [vmem:[#allocation3 + $0xd8] sm:$0xff] }
 0x4be   : > { %v5092_v28 = vpop.f32.mrf.mxu1 }
 0x4bf   : > { %v16018_v57 = vmax.f32 %v6137_v20, %v6195_v48  ;;  %v6138_v43 = vadd.f32 %v15795_v21, %v5957_v24  ;;  %v5313_v29 = vadd.f32 %v5255_v32, %v5092_v28  ;;  %v5737_v30 = vpop.f32.mrf.mxu0 }
 0x4c0   : > { %v14140_v33 = vpop.f32.mrf.mxu1  ;;  %v6903_v28 = vld [vmem:[#allocation3 + $0x91] sm:$0xff] }
 0x4c1   : > { %6311 = vst [vmem:[#allocation3 + $0xa8] sm:$0xff] %v16018_v57  ;;  %v6196_v36 = vmul.f32 0.2, %v6138_v43  ;;  %v5958_v37 = vadd.f32 %v5737_v30, %v5313_v29  ;;  %v14264_v39 = vpop.f32.mrf.mxu0  ;;  %v14480_v30 = vld [vmem:[%s17337_s5 + $0x274] ss:$8 sps:$4 sm:$0xff]   ;;  %v6406_v54 = vpack.c.bf16 %v16018_v57, %v16006_v18 }
 0x4c2   : > { %v5097_v41 = vpop.f32.mrf.mxu1  ;;  %6619 = vmatmul.mubr.bf16.gmra.mxu1 %v6403_v34  ;;  %v5260_v34 = vld [vmem:[#allocation3 + $0xe0] sm:$0xff]  ;;  %9240 = vmatprep.subr.bf16.mxu1 %v14480_v30 }
 0x4c3   : > { %v16024_v45 = vmax.f32 %v6138_v43, %v6196_v36  ;;  %v6139_v46 = vadd.f32 %v15795_v21, %v5958_v37  ;;  %v5314_v49 = vadd.f32 %v5256_v44, %v5097_v41  ;;  %v5742_v51 = vpop.f32.mrf.mxu0  ;;  %7156 = vmatmul.mubr.bf16.gmra.mxu0 %v6940_v40  ;;  %6628 = vmatprep.mubr.bf16.mxu1 %v14585_v0 }
 0x4c4   : > { %v14143_v62 = vpop.f32.mrf.mxu1  ;;  %7165 = vmatprep.mubr.bf16.mxu0 %v14585_v0  ;;  %v6904_v23 = vld [vmem:[#allocation3 + $0x99] sm:$0xff] }
 0x4c5   : > { %6312 = vst [vmem:[#allocation3 + $0xb0] sm:$0xff] %v16024_v45  ;;  %v6197_v12 = vmul.f32 0.2, %v6139_v46  ;;  %v5959_v52 = vadd.f32 %v5742_v51, %v5314_v49  ;;  %v14267_v53 = vpop.f32.mrf.mxu0  ;;  %v6942_v29 = vpack.c.bf16 %v6904_v23, %v6903_v28  ;;  %v5261_v49 = vld [vmem:[#allocation3 + $0xe8] sm:$0xff] }
 0x4c6   : > { %v5100_v56 = vpop.f32.mrf.mxu1 }
 0x4c7   : > { %v16036_v61 = vmax.f32 %v6139_v46, %v6197_v12  ;;  %v6140_v15 = vadd.f32 %v15795_v21, %v5959_v52  ;;  %v5315_v58 = vadd.f32 %v5257_v5, %v5100_v56  ;;  %v5745_v59 = vpop.f32.mrf.mxu0 }
 0x4c8   : > { %v14144_v63 = vpop.f32.mrf.mxu1  ;;  %v6905_v56 = vld [vmem:[#allocation3 + $0xa1] sm:$0xff] }
 0x4c9   : > { %6313 = vst [vmem:[#allocation3 + $0xb8] sm:$0xff] %v16036_v61  ;;  %v6198_v9 = vmul.f32 0.2, %v6140_v15  ;;  %v5960_v4 = vadd.f32 %v5745_v59, %v5315_v58  ;;  %v14268_v50 = vpop.f32.mrf.mxu0  ;;  %v5262_v63 = vld [vmem:[#allocation3 + $0xf0] sm:$0xff] }
 0x4ca   : > { %v5105_v7 = vpop.f32.mrf.mxu1  ;;  %6629 = vmatmul.mubr.bf16.gmra.mxu1 %v6404_v1 }
 0x4cb   : > { %v16042_v10 = vmax.f32 %v6140_v15, %v6198_v9  ;;  %v6141_v11 = vadd.f32 %v15795_v21, %v5960_v4  ;;  %v5316_v13 = vadd.f32 %v5258_v8, %v5105_v7  ;;  %v5750_v14 = vpop.f32.mrf.mxu0  ;;  %7166 = vmatmul.mubr.bf16.gmra.mxu0 %v6941_v6  ;;  %6638 = vmatprep.mubr.bf16.mxu1 %v14585_v0  ;;  %v5263_v8 = vld [vmem:[#allocation3 + $0xf8] sm:$0xff] }
 0x4cc   : > { %v14147_v27 = vpop.f32.mrf.mxu1  ;;  %7175 = vmatprep.mubr.bf16.mxu0 %v14585_v0  ;;  %v6906_v51 = vld [vmem:[#allocation3 + $0xa9] sm:$0xff] }
 0x4cd   : > { %6314 = vst [vmem:[#allocation3 + $0xc0] sm:$0xff] %v16042_v10  ;;  %v6199_v38 = vmul.f32 0.2, %v6141_v11  ;;  %v5961_v16 = vadd.f32 %v5750_v14, %v5316_v13  ;;  %v14271_v17 = vpop.f32.mrf.mxu0  ;;  %v6943_v58 = vpack.c.bf16 %v6906_v51, %v6905_v56 }
 0x4ce   : > { %v5108_v20 = vpop.f32.mrf.mxu1  ;;  %v6407_v17 = vpack.c.bf16 %v16036_v61, %v16024_v45 }
 0x4cf   : > { %v16048_v31 = vmax.f32 %v6141_v11, %v6199_v38  ;;  %v6142_v48 = vadd.f32 %v15795_v21, %v5961_v16  ;;  %v5317_v24 = vadd.f32 %v5259_v22, %v5108_v20  ;;  %v5753_v25 = vpop.f32.mrf.mxu0 }
 0x4d0   : > { %v14148_v26 = vpop.f32.mrf.mxu1  ;;  %v6907_v20 = vld [vmem:[#allocation3 + $0xb1] sm:$0xff] }
 0x4d1   : > { %6315 = vst [vmem:[#allocation3 + $0xc8] sm:$0xff] %v16048_v31  ;;  %v6200_v32 = vmul.f32 0.2, %v6142_v48  ;;  %v5962_v47 = vadd.f32 %v5753_v25, %v5317_v24  ;;  %v14272_v43 = vpop.f32.mrf.mxu0  ;;  %v5264_v26 = vld [vmem:[#allocation3 + $0x100] sm:$0xff] }
 0x4d2   : > { %v5113_v33 = vpop.f32.mrf.mxu1  ;;  %6639 = vmatmul.mubr.bf16.gmra.mxu1 %v6405_v42 }
 0x4d3   : > { %v16060_v36 = vmax.f32 %v6142_v48, %v6200_v32  ;;  %v6143_v55 = vadd.f32 %v15795_v21, %v5962_v47  ;;  %v5318_v60 = vadd.f32 %v5260_v34, %v5113_v33  ;;  %v5758_v37 = vpop.f32.mrf.mxu0  ;;  %7176 = vmatmul.mubr.bf16.gmra.mxu0 %v6942_v29  ;;  %6648 = vmatprep.mubr.bf16.mxu1 %v14585_v0  ;;  %v5265_v33 = vld [vmem:[#allocation3 + $0x108] sm:$0xff] }
 0x4d4   : > { %v14151_v39 = vpop.f32.mrf.mxu1  ;;  %7185 = vmatprep.mubr.bf16.mxu0 %v14585_v0  ;;  %v6908_v11 = vld [vmem:[#allocation3 + $0xb9] sm:$0xff] }
 0x4d5   : > { %6316 = vst [vmem:[#allocation3 + $0xd0] sm:$0xff] %v16060_v36  ;;  %v6201_v40 = vmul.f32 0.2, %v6143_v55  ;;  %v5963_v41 = vadd.f32 %v5758_v37, %v5318_v60  ;;  %v14275_v44 = vpop.f32.mrf.mxu0  ;;  %v6944_v24 = vpack.c.bf16 %v6908_v11, %v6907_v20 }
 0x4d6   : > { %v5116_v46 = vpop.f32.mrf.mxu1 }
 0x4d7   : > { %v16066_v62 = vmax.f32 %v6143_v55, %v6201_v40  ;;  %v6144_v12 = vadd.f32 %v15795_v21, %v5963_v41  ;;  %v5319_v52 = vadd.f32 %v5261_v49, %v5116_v46  ;;  %v5761_v53 = vpop.f32.mrf.mxu0  ;;  %v16077_v21 = vld [vmem:[%s17336_s4] ss:$0 sm:$0xff]  ;;  %v6408_v40 = vpack.c.bf16 %v16048_v31, %v16042_v10 }
 0x4d8   : > { %v14152_v2 = vpop.f32.mrf.mxu1  ;;  %v6909_v41 = vld [vmem:[#allocation3 + $0xc1] sm:$0xff] }
 0x4d9   : > { %6317 = vst [vmem:[#allocation3 + $0xd8] sm:$0xff] %v16066_v62  ;;  %v6202_v5 = vmul.f32 0.2, %v6144_v12  ;;  %v5964_v19 = vadd.f32 %v5761_v53, %v5319_v52  ;;  %v14276_v15 = vpop.f32.mrf.mxu0  ;;  %v5266_v52 = vld [vmem:[#allocation3 + $0x110] sm:$0xff] }
 0x4da   : > { %v5121_v59 = vpop.f32.mrf.mxu1  ;;  %6649 = vmatmul.mubr.bf16.gmra.mxu1 %v6406_v54 }
 0x4db   : > { %v16072_v1 = vmax.f32 %v6144_v12, %v6202_v5  ;;  %v6145_v3 = vadd.f32 %v16077_v21, %v5964_v19  ;;  %v5320_v18 = vadd.f32 %v5262_v63, %v5121_v59  ;;  %v5766_v57 = vpop.f32.mrf.mxu0  ;;  %7186 = vmatmul.mubr.bf16.gmra.mxu0 %v6943_v58  ;;  %6658 = vmatprep.mubr.bf16.mxu1 %v14585_v0  ;;  %v5267_v58 = vld [vmem:[#allocation3 + $0x118] sm:$0xff] }
 0x4dc   : > { %v14155_v9 = vpop.f32.mrf.mxu1  ;;  %7195 = vmatprep.mubr.bf16.mxu0 %v14585_v0  ;;  %v6910_v34 = vld [vmem:[#allocation3 + $0xc9] sm:$0xff] }
 0x4dd   : > { %6318 = vst [vmem:[#allocation3 + $0xe0] sm:$0xff] %v16072_v1  ;;  %v6203_v4 = vmul.f32 0.2, %v6145_v3  ;;  %v5965_v50 = vadd.f32 %v5766_v57, %v5320_v18  ;;  %v14279_v6 = vpop.f32.mrf.mxu0  ;;  %v6945_v51 = vpack.c.bf16 %v6910_v34, %v6909_v41 }
 0x4de   : > { %v5124_v7 = vpop.f32.mrf.mxu1 }
 0x4df   : > { %v16083_v13 = vmax.f32 %v6145_v3, %v6203_v4  ;;  %v6146_v14 = vadd.f32 %v16077_v21, %v5965_v50  ;;  %v5321_v27 = vadd.f32 %v5263_v8, %v5124_v7  ;;  %v5769_v38 = vpop.f32.mrf.mxu0  ;;  %v6409_v4 = vpack.c.bf16 %v16066_v62, %v16060_v36 }
 0x4e0   : > { %v14156_v16 = vpop.f32.mrf.mxu1  ;;  %v6911_v50 = vld [vmem:[#allocation3 + $0xd1] sm:$0xff] }
 0x4e1   : > { %6319 = vst [vmem:[#allocation3 + $0xe8] sm:$0xff] %v16083_v13  ;;  %v6204_v22 = vmul.f32 0.2, %v6146_v14  ;;  %v5966_v23 = vadd.f32 %v5769_v38, %v5321_v27  ;;  %v14280_v48 = vpop.f32.mrf.mxu0  ;;  %v5268_v27 = vld [vmem:[#allocation3 + $0x120] sm:$0xff] }
 0x4e2   : > { %v5129_v25 = vpop.f32.mrf.mxu1  ;;  %6659 = vmatmul.mubr.bf16.gmra.mxu1 %v6407_v17 }
 0x4e3   : > { %v16089_v42 = vmax.f32 %v6146_v14, %v6204_v22  ;;  %v6147_v28 = vadd.f32 %v16077_v21, %v5966_v23  ;;  %v5322_v32 = vadd.f32 %v5264_v26, %v5129_v25  ;;  %v5774_v47 = vpop.f32.mrf.mxu0  ;;  %7196 = vmatmul.mubr.bf16.gmra.mxu0 %v6944_v24  ;;  %6668 = vmatprep.mubr.bf16.mxu1 %v14585_v0  ;;  %v5269_v24 = vld [vmem:[#allocation3 + $0x128] sm:$0xff] }
 0x4e4   : > { %v14159_v45 = vpop.f32.mrf.mxu1  ;;  %7205 = vmatprep.mubr.bf16.mxu0 %v14585_v0  ;;  %v6912_v59 = vld [vmem:[#allocation3 + $0xd9] sm:$0xff] }
 0x4e5   : > { %6320 = vst [vmem:[#allocation3 + $0xf0] sm:$0xff] %v16089_v42  ;;  %v6205_v61 = vmul.f32 0.2, %v6147_v28  ;;  %v5967_v43 = vadd.f32 %v5774_v47, %v5322_v32  ;;  %v14283_v29 = vpop.f32.mrf.mxu0  ;;  %v6946_v11 = vpack.c.bf16 %v6912_v59, %v6911_v50 }
 0x4e6   : > { %v5132_v30 = vpop.f32.mrf.mxu1 }
 0x4e7   : > { %v16095_v35 = vmax.f32 %v6147_v28, %v6205_v61  ;;  %v6148_v55 = vadd.f32 %v16077_v21, %v5967_v43  ;;  %v5323_v60 = vadd.f32 %v5265_v33, %v5132_v30  ;;  %v5777_v37 = vpop.f32.mrf.mxu0  ;;  %v6410_v61 = vpack.c.bf16 %v16083_v13, %v16072_v1 }
 0x4e8   : > { %v14160_v39 = vpop.f32.mrf.mxu1  ;;  %v6913_v43 = vld [vmem:[#allocation3 + $0xe1] sm:$0xff] }
 0x4e9   : > { %6321 = vst [vmem:[#allocation3 + $0xf8] sm:$0xff] %v16095_v35  ;;  %v6206_v44 = vmul.f32 0.2, %v6148_v55  ;;  %v5968_v46 = vadd.f32 %v5777_v37, %v5323_v60  ;;  %v14284_v49 = vpop.f32.mrf.mxu0  ;;  %v5270_v60 = vld [vmem:[#allocation3 + $0x130] sm:$0xff] }
 0x4ea   : > { %v5137_v12 = vpop.f32.mrf.mxu1  ;;  %6669 = vmatmul.mubr.bf16.gmra.mxu1 %v6408_v40 }
 0x4eb   : > { %v16101_v53 = vmax.f32 %v6148_v55, %v6206_v44  ;;  %v6149_v2 = vadd.f32 %v16077_v21, %v5968_v46  ;;  %v5324_v54 = vadd.f32 %v5266_v52, %v5137_v12  ;;  %v5782_v56 = vpop.f32.mrf.mxu0  ;;  %7206 = vmatmul.mubr.bf16.gmra.mxu0 %v6945_v51  ;;  %6678 = vmatprep.mubr.bf16.mxu1 %v14585_v0  ;;  %v5271_v51 = vld [vmem:[#allocation3 + $0x138] sm:$0xff] }
 0x4ec   : > { %v14163_v10 = vpop.f32.mrf.mxu1  ;;  %7215 = vmatprep.mubr.bf16.mxu0 %v14585_v0  ;;  %v6914_v25 = vld [vmem:[#allocation3 + $0xe9] sm:$0xff] }
 0x4ed   : > { %6322 = vst [vmem:[#allocation3 + $0x100] sm:$0xff] %v16101_v53  ;;  %v6207_v31 = vmul.f32 0.2, %v6149_v2  ;;  %v5969_v5 = vadd.f32 %v5782_v56, %v5324_v54  ;;  %v14287_v19 = vpop.f32.mrf.mxu0  ;;  %v6947_v34 = vpack.c.bf16 %v6914_v25, %v6913_v43 }
 0x4ee   : > { %v5140_v15 = vpop.f32.mrf.mxu1 }
 0x4ef   : > { %v16107_v63 = vmax.f32 %v6149_v2, %v6207_v31  ;;  %v6150_v3 = vadd.f32 %v16077_v21, %v5969_v5  ;;  %v5325_v18 = vadd.f32 %v5267_v58, %v5140_v15  ;;  %v5785_v57 = vpop.f32.mrf.mxu0  ;;  %v6411_v31 = vpack.c.bf16 %v16095_v35, %v16089_v42 }
 0x4f0   : > { %v14164_v9 = vpop.f32.mrf.mxu1  ;;  %v6915_v5 = vld [vmem:[#allocation3 + $0xf1] sm:$0xff] }
 0x4f1   : > { %6323 = vst [vmem:[#allocation3 + $0x108] sm:$0xff] %v16107_v63  ;;  %v6208_v6 = vmul.f32 0.2, %v6150_v3  ;;  %v5970_v7 = vadd.f32 %v5785_v57, %v5325_v18  ;;  %v14288_v8 = vpop.f32.mrf.mxu0  ;;  %v5272_v18 = vld [vmem:[#allocation3 + $0x140] sm:$0xff] }
 0x4f2   : > { %v5145_v14 = vpop.f32.mrf.mxu1  ;;  %6679 = vmatmul.mubr.bf16.gmra.mxu1 %v6409_v4 }
 0x4f3   : > { %v16113_v38 = vmax.f32 %v6150_v3, %v6208_v6  ;;  %v6151_v16 = vadd.f32 %v16077_v21, %v5970_v7  ;;  %v5326_v17 = vadd.f32 %v5268_v27, %v5145_v14  ;;  %v5790_v20 = vpop.f32.mrf.mxu0  ;;  %7216 = vmatmul.mubr.bf16.gmra.mxu0 %v6946_v11  ;;  %6688 = vmatprep.mubr.bf16.mxu1 %v14585_v0  ;;  %v5273_v11 = vld [vmem:[#allocation3 + $0x148] sm:$0xff] }
 0x4f4   : > { %v14167_v36 = vpop.f32.mrf.mxu1  ;;  %7225 = vmatprep.mubr.bf16.mxu0 %v14585_v0  ;;  %v6916_v12 = vld [vmem:[#allocation3 + $0xf9] sm:$0xff] }
 0x4f5   : > { %6324 = vst [vmem:[#allocation3 + $0x110] sm:$0xff] %v16113_v38  ;;  %v6209_v62 = vmul.f32 0.2, %v6151_v16  ;;  %v5971_v22 = vadd.f32 %v5790_v20, %v5326_v17  ;;  %v14291_v23 = vpop.f32.mrf.mxu0  ;;  %v6948_v59 = vpack.c.bf16 %v6916_v12, %v6915_v5 }
 0x4f6   : > { %v5148_v48 = vpop.f32.mrf.mxu1 }
 0x4f7   : > { %v16119_v26 = vmax.f32 %v6151_v16, %v6209_v62  ;;  %v6152_v28 = vadd.f32 %v16077_v21, %v5971_v22  ;;  %v5327_v32 = vadd.f32 %v5269_v24, %v5148_v48  ;;  %v5793_v47 = vpop.f32.mrf.mxu0  ;;  %v6412_v62 = vpack.c.bf16 %v16107_v63, %v16101_v53 }
 0x4f8   : > { %v14168_v45 = vpop.f32.mrf.mxu1  ;;  %v6917_v22 = vld [vmem:[#allocation3 + $0x101] sm:$0xff] }
 0x4f9   : > { %6325 = vst [vmem:[#allocation3 + $0x118] sm:$0xff] %v16119_v26  ;;  %v6210_v29 = vmul.f32 0.2, %v6152_v28  ;;  %v5972_v30 = vadd.f32 %v5793_v47, %v5327_v32  ;;  %v14292_v33 = vpop.f32.mrf.mxu0  ;;  %v5274_v32 = vld [vmem:[#allocation3 + $0x150] sm:$0xff] }
 0x4fa   : > { %v5153_v55 = vpop.f32.mrf.mxu1  ;;  %6689 = vmatmul.mubr.bf16.gmra.mxu1 %v6410_v61 }
 0x4fb   : > { %v16125_v37 = vmax.f32 %v6152_v28, %v6210_v29  ;;  %v6153_v39 = vadd.f32 %v16077_v21, %v5972_v30  ;;  %v5328_v40 = vadd.f32 %v5270_v60, %v5153_v55  ;;  %v5798_v41 = vpop.f32.mrf.mxu0  ;;  %7226 = vmatmul.mubr.bf16.gmra.mxu0 %v6947_v34  ;;  %6698 = vmatprep.mubr.bf16.mxu1 %v14585_v0  ;;  %v5275_v34 = vld [vmem:[#allocation3 + $0x158] sm:$0xff] }
 0x4fc   : > { %v14171_v1 = vpop.f32.mrf.mxu1  ;;  %7235 = vmatprep.mubr.bf16.mxu0 %v14585_v0  ;;  %v6918_v14 = vld [vmem:[#allocation3 + $0x109] sm:$0xff] }
 0x4fd   : > { %6326 = vst [vmem:[#allocation3 + $0x120] sm:$0xff] %v16125_v37  ;;  %v6211_v13 = vmul.f32 0.2, %v6153_v39  ;;  %v5973_v44 = vadd.f32 %v5798_v41, %v5328_v40  ;;  %v14295_v46 = vpop.f32.mrf.mxu0  ;;  %v6949_v25 = vpack.c.bf16 %v6918_v14, %v6917_v22 }
 0x4fe   : > { %v5156_v49 = vpop.f32.mrf.mxu1 }
 0x4ff   : > { %v16131_v52 = vmax.f32 %v6153_v39, %v6211_v13  ;;  %v6154_v2 = vadd.f32 %v16077_v21, %v5973_v44  ;;  %v5329_v54 = vadd.f32 %v5271_v51, %v5156_v49  ;;  %v5801_v56 = vpop.f32.mrf.mxu0  ;;  %v6413_v13 = vpack.c.bf16 %v16119_v26, %v16113_v38 }
 0x500   : > { %v14172_v10 = vpop.f32.mrf.mxu1  ;;  %v6919_v44 = vld [vmem:[#allocation3 + $0x111] sm:$0xff] }
 0x501   : > { %6327 = vst [vmem:[#allocation3 + $0x128] sm:$0xff] %v16131_v52  ;;  %v6212_v19 = vmul.f32 0.2, %v6154_v2  ;;  %v5974_v15 = vadd.f32 %v5801_v56, %v5329_v54  ;;  %v14296_v58 = vpop.f32.mrf.mxu0  ;;  %v5276_v54 = vld [vmem:[#allocation3 + $0x160] sm:$0xff] }
 0x502   : > { %v5161_v3 = vpop.f32.mrf.mxu1  ;;  %6699 = vmatmul.mubr.bf16.gmra.mxu1 %v6411_v31 }
 0x503   : > { %v16137_v57 = vmax.f32 %v6154_v2, %v6212_v19  ;;  %v6155_v9 = vadd.f32 %v16077_v21, %v5974_v15  ;;  %v5330_v4 = vadd.f32 %v5272_v18, %v5161_v3  ;;  %v5806_v50 = vpop.f32.mrf.mxu0  ;;  %7236 = vmatmul.mubr.bf16.gmra.mxu0 %v6948_v59  ;;  %6708 = vmatprep.mubr.bf16.mxu1 %v14585_v0  ;;  %v5277_v59 = vld [vmem:[#allocation3 + $0x168] sm:$0xff] }
 0x504   : > { %v14175_v42 = vpop.f32.mrf.mxu1  ;;  %7245 = vmatprep.mubr.bf16.mxu0 %v14585_v0  ;;  %v6920_v55 = vld [vmem:[#allocation3 + $0x119] sm:$0xff] }
 0x505   : > { %6328 = vst [vmem:[#allocation3 + $0x130] sm:$0xff] %v16137_v57  ;;  %v6213_v35 = vmul.f32 0.2, %v6155_v9  ;;  %v5975_v6 = vadd.f32 %v5806_v50, %v5330_v4  ;;  %v14299_v7 = vpop.f32.mrf.mxu0  ;;  %v6950_v12 = vpack.c.bf16 %v6920_v55, %v6919_v44 }
 0x506   : > { %v5164_v8 = vpop.f32.mrf.mxu1 }
 0x507   : > { %v16143_v27 = vmax.f32 %v6155_v9, %v6213_v35  ;;  %v6156_v16 = vadd.f32 %v16077_v21, %v5975_v6  ;;  %v5331_v17 = vadd.f32 %v5273_v11, %v5164_v8  ;;  %v5809_v20 = vpop.f32.mrf.mxu0  ;;  %v6414_v35 = vpack.c.bf16 %v16131_v52, %v16125_v37 }
 0x508   : > { %v14176_v36 = vpop.f32.mrf.mxu1  ;;  %v6921_v6 = vld [vmem:[#allocation3 + $0x121] sm:$0xff] }
 0x509   : > { %6329 = vst [vmem:[#allocation3 + $0x138] sm:$0xff] %v16143_v27  ;;  %v6214_v23 = vmul.f32 0.2, %v6156_v16  ;;  %v5976_v48 = vadd.f32 %v5809_v20, %v5331_v17  ;;  %v14300_v24 = vpop.f32.mrf.mxu0  ;;  %v5278_v17 = vld [vmem:[#allocation3 + $0x170] sm:$0xff] }
 0x50a   : > { %v5169_v28 = vpop.f32.mrf.mxu1  ;;  %6709 = vmatmul.mubr.bf16.gmra.mxu1 %v6412_v62 }
 0x50b   : > { %v16149_v47 = vmax.f32 %v6156_v16, %v6214_v23  ;;  %v6157_v45 = vadd.f32 %v16077_v21, %v5976_v48  ;;  %v5332_v61 = vadd.f32 %v5274_v32, %v5169_v28  ;;  %v5814_v43 = vpop.f32.mrf.mxu0  ;;  %7246 = vmatmul.mubr.bf16.gmra.mxu0 %v6949_v25  ;;  %6718 = vmatprep.mubr.bf16.mxu1 %v14585_v0  ;;  %v5279_v25 = vld [vmem:[#allocation3 + $0x178] sm:$0xff] }
 0x50c   : > { %v14179_v53 = vpop.f32.mrf.mxu1  ;;  %7255 = vmatprep.mubr.bf16.mxu0 %v14585_v0  ;;  %v6922_v3 = vld [vmem:[#allocation3 + $0x129] sm:$0xff] }
 0x50d   : > { %6330 = vst [vmem:[#allocation3 + $0x140] sm:$0xff] %v16149_v47  ;;  %v6215_v63 = vmul.f32 0.2, %v6157_v45  ;;  %v5977_v29 = vadd.f32 %v5814_v43, %v5332_v61  ;;  %v14303_v30 = vpop.f32.mrf.mxu0  ;;  %v6951_v14 = vpack.c.bf16 %v6922_v3, %v6921_v6 }
 0x50e   : > { %v5172_v33 = vpop.f32.mrf.mxu1 }
 0x50f   : > { %v16155_v60 = vmax.f32 %v6157_v45, %v6215_v63  ;;  %v6158_v39 = vadd.f32 %v16077_v21, %v5977_v29  ;;  %v5333_v40 = vadd.f32 %v5275_v34, %v5172_v33  ;;  %v5817_v41 = vpop.f32.mrf.mxu0  ;;  %v6415_v63 = vpack.c.bf16 %v16143_v27, %v16137_v57 }
 0x510   : > { %v14180_v1 = vpop.f32.mrf.mxu1  ;;  %v6923_v29 = vld [vmem:[#allocation3 + $0x131] sm:$0xff] }
 0x511   : > { %6331 = vst [vmem:[#allocation3 + $0x148] sm:$0xff] %v16155_v60  ;;  %v6216_v46 = vmul.f32 0.2, %v6158_v39  ;;  %v5978_v49 = vadd.f32 %v5817_v41, %v5333_v40  ;;  %v14304_v51 = vpop.f32.mrf.mxu0  ;;  %v5280_v40 = vld [vmem:[#allocation3 + $0x180] sm:$0xff] }
 0x512   : > { %v5177_v2 = vpop.f32.mrf.mxu1  ;;  %6719 = vmatmul.mubr.bf16.gmra.mxu1 %v6413_v13 }
 0x513   : > { %v16161_v56 = vmax.f32 %v6158_v39, %v6216_v46  ;;  %v6159_v10 = vadd.f32 %v16077_v21, %v5978_v49  ;;  %v5334_v31 = vadd.f32 %v5276_v54, %v5177_v2  ;;  %v5822_v5 = vpop.f32.mrf.mxu0  ;;  %7256 = vmatmul.mubr.bf16.gmra.mxu0 %v6950_v12  ;;  %6728 = vmatprep.mubr.bf16.mxu1 %v14585_v0  ;;  %v5281_v12 = vld [vmem:[#allocation3 + $0x188] sm:$0xff] }
 0x514   : > { %v14183_v38 = vpop.f32.mrf.mxu1  ;;  %7265 = vmatprep.mubr.bf16.mxu0 %v14585_v0  ;;  %v6924_v28 = vld [vmem:[#allocation3 + $0x139] sm:$0xff] }
 0x515   : > { %6332 = vst [vmem:[#allocation3 + $0x150] sm:$0xff] %v16161_v56  ;;  %v6217_v26 = vmul.f32 0.2, %v6159_v10  ;;  %v5979_v19 = vadd.f32 %v5822_v5, %v5334_v31  ;;  %v14307_v15 = vpop.f32.mrf.mxu0  ;;  %v6952_v55 = vpack.c.bf16 %v6924_v28, %v6923_v29 }
 0x516   : > { %v5180_v58 = vpop.f32.mrf.mxu1 }
 0x517   : > { %v16167_v18 = vmax.f32 %v6159_v10, %v6217_v26  ;;  %v6160_v9 = vadd.f32 %v16077_v21, %v5979_v19  ;;  %v5335_v4 = vadd.f32 %v5277_v59, %v5180_v58  ;;  %v5825_v50 = vpop.f32.mrf.mxu0  ;;  %v6416_v26 = vpack.c.bf16 %v16155_v60, %v16149_v47 }
 0x518   : > { %v14184_v42 = vpop.f32.mrf.mxu1  ;;  %v6925_v19 = vld [vmem:[#allocation3 + $0x141] sm:$0xff] }
 0x519   : > { %6333 = vst [vmem:[#allocation3 + $0x158] sm:$0xff] %v16167_v18  ;;  %v6218_v7 = vmul.f32 0.2, %v6160_v9  ;;  %v5980_v8 = vadd.f32 %v5825_v50, %v5335_v4  ;;  %v14308_v11 = vpop.f32.mrf.mxu0  ;;  %v5282_v4 = vld [vmem:[#allocation3 + $0x190] sm:$0xff] }
 0x51a   : > { %v5185_v16 = vpop.f32.mrf.mxu1  ;;  %6729 = vmatmul.mubr.bf16.gmra.mxu1 %v6414_v35 }
 0x51b   : > { %v16173_v20 = vmax.f32 %v6160_v9, %v6218_v7  ;;  %v6161_v36 = vadd.f32 %v16077_v21, %v5980_v8  ;;  %v5336_v62 = vadd.f32 %v5278_v17, %v5185_v16  ;;  %v5830_v22 = vpop.f32.mrf.mxu0  ;;  %7266 = vmatmul.mubr.bf16.gmra.mxu0 %v6951_v14  ;;  %6738 = vmatprep.mubr.bf16.mxu1 %v14585_v0  ;;  %v5283_v14 = vld [vmem:[#allocation3 + $0x198] sm:$0xff] }
 0x51c   : > { %v14187_v37 = vpop.f32.mrf.mxu1  ;;  %7275 = vmatprep.mubr.bf16.mxu0 %v14585_v0  ;;  %v6926_v2 = vld [vmem:[#allocation3 + $0x149] sm:$0xff] }
 0x51d   : > { %6334 = vst [vmem:[#allocation3 + $0x160] sm:$0xff] %v16173_v20  ;;  %v6219_v52 = vmul.f32 0.2, %v6161_v36  ;;  %v5981_v23 = vadd.f32 %v5830_v22, %v5336_v62  ;;  %v14311_v48 = vpop.f32.mrf.mxu0  ;;  %v6953_v3 = vpack.c.bf16 %v6926_v2, %v6925_v19 }
 0x51e   : > { %v5188_v24 = vpop.f32.mrf.mxu1 }
 0x51f   : > { %v16179_v32 = vmax.f32 %v6161_v36, %v6219_v52  ;;  %v6162_v45 = vadd.f32 %v16077_v21, %v5981_v23  ;;  %v5337_v61 = vadd.f32 %v5279_v25, %v5188_v24  ;;  %v5833_v43 = vpop.f32.mrf.mxu0  ;;  %v6417_v52 = vpack.c.bf16 %v16167_v18, %v16161_v56 }
 0x520   : > { %v14188_v53 = vpop.f32.mrf.mxu1  ;;  %v6927_v23 = vld [vmem:[#allocation3 + $0x151] sm:$0xff] }
 0x521   : > { %6335 = vst [vmem:[#allocation3 + $0x168] sm:$0xff] %v16179_v32  ;;  %v6220_v30 = vmul.f32 0.2, %v6162_v45  ;;  %v5982_v33 = vadd.f32 %v5833_v43, %v5337_v61  ;;  %v14312_v34 = vpop.f32.mrf.mxu0  ;;  %v5284_v61 = vld [vmem:[#allocation3 + $0x1a0] sm:$0xff] }
 0x522   : > { %v5193_v39 = vpop.f32.mrf.mxu1  ;;  %6739 = vmatmul.mubr.bf16.gmra.mxu1 %v6415_v63 }
 0x523   : > { %v16185_v41 = vmax.f32 %v6162_v45, %v6220_v30  ;;  %v6163_v1 = vadd.f32 %v16077_v21, %v5982_v33  ;;  %v5338_v13 = vadd.f32 %v5280_v40, %v5193_v39  ;;  %v5838_v44 = vpop.f32.mrf.mxu0  ;;  %7276 = vmatmul.mubr.bf16.gmra.mxu0 %v6952_v55  ;;  %6748 = vmatprep.mubr.bf16.mxu1 %v14585_v0  ;;  %v5285_v55 = vld [vmem:[#allocation3 + $0x1a8] sm:$0xff] }
 0x524   : > { %v14191_v57 = vpop.f32.mrf.mxu1  ;;  %7285 = vmatprep.mubr.bf16.mxu0 %v14585_v0  ;;  %v6928_v16 = vld [vmem:[#allocation3 + $0x159] sm:$0xff] }
 0x525   : > { %6336 = vst [vmem:[#allocation3 + $0x170] sm:$0xff] %v16185_v41  ;;  %v6221_v27 = vmul.f32 0.2, %v6163_v1  ;;  %v5983_v46 = vadd.f32 %v5838_v44, %v5338_v13  ;;  %v14315_v49 = vpop.f32.mrf.mxu0  ;;  %v6954_v28 = vpack.c.bf16 %v6928_v16, %v6927_v23 }
 0x526   : > { %v5196_v51 = vpop.f32.mrf.mxu1 }
 0x527   : > { %v16191_v54 = vmax.f32 %v6163_v1, %v6221_v27  ;;  %v6164_v10 = vadd.f32 %v16077_v21, %v5983_v46  ;;  %v5339_v31 = vadd.f32 %v5281_v12, %v5196_v51  ;;  %v5841_v5 = vpop.f32.mrf.mxu0  ;;  %v6418_v27 = vpack.c.bf16 %v16179_v32, %v16173_v20 }
 0x528   : > { %v14192_v38 = vpop.f32.mrf.mxu1  ;;  %v6929_v46 = vld [vmem:[#allocation3 + $0x161] sm:$0xff] }
 0x529   : > { %6337 = vst [vmem:[#allocation3 + $0x178] sm:$0xff] %v16191_v54  ;;  %v6222_v15 = vmul.f32 0.2, %v6164_v10  ;;  %v5984_v58 = vadd.f32 %v5841_v5, %v5339_v31  ;;  %v14316_v59 = vpop.f32.mrf.mxu0  ;;  %v5286_v31 = vld [vmem:[#allocation3 + $0x1b0] sm:$0xff] }
 0x52a   : > { %v5201_v9 = vpop.f32.mrf.mxu1  ;;  %6749 = vmatmul.mubr.bf16.gmra.mxu1 %v6416_v26 }
 0x52b   : > { %v6280_v50 = vmax.f32 %v6164_v10, %v6222_v15  ;;  %v6165_v42 = vadd.f32 %v16077_v21, %v5984_v58  ;;  %v5340_v35 = vadd.f32 %v5282_v4, %v5201_v9  ;;  %v5846_v6 = vpop.f32.mrf.mxu0  ;;  %7286 = vmatmul.mubr.bf16.gmra.mxu0 %v6953_v3  ;;  %6758 = vmatprep.mubr.bf16.mxu1 %v14585_v0  ;;  %v5287_v3 = vld [vmem:[#allocation3 + $0x1b8] sm:$0xff] }
 0x52c   : > { %v14195_v7 = vpop.f32.mrf.mxu1  ;;  %7295 = vmatprep.mubr.bf16.mxu0 %v14585_v0  ;;  %v6930_v39 = vld [vmem:[#allocation3 + $0x169] sm:$0xff] }
 0x52d   : > { %6338 = vst [vmem:[#allocation3 + $0x180] sm:$0xff] %v6280_v50  ;;  %v6223_v47 = vmul.f32 0.2, %v6165_v42  ;;  %v5985_v60 = vadd.f32 %v5846_v6, %v5340_v35  ;;  %v14319_v8 = vpop.f32.mrf.mxu0  ;;  %v6955_v2 = vpack.c.bf16 %v6930_v39, %v6929_v46  ;;  %v6419_v7 = vpack.c.bf16 %v16191_v54, %v16185_v41 }
 0x52e   : > { %v5204_v11 = vpop.f32.mrf.mxu1 }
 0x52f   : > { %v6281_v17 = vmax.f32 %v6165_v42, %v6223_v47  ;;  %v6166_v36 = vadd.f32 %v16077_v21, %v5985_v60  ;;  %v5341_v62 = vadd.f32 %v5283_v14, %v5204_v11  ;;  %v5849_v22 = vpop.f32.mrf.mxu0 }
 0x530   : > { %v14196_v37 = vpop.f32.mrf.mxu1  ;;  %v6931_v47 = vld [vmem:[#allocation3 + $0x171] sm:$0xff] }
 0x531   : > { %6339 = vst [vmem:[#allocation3 + $0x188] sm:$0xff] %v6281_v17  ;;  %v6224_v48 = vmul.f32 0.2, %v6166_v36  ;;  %v5986_v24 = vadd.f32 %v5849_v22, %v5341_v62  ;;  %v14320_v25 = vpop.f32.mrf.mxu0  ;;  %v5288_v17 = vld [vmem:[#allocation3 + $0x1c0] sm:$0xff] }
 0x532   : > { %v5209_v45 = vpop.f32.mrf.mxu1  ;;  %6759 = vmatmul.mubr.bf16.gmra.mxu1 %v6417_v52  ;;  %v5289_v25 = vld [vmem:[#allocation3 + $0x1c8] sm:$0xff] }
 0x533   : > { %v6282_v43 = vmax.f32 %v6166_v36, %v6224_v48  ;;  %v6167_v53 = vadd.f32 %v16077_v21, %v5986_v24  ;;  %v5342_v63 = vadd.f32 %v5284_v61, %v5209_v45  ;;  %v5854_v29 = vpop.f32.mrf.mxu0  ;;  %7296 = vmatmul.mubr.bf16.gmra.mxu0 %v6954_v28  ;;  %6768 = vmatprep.mubr.bf16.mxu1 %v14585_v0  ;;  %v7615_v48 = vld [vmem:[#allocation3 + $0x10] sm:$0xff] }
 0x534   : > { %v14199_v30 = vpop.f32.mrf.mxu1  ;;  %7305 = vmatprep.mubr.bf16.mxu0 %v14585_v0  ;;  %v6932_v9 = vld [vmem:[#allocation3 + $0x179] sm:$0xff]  ;;  %v8344_v28 = vld [vmem:[#allocation3 + $0x11] sm:$0xff] }
 0x535   : > { %6340 = vst [vmem:[#allocation3 + $0x190] sm:$0xff] %v6282_v43  ;;  %v6225_v56 = vmul.f32 0.2, %v6167_v53  ;;  %v5987_v18 = vadd.f32 %v5854_v29, %v5342_v63  ;;  %v14323_v33 = vpop.f32.mrf.mxu0  ;;  %v6956_v14 = vpack.c.bf16 %v6932_v9, %v6931_v47  ;;  %v14478_v63 = vld [vmem:[%s17337_s5 + $0x270] ss:$8 sps:$4 sm:$0xff]   ;;  %v7614_v29 = vld [vmem:[#allocation3 + $0x8] sm:$0xff] }
 0x536   : > { %v5212_v34 = vpop.f32.mrf.mxu1  ;;  %v14481_v33 = vld [vmem:[%s17337_s5 + $0x2f0] ss:$8 sps:$4 sm:$0xff]  }
 0x537   : > { %v6283_v40 = vmax.f32 %v6167_v53, %v6225_v56  ;;  %v6168_v1 = vadd.f32 %v16077_v21, %v5987_v18  ;;  %v5343_v13 = vadd.f32 %v5285_v55, %v5212_v34  ;;  %v5857_v44 = vpop.f32.mrf.mxu0  ;;  %v7662_v56 = vpack.c.bf16 %v7615_v48, %v7614_v29  ;;  %v8343_v18 = vld [vmem:[#allocation3 + $0x9] sm:$0xff] }
 0x538   : > { %v14200_v57 = vpop.f32.mrf.mxu1  ;;  %v14505_v29 = vld [vmem:[%s17337_s5 + $0x2b0] ss:$8 sps:$4 sm:$0xff]  }
 0x539   : > { %6341 = vst [vmem:[#allocation3 + $0x198] sm:$0xff] %v6283_v40  ;;  %v6226_v49 = vmul.f32 0.2, %v6168_v1  ;;  %v5988_v51 = vadd.f32 %v5857_v44, %v5343_v13  ;;  %v14324_v12 = vpop.f32.mrf.mxu0  ;;  %v8391_v40 = vpack.c.bf16 %v8344_v28, %v8343_v18  ;;  %v14489_v44 = vld [vmem:[%s17337_s5 + $0x2e4] ss:$8 sps:$4 sm:$0xff]  }
 0x53a   : > { %v5217_v10 = vpop.f32.mrf.mxu1  ;;  %6769 = vmatmul.mubr.bf16.gmra.mxu1 %v6418_v27 }
 0x53b   : > { %v6284_v5 = vmax.f32 %v6168_v1, %v6226_v49  ;;  %v6169_v38 = vadd.f32 %v16077_v21, %v5988_v51  ;;  %v5344_v26 = vadd.f32 %v5286_v31, %v5217_v10  ;;  %v5862_v19 = vpop.f32.mrf.mxu0  ;;  %7306 = vmatmul.mubr.bf16.gmra.mxu0 %v6955_v2  ;;  %6778 = vmatprep.mubr.bf16.mxu1 %v14585_v0  ;;  %v14486_v1 = vld [vmem:[%s17337_s5 + $0x264] ss:$8 sps:$4 sm:$0xff]   ;;  %v14484_v49 = vld [vmem:[%s17337_s5 + $0x260] ss:$8 sps:$4 sm:$0xff]  }
 0x53c   : > { %v14203_v15 = vpop.f32.mrf.mxu1  ;;  %7315 = vmatprep.mubr.bf16.mxu0 %v14585_v0  ;;  %v14487_v2 = vld [vmem:[%s17337_s5 + $0x2e0] ss:$8 sps:$4 sm:$0xff]  }
 0x53d   : > { %6342 = vst [vmem:[#allocation3 + $0x1a0] sm:$0xff] %v6284_v5  ;;  %v6227_v20 = vmul.f32 0.2, %v6169_v38  ;;  %v5989_v32 = vadd.f32 %v5862_v19, %v5344_v26  ;;  %v14327_v58 = vpop.f32.mrf.mxu0  ;;  %v7617_v5 = vld [vmem:[#allocation3 + $0x20] sm:$0xff] }
 0x53e   : > { %v5220_v59 = vpop.f32.mrf.mxu1  ;;  %v8346_v15 = vld [vmem:[#allocation3 + $0x21] sm:$0xff]  ;;  %v7616_v58 = vld [vmem:[#allocation3 + $0x18] sm:$0xff] }
 0x53f   : > { %v6285_v4 = vmax.f32 %v6169_v38, %v6227_v20  ;;  %v6170_v50 = vadd.f32 %v16077_v21, %v5989_v32  ;;  %v5345_v42 = vadd.f32 %v5287_v3, %v5220_v59  ;;  %v5865_v35 = vpop.f32.mrf.mxu0  ;;  %v14495_v38 = vld [vmem:[%s17337_s5 + $0x2d4] ss:$8 sps:$4 sm:$0xff]   ;;  %v7663_v9 = vpack.c.bf16 %v7617_v5, %v7616_v58  ;;  %v14514_v5 = vld [vmem:[%s17337_s5 + $0x210] ss:$8 sps:$4 sm:$0xff]  }
 0x540   : > { %v14204_v6 = vpop.f32.mrf.mxu1 }
 0x541   : > { %6343 = vst [vmem:[#allocation3 + $0x1a8] sm:$0xff] %v6285_v4  ;;  %v6228_v60 = vmul.f32 0.2, %v6170_v50  ;;  %v5990_v8 = vadd.f32 %v5865_v35, %v5345_v42  ;;  %v14328_v11 = vpop.f32.mrf.mxu0  ;;  %v8345_v4 = vld [vmem:[#allocation3 + $0x19] sm:$0xff] }
 0x542   : > { %v5225_v16 = vpop.f32.mrf.mxu1  ;;  %6779 = vmatmul.mubr.bf16.gmra.mxu1 %v6419_v7  ;;  %v8392_v35 = vpack.c.bf16 %v8346_v15, %v8345_v4  ;;  %v14493_v6 = vld [vmem:[%s17337_s5 + $0x2d0] ss:$8 sps:$4 sm:$0xff]   ;;  %v14498_v7 = vld [vmem:[%s17337_s5 + $0x244] ss:$8 sps:$4 sm:$0xff]  }
 0x543   : > { %v6286_v36 = vmax.f32 %v6170_v50, %v6228_v60  ;;  %v6171_v62 = vadd.f32 %v16077_v21, %v5990_v8  ;;  %v5346_v22 = vadd.f32 %v5288_v17, %v5225_v16  ;;  %v5870_v37 = vpop.f32.mrf.mxu0  ;;  %7316 = vmatmul.mubr.bf16.gmra.mxu0 %v6956_v14  ;;  %7814 = vmatprep.mubr.bf16.mxu1 %v14585_v0  ;;  %v14490_v50 = vld [vmem:[%s17337_s5 + $0x250] ss:$8 sps:$4 sm:$0xff]   ;;  %v14501_v8 = vld [vmem:[%s17337_s5 + $0x2c4] ss:$8 sps:$4 sm:$0xff]   ;;  %v14496_v17 = vld [vmem:[%s17337_s5 + $0x240] ss:$8 sps:$4 sm:$0xff]  }
 0x544   : > { %v14207_v52 = vpop.f32.mrf.mxu1  ;;  %8543 = vmatprep.mubr.bf16.mxu0 %v14585_v0  ;;  %v7623_v4 = vld [vmem:[#allocation3 + $0x50] sm:$0xff] }
 0x545   : > { %6344 = vst [vmem:[#allocation3 + $0x1b0] sm:$0xff] %v6286_v36  ;;  %v6229_v41 = vmul.f32 0.2, %v6171_v62  ;;  %v5991_v54 = vadd.f32 %v5870_v37, %v5346_v22  ;;  %v14331_v23 = vpop.f32.mrf.mxu0  ;;  %v14499_v22 = vld [vmem:[%s17337_s5 + $0x2c0] ss:$8 sps:$4 sm:$0xff]  }
 0x546   : > { %v5228_v24 = vpop.f32.mrf.mxu1  ;;  %v14504_v37 = vld [vmem:[%s17337_s5 + $0x234] ss:$8 sps:$4 sm:$0xff]  }
 0x547   : > { %v6287_v45 = vmax.f32 %v6171_v62, %v6229_v41  ;;  %v6172_v61 = vadd.f32 %v16077_v21, %v5991_v54  ;;  %v5347_v43 = vadd.f32 %v5289_v25, %v5228_v24  ;;  %v5873_v53 = vpop.f32.mrf.mxu0  ;;  %v7619_v62 = vld [vmem:[#allocation3 + $0x30] sm:$0xff]  ;;  %v7618_v24 = vld [vmem:[#allocation3 + $0x28] sm:$0xff] }
 0x548   : > { %v14208_v30 = vpop.f32.mrf.mxu1  ;;  %v8348_v54 = vld [vmem:[#allocation3 + $0x31] sm:$0xff] }
 0x549   : > { %6345 = vst [vmem:[#allocation3 + $0x1b8] sm:$0xff] %v6287_v45  ;;  %v6230_v34 = vmul.f32 0.2, %v6172_v61  ;;  %v5992_v55 = vadd.f32 %v5873_v53, %v5347_v43  ;;  %v14332_v39 = vpop.f32.mrf.mxu0  ;;  %v14507_v23 = vld [vmem:[%s17337_s5 + $0x2b4] ss:$8 sps:$4 sm:$0xff]   ;;  %v7664_v45 = vpack.c.bf16 %v7619_v62, %v7618_v24 }
 0x54a   : > { %v6550_v13 = vpop.f32.mrf.mxu1  ;;  %7815 = vmatmul.mubr.bf16.vlgmr.msra.gmra.mxu1 %v7662_v56  ;;  %v14502_v43 = vld [vmem:[%s17337_s5 + $0x230] ss:$8 sps:$4 sm:$0xff]   ;;  %v14510_v30 = vld [vmem:[%s17337_s5 + $0x224] ss:$8 sps:$4 sm:$0xff]  }
 0x54b   : > { %v6288_v57 = vmax.f32 %v6172_v61, %v6230_v34  ;;  %v6173_v27 = vadd.f32 %v16077_v21, %v5992_v55  ;;  %9241 = vmatpush1.bf16.msra.mxu1 %v14478_v63  ;;  %v7087_v46 = vpop.f32.mrf.mxu0  ;;  %8544 = vmatmul.mubr.bf16.vlgmr.msra.gmra.mxu0 %v8391_v40  ;;  %v14492_v21 = vld [vmem:[%s17337_s5 + $0x254] ss:$8 sps:$4 sm:$0xff]   ;;  %v8347_v61 = vld [vmem:[#allocation3 + $0x29] sm:$0xff] }
 0x54c   : > { %v6552_v51 = vpop.f32.mrf.mxu1  ;;  %v7422_v12 = vadd.f32 %v7087_v46, %v6550_v13  ;;  %7824 = vmatprep.mubr.bf16.mxu1 %v14585_v0  ;;  %9970 = vmatpush1.bf16.msra.mxu0 %v14481_v33  ;;  %v8393_v63 = vpack.c.bf16 %v8348_v54, %v8347_v61  ;;  %v14513_v33 = vld [vmem:[%s17337_s5 + $0x2a4] ss:$8 sps:$4 sm:$0xff]   ;;  %v14508_v40 = vld [vmem:[%s17337_s5 + $0x220] ss:$8 sps:$4 sm:$0xff]  }
 0x54d   : > { %6346 = vst [vmem:[#allocation3 + $0x1c0] sm:$0xff] %v6288_v57  ;;  %v6231_v10 = vmul.f32 0.2, %v6173_v27  ;;  %v7089_v31 = vpop.f32.mrf.mxu0  ;;  %8553 = vmatprep.mubr.bf16.mxu0 %v14585_v0  ;;  %9242 = vmatprep.subr.bf16.mxu1 %v14486_v1  ;;  %v7621_v13 = vld [vmem:[#allocation3 + $0x40] sm:$0xff]  ;;  %v14516_v57 = vld [vmem:[%s17337_s5 + $0x214] ss:$8 sps:$4 sm:$0xff]  }
 0x54e   : > { %v6554_v26 = vpop.f32.mrf.mxu1  ;;  %7518 = vst [vmem:[%s16235_s11] sm:$0xff] %v7422_v12  ;;  %v7423_v19 = vadd.f32 %v7089_v31, %v6552_v51  ;;  %9971 = vmatprep.subr.bf16.mxu0 %v14489_v44  ;;  %v14511_v44 = vld [vmem:[%s17337_s5 + $0x2a0] ss:$8 sps:$4 sm:$0xff]   ;;  %v7620_v12 = vld [vmem:[#allocation3 + $0x38] sm:$0xff] }
 0x54f   : > { %v6289_v20 = vmax.f32 %v6173_v27, %v6231_v10  ;;  %v7091_v32 = vpop.f32.mrf.mxu0  ;;  %9243 = vmatpush1.bf16.msra.mxu1 %v14484_v49  ;;  %v8350_v49 = vld [vmem:[#allocation3 + $0x41] sm:$0xff]  ;;  %v7665_v10 = vpack.c.bf16 %v7621_v13, %v7620_v12  ;;  %v8349_v31 = vld [vmem:[#allocation3 + $0x39] sm:$0xff]  ;;  %v8355_v12 = vld [vmem:[#allocation3 + $0x69] sm:$0xff] }
 0x550   : > { %v6556_v59 = vpop.f32.mrf.mxu1  ;;  %7519 = vst [vmem:[%s16235_s11 + $0x8] sm:$0xff] %v7423_v19  ;;  %v7424_v3 = vadd.f32 %v7091_v32, %v6554_v26  ;;  %9972 = vmatpush1.bf16.msra.mxu0 %v14487_v2  ;;  %9244 = vmatprep.subr.bf16.mxu1 %v14492_v21  ;;  %v8394_v26 = vpack.c.bf16 %v8350_v49, %v8349_v31  ;;  %v14519_v32 = vld [vmem:[%s17337_s5 + $0x294] ss:$8 sps:$4 sm:$0xff]  }
 0x551   : > { %6347 = vst [vmem:[#allocation3 + $0x1c8] sm:$0xff] %v6289_v20  ;;  %v7093_v42 = vpop.f32.mrf.mxu0  ;;  %9973 = vmatprep.subr.bf16.mxu0 %v14495_v38  ;;  %v14517_v20 = vld [vmem:[%s17337_s5 + $0x290] ss:$8 sps:$4 sm:$0xff]  }
 0x552   : > { %v6560_v47 = vpop.f32.mrf.mxu1  ;;  %7520 = vst [vmem:[%s16235_s11 + $0x10] sm:$0xff] %v7424_v3  ;;  %7825 = vmatmul.mubr.bf16.gmra.mxu1 %v7663_v9  ;;  %v7425_v60 = vadd.f32 %v7093_v42, %v6556_v59 }
 0x553   : > { %v7097_v11 = vpop.f32.mrf.mxu0  ;;  %8554 = vmatmul.mubr.bf16.gmra.mxu0 %v8392_v35  ;;  %7834 = vmatprep.mubr.bf16.mxu1 %v14585_v0  ;;  %v8352_v35 = vld [vmem:[#allocation3 + $0x51] sm:$0xff] }
 0x554   : > { %v6562_v14 = vpop.f32.mrf.mxu1  ;;  %7521 = vst [vmem:[%s16235_s11 + $0x18] sm:$0xff] %v7425_v60  ;;  %v7426_v16 = vadd.f32 %v7097_v11, %v6560_v47  ;;  %8563 = vmatprep.mubr.bf16.mxu0 %v14585_v0  ;;  %9245 = vmatpush1.bf16.msra.mxu1 %v14490_v50  ;;  %v8351_v11 = vld [vmem:[#allocation3 + $0x49] sm:$0xff] }
 0x555   : > { %v7099_v36 = vpop.f32.mrf.mxu0  ;;  %9974 = vmatpush1.bf16.msra.mxu0 %v14493_v6  ;;  %9246 = vmatprep.subr.bf16.mxu1 %v14498_v7  ;;  %v7622_v7 = vld [vmem:[#allocation3 + $0x48] sm:$0xff] }
 0x556   : > { %v6564_v52 = vpop.f32.mrf.mxu1  ;;  %7522 = vst [vmem:[%s16235_s11 + $0x20] sm:$0xff] %v7426_v16  ;;  %v7427_v41 = vadd.f32 %v7099_v36, %v6562_v14  ;;  %9975 = vmatprep.subr.bf16.mxu0 %v14501_v8  ;;  %v7666_v8 = vpack.c.bf16 %v7623_v4, %v7622_v7  ;;  %v8395_v16 = vpack.c.bf16 %v8352_v35, %v8351_v11  ;;  %v7628_v4 = vld [vmem:[#allocation3 + $0x78] sm:$0xff] }
 0x557   : > { %v7101_v48 = vpop.f32.mrf.mxu0 }
 0x558   : > { %v6566_v25 = vpop.f32.mrf.mxu1  ;;  %7523 = vst [vmem:[%s16235_s11 + $0x28] sm:$0xff] %v7427_v41  ;;  %v7428_v28 = vadd.f32 %v7101_v48, %v6564_v52  ;;  %9247 = vmatpush1.bf16.msra.mxu1 %v14496_v17  ;;  %v7625_v41 = vld [vmem:[#allocation3 + $0x60] sm:$0xff] }
 0x559   : > { %v7103_v53 = vpop.f32.mrf.mxu0  ;;  %9976 = vmatpush1.bf16.msra.mxu0 %v14499_v22  ;;  %9248 = vmatprep.subr.bf16.mxu1 %v14504_v37  ;;  %v8354_v48 = vld [vmem:[#allocation3 + $0x61] sm:$0xff] }
 0x55a   : > { %v6570_v56 = vpop.f32.mrf.mxu1  ;;  %7524 = vst [vmem:[%s16235_s11 + $0x30] sm:$0xff] %v7428_v28  ;;  %7835 = vmatmul.mubr.bf16.gmra.mxu1 %v7664_v45  ;;  %v7429_v18 = vadd.f32 %v7103_v53, %v6566_v25  ;;  %9977 = vmatprep.subr.bf16.mxu0 %v14507_v23  ;;  %v7624_v25 = vld [vmem:[#allocation3 + $0x58] sm:$0xff]  ;;  %v14520_v53 = vld [vmem:[%s17337_s5 + $0x200] ss:$8 sps:$4 sm:$0xff]  }
 0x55b   : > { %v7107_v34 = vpop.f32.mrf.mxu0  ;;  %8564 = vmatmul.mubr.bf16.gmra.mxu0 %v8393_v63  ;;  %7844 = vmatprep.mubr.bf16.mxu1 %v14585_v0  ;;  %v7667_v61 = vpack.c.bf16 %v7625_v41, %v7624_v25  ;;  %v14522_v63 = vld [vmem:[%s17337_s5 + $0x204] ss:$8 sps:$4 sm:$0xff]   ;;  %v14528_v25 = vld [vmem:[%s17337_s5 + $0x374] ss:$8 sps:$4 sm:$0xff]  }
 0x55c   : > { %v6572_v55 = vpop.f32.mrf.mxu1  ;;  %7525 = vst [vmem:[%s16235_s11 + $0x38] sm:$0xff] %v7429_v18  ;;  %v7430_v39 = vadd.f32 %v7107_v34, %v6570_v56  ;;  %8573 = vmatprep.mubr.bf16.mxu0 %v14585_v0  ;;  %9249 = vmatpush1.bf16.msra.mxu1 %v14502_v43  ;;  %v8353_v43 = vld [vmem:[#allocation3 + $0x59] sm:$0xff]  ;;  %v7630_v41 = vld [vmem:[#allocation3 + $0x88] sm:$0xff] }
 0x55d   : > { %v7109_v1 = vpop.f32.mrf.mxu0  ;;  %9978 = vmatpush1.bf16.msra.mxu0 %v14505_v29  ;;  %9250 = vmatprep.subr.bf16.mxu1 %v14510_v30  ;;  %v8396_v30 = vpack.c.bf16 %v8354_v48, %v8353_v43 }
 0x55e   : > { %v6574_v27 = vpop.f32.mrf.mxu1  ;;  %7526 = vst [vmem:[%s16235_s11 + $0x40] sm:$0xff] %v7430_v39  ;;  %v7431_v46 = vadd.f32 %v7109_v1, %v6572_v55  ;;  %9979 = vmatprep.subr.bf16.mxu0 %v14513_v33 }
 0x55f   : > { %v7111_v51 = vpop.f32.mrf.mxu0 }
 0x560   : > { %v6576_v2 = vpop.f32.mrf.mxu1  ;;  %7527 = vst [vmem:[%s16235_s11 + $0x48] sm:$0xff] %v7431_v46  ;;  %v7432_v21 = vadd.f32 %v7111_v51, %v6574_v27  ;;  %9251 = vmatpush1.bf16.msra.mxu1 %v14508_v40  ;;  %v7627_v40 = vld [vmem:[#allocation3 + $0x70] sm:$0xff]  ;;  %v7626_v27 = vld [vmem:[#allocation3 + $0x68] sm:$0xff] }
 0x561   : > { %v7113_v38 = vpop.f32.mrf.mxu0  ;;  %9980 = vmatpush1.bf16.msra.mxu0 %v14511_v44  ;;  %9252 = vmatprep.subr.bf16.mxu1 %v14516_v57  ;;  %v8356_v44 = vld [vmem:[#allocation3 + $0x71] sm:$0xff]  ;;  %v7668_v51 = vpack.c.bf16 %v7627_v40, %v7626_v27 }
 0x562   : > { %v6580_v19 = vpop.f32.mrf.mxu1  ;;  %7528 = vst [vmem:[%s16235_s11 + $0x50] sm:$0xff] %v7432_v21  ;;  %7845 = vmatmul.mubr.bf16.gmra.mxu1 %v7665_v10  ;;  %v7433_v15 = vadd.f32 %v7113_v38, %v6576_v2  ;;  %9981 = vmatprep.subr.bf16.mxu0 %v14519_v32  ;;  %v8397_v21 = vpack.c.bf16 %v8356_v44, %v8355_v12  ;;  %v14525_v38 = vld [vmem:[%s17337_s5 + $0x284] ss:$8 sps:$4 sm:$0xff]   ;;  %v8361_v44 = vld [vmem:[#allocation3 + $0x99] sm:$0xff] }
 0x563   : > { %v7117_v58 = vpop.f32.mrf.mxu0  ;;  %8574 = vmatmul.mubr.bf16.gmra.mxu0 %v8394_v26  ;;  %7854 = vmatprep.mubr.bf16.mxu1 %v14585_v0  ;;  %v7629_v32 = vld [vmem:[#allocation3 + $0x80] sm:$0xff]  ;;  %v14531_v12 = vld [vmem:[%s17337_s5 + $0x3f4] ss:$8 sps:$4 sm:$0xff]  }
 0x564   : > { %v6582_v59 = vpop.f32.mrf.mxu1  ;;  %7529 = vst [vmem:[%s16235_s11 + $0x58] sm:$0xff] %v7433_v15  ;;  %v7434_v3 = vadd.f32 %v7117_v58, %v6580_v19  ;;  %8583 = vmatprep.mubr.bf16.mxu0 %v14585_v0  ;;  %9253 = vmatpush1.bf16.msra.mxu1 %v14514_v5  ;;  %v14523_v5 = vld [vmem:[%s17337_s5 + $0x280] ss:$8 sps:$4 sm:$0xff]   ;;  %v7669_v35 = vpack.c.bf16 %v7629_v32, %v7628_v4 }
 0x565   : > { %v7119_v9 = vpop.f32.mrf.mxu0  ;;  %9982 = vmatpush1.bf16.msra.mxu0 %v14517_v20  ;;  %9254 = vmatprep.subr.bf16.mxu1 %v14522_v63 }
 0x566   : > { %v6584_v50 = vpop.f32.mrf.mxu1  ;;  %7530 = vst [vmem:[%s16235_s11 + $0x60] sm:$0xff] %v7434_v3  ;;  %v7435_v42 = vadd.f32 %v7119_v9, %v6582_v59  ;;  %9983 = vmatprep.subr.bf16.mxu0 %v14525_v38  ;;  %v8358_v3 = vld [vmem:[#allocation3 + $0x81] sm:$0xff] }
 0x567   : > { %v7121_v6 = vpop.f32.mrf.mxu0 }
 0x568   : > { %v6586_v47 = vpop.f32.mrf.mxu1  ;;  %7531 = vst [vmem:[%s16235_s11 + $0x68] sm:$0xff] %v7435_v42  ;;  %v7436_v60 = vadd.f32 %v7121_v6, %v6584_v50  ;;  %9255 = vmatpush1.bf16.msra.mxu1 %v14520_v53  ;;  %v8357_v6 = vld [vmem:[#allocation3 + $0x79] sm:$0xff] }
 0x569   : > { %v7123_v14 = vpop.f32.mrf.mxu0  ;;  %9984 = vmatpush1.bf16.msra.mxu0 %v14523_v5  ;;  %10698 = vmatprep.subr.bf16.mxu1 %v14528_v25 }
 0x56a   : > { %v6590_v17 = vpop.f32.mrf.mxu1  ;;  %7532 = vst [vmem:[%s16235_s11 + $0x70] sm:$0xff] %v7436_v60  ;;  %7855 = vmatmul.mubr.bf16.gmra.mxu1 %v7666_v8  ;;  %v7437_v36 = vadd.f32 %v7123_v14, %v6586_v47  ;;  %v8398_v47 = vpack.c.bf16 %v8358_v3, %v8357_v6  ;;  %11427 = vmatprep.subr.bf16.mxu0 %v14531_v12  ;;  %v7640_v12 = vld [vmem:[#allocation3 + $0xd8] sm:$0xff] }
 0x56b   : > { %v7127_v62 = vpop.f32.mrf.mxu0  ;;  %8584 = vmatmul.mubr.bf16.gmra.mxu0 %v8395_v16  ;;  %7864 = vmatprep.mubr.bf16.mxu1 %v14585_v0 }
 0x56c   : > { %v6592_v22 = vpop.f32.mrf.mxu1  ;;  %7533 = vst [vmem:[%s16235_s11 + $0x78] sm:$0xff] %v7437_v36  ;;  %v7438_v37 = vadd.f32 %v7127_v62, %v6590_v17  ;;  %8593 = vmatprep.mubr.bf16.mxu0 %v14585_v0  ;;  %v7631_v36 = vld [vmem:[#allocation3 + $0x90] sm:$0xff] }
 0x56d   : > { %v7129_v52 = vpop.f32.mrf.mxu0  ;;  %v7670_v48 = vpack.c.bf16 %v7631_v36, %v7630_v41 }
 0x56e   : > { %v6594_v54 = vpop.f32.mrf.mxu1  ;;  %7534 = vst [vmem:[%s16235_s11 + $0x80] sm:$0xff] %v7438_v37  ;;  %v7439_v23 = vadd.f32 %v7129_v52, %v6592_v22  ;;  %v8360_v37 = vld [vmem:[#allocation3 + $0x91] sm:$0xff] }
 0x56f   : > { %v7131_v24 = vpop.f32.mrf.mxu0 }
 0x570   : > { %v6596_v28 = vpop.f32.mrf.mxu1  ;;  %7535 = vst [vmem:[%s16235_s11 + $0x88] sm:$0xff] %v7439_v23  ;;  %v7440_v45 = vadd.f32 %v7131_v24, %v6594_v54  ;;  %v8359_v24 = vld [vmem:[#allocation3 + $0x89] sm:$0xff] }
 0x571   : > { %v7133_v29 = vpop.f32.mrf.mxu0 }
 0x572   : > { %v6600_v56 = vpop.f32.mrf.mxu1  ;;  %7536 = vst [vmem:[%s16235_s11 + $0x90] sm:$0xff] %v7440_v45  ;;  %7865 = vmatmul.mubr.bf16.gmra.mxu1 %v7667_v61  ;;  %v7441_v18 = vadd.f32 %v7133_v29, %v6596_v28  ;;  %v8399_v45 = vpack.c.bf16 %v8360_v37, %v8359_v24 }
 0x573   : > { %v7137_v33 = vpop.f32.mrf.mxu0  ;;  %8594 = vmatmul.mubr.bf16.gmra.mxu0 %v8396_v30  ;;  %7874 = vmatprep.mubr.bf16.mxu1 %v14585_v0 }
 0x574   : > { %v6602_v34 = vpop.f32.mrf.mxu1  ;;  %7537 = vst [vmem:[%s16235_s11 + $0x98] sm:$0xff] %v7441_v18  ;;  %v7442_v55 = vadd.f32 %v7137_v33, %v6600_v56  ;;  %8603 = vmatprep.mubr.bf16.mxu0 %v14585_v0  ;;  %v7633_v56 = vld [vmem:[#allocation3 + $0xa0] sm:$0xff] }
 0x575   : > { %v7139_v39 = vpop.f32.mrf.mxu0 }
 0x576   : > { %v6604_v1 = vpop.f32.mrf.mxu1  ;;  %7538 = vst [vmem:[%s16235_s11 + $0xa0] sm:$0xff] %v7442_v55  ;;  %v7443_v13 = vadd.f32 %v7139_v39, %v6602_v34  ;;  %v8362_v34 = vld [vmem:[#allocation3 + $0xa1] sm:$0xff]  ;;  %v7632_v39 = vld [vmem:[#allocation3 + $0x98] sm:$0xff] }
 0x577   : > { %v7141_v57 = vpop.f32.mrf.mxu0  ;;  %v8400_v27 = vpack.c.bf16 %v8362_v34, %v8361_v44 }
 0x578   : > { %v6606_v46 = vpop.f32.mrf.mxu1  ;;  %7539 = vst [vmem:[%s16235_s11 + $0xa8] sm:$0xff] %v7443_v13  ;;  %v7444_v49 = vadd.f32 %v7141_v57, %v6604_v1  ;;  %v7671_v13 = vpack.c.bf16 %v7633_v56, %v7632_v39 }
 0x579   : > { %v7143_v2 = vpop.f32.mrf.mxu0 }
 0x57a   : > { %v6610_v10 = vpop.f32.mrf.mxu1  ;;  %7540 = vst [vmem:[%s16235_s11 + $0xb0] sm:$0xff] %v7444_v49  ;;  %7875 = vmatmul.mubr.bf16.gmra.mxu1 %v7668_v51  ;;  %v7445_v31 = vadd.f32 %v7143_v2, %v6606_v46 }
 0x57b   : > { %v7147_v26 = vpop.f32.mrf.mxu0  ;;  %8604 = vmatmul.mubr.bf16.gmra.mxu0 %v8397_v21  ;;  %7884 = vmatprep.mubr.bf16.mxu1 %v14585_v0 }
 0x57c   : > { %v6612_v19 = vpop.f32.mrf.mxu1  ;;  %7541 = vst [vmem:[%s16235_s11 + $0xb8] sm:$0xff] %v7445_v31  ;;  %v7446_v15 = vadd.f32 %v7147_v26, %v6610_v10  ;;  %8613 = vmatprep.mubr.bf16.mxu0 %v14585_v0  ;;  %v7635_v31 = vld [vmem:[#allocation3 + $0xb0] sm:$0xff] }
 0x57d   : > { %v7149_v20 = vpop.f32.mrf.mxu0  ;;  %v8364_v26 = vld [vmem:[#allocation3 + $0xb1] sm:$0xff] }
 0x57e   : > { %v6614_v58 = vpop.f32.mrf.mxu1  ;;  %7542 = vst [vmem:[%s16235_s11 + $0xc0] sm:$0xff] %v7446_v15  ;;  %v7447_v59 = vadd.f32 %v7149_v20, %v6612_v19  ;;  %v7634_v15 = vld [vmem:[#allocation3 + $0xa8] sm:$0xff] }
 0x57f   : > { %v7151_v9 = vpop.f32.mrf.mxu0 }
 0x580   : > { %v6616_v50 = vpop.f32.mrf.mxu1  ;;  %7543 = vst [vmem:[%s16235_s11 + $0xc8] sm:$0xff] %v7447_v59  ;;  %v7448_v42 = vadd.f32 %v7151_v9, %v6614_v58  ;;  %v7672_v58 = vpack.c.bf16 %v7635_v31, %v7634_v15  ;;  %v8363_v59 = vld [vmem:[#allocation3 + $0xa9] sm:$0xff]  ;;  %v8369_v31 = vld [vmem:[#allocation3 + $0xd9] sm:$0xff] }
 0x581   : > { %v7153_v7 = vpop.f32.mrf.mxu0  ;;  %v8401_v9 = vpack.c.bf16 %v8364_v26, %v8363_v59  ;;  %v7643_v59 = vld [vmem:[#allocation3 + $0xf0] sm:$0xff] }
 0x582   : > { %v6620_v60 = vpop.f32.mrf.mxu1  ;;  %7544 = vst [vmem:[%s16235_s11 + $0xd0] sm:$0xff] %v7448_v42  ;;  %7885 = vmatmul.mubr.bf16.gmra.mxu1 %v7669_v35  ;;  %v7449_v8 = vadd.f32 %v7153_v7, %v6616_v50 }
 0x583   : > { %v7157_v11 = vpop.f32.mrf.mxu0  ;;  %8614 = vmatmul.mubr.bf16.gmra.mxu0 %v8398_v47  ;;  %7894 = vmatprep.mubr.bf16.mxu1 %v14585_v0  ;;  %v7637_v47 = vld [vmem:[#allocation3 + $0xc0] sm:$0xff] }
 0x584   : > { %v6622_v14 = vpop.f32.mrf.mxu1  ;;  %7545 = vst [vmem:[%s16235_s11 + $0xd8] sm:$0xff] %v7449_v8  ;;  %v7450_v16 = vadd.f32 %v7157_v11, %v6620_v60  ;;  %8623 = vmatprep.mubr.bf16.mxu0 %v14585_v0  ;;  %v8366_v11 = vld [vmem:[#allocation3 + $0xc1] sm:$0xff] }
 0x585   : > { %v7159_v17 = vpop.f32.mrf.mxu0 }
 0x586   : > { %v6624_v62 = vpop.f32.mrf.mxu1  ;;  %7546 = vst [vmem:[%s16235_s11 + $0xe0] sm:$0xff] %v7450_v16  ;;  %v7451_v22 = vadd.f32 %v7159_v17, %v6622_v14  ;;  %v7636_v16 = vld [vmem:[#allocation3 + $0xb8] sm:$0xff] }
 0x587   : > { %v7161_v52 = vpop.f32.mrf.mxu0 }
 0x588   : > { %v6626_v54 = vpop.f32.mrf.mxu1  ;;  %7547 = vst [vmem:[%s16235_s11 + $0xe8] sm:$0xff] %v7451_v22  ;;  %v7452_v23 = vadd.f32 %v7161_v52, %v6624_v62  ;;  %v7673_v62 = vpack.c.bf16 %v7637_v47, %v7636_v16  ;;  %v8365_v22 = vld [vmem:[#allocation3 + $0xb9] sm:$0xff]  ;;  %v8371_v47 = vld [vmem:[#allocation3 + $0xe9] sm:$0xff] }
 0x589   : > { %v7163_v28 = vpop.f32.mrf.mxu0  ;;  %v8402_v52 = vpack.c.bf16 %v8366_v11, %v8365_v22  ;;  %v7645_v22 = vld [vmem:[#allocation3 + $0x100] sm:$0xff] }
 0x58a   : > { %v6630_v61 = vpop.f32.mrf.mxu1  ;;  %7548 = vst [vmem:[%s16235_s11 + $0xf0] sm:$0xff] %v7452_v23  ;;  %7895 = vmatmul.mubr.bf16.gmra.mxu1 %v7670_v48  ;;  %v7453_v43 = vadd.f32 %v7163_v28, %v6626_v54  ;;  %v7639_v28 = vld [vmem:[#allocation3 + $0xd0] sm:$0xff] }
 0x58b   : > { %v7167_v53 = vpop.f32.mrf.mxu0  ;;  %8624 = vmatmul.mubr.bf16.gmra.mxu0 %v8399_v45  ;;  %7904 = vmatprep.mubr.bf16.mxu1 %v14585_v0 }
 0x58c   : > { %v6632_v63 = vpop.f32.mrf.mxu1  ;;  %7549 = vst [vmem:[%s16235_s11 + $0xf8] sm:$0xff] %v7453_v43  ;;  %v7454_v29 = vadd.f32 %v7167_v53, %v6630_v61  ;;  %8633 = vmatprep.mubr.bf16.mxu0 %v14585_v0  ;;  %v8368_v43 = vld [vmem:[#allocation3 + $0xd1] sm:$0xff] }
 0x58d   : > { %v7169_v30 = vpop.f32.mrf.mxu0 }
 0x58e   : > { %v6634_v18 = vpop.f32.mrf.mxu1  ;;  %7550 = vst [vmem:[%s16235_s11 + $0x100] sm:$0xff] %v7454_v29  ;;  %v7455_v33 = vadd.f32 %v7169_v30, %v6632_v63  ;;  %v7638_v63 = vld [vmem:[#allocation3 + $0xc8] sm:$0xff] }
 0x58f   : > { %v7171_v55 = vpop.f32.mrf.mxu0  ;;  %v7674_v56 = vpack.c.bf16 %v7639_v28, %v7638_v63  ;;  %v8373_v28 = vld [vmem:[#allocation3 + $0xf9] sm:$0xff] }
 0x590   : > { %v6636_v40 = vpop.f32.mrf.mxu1  ;;  %7551 = vst [vmem:[%s16235_s11 + $0x108] sm:$0xff] %v7455_v33  ;;  %v7456_v1 = vadd.f32 %v7171_v55, %v6634_v18  ;;  %v8367_v18 = vld [vmem:[#allocation3 + $0xc9] sm:$0xff] }
 0x591   : > { %v7173_v57 = vpop.f32.mrf.mxu0  ;;  %v8403_v34 = vpack.c.bf16 %v8368_v43, %v8367_v18  ;;  %v7647_v18 = vld [vmem:[#allocation3 + $0x110] sm:$0xff] }
 0x592   : > { %v6640_v46 = vpop.f32.mrf.mxu1  ;;  %7552 = vst [vmem:[%s16235_s11 + $0x110] sm:$0xff] %v7456_v1  ;;  %7905 = vmatmul.mubr.bf16.gmra.mxu1 %v7671_v13  ;;  %v7457_v49 = vadd.f32 %v7173_v57, %v6636_v40  ;;  %v7641_v57 = vld [vmem:[#allocation3 + $0xe0] sm:$0xff] }
 0x593   : > { %v7177_v51 = vpop.f32.mrf.mxu0  ;;  %8634 = vmatmul.mubr.bf16.gmra.mxu0 %v8400_v27  ;;  %7914 = vmatprep.mubr.bf16.mxu1 %v14585_v0 }
 0x594   : > { %v6642_v2 = vpop.f32.mrf.mxu1  ;;  %7553 = vst [vmem:[%s16235_s11 + $0x118] sm:$0xff] %v7457_v49  ;;  %v7458_v21 = vadd.f32 %v7177_v51, %v6640_v46  ;;  %8643 = vmatprep.mubr.bf16.mxu0 %v14585_v0  ;;  %v8370_v49 = vld [vmem:[#allocation3 + $0xe1] sm:$0xff] }
 0x595   : > { %v7179_v10 = vpop.f32.mrf.mxu0 }
 0x596   : > { %v6644_v5 = vpop.f32.mrf.mxu1  ;;  %7554 = vst [vmem:[%s16235_s11 + $0x120] sm:$0xff] %v7458_v21  ;;  %v7459_v38 = vadd.f32 %v7179_v10, %v6642_v2  ;;  %v7675_v10 = vpack.c.bf16 %v7641_v57, %v7640_v12  ;;  %v8375_v57 = vld [vmem:[#allocation3 + $0x109] sm:$0xff] }
 0x597   : > { %v7181_v19 = vpop.f32.mrf.mxu0 }
 0x598   : > { %v6646_v20 = vpop.f32.mrf.mxu1  ;;  %7555 = vst [vmem:[%s16235_s11 + $0x128] sm:$0xff] %v7459_v38  ;;  %v7460_v32 = vadd.f32 %v7181_v19, %v6644_v5  ;;  %v8404_v38 = vpack.c.bf16 %v8370_v49, %v8369_v31  ;;  %v7649_v31 = vld [vmem:[#allocation3 + $0x120] sm:$0xff] }
 0x599   : > { %v7183_v3 = vpop.f32.mrf.mxu0 }
 0x59a   : > { %v6650_v4 = vpop.f32.mrf.mxu1  ;;  %7556 = vst [vmem:[%s16235_s11 + $0x130] sm:$0xff] %v7460_v32  ;;  %7915 = vmatmul.mubr.bf16.gmra.mxu1 %v7672_v58  ;;  %v7461_v50 = vadd.f32 %v7183_v3, %v6646_v20 }
 0x59b   : > { %v7187_v42 = vpop.f32.mrf.mxu0  ;;  %8644 = vmatmul.mubr.bf16.gmra.mxu0 %v8401_v9  ;;  %7924 = vmatprep.mubr.bf16.mxu1 %v14585_v0 }
 0x59c   : > { %v6652_v35 = vpop.f32.mrf.mxu1  ;;  %7557 = vst [vmem:[%s16235_s11 + $0x138] sm:$0xff] %v7461_v50  ;;  %v7462_v6 = vadd.f32 %v7187_v42, %v6650_v4  ;;  %8653 = vmatprep.mubr.bf16.mxu0 %v14585_v0  ;;  %v8372_v4 = vld [vmem:[#allocation3 + $0xf1] sm:$0xff]  ;;  %v7642_v42 = vld [vmem:[#allocation3 + $0xe8] sm:$0xff] }
 0x59d   : > { %v7189_v7 = vpop.f32.mrf.mxu0 }
 0x59e   : > { %v6654_v60 = vpop.f32.mrf.mxu1  ;;  %7558 = vst [vmem:[%s16235_s11 + $0x140] sm:$0xff] %v7462_v6  ;;  %v7463_v8 = vadd.f32 %v7189_v7, %v6652_v35  ;;  %v7676_v7 = vpack.c.bf16 %v7643_v59, %v7642_v42  ;;  %v8377_v59 = vld [vmem:[#allocation3 + $0x119] sm:$0xff] }
 0x59f   : > { %v7191_v14 = vpop.f32.mrf.mxu0 }
 0x5a0   : > { %v6656_v17 = vpop.f32.mrf.mxu1  ;;  %7559 = vst [vmem:[%s16235_s11 + $0x148] sm:$0xff] %v7463_v8  ;;  %v7464_v36 = vadd.f32 %v7191_v14, %v6654_v60  ;;  %v8405_v8 = vpack.c.bf16 %v8372_v4, %v8371_v47  ;;  %v7651_v47 = vld [vmem:[#allocation3 + $0x130] sm:$0xff] }
 0x5a1   : > { %v7193_v37 = vpop.f32.mrf.mxu0 }
 0x5a2   : > { %v6660_v41 = vpop.f32.mrf.mxu1  ;;  %7560 = vst [vmem:[%s16235_s11 + $0x150] sm:$0xff] %v7464_v36  ;;  %7925 = vmatmul.mubr.bf16.gmra.mxu1 %v7673_v62  ;;  %v7465_v54 = vadd.f32 %v7193_v37, %v6656_v17 }
 0x5a3   : > { %v7197_v23 = vpop.f32.mrf.mxu0  ;;  %8654 = vmatmul.mubr.bf16.gmra.mxu0 %v8402_v52  ;;  %7934 = vmatprep.mubr.bf16.mxu1 %v14585_v0 }
 0x5a4   : > { %v6662_v48 = vpop.f32.mrf.mxu1  ;;  %7561 = vst [vmem:[%s16235_s11 + $0x158] sm:$0xff] %v7465_v54  ;;  %v7466_v24 = vadd.f32 %v7197_v23, %v6660_v41  ;;  %8663 = vmatprep.mubr.bf16.mxu0 %v14585_v0  ;;  %v8374_v41 = vld [vmem:[#allocation3 + $0x101] sm:$0xff]  ;;  %v7644_v23 = vld [vmem:[#allocation3 + $0xf8] sm:$0xff] }
 0x5a5   : > { %v7199_v25 = vpop.f32.mrf.mxu0 }
 0x5a6   : > { %v6664_v45 = vpop.f32.mrf.mxu1  ;;  %7562 = vst [vmem:[%s16235_s11 + $0x160] sm:$0xff] %v7466_v24  ;;  %v7467_v61 = vadd.f32 %v7199_v25, %v6662_v48  ;;  %v7677_v25 = vpack.c.bf16 %v7645_v22, %v7644_v23  ;;  %v8379_v22 = vld [vmem:[#allocation3 + $0x129] sm:$0xff] }
 0x5a7   : > { %v7201_v53 = vpop.f32.mrf.mxu0 }
 0x5a8   : > { %v6666_v29 = vpop.f32.mrf.mxu1  ;;  %7563 = vst [vmem:[%s16235_s11 + $0x168] sm:$0xff] %v7467_v61  ;;  %v7468_v30 = vadd.f32 %v7201_v53, %v6664_v45  ;;  %v8406_v61 = vpack.c.bf16 %v8374_v41, %v8373_v28  ;;  %v7653_v28 = vld [vmem:[#allocation3 + $0x140] sm:$0xff] }
 0x5a9   : > { %v7203_v33 = vpop.f32.mrf.mxu0 }
 0x5aa   : > { %v6670_v55 = vpop.f32.mrf.mxu1  ;;  %7564 = vst [vmem:[%s16235_s11 + $0x170] sm:$0xff] %v7468_v30  ;;  %7935 = vmatmul.mubr.bf16.gmra.mxu1 %v7674_v56  ;;  %v7469_v39 = vadd.f32 %v7203_v33, %v6666_v29 }
 0x5ab   : > { %v7207_v40 = vpop.f32.mrf.mxu0  ;;  %8664 = vmatmul.mubr.bf16.gmra.mxu0 %v8403_v34  ;;  %7944 = vmatprep.mubr.bf16.mxu1 %v14585_v0 }
 0x5ac   : > { %v6672_v1 = vpop.f32.mrf.mxu1  ;;  %7565 = vst [vmem:[%s16235_s11 + $0x178] sm:$0xff] %v7469_v39  ;;  %v7470_v13 = vadd.f32 %v7207_v40, %v6670_v55  ;;  %8673 = vmatprep.mubr.bf16.mxu0 %v14585_v0  ;;  %v8376_v55 = vld [vmem:[#allocation3 + $0x111] sm:$0xff]  ;;  %v7646_v40 = vld [vmem:[#allocation3 + $0x108] sm:$0xff] }
 0x5ad   : > { %v7209_v44 = vpop.f32.mrf.mxu0 }
 0x5ae   : > { %v6674_v27 = vpop.f32.mrf.mxu1  ;;  %7566 = vst [vmem:[%s16235_s11 + $0x180] sm:$0xff] %v7470_v13  ;;  %v7471_v46 = vadd.f32 %v7209_v44, %v6672_v1  ;;  %v7678_v44 = vpack.c.bf16 %v7647_v18, %v7646_v40  ;;  %v8381_v18 = vld [vmem:[#allocation3 + $0x139] sm:$0xff] }
 0x5af   : > { %v7211_v51 = vpop.f32.mrf.mxu0 }
 0x5b0   : > { %v6676_v2 = vpop.f32.mrf.mxu1  ;;  %7567 = vst [vmem:[%s16235_s11 + $0x188] sm:$0xff] %v7471_v46  ;;  %v7472_v21 = vadd.f32 %v7211_v51, %v6674_v27  ;;  %v8407_v46 = vpack.c.bf16 %v8376_v55, %v8375_v57  ;;  %v7655_v57 = vld [vmem:[#allocation3 + $0x150] sm:$0xff] }
 0x5b1   : > { %v7213_v5 = vpop.f32.mrf.mxu0 }
 0x5b2   : > { %v6680_v26 = vpop.f32.mrf.mxu1  ;;  %7568 = vst [vmem:[%s16235_s11 + $0x190] sm:$0xff] %v7472_v21  ;;  %7945 = vmatmul.mubr.bf16.gmra.mxu1 %v7675_v10  ;;  %v7473_v19 = vadd.f32 %v7213_v5, %v6676_v2 }
 0x5b3   : > { %v7217_v15 = vpop.f32.mrf.mxu0  ;;  %8674 = vmatmul.mubr.bf16.gmra.mxu0 %v8404_v38  ;;  %7954 = vmatprep.mubr.bf16.mxu1 %v14585_v0 }
 0x5b4   : > { %v6682_v20 = vpop.f32.mrf.mxu1  ;;  %7569 = vst [vmem:[%s16235_s11 + $0x198] sm:$0xff] %v7473_v19  ;;  %v7474_v32 = vadd.f32 %v7217_v15, %v6680_v26  ;;  %8683 = vmatprep.mubr.bf16.mxu0 %v14585_v0  ;;  %v8378_v26 = vld [vmem:[#allocation3 + $0x121] sm:$0xff]  ;;  %v7648_v15 = vld [vmem:[#allocation3 + $0x118] sm:$0xff] }
 0x5b5   : > { %v7219_v58 = vpop.f32.mrf.mxu0 }
 0x5b6   : > { %v6684_v3 = vpop.f32.mrf.mxu1  ;;  %7570 = vst [vmem:[%s16235_s11 + $0x1a0] sm:$0xff] %v7474_v32  ;;  %v7475_v9 = vadd.f32 %v7219_v58, %v6682_v20  ;;  %v7679_v58 = vpack.c.bf16 %v7649_v31, %v7648_v15  ;;  %v8383_v31 = vld [vmem:[#allocation3 + $0x149] sm:$0xff] }
 0x5b7   : > { %v7221_v50 = vpop.f32.mrf.mxu0 }
 0x5b8   : > { %v6686_v35 = vpop.f32.mrf.mxu1  ;;  %7571 = vst [vmem:[%s16235_s11 + $0x1a8] sm:$0xff] %v7475_v9  ;;  %v7476_v6 = vadd.f32 %v7221_v50, %v6684_v3  ;;  %v8408_v9 = vpack.c.bf16 %v8378_v26, %v8377_v59  ;;  %v7657_v59 = vld [vmem:[#allocation3 + $0x160] sm:$0xff] }
 0x5b9   : > { %v7223_v60 = vpop.f32.mrf.mxu0 }
 0x5ba   : > { %v6690_v11 = vpop.f32.mrf.mxu1  ;;  %7572 = vst [vmem:[%s16235_s11 + $0x1b0] sm:$0xff] %v7476_v6  ;;  %7955 = vmatmul.mubr.bf16.gmra.mxu1 %v7676_v7  ;;  %v7477_v14 = vadd.f32 %v7223_v60, %v6686_v35 }
 0x5bb   : > { %v7227_v16 = vpop.f32.mrf.mxu0  ;;  %8684 = vmatmul.mubr.bf16.gmra.mxu0 %v8405_v8  ;;  %7964 = vmatprep.mubr.bf16.mxu1 %v14585_v0 }
 0x5bc   : > { %v6692_v17 = vpop.f32.mrf.mxu1  ;;  %7573 = vst [vmem:[%s16235_s11 + $0x1b8] sm:$0xff] %v7477_v14  ;;  %v7478_v36 = vadd.f32 %v7227_v16, %v6690_v11  ;;  %8693 = vmatprep.mubr.bf16.mxu0 %v14585_v0  ;;  %v8380_v11 = vld [vmem:[#allocation3 + $0x131] sm:$0xff]  ;;  %v7650_v16 = vld [vmem:[#allocation3 + $0x128] sm:$0xff] }
 0x5bd   : > { %v7229_v62 = vpop.f32.mrf.mxu0 }
 0x5be   : > { %v6694_v37 = vpop.f32.mrf.mxu1  ;;  %7574 = vst [vmem:[%s16235_s11 + $0x1c0] sm:$0xff] %v7478_v36  ;;  %v7479_v52 = vadd.f32 %v7229_v62, %v6692_v17  ;;  %v7680_v62 = vpack.c.bf16 %v7651_v47, %v7650_v16  ;;  %v8385_v47 = vld [vmem:[#allocation3 + $0x159] sm:$0xff] }
 0x5bf   : > { %v7231_v54 = vpop.f32.mrf.mxu0 }
 0x5c0   : > { %v6696_v48 = vpop.f32.mrf.mxu1  ;;  %7575 = vst [vmem:[%s16235_s11 + $0x1c8] sm:$0xff] %v7479_v52  ;;  %v7480_v24 = vadd.f32 %v7231_v54, %v6694_v37  ;;  %v8409_v52 = vpack.c.bf16 %v8380_v11, %v8379_v22  ;;  %v7659_v22 = vld [vmem:[#allocation3 + $0x170] sm:$0xff] }
 0x5c1   : > { %v7233_v45 = vpop.f32.mrf.mxu0 }
 0x5c2   : > { %v6700_v43 = vpop.f32.mrf.mxu1  ;;  %7576 = vst [vmem:[%s16235_s11 + $0x1d0] sm:$0xff] %v7480_v24  ;;  %7965 = vmatmul.mubr.bf16.gmra.mxu1 %v7677_v25  ;;  %v7481_v53 = vadd.f32 %v7233_v45, %v6696_v48 }
 0x5c3   : > { %v7237_v63 = vpop.f32.mrf.mxu0  ;;  %8694 = vmatmul.mubr.bf16.gmra.mxu0 %v8406_v61  ;;  %7974 = vmatprep.mubr.bf16.mxu1 %v14585_v0 }
 0x5c4   : > { %v6702_v29 = vpop.f32.mrf.mxu1  ;;  %7577 = vst [vmem:[%s16235_s11 + $0x1d8] sm:$0xff] %v7481_v53  ;;  %v7482_v30 = vadd.f32 %v7237_v63, %v6700_v43  ;;  %8703 = vmatprep.mubr.bf16.mxu0 %v14585_v0  ;;  %v8382_v43 = vld [vmem:[#allocation3 + $0x141] sm:$0xff]  ;;  %v7652_v63 = vld [vmem:[#allocation3 + $0x138] sm:$0xff] }
 0x5c5   : > { %v7239_v56 = vpop.f32.mrf.mxu0 }
 0x5c6   : > { %v6704_v33 = vpop.f32.mrf.mxu1  ;;  %7578 = vst [vmem:[%s16235_s11 + $0x1e0] sm:$0xff] %v7482_v30  ;;  %v7483_v34 = vadd.f32 %v7239_v56, %v6702_v29  ;;  %v7681_v56 = vpack.c.bf16 %v7653_v28, %v7652_v63  ;;  %v8387_v28 = vld [vmem:[#allocation3 + $0x169] sm:$0xff] }
 0x5c7   : > { %v7241_v39 = vpop.f32.mrf.mxu0 }
 0x5c8   : > { %v6706_v1 = vpop.f32.mrf.mxu1  ;;  %7579 = vst [vmem:[%s16235_s11 + $0x1e8] sm:$0xff] %v7483_v34  ;;  %v7484_v13 = vadd.f32 %v7241_v39, %v6704_v33  ;;  %v8410_v34 = vpack.c.bf16 %v8382_v43, %v8381_v18  ;;  %v7661_v18 = vld [vmem:[#allocation3 + $0x180] sm:$0xff] }
 0x5c9   : > { %v7243_v27 = vpop.f32.mrf.mxu0 }
 0x5ca   : > { %v6710_v49 = vpop.f32.mrf.mxu1  ;;  %7580 = vst [vmem:[%s16235_s11 + $0x1f0] sm:$0xff] %v7484_v13  ;;  %7975 = vmatmul.mubr.bf16.gmra.mxu1 %v7678_v44  ;;  %v7485_v51 = vadd.f32 %v7243_v27, %v6706_v1 }
 0x5cb   : > { %v7247_v12 = vpop.f32.mrf.mxu0  ;;  %8704 = vmatmul.mubr.bf16.gmra.mxu0 %v8407_v46  ;;  %7984 = vmatprep.mubr.bf16.mxu1 %v14585_v0 }
 0x5cc   : > { %v6712_v2 = vpop.f32.mrf.mxu1  ;;  %7581 = vst [vmem:[%s16235_s11 + $0x1f8] sm:$0xff] %v7485_v51  ;;  %v7486_v21 = vadd.f32 %v7247_v12, %v6710_v49  ;;  %8713 = vmatprep.mubr.bf16.mxu0 %v14585_v0  ;;  %v8384_v49 = vld [vmem:[#allocation3 + $0x151] sm:$0xff]  ;;  %v7654_v12 = vld [vmem:[#allocation3 + $0x148] sm:$0xff] }
 0x5cd   : > { %v7249_v10 = vpop.f32.mrf.mxu0 }
 0x5ce   : > { %v6714_v5 = vpop.f32.mrf.mxu1  ;;  %7582 = vst [vmem:[%s16235_s11 + $0x200] sm:$0xff] %v7486_v21  ;;  %v7487_v38 = vadd.f32 %v7249_v10, %v6712_v2  ;;  %v7682_v10 = vpack.c.bf16 %v7655_v57, %v7654_v12  ;;  %v8389_v57 = vld [vmem:[#allocation3 + $0x179] sm:$0xff] }
 0x5cf   : > { %v7251_v19 = vpop.f32.mrf.mxu0 }
 0x5d0   : > { %v6716_v20 = vpop.f32.mrf.mxu1  ;;  %7583 = vst [vmem:[%s16235_s11 + $0x208] sm:$0xff] %v7487_v38  ;;  %v7488_v32 = vadd.f32 %v7251_v19, %v6714_v5  ;;  %v8411_v38 = vpack.c.bf16 %v8384_v49, %v8383_v31  ;;  %v9073_v31 = vld [vmem:[#allocation3 + $0x48] sm:$0xff] }
 0x5d1   : > { %v7253_v3 = vpop.f32.mrf.mxu0 }
 0x5d2   : > { %v6720_v4 = vpop.f32.mrf.mxu1  ;;  %7584 = vst [vmem:[%s16235_s11 + $0x210] sm:$0xff] %v7488_v32  ;;  %7985 = vmatmul.mubr.bf16.gmra.mxu1 %v7679_v58  ;;  %v7489_v50 = vadd.f32 %v7253_v3, %v6716_v20 }
 0x5d3   : > { %v7257_v42 = vpop.f32.mrf.mxu0  ;;  %8714 = vmatmul.mubr.bf16.gmra.mxu0 %v8408_v9  ;;  %7994 = vmatprep.mubr.bf16.mxu1 %v14585_v0 }
 0x5d4   : > { %v6722_v35 = vpop.f32.mrf.mxu1  ;;  %7585 = vst [vmem:[%s16235_s11 + $0x218] sm:$0xff] %v7489_v50  ;;  %v7490_v6 = vadd.f32 %v7257_v42, %v6720_v4  ;;  %8723 = vmatprep.mubr.bf16.mxu0 %v14585_v0  ;;  %v8386_v4 = vld [vmem:[#allocation3 + $0x161] sm:$0xff]  ;;  %v7656_v42 = vld [vmem:[#allocation3 + $0x158] sm:$0xff] }
 0x5d5   : > { %v7259_v7 = vpop.f32.mrf.mxu0 }
 0x5d6   : > { %v6724_v60 = vpop.f32.mrf.mxu1  ;;  %7586 = vst [vmem:[%s16235_s11 + $0x220] sm:$0xff] %v7490_v6  ;;  %v7491_v8 = vadd.f32 %v7259_v7, %v6722_v35  ;;  %v7683_v7 = vpack.c.bf16 %v7657_v59, %v7656_v42  ;;  %v14534_v42 = vld [vmem:[%s17337_s5 + $0x364] ss:$8 sps:$4 sm:$0xff]  }
 0x5d7   : > { %v7261_v14 = vpop.f32.mrf.mxu0 }
 0x5d8   : > { %v6726_v17 = vpop.f32.mrf.mxu1  ;;  %7587 = vst [vmem:[%s16235_s11 + $0x228] sm:$0xff] %v7491_v8  ;;  %v7492_v36 = vadd.f32 %v7261_v14, %v6724_v60  ;;  %v8412_v8 = vpack.c.bf16 %v8386_v4, %v8385_v47  ;;  %v14537_v47 = vld [vmem:[%s17337_s5 + $0x3e4] ss:$8 sps:$4 sm:$0xff]  }
 0x5d9   : > { %v7263_v37 = vpop.f32.mrf.mxu0 }
 0x5da   : > { %v6730_v41 = vpop.f32.mrf.mxu1  ;;  %7588 = vst [vmem:[%s16235_s11 + $0x230] sm:$0xff] %v7492_v36  ;;  %7995 = vmatmul.mubr.bf16.gmra.mxu1 %v7680_v62  ;;  %v7493_v54 = vadd.f32 %v7263_v37, %v6726_v17 }
 0x5db   : > { %v7267_v23 = vpop.f32.mrf.mxu0  ;;  %8724 = vmatmul.mubr.bf16.gmra.mxu0 %v8409_v52  ;;  %8004 = vmatprep.mubr.bf16.mxu1 %v14585_v0 }
 0x5dc   : > { %v6732_v48 = vpop.f32.mrf.mxu1  ;;  %7589 = vst [vmem:[%s16235_s11 + $0x238] sm:$0xff] %v7493_v54  ;;  %v7494_v24 = vadd.f32 %v7267_v23, %v6730_v41  ;;  %8733 = vmatprep.mubr.bf16.mxu0 %v14585_v0  ;;  %v8388_v41 = vld [vmem:[#allocation3 + $0x171] sm:$0xff]  ;;  %v7658_v23 = vld [vmem:[#allocation3 + $0x168] sm:$0xff] }
 0x5dd   : > { %v7269_v25 = vpop.f32.mrf.mxu0 }
 0x5de   : > { %v6734_v45 = vpop.f32.mrf.mxu1  ;;  %7590 = vst [vmem:[%s16235_s11 + $0x240] sm:$0xff] %v7494_v24  ;;  %v7495_v61 = vadd.f32 %v7269_v25, %v6732_v48  ;;  %v7684_v25 = vpack.c.bf16 %v7659_v22, %v7658_v23  ;;  %v8057_v23 = vld [vmem:[%s16235_s11 + $0x10] sm:$0xff] }
 0x5df   : > { %v7271_v53 = vpop.f32.mrf.mxu0 }
 0x5e0   : > { %v6736_v29 = vpop.f32.mrf.mxu1  ;;  %7591 = vst [vmem:[%s16235_s11 + $0x248] sm:$0xff] %v7495_v61  ;;  %v7496_v30 = vadd.f32 %v7271_v53, %v6734_v45  ;;  %v8413_v61 = vpack.c.bf16 %v8388_v41, %v8387_v28  ;;  %v14543_v41 = vld [vmem:[%s17337_s5 + $0x3d4] ss:$8 sps:$4 sm:$0xff]  }
 0x5e1   : > { %v7273_v33 = vpop.f32.mrf.mxu0 }
 0x5e2   : > { %v6740_v55 = vpop.f32.mrf.mxu1  ;;  %7592 = vst [vmem:[%s16235_s11 + $0x250] sm:$0xff] %v7496_v30  ;;  %8005 = vmatmul.mubr.bf16.gmra.mxu1 %v7681_v56  ;;  %v7497_v39 = vadd.f32 %v7273_v33, %v6736_v29 }
 0x5e3   : > { %v7277_v40 = vpop.f32.mrf.mxu0  ;;  %8734 = vmatmul.mubr.bf16.gmra.mxu0 %v8410_v34  ;;  %8014 = vmatprep.mubr.bf16.mxu1 %v14585_v0 }
 0x5e4   : > { %v6742_v1 = vpop.f32.mrf.mxu1  ;;  %7593 = vst [vmem:[%s16235_s11 + $0x258] sm:$0xff] %v7497_v39  ;;  %v7498_v13 = vadd.f32 %v7277_v40, %v6740_v55  ;;  %8743 = vmatprep.mubr.bf16.mxu0 %v14585_v0  ;;  %v8390_v55 = vld [vmem:[#allocation3 + $0x181] sm:$0xff]  ;;  %v7660_v40 = vld [vmem:[#allocation3 + $0x178] sm:$0xff] }
 0x5e5   : > { %v7279_v44 = vpop.f32.mrf.mxu0 }
 0x5e6   : > { %v6744_v27 = vpop.f32.mrf.mxu1  ;;  %7594 = vst [vmem:[%s16235_s11 + $0x260] sm:$0xff] %v7498_v13  ;;  %v7499_v46 = vadd.f32 %v7279_v44, %v6742_v1  ;;  %v7685_v44 = vpack.c.bf16 %v7661_v18, %v7660_v40  ;;  %v8059_v40 = vld [vmem:[%s16235_s11 + $0x20] sm:$0xff] }
 0x5e7   : > { %v7281_v51 = vpop.f32.mrf.mxu0 }
 0x5e8   : > { %v6746_v2 = vpop.f32.mrf.mxu1  ;;  %7595 = vst [vmem:[%s16235_s11 + $0x268] sm:$0xff] %v7499_v46  ;;  %v7500_v21 = vadd.f32 %v7281_v51, %v6744_v27  ;;  %v8414_v46 = vpack.c.bf16 %v8390_v55, %v8389_v57  ;;  %v14546_v55 = vld [vmem:[%s17337_s5 + $0x344] ss:$8 sps:$4 sm:$0xff]  }
 0x5e9   : > { %v7283_v5 = vpop.f32.mrf.mxu0 }
 0x5ea   : > { %v6750_v26 = vpop.f32.mrf.mxu1  ;;  %7596 = vst [vmem:[%s16235_s11 + $0x270] sm:$0xff] %v7500_v21  ;;  %8015 = vmatmul.mubr.bf16.gmra.mxu1 %v7682_v10  ;;  %v7501_v19 = vadd.f32 %v7283_v5, %v6746_v2 }
 0x5eb   : > { %v7287_v15 = vpop.f32.mrf.mxu0  ;;  %8744 = vmatmul.mubr.bf16.gmra.mxu0 %v8411_v38  ;;  %8024 = vmatprep.mubr.bf16.mxu1 %v14585_v0 }
 0x5ec   : > { %v6752_v20 = vpop.f32.mrf.mxu1  ;;  %7597 = vst [vmem:[%s16235_s11 + $0x278] sm:$0xff] %v7501_v19  ;;  %v7502_v32 = vadd.f32 %v7287_v15, %v6750_v26  ;;  %8753 = vmatprep.mubr.bf16.mxu0 %v14585_v0  ;;  %v9802_v26 = vld [vmem:[#allocation3 + $0x49] sm:$0xff] }
 0x5ed   : > { %v7289_v58 = vpop.f32.mrf.mxu0  ;;  %v14526_v19 = vld [vmem:[%s17337_s5 + $0x370] ss:$8 sps:$4 sm:$0xff]  }
 0x5ee   : > { %v6754_v3 = vpop.f32.mrf.mxu1  ;;  %7598 = vst [vmem:[%s16235_s11 + $0x280] sm:$0xff] %v7502_v32  ;;  %v7503_v9 = vadd.f32 %v7289_v58, %v6752_v20  ;;  %v9072_v20 = vld [vmem:[#allocation3 + $0x40] sm:$0xff] }
 0x5ef   : > { %v7291_v50 = vpop.f32.mrf.mxu0  ;;  %v9120_v59 = vpack.c.bf16 %v9073_v31, %v9072_v20  ;;  %v14552_v31 = vld [vmem:[%s17337_s5 + $0x334] ss:$8 sps:$4 sm:$0xff]  }
 0x5f0   : > { %v6756_v35 = vpop.f32.mrf.mxu1  ;;  %7599 = vst [vmem:[%s16235_s11 + $0x288] sm:$0xff] %v7503_v9  ;;  %v7504_v6 = vadd.f32 %v7291_v50, %v6754_v3  ;;  %v9801_v3 = vld [vmem:[#allocation3 + $0x41] sm:$0xff]  ;;  %v14529_v9 = vld [vmem:[%s17337_s5 + $0x3f0] ss:$8 sps:$4 sm:$0xff]  }
 0x5f1   : > { %v7293_v60 = vpop.f32.mrf.mxu0  ;;  %v9849_v50 = vpack.c.bf16 %v9802_v26, %v9801_v3  ;;  %v9806_v26 = vld [vmem:[#allocation3 + $0x69] sm:$0xff]  ;;  %v8062_v3 = vld [vmem:[%s16235_s11 + $0x38] sm:$0xff] }
 0x5f2   : > { %v6760_v11 = vpop.f32.mrf.mxu1  ;;  %7600 = vst [vmem:[%s16235_s11 + $0x290] sm:$0xff] %v7504_v6  ;;  %8025 = vmatmul.mubr.bf16.gmra.mxu1 %v7683_v7  ;;  %v7505_v14 = vadd.f32 %v7293_v60, %v6756_v35  ;;  %v8055_v6 = vld [vmem:[%s16235_s11] sm:$0xff] }
 0x5f3   : > { %v7297_v16 = vpop.f32.mrf.mxu0  ;;  %8754 = vmatmul.mubr.bf16.gmra.mxu0 %v8412_v8  ;;  %8034 = vmatprep.mubr.bf16.mxu1 %v14585_v0 }
 0x5f4   : > { %v6762_v17 = vpop.f32.mrf.mxu1  ;;  %7601 = vst [vmem:[%s16235_s11 + $0x298] sm:$0xff] %v7505_v14  ;;  %v7506_v36 = vadd.f32 %v7297_v16, %v6760_v11  ;;  %8763 = vmatprep.mubr.bf16.mxu0 %v14585_v0  ;;  %v14532_v11 = vld [vmem:[%s17337_s5 + $0x360] ss:$8 sps:$4 sm:$0xff]  }
 0x5f5   : > { %v7299_v62 = vpop.f32.mrf.mxu0  ;;  %v8056_v16 = vld [vmem:[%s16235_s11 + $0x8] sm:$0xff] }
 0x5f6   : > { %v6764_v37 = vpop.f32.mrf.mxu1  ;;  %7602 = vst [vmem:[%s16235_s11 + $0x2a0] sm:$0xff] %v7506_v36  ;;  %v7507_v52 = vadd.f32 %v7299_v62, %v6762_v17  ;;  %v14535_v17 = vld [vmem:[%s17337_s5 + $0x3e0] ss:$8 sps:$4 sm:$0xff]   ;;  %v14540_v36 = vld [vmem:[%s17337_s5 + $0x354] ss:$8 sps:$4 sm:$0xff]  }
 0x5f7   : > { %v7301_v54 = vpop.f32.mrf.mxu0 }
 0x5f8   : > { %v6766_v48 = vpop.f32.mrf.mxu1  ;;  %7603 = vst [vmem:[%s16235_s11 + $0x2a8] sm:$0xff] %v7507_v52  ;;  %v7508_v24 = vadd.f32 %v7301_v54, %v6764_v37  ;;  %v9075_v52 = vld [vmem:[#allocation3 + $0x58] sm:$0xff] }
 0x5f9   : > { %v7303_v45 = vpop.f32.mrf.mxu0 }
 0x5fa   : > { %v6770_v43 = vpop.f32.mrf.mxu1  ;;  %7604 = vst [vmem:[%s16235_s11 + $0x2b0] sm:$0xff] %v7508_v24  ;;  %8035 = vmatmul.mubr.bf16.gmra.mxu1 %v7684_v25  ;;  %v7509_v53 = vadd.f32 %v7303_v45, %v6766_v48  ;;  %v9804_v48 = vld [vmem:[#allocation3 + $0x59] sm:$0xff]  ;;  %v9074_v45 = vld [vmem:[#allocation3 + $0x50] sm:$0xff] }
 0x5fb   : > { %v7307_v63 = vpop.f32.mrf.mxu0  ;;  %8764 = vmatmul.mubr.bf16.gmra.mxu0 %v8413_v61  ;;  %8044 = vmatprep.mubr.bf16.mxu1 %v14585_v0 }
 0x5fc   : > { %v6772_v29 = vpop.f32.mrf.mxu1  ;;  %7605 = vst [vmem:[%s16235_s11 + $0x2b8] sm:$0xff] %v7509_v53  ;;  %v7510_v30 = vadd.f32 %v7307_v63, %v6770_v43  ;;  %8773 = vmatprep.mubr.bf16.mxu0 %v14585_v0  ;;  %v8058_v43 = vld [vmem:[%s16235_s11 + $0x18] sm:$0xff]  ;;  %v9121_v53 = vpack.c.bf16 %v9075_v52, %v9074_v45 }
 0x5fd   : > { %v7309_v56 = vpop.f32.mrf.mxu0  ;;  %v9803_v63 = vld [vmem:[#allocation3 + $0x51] sm:$0xff]  ;;  %v9808_v45 = vld [vmem:[#allocation3 + $0x79] sm:$0xff] }
 0x5fe   : > { %v6774_v33 = vpop.f32.mrf.mxu1  ;;  %7606 = vst [vmem:[%s16235_s11 + $0x2c0] sm:$0xff] %v7510_v30  ;;  %v7511_v34 = vadd.f32 %v7309_v56, %v6772_v29  ;;  %v14538_v29 = vld [vmem:[%s17337_s5 + $0x350] ss:$8 sps:$4 sm:$0xff]  }
 0x5ff   : > { %v7311_v39 = vpop.f32.mrf.mxu0 }
 0x600   : > { %v6776_v1 = vpop.f32.mrf.mxu1  ;;  %7607 = vst [vmem:[%s16235_s11 + $0x2c8] sm:$0xff] %v7511_v34  ;;  %v7512_v13 = vadd.f32 %v7311_v39, %v6774_v33  ;;  %v9850_v33 = vpack.c.bf16 %v9804_v48, %v9803_v63  ;;  %v14541_v34 = vld [vmem:[%s17337_s5 + $0x3d0] ss:$8 sps:$4 sm:$0xff]   ;;  %v14559_v48 = vld [vmem:[%s17337_s5 + $0x3a0] ss:$8 sps:$4 sm:$0xff]  }
 0x601   : > { %v7313_v27 = vpop.f32.mrf.mxu0  ;;  %v9078_v63 = vld [vmem:[#allocation3 + $0x70] sm:$0xff] }
 0x602   : > { %v6780_v49 = vpop.f32.mrf.mxu1  ;;  %7608 = vst [vmem:[%s16235_s11 + $0x2d0] sm:$0xff] %v7512_v13  ;;  %8045 = vmatmul.mubr.bf16.gmra.mxu1 %v7685_v44  ;;  %v7513_v51 = vadd.f32 %v7313_v27, %v6776_v1  ;;  %v14549_v1 = vld [vmem:[%s17337_s5 + $0x3c4] ss:$8 sps:$4 sm:$0xff]  }
 0x603   : > { %v7317_v12 = vpop.f32.mrf.mxu0  ;;  %8774 = vmatmul.mubr.bf16.gmra.mxu0 %v8414_v46  ;;  %9272 = vmatprep.mubr.bf16.mxu1 %v14585_v0  ;;  %v8060_v46 = vld [vmem:[%s16235_s11 + $0x28] sm:$0xff] }
 0x604   : > { %v6782_v2 = vpop.f32.mrf.mxu1  ;;  %7609 = vst [vmem:[%s16235_s11 + $0x2d8] sm:$0xff] %v7513_v51  ;;  %v7514_v21 = vadd.f32 %v7317_v12, %v6780_v49  ;;  %10001 = vmatprep.mubr.bf16.mxu0 %v14585_v0  ;;  %v14544_v49 = vld [vmem:[%s17337_s5 + $0x340] ss:$8 sps:$4 sm:$0xff]  }
 0x605   : > { %v7319_v10 = vpop.f32.mrf.mxu0 }
 0x606   : > { %v6784_v5 = vpop.f32.mrf.mxu1  ;;  %7610 = vst [vmem:[%s16235_s11 + $0x2e0] sm:$0xff] %v7514_v21  ;;  %v7515_v38 = vadd.f32 %v7319_v10, %v6782_v2  ;;  %v9077_v21 = vld [vmem:[#allocation3 + $0x68] sm:$0xff] }
 0x607   : > { %v7321_v15 = vpop.f32.mrf.mxu0  ;;  %v14547_v10 = vld [vmem:[%s17337_s5 + $0x3c0] ss:$8 sps:$4 sm:$0xff]  }
 0x608   : > { %v6786_v32 = vpop.f32.mrf.mxu1  ;;  %7611 = vst [vmem:[%s16235_s11 + $0x2e8] sm:$0xff] %v7515_v38  ;;  %v7516_v58 = vadd.f32 %v7321_v15, %v6784_v5  ;;  %v8061_v38 = vld [vmem:[%s16235_s11 + $0x30] sm:$0xff] }
 0x609   : > { %v7323_v4 = vpop.f32.mrf.mxu0 }
 0x60a   : > { %7612 = vst [vmem:[%s16235_s11 + $0x2f0] sm:$0xff] %v7516_v58  ;;  %v7816_v35 = vpop.f32.mrf.mxu1  ;;  %9273 = vmatmul.mubr.bf16.vlgmr.msra.gmra.mxu1 %v9120_v59  ;;  %v7517_v7 = vadd.f32 %v7323_v4, %v6786_v32  ;;  %v9076_v58 = vld [vmem:[#allocation3 + $0x60] sm:$0xff] }
 0x60b   : > { %v8151_v60 = vadd.f32 %v8055_v6, %v7816_v35  ;;  %10699 = vmatpush1.bf16.msra.mxu1 %v14526_v19  ;;  %v8545_v8 = vpop.f32.mrf.mxu0  ;;  %10002 = vmatmul.mubr.bf16.vlgmr.msra.gmra.mxu0 %v9849_v50  ;;  %v14555_v19 = vld [vmem:[%s17337_s5 + $0x3b4] ss:$8 sps:$4 sm:$0xff]   ;;  %v9805_v4 = vld [vmem:[#allocation3 + $0x61] sm:$0xff]  ;;  %v14550_v50 = vld [vmem:[%s17337_s5 + $0x330] ss:$8 sps:$4 sm:$0xff]  }
 0x60c   : > { %7613 = vst [vmem:[%s16235_s11 + $0x2f8] sm:$0xff] %v7517_v7  ;;  %v7818_v14 = vpop.f32.mrf.mxu1  ;;  %9282 = vmatprep.mubr.bf16.mxu1 %v14585_v0  ;;  %11428 = vmatpush1.bf16.msra.mxu0 %v14529_v9  ;;  %v9122_v9 = vpack.c.bf16 %v9077_v21, %v9076_v58  ;;  %v9851_v7 = vpack.c.bf16 %v9806_v26, %v9805_v4  ;;  %v9810_v26 = vld [vmem:[#allocation3 + $0x89] sm:$0xff] }
 0x60d   : > { %v8152_v62 = vadd.f32 %v8056_v16, %v7818_v14  ;;  %v8880_v22 = vadd.f32 %v8545_v8, %v8151_v60  ;;  %v8547_v37 = vpop.f32.mrf.mxu0  ;;  %10011 = vmatprep.mubr.bf16.mxu0 %v14585_v0  ;;  %10700 = vmatprep.subr.bf16.mxu1 %v14534_v42  ;;  %v14558_v60 = vld [vmem:[%s17337_s5 + $0x324] ss:$8 sps:$4 sm:$0xff]  }
 0x60e   : > { %v7820_v54 = vpop.f32.mrf.mxu1  ;;  %11429 = vmatprep.subr.bf16.mxu0 %v14537_v47  ;;  %v14553_v47 = vld [vmem:[%s17337_s5 + $0x3b0] ss:$8 sps:$4 sm:$0xff]   ;;  %v14561_v14 = vld [vmem:[%s17337_s5 + $0x3a4] ss:$8 sps:$4 sm:$0xff]  }
 0x60f   : > { %v8153_v24 = vadd.f32 %v8057_v23, %v7820_v54  ;;  %8976 = vst [vmem:[%s16235_s11] sm:$0xff] %v8880_v22  ;;  %v8881_v25 = vadd.f32 %v8547_v37, %v8152_v62  ;;  %v8549_v28 = vpop.f32.mrf.mxu0  ;;  %10701 = vmatpush1.bf16.msra.mxu1 %v14532_v11  ;;  %v8063_v11 = vld [vmem:[%s16235_s11 + $0x40] sm:$0xff]  ;;  %v8064_v22 = vld [vmem:[%s16235_s11 + $0x48] sm:$0xff]  ;;  %v9079_v23 = vld [vmem:[#allocation3 + $0x78] sm:$0xff] }
 0x610   : > { %v7822_v61 = vpop.f32.mrf.mxu1  ;;  %11430 = vmatpush1.bf16.msra.mxu0 %v14535_v17  ;;  %10702 = vmatprep.subr.bf16.mxu1 %v14540_v36  ;;  %v14556_v37 = vld [vmem:[%s17337_s5 + $0x320] ss:$8 sps:$4 sm:$0xff]  }
 0x611   : > { %v8154_v30 = vadd.f32 %v8058_v43, %v7822_v61  ;;  %8977 = vst [vmem:[%s16235_s11 + $0x8] sm:$0xff] %v8881_v25  ;;  %v8882_v56 = vadd.f32 %v8549_v28, %v8153_v24  ;;  %v8551_v18 = vpop.f32.mrf.mxu0  ;;  %11431 = vmatprep.subr.bf16.mxu0 %v14543_v41  ;;  %v14564_v24 = vld [vmem:[%s17337_s5 + $0x314] ss:$8 sps:$4 sm:$0xff]  }
 0x612   : > { %v7826_v39 = vpop.f32.mrf.mxu1  ;;  %9283 = vmatmul.mubr.bf16.gmra.mxu1 %v9121_v53  ;;  %v8065_v28 = vld [vmem:[%s16235_s11 + $0x50] sm:$0xff] }
 0x613   : > { %v8155_v13 = vadd.f32 %v8059_v40, %v7826_v39  ;;  %8978 = vst [vmem:[%s16235_s11 + $0x10] sm:$0xff] %v8882_v56  ;;  %v8883_v44 = vadd.f32 %v8551_v18, %v8154_v30  ;;  %v8555_v57 = vpop.f32.mrf.mxu0  ;;  %10012 = vmatmul.mubr.bf16.gmra.mxu0 %v9850_v33  ;;  %9292 = vmatprep.mubr.bf16.mxu1 %v14585_v0  ;;  %v8066_v30 = vld [vmem:[%s16235_s11 + $0x58] sm:$0xff] }
 0x614   : > { %v7828_v27 = vpop.f32.mrf.mxu1  ;;  %10021 = vmatprep.mubr.bf16.mxu0 %v14585_v0  ;;  %10703 = vmatpush1.bf16.msra.mxu1 %v14538_v29  ;;  %v9123_v56 = vpack.c.bf16 %v9079_v23, %v9078_v63  ;;  %v9807_v18 = vld [vmem:[#allocation3 + $0x71] sm:$0xff] }
 0x615   : > { %v8156_v51 = vadd.f32 %v8060_v46, %v7828_v27  ;;  %8979 = vst [vmem:[%s16235_s11 + $0x18] sm:$0xff] %v8883_v44  ;;  %v8884_v12 = vadd.f32 %v8555_v57, %v8155_v13  ;;  %v8557_v2 = vpop.f32.mrf.mxu0  ;;  %11432 = vmatpush1.bf16.msra.mxu0 %v14541_v34  ;;  %10704 = vmatprep.subr.bf16.mxu1 %v14546_v55  ;;  %v14562_v33 = vld [vmem:[%s17337_s5 + $0x310] ss:$8 sps:$4 sm:$0xff]   ;;  %v8067_v13 = vld [vmem:[%s16235_s11 + $0x60] sm:$0xff] }
 0x616   : > { %v7830_v5 = vpop.f32.mrf.mxu1  ;;  %11433 = vmatprep.subr.bf16.mxu0 %v14549_v1  ;;  %v9852_v40 = vpack.c.bf16 %v9808_v45, %v9807_v18  ;;  %v14565_v46 = vld [vmem:[%s17337_s5 + $0x390] ss:$8 sps:$4 sm:$0xff]   ;;  %v8075_v18 = vld [vmem:[%s16235_s11 + $0xa0] sm:$0xff] }
 0x617   : > { %v8157_v15 = vadd.f32 %v8061_v38, %v7830_v5  ;;  %8980 = vst [vmem:[%s16235_s11 + $0x20] sm:$0xff] %v8884_v12  ;;  %v8885_v20 = vadd.f32 %v8557_v2, %v8156_v51  ;;  %v8559_v32 = vpop.f32.mrf.mxu0  ;;  %v8068_v12 = vld [vmem:[%s16235_s11 + $0x68] sm:$0xff]  ;;  %v8069_v38 = vld [vmem:[%s16235_s11 + $0x70] sm:$0xff] }
 0x618   : > { %v7832_v59 = vpop.f32.mrf.mxu1  ;;  %10705 = vmatpush1.bf16.msra.mxu1 %v14544_v49  ;;  %v14567_v49 = vld [vmem:[%s17337_s5 + $0x394] ss:$8 sps:$4 sm:$0xff]  }
 0x619   : > { %v8158_v42 = vadd.f32 %v8062_v3, %v7832_v59  ;;  %8981 = vst [vmem:[%s16235_s11 + $0x28] sm:$0xff] %v8885_v20  ;;  %v8886_v35 = vadd.f32 %v8559_v32, %v8157_v15  ;;  %v8561_v6 = vpop.f32.mrf.mxu0  ;;  %11434 = vmatpush1.bf16.msra.mxu0 %v14547_v10  ;;  %10706 = vmatprep.subr.bf16.mxu1 %v14552_v31  ;;  %v9081_v31 = vld [vmem:[#allocation3 + $0x88] sm:$0xff]  ;;  %v9080_v32 = vld [vmem:[#allocation3 + $0x80] sm:$0xff]  ;;  %v8070_v59 = vld [vmem:[%s16235_s11 + $0x78] sm:$0xff] }
 0x61a   : > { %v7836_v8 = vpop.f32.mrf.mxu1  ;;  %9293 = vmatmul.mubr.bf16.gmra.mxu1 %v9122_v9  ;;  %11435 = vmatprep.subr.bf16.mxu0 %v14555_v19  ;;  %v9124_v3 = vpack.c.bf16 %v9081_v31, %v9080_v32  ;;  %v9809_v9 = vld [vmem:[#allocation3 + $0x81] sm:$0xff]  ;;  %v9811_v45 = vld [vmem:[#allocation3 + $0x91] sm:$0xff] }
 0x61b   : > { %v8159_v16 = vadd.f32 %v8063_v11, %v7836_v8  ;;  %8982 = vst [vmem:[%s16235_s11 + $0x30] sm:$0xff] %v8886_v35  ;;  %v8887_v17 = vadd.f32 %v8561_v6, %v8158_v42  ;;  %v8565_v36 = vpop.f32.mrf.mxu0  ;;  %10022 = vmatmul.mubr.bf16.gmra.mxu0 %v9851_v7  ;;  %9302 = vmatprep.mubr.bf16.mxu1 %v14585_v0  ;;  %v8071_v7 = vld [vmem:[%s16235_s11 + $0x80] sm:$0xff]  ;;  %v8078_v31 = vld [vmem:[%s16235_s11 + $0xb8] sm:$0xff] }
 0x61c   : > { %v7838_v62 = vpop.f32.mrf.mxu1  ;;  %10031 = vmatprep.mubr.bf16.mxu0 %v14585_v0  ;;  %10707 = vmatpush1.bf16.msra.mxu1 %v14550_v50  ;;  %v9853_v35 = vpack.c.bf16 %v9810_v26, %v9809_v9 }
 0x61d   : > { %v8160_v52 = vadd.f32 %v8064_v22, %v7838_v62  ;;  %8983 = vst [vmem:[%s16235_s11 + $0x38] sm:$0xff] %v8887_v17  ;;  %v8888_v41 = vadd.f32 %v8565_v36, %v8159_v16  ;;  %v8567_v54 = vpop.f32.mrf.mxu0  ;;  %11436 = vmatpush1.bf16.msra.mxu0 %v14553_v47  ;;  %10708 = vmatprep.subr.bf16.mxu1 %v14558_v60  ;;  %v9083_v62 = vld [vmem:[#allocation3 + $0x98] sm:$0xff] }
 0x61e   : > { %v7840_v25 = vpop.f32.mrf.mxu1  ;;  %11437 = vmatprep.subr.bf16.mxu0 %v14561_v14  ;;  %v8072_v14 = vld [vmem:[%s16235_s11 + $0x88] sm:$0xff] }
 0x61f   : > { %v8161_v61 = vadd.f32 %v8065_v28, %v7840_v25  ;;  %8984 = vst [vmem:[%s16235_s11 + $0x40] sm:$0xff] %v8888_v41  ;;  %v8889_v43 = vadd.f32 %v8567_v54, %v8160_v52  ;;  %v8569_v53 = vpop.f32.mrf.mxu0  ;;  %v9812_v52 = vld [vmem:[#allocation3 + $0x99] sm:$0xff] }
 0x620   : > { %v7842_v29 = vpop.f32.mrf.mxu1  ;;  %10709 = vmatpush1.bf16.msra.mxu1 %v14556_v37  ;;  %v8073_v37 = vld [vmem:[%s16235_s11 + $0x90] sm:$0xff]  ;;  %v8074_v25 = vld [vmem:[%s16235_s11 + $0x98] sm:$0xff]  ;;  %v9854_v63 = vpack.c.bf16 %v9812_v52, %v9811_v45 }
 0x621   : > { %v8162_v34 = vadd.f32 %v8066_v30, %v7842_v29  ;;  %8985 = vst [vmem:[%s16235_s11 + $0x48] sm:$0xff] %v8889_v43  ;;  %v8890_v55 = vadd.f32 %v8569_v53, %v8161_v61  ;;  %v8571_v39 = vpop.f32.mrf.mxu0  ;;  %11438 = vmatpush1.bf16.msra.mxu0 %v14559_v48  ;;  %10710 = vmatprep.subr.bf16.mxu1 %v14564_v24  ;;  %v9082_v48 = vld [vmem:[#allocation3 + $0x90] sm:$0xff]  ;;  %v14568_v29 = vld [vmem:[%s17337_s5 + $0x300] ss:$8 sps:$4 sm:$0xff]   ;;  %v14570_v30 = vld [vmem:[%s17337_s5 + $0x304] ss:$8 sps:$4 sm:$0xff]  }
 0x622   : > { %v7846_v1 = vpop.f32.mrf.mxu1  ;;  %9303 = vmatmul.mubr.bf16.gmra.mxu1 %v9123_v56  ;;  %11439 = vmatprep.subr.bf16.mxu0 %v14567_v49  ;;  %v9125_v28 = vpack.c.bf16 %v9083_v62, %v9082_v48  ;;  %v9814_v49 = vld [vmem:[#allocation3 + $0xa9] sm:$0xff] }
 0x623   : > { %v8163_v44 = vadd.f32 %v8067_v13, %v7846_v1  ;;  %8986 = vst [vmem:[%s16235_s11 + $0x50] sm:$0xff] %v8890_v55  ;;  %v8891_v57 = vadd.f32 %v8571_v39, %v8162_v34  ;;  %v8575_v27 = vpop.f32.mrf.mxu0  ;;  %10032 = vmatmul.mubr.bf16.gmra.mxu0 %v9852_v40  ;;  %9312 = vmatprep.mubr.bf16.mxu1 %v14585_v0  ;;  %v8076_v40 = vld [vmem:[%s16235_s11 + $0xa8] sm:$0xff]  ;;  %v9086_v62 = vld [vmem:[#allocation3 + $0xb0] sm:$0xff] }
 0x624   : > { %v7848_v51 = vpop.f32.mrf.mxu1  ;;  %10041 = vmatprep.mubr.bf16.mxu0 %v14585_v0  ;;  %10711 = vmatpush1.bf16.msra.mxu1 %v14562_v33 }
 0x625   : > { %v8164_v2 = vadd.f32 %v8068_v12, %v7848_v51  ;;  %8987 = vst [vmem:[%s16235_s11 + $0x58] sm:$0xff] %v8891_v57  ;;  %v8892_v21 = vadd.f32 %v8575_v27, %v8163_v44  ;;  %v8577_v10 = vpop.f32.mrf.mxu0  ;;  %11440 = vmatpush1.bf16.msra.mxu0 %v14565_v46  ;;  %10712 = vmatprep.subr.bf16.mxu1 %v14570_v30  ;;  %v9085_v57 = vld [vmem:[#allocation3 + $0xa8] sm:$0xff]  ;;  %v8077_v46 = vld [vmem:[%s16235_s11 + $0xb0] sm:$0xff] }
 0x626   : > { %v7850_v5 = vpop.f32.mrf.mxu1 }
 0x627   : > { %v8165_v19 = vadd.f32 %v8069_v38, %v7850_v5  ;;  %8988 = vst [vmem:[%s16235_s11 + $0x60] sm:$0xff] %v8892_v21  ;;  %v8893_v15 = vadd.f32 %v8577_v10, %v8164_v2  ;;  %v8579_v20 = vpop.f32.mrf.mxu0  ;;  %v9084_v21 = vld [vmem:[#allocation3 + $0xa0] sm:$0xff] }
 0x628   : > { %v7852_v58 = vpop.f32.mrf.mxu1  ;;  %10713 = vmatpush1.bf16.msra.mxu1 %v14568_v29  ;;  %v9126_v5 = vpack.c.bf16 %v9085_v57, %v9084_v21  ;;  %v9813_v38 = vld [vmem:[#allocation3 + $0xa1] sm:$0xff]  ;;  %v8086_v57 = vld [vmem:[%s16235_s11 + $0xf8] sm:$0xff] }
 0x629   : > { %v8166_v4 = vadd.f32 %v8070_v59, %v7852_v58  ;;  %8989 = vst [vmem:[%s16235_s11 + $0x68] sm:$0xff] %v8893_v15  ;;  %v8894_v50 = vadd.f32 %v8579_v20, %v8165_v19  ;;  %v8581_v42 = vpop.f32.mrf.mxu0  ;;  %v9855_v20 = vpack.c.bf16 %v9814_v49, %v9813_v38  ;;  %v8079_v58 = vld [vmem:[%s16235_s11 + $0xc0] sm:$0xff] }
 0x62a   : > { %v7856_v6 = vpop.f32.mrf.mxu1  ;;  %9313 = vmatmul.mubr.bf16.gmra.mxu1 %v9124_v3 }
 0x62b   : > { %v8167_v47 = vadd.f32 %v8071_v7, %v7856_v6  ;;  %8990 = vst [vmem:[%s16235_s11 + $0x70] sm:$0xff] %v8894_v50  ;;  %v8895_v60 = vadd.f32 %v8581_v42, %v8166_v4  ;;  %v8585_v8 = vpop.f32.mrf.mxu0  ;;  %10042 = vmatmul.mubr.bf16.gmra.mxu0 %v9853_v35  ;;  %9322 = vmatprep.mubr.bf16.mxu1 %v14585_v0  ;;  %v14571_v4 = vld [vmem:[%s17337_s5 + $0x380] ss:$8 sps:$4 sm:$0xff]   ;;  %v14573_v50 = vld [vmem:[%s17337_s5 + $0x384] ss:$8 sps:$4 sm:$0xff]  }
 0x62c   : > { %v7858_v11 = vpop.f32.mrf.mxu1  ;;  %10051 = vmatprep.mubr.bf16.mxu0 %v14585_v0  ;;  %v8080_v35 = vld [vmem:[%s16235_s11 + $0xc8] sm:$0xff]  ;;  %11441 = vmatprep.subr.bf16.mxu0 %v14573_v50 }
 0x62d   : > { %v8168_v16 = vadd.f32 %v8072_v14, %v7858_v11  ;;  %8991 = vst [vmem:[%s16235_s11 + $0x78] sm:$0xff] %v8895_v60  ;;  %v8896_v17 = vadd.f32 %v8585_v8, %v8167_v47  ;;  %v8587_v36 = vpop.f32.mrf.mxu0  ;;  %v9087_v60 = vld [vmem:[#allocation3 + $0xb8] sm:$0xff]  ;;  %v8081_v11 = vld [vmem:[%s16235_s11 + $0xd0] sm:$0xff]  ;;  %11442 = vmatpush1.bf16.msra.mxu0 %v14571_v4 }
 0x62e   : > { %v7860_v22 = vpop.f32.mrf.mxu1  ;;  %v9816_v14 = vld [vmem:[#allocation3 + $0xb9] sm:$0xff]  ;;  %v9127_v52 = vpack.c.bf16 %v9087_v60, %v9086_v62  ;;  %v9819_v60 = vld [vmem:[#allocation3 + $0xd1] sm:$0xff] }
 0x62f   : > { %v8169_v41 = vadd.f32 %v8073_v37, %v7860_v22  ;;  %8992 = vst [vmem:[%s16235_s11 + $0x80] sm:$0xff] %v8896_v17  ;;  %v8897_v54 = vadd.f32 %v8587_v36, %v8168_v16  ;;  %v8589_v23 = vpop.f32.mrf.mxu0  ;;  %v8082_v37 = vld [vmem:[%s16235_s11 + $0xd8] sm:$0xff] }
 0x630   : > { %v7862_v24 = vpop.f32.mrf.mxu1 }
 0x631   : > { %v8170_v61 = vadd.f32 %v8074_v25, %v7862_v24  ;;  %8993 = vst [vmem:[%s16235_s11 + $0x88] sm:$0xff] %v8897_v54  ;;  %v8898_v43 = vadd.f32 %v8589_v23, %v8169_v41  ;;  %v8591_v53 = vpop.f32.mrf.mxu0  ;;  %v9815_v41 = vld [vmem:[#allocation3 + $0xb1] sm:$0xff] }
 0x632   : > { %v7866_v56 = vpop.f32.mrf.mxu1  ;;  %9323 = vmatmul.mubr.bf16.gmra.mxu1 %v9125_v28  ;;  %v9856_v24 = vpack.c.bf16 %v9816_v14, %v9815_v41  ;;  %v8083_v28 = vld [vmem:[%s16235_s11 + $0xe0] sm:$0xff]  ;;  %v8092_v41 = vld [vmem:[%s16235_s11 + $0x128] sm:$0xff] }
 0x633   : > { %v8171_v33 = vadd.f32 %v8075_v18, %v7866_v56  ;;  %8994 = vst [vmem:[%s16235_s11 + $0x90] sm:$0xff] %v8898_v43  ;;  %v8899_v34 = vadd.f32 %v8591_v53, %v8170_v61  ;;  %v8595_v55 = vpop.f32.mrf.mxu0  ;;  %10052 = vmatmul.mubr.bf16.gmra.mxu0 %v9854_v63  ;;  %9332 = vmatprep.mubr.bf16.mxu1 %v14585_v0  ;;  %v8084_v63 = vld [vmem:[%s16235_s11 + $0xe8] sm:$0xff] }
 0x634   : > { %v7868_v39 = vpop.f32.mrf.mxu1  ;;  %10061 = vmatprep.mubr.bf16.mxu0 %v14585_v0  ;;  %v9089_v18 = vld [vmem:[#allocation3 + $0xc8] sm:$0xff] }
 0x635   : > { %v8172_v1 = vadd.f32 %v8076_v40, %v7868_v39  ;;  %8995 = vst [vmem:[%s16235_s11 + $0x98] sm:$0xff] %v8899_v34  ;;  %v8900_v13 = vadd.f32 %v8595_v55, %v8171_v33  ;;  %v8597_v44 = vpop.f32.mrf.mxu0  ;;  %v8085_v34 = vld [vmem:[%s16235_s11 + $0xf0] sm:$0xff] }
 0x636   : > { %v7870_v27 = vpop.f32.mrf.mxu1  ;;  %v9818_v55 = vld [vmem:[#allocation3 + $0xc9] sm:$0xff] }
 0x637   : > { %v8173_v51 = vadd.f32 %v8077_v46, %v7870_v27  ;;  %8996 = vst [vmem:[%s16235_s11 + $0xa0] sm:$0xff] %v8900_v13  ;;  %v8901_v12 = vadd.f32 %v8597_v44, %v8172_v1  ;;  %v8599_v2 = vpop.f32.mrf.mxu0  ;;  %v9088_v13 = vld [vmem:[#allocation3 + $0xc0] sm:$0xff] }
 0x638   : > { %v7872_v10 = vpop.f32.mrf.mxu1  ;;  %v9128_v27 = vpack.c.bf16 %v9089_v18, %v9088_v13  ;;  %v9817_v46 = vld [vmem:[#allocation3 + $0xc1] sm:$0xff] }
 0x639   : > { %v8174_v26 = vadd.f32 %v8078_v31, %v7872_v10  ;;  %8997 = vst [vmem:[%s16235_s11 + $0xa8] sm:$0xff] %v8901_v12  ;;  %v8902_v19 = vadd.f32 %v8599_v2, %v8173_v51  ;;  %v8601_v15 = vpop.f32.mrf.mxu0  ;;  %v9857_v2 = vpack.c.bf16 %v9818_v55, %v9817_v46  ;;  %v8087_v10 = vld [vmem:[%s16235_s11 + $0x100] sm:$0xff]  ;;  %v8096_v46 = vld [vmem:[%s16235_s11 + $0x148] sm:$0xff] }
 0x63a   : > { %v7876_v32 = vpop.f32.mrf.mxu1  ;;  %9333 = vmatmul.mubr.bf16.gmra.mxu1 %v9126_v5  ;;  %v9821_v18 = vld [vmem:[#allocation3 + $0xe1] sm:$0xff] }
 0x63b   : > { %v8175_v59 = vadd.f32 %v8079_v58, %v7876_v32  ;;  %8998 = vst [vmem:[%s16235_s11 + $0xb0] sm:$0xff] %v8902_v19  ;;  %v8903_v3 = vadd.f32 %v8601_v15, %v8174_v26  ;;  %v8605_v9 = vpop.f32.mrf.mxu0  ;;  %10062 = vmatmul.mubr.bf16.gmra.mxu0 %v9855_v20  ;;  %9342 = vmatprep.mubr.bf16.mxu1 %v14585_v0  ;;  %v8088_v19 = vld [vmem:[%s16235_s11 + $0x108] sm:$0xff]  ;;  %v9091_v58 = vld [vmem:[#allocation3 + $0xd8] sm:$0xff] }
 0x63c   : > { %v7878_v42 = vpop.f32.mrf.mxu1  ;;  %10071 = vmatprep.mubr.bf16.mxu0 %v14585_v0 }
 0x63d   : > { %v8176_v6 = vadd.f32 %v8080_v35, %v7878_v42  ;;  %8999 = vst [vmem:[%s16235_s11 + $0xb8] sm:$0xff] %v8903_v3  ;;  %v8904_v7 = vadd.f32 %v8605_v9, %v8175_v59  ;;  %v8607_v47 = vpop.f32.mrf.mxu0  ;;  %v8089_v3 = vld [vmem:[%s16235_s11 + $0x110] sm:$0xff]  ;;  %v9820_v9 = vld [vmem:[#allocation3 + $0xd9] sm:$0xff] }
 0x63e   : > { %v7880_v8 = vpop.f32.mrf.mxu1  ;;  %v9090_v35 = vld [vmem:[#allocation3 + $0xd0] sm:$0xff] }
 0x63f   : > { %v8177_v16 = vadd.f32 %v8081_v11, %v7880_v8  ;;  %9000 = vst [vmem:[%s16235_s11 + $0xc0] sm:$0xff] %v8904_v7  ;;  %v8905_v17 = vadd.f32 %v8607_v47, %v8176_v6  ;;  %v8609_v36 = vpop.f32.mrf.mxu0  ;;  %v8090_v7 = vld [vmem:[%s16235_s11 + $0x118] sm:$0xff]  ;;  %v9129_v47 = vpack.c.bf16 %v9091_v58, %v9090_v35 }
 0x640   : > { %v7882_v22 = vpop.f32.mrf.mxu1  ;;  %v9823_v58 = vld [vmem:[#allocation3 + $0xf1] sm:$0xff] }
 0x641   : > { %v8178_v54 = vadd.f32 %v8082_v37, %v7882_v22  ;;  %9001 = vst [vmem:[%s16235_s11 + $0xc8] sm:$0xff] %v8905_v17  ;;  %v8906_v23 = vadd.f32 %v8609_v36, %v8177_v16  ;;  %v8611_v48 = vpop.f32.mrf.mxu0  ;;  %v9858_v16 = vpack.c.bf16 %v9820_v9, %v9819_v60  ;;  %v8091_v36 = vld [vmem:[%s16235_s11 + $0x120] sm:$0xff]  ;;  %v8100_v60 = vld [vmem:[%s16235_s11 + $0x168] sm:$0xff] }
 0x642   : > { %v7886_v25 = vpop.f32.mrf.mxu1  ;;  %9343 = vmatmul.mubr.bf16.gmra.mxu1 %v9127_v52 }
 0x643   : > { %v8179_v45 = vadd.f32 %v8083_v28, %v7886_v25  ;;  %9002 = vst [vmem:[%s16235_s11 + $0xd0] sm:$0xff] %v8906_v23  ;;  %v8907_v61 = vadd.f32 %v8611_v48, %v8178_v54  ;;  %v8615_v43 = vpop.f32.mrf.mxu0  ;;  %10072 = vmatmul.mubr.bf16.gmra.mxu0 %v9856_v24  ;;  %9352 = vmatprep.mubr.bf16.mxu1 %v14585_v0  ;;  %v9093_v24 = vld [vmem:[#allocation3 + $0xe8] sm:$0xff]  ;;  %v8093_v28 = vld [vmem:[%s16235_s11 + $0x130] sm:$0xff] }
 0x644   : > { %v7888_v53 = vpop.f32.mrf.mxu1  ;;  %10081 = vmatprep.mubr.bf16.mxu0 %v14585_v0 }
 0x645   : > { %v8180_v29 = vadd.f32 %v8084_v63, %v7888_v53  ;;  %9003 = vst [vmem:[%s16235_s11 + $0xd8] sm:$0xff] %v8907_v61  ;;  %v8908_v30 = vadd.f32 %v8615_v43, %v8179_v45  ;;  %v8617_v56 = vpop.f32.mrf.mxu0  ;;  %v9822_v45 = vld [vmem:[#allocation3 + $0xe9] sm:$0xff]  ;;  %v9092_v63 = vld [vmem:[#allocation3 + $0xe0] sm:$0xff] }
 0x646   : > { %v7890_v33 = vpop.f32.mrf.mxu1 }
 0x647   : > { %v8181_v39 = vadd.f32 %v8085_v34, %v7890_v33  ;;  %9004 = vst [vmem:[%s16235_s11 + $0xe0] sm:$0xff] %v8908_v30  ;;  %v8909_v40 = vadd.f32 %v8617_v56, %v8180_v29  ;;  %v8619_v1 = vpop.f32.mrf.mxu0  ;;  %v8094_v30 = vld [vmem:[%s16235_s11 + $0x138] sm:$0xff]  ;;  %v9130_v56 = vpack.c.bf16 %v9093_v24, %v9092_v63  ;;  %v9825_v24 = vld [vmem:[#allocation3 + $0x101] sm:$0xff] }
 0x648   : > { %v7892_v44 = vpop.f32.mrf.mxu1 }
 0x649   : > { %v8182_v49 = vadd.f32 %v8086_v57, %v7892_v44  ;;  %9005 = vst [vmem:[%s16235_s11 + $0xe8] sm:$0xff] %v8909_v40  ;;  %v8910_v51 = vadd.f32 %v8619_v1, %v8181_v39  ;;  %v8621_v12 = vpop.f32.mrf.mxu0  ;;  %v9859_v39 = vpack.c.bf16 %v9822_v45, %v9821_v18  ;;  %v8095_v1 = vld [vmem:[%s16235_s11 + $0x140] sm:$0xff]  ;;  %v8104_v18 = vld [vmem:[%s16235_s11 + $0x188] sm:$0xff] }
 0x64a   : > { %v7896_v21 = vpop.f32.mrf.mxu1  ;;  %9353 = vmatmul.mubr.bf16.gmra.mxu1 %v9128_v27 }
 0x64b   : > { %v8183_v31 = vadd.f32 %v8087_v10, %v7896_v21  ;;  %9006 = vst [vmem:[%s16235_s11 + $0xf0] sm:$0xff] %v8910_v51  ;;  %v8911_v5 = vadd.f32 %v8621_v12, %v8182_v49  ;;  %v8625_v38 = vpop.f32.mrf.mxu0  ;;  %10082 = vmatmul.mubr.bf16.gmra.mxu0 %v9857_v2  ;;  %9362 = vmatprep.mubr.bf16.mxu1 %v14585_v0  ;;  %v9095_v2 = vld [vmem:[#allocation3 + $0xf8] sm:$0xff]  ;;  %v8097_v10 = vld [vmem:[%s16235_s11 + $0x150] sm:$0xff] }
 0x64c   : > { %v7898_v26 = vpop.f32.mrf.mxu1  ;;  %10091 = vmatprep.mubr.bf16.mxu0 %v14585_v0 }
 0x64d   : > { %v8184_v15 = vadd.f32 %v8088_v19, %v7898_v26  ;;  %9007 = vst [vmem:[%s16235_s11 + $0xf8] sm:$0xff] %v8911_v5  ;;  %v8912_v20 = vadd.f32 %v8625_v38, %v8183_v31  ;;  %v8627_v32 = vpop.f32.mrf.mxu0  ;;  %v9824_v31 = vld [vmem:[#allocation3 + $0xf9] sm:$0xff]  ;;  %v9094_v19 = vld [vmem:[#allocation3 + $0xf0] sm:$0xff] }
 0x64e   : > { %v7900_v59 = vpop.f32.mrf.mxu1 }
 0x64f   : > { %v8185_v4 = vadd.f32 %v8089_v3, %v7900_v59  ;;  %9008 = vst [vmem:[%s16235_s11 + $0x100] sm:$0xff] %v8912_v20  ;;  %v8913_v50 = vadd.f32 %v8627_v32, %v8184_v15  ;;  %v8629_v42 = vpop.f32.mrf.mxu0  ;;  %v8098_v20 = vld [vmem:[%s16235_s11 + $0x158] sm:$0xff]  ;;  %v9131_v32 = vpack.c.bf16 %v9095_v2, %v9094_v19 }
 0x650   : > { %v7902_v6 = vpop.f32.mrf.mxu1  ;;  %v9827_v2 = vld [vmem:[#allocation3 + $0x111] sm:$0xff] }
 0x651   : > { %v8186_v8 = vadd.f32 %v8090_v7, %v7902_v6  ;;  %9009 = vst [vmem:[%s16235_s11 + $0x108] sm:$0xff] %v8913_v50  ;;  %v8914_v11 = vadd.f32 %v8629_v42, %v8185_v4  ;;  %v8631_v14 = vpop.f32.mrf.mxu0  ;;  %v9860_v4 = vpack.c.bf16 %v9824_v31, %v9823_v58  ;;  %v8099_v42 = vld [vmem:[%s16235_s11 + $0x160] sm:$0xff]  ;;  %v8108_v58 = vld [vmem:[%s16235_s11 + $0x1a8] sm:$0xff] }
 0x652   : > { %v7906_v17 = vpop.f32.mrf.mxu1  ;;  %9363 = vmatmul.mubr.bf16.gmra.mxu1 %v9129_v47 }
 0x653   : > { %v8187_v62 = vadd.f32 %v8091_v36, %v7906_v17  ;;  %9010 = vst [vmem:[%s16235_s11 + $0x110] sm:$0xff] %v8914_v11  ;;  %v8915_v22 = vadd.f32 %v8631_v14, %v8186_v8  ;;  %v8635_v37 = vpop.f32.mrf.mxu0  ;;  %10092 = vmatmul.mubr.bf16.gmra.mxu0 %v9858_v16  ;;  %9372 = vmatprep.mubr.bf16.mxu1 %v14585_v0  ;;  %v9097_v16 = vld [vmem:[#allocation3 + $0x108] sm:$0xff]  ;;  %v8101_v36 = vld [vmem:[%s16235_s11 + $0x170] sm:$0xff] }
 0x654   : > { %v7908_v52 = vpop.f32.mrf.mxu1  ;;  %10101 = vmatprep.mubr.bf16.mxu0 %v14585_v0 }
 0x655   : > { %v8188_v54 = vadd.f32 %v8092_v41, %v7908_v52  ;;  %9011 = vst [vmem:[%s16235_s11 + $0x118] sm:$0xff] %v8915_v22  ;;  %v8916_v23 = vadd.f32 %v8635_v37, %v8187_v62  ;;  %v8637_v48 = vpop.f32.mrf.mxu0  ;;  %v9826_v62 = vld [vmem:[#allocation3 + $0x109] sm:$0xff]  ;;  %v9096_v41 = vld [vmem:[#allocation3 + $0x100] sm:$0xff] }
 0x656   : > { %v7910_v25 = vpop.f32.mrf.mxu1 }
 0x657   : > { %v8189_v61 = vadd.f32 %v8093_v28, %v7910_v25  ;;  %9012 = vst [vmem:[%s16235_s11 + $0x120] sm:$0xff] %v8916_v23  ;;  %v8917_v43 = vadd.f32 %v8637_v48, %v8188_v54  ;;  %v8639_v53 = vpop.f32.mrf.mxu0  ;;  %v8102_v23 = vld [vmem:[%s16235_s11 + $0x178] sm:$0xff]  ;;  %v9132_v48 = vpack.c.bf16 %v9097_v16, %v9096_v41  ;;  %v9829_v16 = vld [vmem:[#allocation3 + $0x121] sm:$0xff] }
 0x658   : > { %v7912_v29 = vpop.f32.mrf.mxu1 }
 0x659   : > { %v8190_v33 = vadd.f32 %v8094_v30, %v7912_v29  ;;  %9013 = vst [vmem:[%s16235_s11 + $0x128] sm:$0xff] %v8917_v43  ;;  %v8918_v34 = vadd.f32 %v8639_v53, %v8189_v61  ;;  %v8641_v55 = vpop.f32.mrf.mxu0  ;;  %v9861_v61 = vpack.c.bf16 %v9826_v62, %v9825_v24  ;;  %v8103_v53 = vld [vmem:[%s16235_s11 + $0x180] sm:$0xff]  ;;  %v8112_v24 = vld [vmem:[%s16235_s11 + $0x1c8] sm:$0xff] }
 0x65a   : > { %v7916_v40 = vpop.f32.mrf.mxu1  ;;  %9373 = vmatmul.mubr.bf16.gmra.mxu1 %v9130_v56 }
 0x65b   : > { %v8191_v13 = vadd.f32 %v8095_v1, %v7916_v40  ;;  %9014 = vst [vmem:[%s16235_s11 + $0x130] sm:$0xff] %v8918_v34  ;;  %v8919_v44 = vadd.f32 %v8641_v55, %v8190_v33  ;;  %v8645_v57 = vpop.f32.mrf.mxu0  ;;  %10102 = vmatmul.mubr.bf16.gmra.mxu0 %v9859_v39  ;;  %9382 = vmatprep.mubr.bf16.mxu1 %v14585_v0  ;;  %v9099_v39 = vld [vmem:[#allocation3 + $0x118] sm:$0xff]  ;;  %v8105_v1 = vld [vmem:[%s16235_s11 + $0x190] sm:$0xff] }
 0x65c   : > { %v7918_v27 = vpop.f32.mrf.mxu1  ;;  %10111 = vmatprep.mubr.bf16.mxu0 %v14585_v0 }
 0x65d   : > { %v8192_v49 = vadd.f32 %v8096_v46, %v7918_v27  ;;  %9015 = vst [vmem:[%s16235_s11 + $0x138] sm:$0xff] %v8919_v44  ;;  %v8920_v51 = vadd.f32 %v8645_v57, %v8191_v13  ;;  %v8647_v12 = vpop.f32.mrf.mxu0  ;;  %v9828_v13 = vld [vmem:[#allocation3 + $0x119] sm:$0xff]  ;;  %v9098_v46 = vld [vmem:[#allocation3 + $0x110] sm:$0xff] }
 0x65e   : > { %v7920_v21 = vpop.f32.mrf.mxu1 }
 0x65f   : > { %v8193_v5 = vadd.f32 %v8097_v10, %v7920_v21  ;;  %9016 = vst [vmem:[%s16235_s11 + $0x140] sm:$0xff] %v8920_v51  ;;  %v8921_v38 = vadd.f32 %v8647_v12, %v8192_v49  ;;  %v8649_v26 = vpop.f32.mrf.mxu0  ;;  %v8106_v51 = vld [vmem:[%s16235_s11 + $0x198] sm:$0xff]  ;;  %v9133_v12 = vpack.c.bf16 %v9099_v39, %v9098_v46 }
 0x660   : > { %v7922_v15 = vpop.f32.mrf.mxu1  ;;  %v9831_v39 = vld [vmem:[#allocation3 + $0x131] sm:$0xff] }
 0x661   : > { %v8194_v59 = vadd.f32 %v8098_v20, %v7922_v15  ;;  %9017 = vst [vmem:[%s16235_s11 + $0x148] sm:$0xff] %v8921_v38  ;;  %v8922_v3 = vadd.f32 %v8649_v26, %v8193_v5  ;;  %v8651_v9 = vpop.f32.mrf.mxu0  ;;  %v9862_v5 = vpack.c.bf16 %v9828_v13, %v9827_v2  ;;  %v8107_v26 = vld [vmem:[%s16235_s11 + $0x1a0] sm:$0xff]  ;;  %v8116_v2 = vld [vmem:[%s16235_s11 + $0x1e8] sm:$0xff] }
 0x662   : > { %v7926_v50 = vpop.f32.mrf.mxu1  ;;  %9383 = vmatmul.mubr.bf16.gmra.mxu1 %v9131_v32 }
 0x663   : > { %v8195_v35 = vadd.f32 %v8099_v42, %v7926_v50  ;;  %9018 = vst [vmem:[%s16235_s11 + $0x150] sm:$0xff] %v8922_v3  ;;  %v8923_v6 = vadd.f32 %v8651_v9, %v8194_v59  ;;  %v8655_v7 = vpop.f32.mrf.mxu0  ;;  %10112 = vmatmul.mubr.bf16.gmra.mxu0 %v9860_v4  ;;  %9392 = vmatprep.mubr.bf16.mxu1 %v14585_v0  ;;  %v9101_v4 = vld [vmem:[#allocation3 + $0x128] sm:$0xff]  ;;  %v8109_v42 = vld [vmem:[%s16235_s11 + $0x1b0] sm:$0xff] }
 0x664   : > { %v7928_v47 = vpop.f32.mrf.mxu1  ;;  %10121 = vmatprep.mubr.bf16.mxu0 %v14585_v0 }
 0x665   : > { %v8196_v8 = vadd.f32 %v8100_v60, %v7928_v47  ;;  %9019 = vst [vmem:[%s16235_s11 + $0x158] sm:$0xff] %v8923_v6  ;;  %v8924_v11 = vadd.f32 %v8655_v7, %v8195_v35  ;;  %v8657_v14 = vpop.f32.mrf.mxu0  ;;  %v9830_v35 = vld [vmem:[#allocation3 + $0x129] sm:$0xff]  ;;  %v9100_v60 = vld [vmem:[#allocation3 + $0x120] sm:$0xff] }
 0x666   : > { %v7930_v17 = vpop.f32.mrf.mxu1 }
 0x667   : > { %v8197_v22 = vadd.f32 %v8101_v36, %v7930_v17  ;;  %9020 = vst [vmem:[%s16235_s11 + $0x160] sm:$0xff] %v8924_v11  ;;  %v8925_v37 = vadd.f32 %v8657_v14, %v8196_v8  ;;  %v8659_v52 = vpop.f32.mrf.mxu0  ;;  %v8110_v11 = vld [vmem:[%s16235_s11 + $0x1b8] sm:$0xff]  ;;  %v9134_v14 = vpack.c.bf16 %v9101_v4, %v9100_v60  ;;  %v9833_v4 = vld [vmem:[#allocation3 + $0x141] sm:$0xff] }
 0x668   : > { %v7932_v54 = vpop.f32.mrf.mxu1 }
 0x669   : > { %v8198_v25 = vadd.f32 %v8102_v23, %v7932_v54  ;;  %9021 = vst [vmem:[%s16235_s11 + $0x168] sm:$0xff] %v8925_v37  ;;  %v8926_v28 = vadd.f32 %v8659_v52, %v8197_v22  ;;  %v8661_v45 = vpop.f32.mrf.mxu0  ;;  %v9863_v22 = vpack.c.bf16 %v9830_v35, %v9829_v16  ;;  %v8111_v52 = vld [vmem:[%s16235_s11 + $0x1c0] sm:$0xff]  ;;  %v8120_v16 = vld [vmem:[%s16235_s11 + $0x208] sm:$0xff] }
 0x66a   : > { %v7936_v43 = vpop.f32.mrf.mxu1  ;;  %9393 = vmatmul.mubr.bf16.gmra.mxu1 %v9132_v48 }
 0x66b   : > { %v8199_v63 = vadd.f32 %v8103_v53, %v7936_v43  ;;  %9022 = vst [vmem:[%s16235_s11 + $0x170] sm:$0xff] %v8926_v28  ;;  %v8927_v29 = vadd.f32 %v8661_v45, %v8198_v25  ;;  %v8665_v30 = vpop.f32.mrf.mxu0  ;;  %10122 = vmatmul.mubr.bf16.gmra.mxu0 %v9861_v61  ;;  %9402 = vmatprep.mubr.bf16.mxu1 %v14585_v0  ;;  %v9103_v61 = vld [vmem:[#allocation3 + $0x138] sm:$0xff]  ;;  %v8113_v53 = vld [vmem:[%s16235_s11 + $0x1d0] sm:$0xff] }
 0x66c   : > { %v7938_v56 = vpop.f32.mrf.mxu1  ;;  %10131 = vmatprep.mubr.bf16.mxu0 %v14585_v0 }
 0x66d   : > { %v8200_v33 = vadd.f32 %v8104_v18, %v7938_v56  ;;  %9023 = vst [vmem:[%s16235_s11 + $0x178] sm:$0xff] %v8927_v29  ;;  %v8928_v34 = vadd.f32 %v8665_v30, %v8199_v63  ;;  %v8667_v55 = vpop.f32.mrf.mxu0  ;;  %v9832_v63 = vld [vmem:[#allocation3 + $0x139] sm:$0xff]  ;;  %v9102_v18 = vld [vmem:[#allocation3 + $0x130] sm:$0xff] }
 0x66e   : > { %v7940_v40 = vpop.f32.mrf.mxu1 }
 0x66f   : > { %v8201_v44 = vadd.f32 %v8105_v1, %v7940_v40  ;;  %9024 = vst [vmem:[%s16235_s11 + $0x180] sm:$0xff] %v8928_v34  ;;  %v8929_v57 = vadd.f32 %v8667_v55, %v8200_v33  ;;  %v8669_v27 = vpop.f32.mrf.mxu0  ;;  %v8114_v34 = vld [vmem:[%s16235_s11 + $0x1d8] sm:$0xff]  ;;  %v9135_v55 = vpack.c.bf16 %v9103_v61, %v9102_v18 }
 0x670   : > { %v7942_v49 = vpop.f32.mrf.mxu1  ;;  %v9835_v61 = vld [vmem:[#allocation3 + $0x151] sm:$0xff] }
 0x671   : > { %v8202_v21 = vadd.f32 %v8106_v51, %v7942_v49  ;;  %9025 = vst [vmem:[%s16235_s11 + $0x188] sm:$0xff] %v8929_v57  ;;  %v8930_v10 = vadd.f32 %v8669_v27, %v8201_v44  ;;  %v8671_v31 = vpop.f32.mrf.mxu0  ;;  %v9864_v44 = vpack.c.bf16 %v9832_v63, %v9831_v39  ;;  %v8115_v27 = vld [vmem:[%s16235_s11 + $0x1e0] sm:$0xff]  ;;  %v8124_v39 = vld [vmem:[%s16235_s11 + $0x228] sm:$0xff] }
 0x672   : > { %v7946_v38 = vpop.f32.mrf.mxu1  ;;  %9403 = vmatmul.mubr.bf16.gmra.mxu1 %v9133_v12 }
 0x673   : > { %v8203_v19 = vadd.f32 %v8107_v26, %v7946_v38  ;;  %9026 = vst [vmem:[%s16235_s11 + $0x190] sm:$0xff] %v8930_v10  ;;  %v8931_v15 = vadd.f32 %v8671_v31, %v8202_v21  ;;  %v8675_v20 = vpop.f32.mrf.mxu0  ;;  %10132 = vmatmul.mubr.bf16.gmra.mxu0 %v9862_v5  ;;  %9412 = vmatprep.mubr.bf16.mxu1 %v14585_v0  ;;  %v9105_v5 = vld [vmem:[#allocation3 + $0x148] sm:$0xff]  ;;  %v8117_v26 = vld [vmem:[%s16235_s11 + $0x1f0] sm:$0xff] }
 0x674   : > { %v7948_v32 = vpop.f32.mrf.mxu1  ;;  %10141 = vmatprep.mubr.bf16.mxu0 %v14585_v0 }
 0x675   : > { %v8204_v59 = vadd.f32 %v8108_v58, %v7948_v32  ;;  %9027 = vst [vmem:[%s16235_s11 + $0x198] sm:$0xff] %v8931_v15  ;;  %v8932_v3 = vadd.f32 %v8675_v20, %v8203_v19  ;;  %v8677_v9 = vpop.f32.mrf.mxu0  ;;  %v9834_v19 = vld [vmem:[#allocation3 + $0x149] sm:$0xff]  ;;  %v9104_v58 = vld [vmem:[#allocation3 + $0x140] sm:$0xff] }
 0x676   : > { %v7950_v50 = vpop.f32.mrf.mxu1 }
 0x677   : > { %v8205_v6 = vadd.f32 %v8109_v42, %v7950_v50  ;;  %9028 = vst [vmem:[%s16235_s11 + $0x1a0] sm:$0xff] %v8932_v3  ;;  %v8933_v7 = vadd.f32 %v8677_v9, %v8204_v59  ;;  %v8679_v47 = vpop.f32.mrf.mxu0  ;;  %v8118_v3 = vld [vmem:[%s16235_s11 + $0x1f8] sm:$0xff]  ;;  %v9136_v9 = vpack.c.bf16 %v9105_v5, %v9104_v58  ;;  %v9837_v5 = vld [vmem:[#allocation3 + $0x161] sm:$0xff] }
 0x678   : > { %v7952_v8 = vpop.f32.mrf.mxu1 }
 0x679   : > { %v8206_v17 = vadd.f32 %v8110_v11, %v7952_v8  ;;  %9029 = vst [vmem:[%s16235_s11 + $0x1a8] sm:$0xff] %v8933_v7  ;;  %v8934_v36 = vadd.f32 %v8679_v47, %v8205_v6  ;;  %v8681_v62 = vpop.f32.mrf.mxu0  ;;  %v9865_v6 = vpack.c.bf16 %v9834_v19, %v9833_v4  ;;  %v8119_v47 = vld [vmem:[%s16235_s11 + $0x200] sm:$0xff]  ;;  %v8128_v4 = vld [vmem:[%s16235_s11 + $0x248] sm:$0xff] }
 0x67a   : > { %v7956_v37 = vpop.f32.mrf.mxu1  ;;  %9413 = vmatmul.mubr.bf16.gmra.mxu1 %v9134_v14 }
 0x67b   : > { %v8207_v41 = vadd.f32 %v8111_v52, %v7956_v37  ;;  %9030 = vst [vmem:[%s16235_s11 + $0x1b0] sm:$0xff] %v8934_v36  ;;  %v8935_v54 = vadd.f32 %v8681_v62, %v8206_v17  ;;  %v8685_v23 = vpop.f32.mrf.mxu0  ;;  %10142 = vmatmul.mubr.bf16.gmra.mxu0 %v9863_v22  ;;  %9422 = vmatprep.mubr.bf16.mxu1 %v14585_v0  ;;  %v9107_v22 = vld [vmem:[#allocation3 + $0x158] sm:$0xff]  ;;  %v8121_v52 = vld [vmem:[%s16235_s11 + $0x210] sm:$0xff] }
 0x67c   : > { %v7958_v48 = vpop.f32.mrf.mxu1  ;;  %10151 = vmatprep.mubr.bf16.mxu0 %v14585_v0 }
 0x67d   : > { %v8208_v25 = vadd.f32 %v8112_v24, %v7958_v48  ;;  %9031 = vst [vmem:[%s16235_s11 + $0x1b8] sm:$0xff] %v8935_v54  ;;  %v8936_v28 = vadd.f32 %v8685_v23, %v8207_v41  ;;  %v8687_v45 = vpop.f32.mrf.mxu0  ;;  %v9836_v41 = vld [vmem:[#allocation3 + $0x159] sm:$0xff]  ;;  %v9106_v24 = vld [vmem:[#allocation3 + $0x150] sm:$0xff] }
 0x67e   : > { %v7960_v43 = vpop.f32.mrf.mxu1 }
 0x67f   : > { %v8209_v29 = vadd.f32 %v8113_v53, %v7960_v43  ;;  %9032 = vst [vmem:[%s16235_s11 + $0x1c0] sm:$0xff] %v8936_v28  ;;  %v8937_v30 = vadd.f32 %v8687_v45, %v8208_v25  ;;  %v8689_v56 = vpop.f32.mrf.mxu0  ;;  %v8122_v28 = vld [vmem:[%s16235_s11 + $0x218] sm:$0xff]  ;;  %v9137_v45 = vpack.c.bf16 %v9107_v22, %v9106_v24 }
 0x680   : > { %v7962_v33 = vpop.f32.mrf.mxu1  ;;  %v9839_v22 = vld [vmem:[#allocation3 + $0x171] sm:$0xff] }
 0x681   : > { %v8210_v40 = vadd.f32 %v8114_v34, %v7962_v33  ;;  %9033 = vst [vmem:[%s16235_s11 + $0x1c8] sm:$0xff] %v8937_v30  ;;  %v8938_v1 = vadd.f32 %v8689_v56, %v8209_v29  ;;  %v8691_v13 = vpop.f32.mrf.mxu0  ;;  %v9866_v29 = vpack.c.bf16 %v9836_v41, %v9835_v61  ;;  %v8123_v56 = vld [vmem:[%s16235_s11 + $0x220] sm:$0xff]  ;;  %v8132_v61 = vld [vmem:[%s16235_s11 + $0x268] sm:$0xff] }
 0x682   : > { %v7966_v57 = vpop.f32.mrf.mxu1  ;;  %9423 = vmatmul.mubr.bf16.gmra.mxu1 %v9135_v55 }
 0x683   : > { %v8211_v46 = vadd.f32 %v8115_v27, %v7966_v57  ;;  %9034 = vst [vmem:[%s16235_s11 + $0x1d0] sm:$0xff] %v8938_v1  ;;  %v8939_v49 = vadd.f32 %v8691_v13, %v8210_v40  ;;  %v8695_v51 = vpop.f32.mrf.mxu0  ;;  %10152 = vmatmul.mubr.bf16.gmra.mxu0 %v9864_v44  ;;  %9432 = vmatprep.mubr.bf16.mxu1 %v14585_v0  ;;  %v9109_v44 = vld [vmem:[#allocation3 + $0x168] sm:$0xff]  ;;  %v8125_v27 = vld [vmem:[%s16235_s11 + $0x230] sm:$0xff] }
 0x684   : > { %v7968_v12 = vpop.f32.mrf.mxu1  ;;  %10161 = vmatprep.mubr.bf16.mxu0 %v14585_v0 }
 0x685   : > { %v8212_v21 = vadd.f32 %v8116_v2, %v7968_v12  ;;  %9035 = vst [vmem:[%s16235_s11 + $0x1d8] sm:$0xff] %v8939_v49  ;;  %v8940_v10 = vadd.f32 %v8695_v51, %v8211_v46  ;;  %v8697_v31 = vpop.f32.mrf.mxu0  ;;  %v9838_v46 = vld [vmem:[#allocation3 + $0x169] sm:$0xff]  ;;  %v9108_v2 = vld [vmem:[#allocation3 + $0x160] sm:$0xff] }
 0x686   : > { %v7970_v38 = vpop.f32.mrf.mxu1 }
 0x687   : > { %v8213_v15 = vadd.f32 %v8117_v26, %v7970_v38  ;;  %9036 = vst [vmem:[%s16235_s11 + $0x1e0] sm:$0xff] %v8940_v10  ;;  %v8941_v20 = vadd.f32 %v8697_v31, %v8212_v21  ;;  %v8699_v32 = vpop.f32.mrf.mxu0  ;;  %v8126_v10 = vld [vmem:[%s16235_s11 + $0x238] sm:$0xff]  ;;  %v9138_v31 = vpack.c.bf16 %v9109_v44, %v9108_v2  ;;  %v9841_v44 = vld [vmem:[#allocation3 + $0x181] sm:$0xff] }
 0x688   : > { %v7972_v59 = vpop.f32.mrf.mxu1 }
 0x689   : > { %v8214_v50 = vadd.f32 %v8118_v3, %v7972_v59  ;;  %9037 = vst [vmem:[%s16235_s11 + $0x1e8] sm:$0xff] %v8941_v20  ;;  %v8942_v42 = vadd.f32 %v8699_v32, %v8213_v15  ;;  %v8701_v35 = vpop.f32.mrf.mxu0  ;;  %v9867_v15 = vpack.c.bf16 %v9838_v46, %v9837_v5  ;;  %v8127_v32 = vld [vmem:[%s16235_s11 + $0x240] sm:$0xff]  ;;  %v8136_v5 = vld [vmem:[%s16235_s11 + $0x288] sm:$0xff] }
 0x68a   : > { %v7976_v7 = vpop.f32.mrf.mxu1  ;;  %9433 = vmatmul.mubr.bf16.gmra.mxu1 %v9136_v9 }
 0x68b   : > { %v8215_v60 = vadd.f32 %v8119_v47, %v7976_v7  ;;  %9038 = vst [vmem:[%s16235_s11 + $0x1f0] sm:$0xff] %v8942_v42  ;;  %v8943_v8 = vadd.f32 %v8701_v35, %v8214_v50  ;;  %v8705_v11 = vpop.f32.mrf.mxu0  ;;  %10162 = vmatmul.mubr.bf16.gmra.mxu0 %v9865_v6  ;;  %9442 = vmatprep.mubr.bf16.mxu1 %v14585_v0  ;;  %v9111_v6 = vld [vmem:[#allocation3 + $0x178] sm:$0xff]  ;;  %v8129_v47 = vld [vmem:[%s16235_s11 + $0x250] sm:$0xff] }
 0x68c   : > { %v7978_v14 = vpop.f32.mrf.mxu1  ;;  %10171 = vmatprep.mubr.bf16.mxu0 %v14585_v0 }
 0x68d   : > { %v8216_v17 = vadd.f32 %v8120_v16, %v7978_v14  ;;  %9039 = vst [vmem:[%s16235_s11 + $0x1f8] sm:$0xff] %v8943_v8  ;;  %v8944_v36 = vadd.f32 %v8705_v11, %v8215_v60  ;;  %v8707_v62 = vpop.f32.mrf.mxu0  ;;  %v9840_v60 = vld [vmem:[#allocation3 + $0x179] sm:$0xff]  ;;  %v9110_v16 = vld [vmem:[#allocation3 + $0x170] sm:$0xff] }
 0x68e   : > { %v7980_v37 = vpop.f32.mrf.mxu1 }
 0x68f   : > { %v8217_v54 = vadd.f32 %v8121_v52, %v7980_v37  ;;  %9040 = vst [vmem:[%s16235_s11 + $0x200] sm:$0xff] %v8944_v36  ;;  %v8945_v23 = vadd.f32 %v8707_v62, %v8216_v17  ;;  %v8709_v48 = vpop.f32.mrf.mxu0  ;;  %v8130_v36 = vld [vmem:[%s16235_s11 + $0x258] sm:$0xff]  ;;  %v9139_v62 = vpack.c.bf16 %v9111_v6, %v9110_v16 }
 0x690   : > { %v7982_v25 = vpop.f32.mrf.mxu1  ;;  %v9843_v6 = vld [vmem:[#allocation3 + $0x191] sm:$0xff] }
 0x691   : > { %v8218_v43 = vadd.f32 %v8122_v28, %v7982_v25  ;;  %9041 = vst [vmem:[%s16235_s11 + $0x208] sm:$0xff] %v8945_v23  ;;  %v8946_v53 = vadd.f32 %v8709_v48, %v8217_v54  ;;  %v8711_v63 = vpop.f32.mrf.mxu0  ;;  %v9868_v54 = vpack.c.bf16 %v9840_v60, %v9839_v22  ;;  %v8131_v48 = vld [vmem:[%s16235_s11 + $0x260] sm:$0xff]  ;;  %v8140_v22 = vld [vmem:[%s16235_s11 + $0x2a8] sm:$0xff] }
 0x692   : > { %v7986_v30 = vpop.f32.mrf.mxu1  ;;  %9443 = vmatmul.mubr.bf16.gmra.mxu1 %v9137_v45 }
 0x693   : > { %v8219_v18 = vadd.f32 %v8123_v56, %v7986_v30  ;;  %9042 = vst [vmem:[%s16235_s11 + $0x210] sm:$0xff] %v8946_v53  ;;  %v8947_v33 = vadd.f32 %v8711_v63, %v8218_v43  ;;  %v8715_v34 = vpop.f32.mrf.mxu0  ;;  %10172 = vmatmul.mubr.bf16.gmra.mxu0 %v9866_v29  ;;  %9452 = vmatprep.mubr.bf16.mxu1 %v14585_v0  ;;  %v9113_v29 = vld [vmem:[#allocation3 + $0x188] sm:$0xff]  ;;  %v8133_v56 = vld [vmem:[%s16235_s11 + $0x270] sm:$0xff] }
 0x694   : > { %v7988_v55 = vpop.f32.mrf.mxu1  ;;  %10181 = vmatprep.mubr.bf16.mxu0 %v14585_v0 }
 0x695   : > { %v8220_v40 = vadd.f32 %v8124_v39, %v7988_v55  ;;  %9043 = vst [vmem:[%s16235_s11 + $0x218] sm:$0xff] %v8947_v33  ;;  %v8948_v1 = vadd.f32 %v8715_v34, %v8219_v18  ;;  %v8717_v13 = vpop.f32.mrf.mxu0  ;;  %v9842_v18 = vld [vmem:[#allocation3 + $0x189] sm:$0xff]  ;;  %v9112_v39 = vld [vmem:[#allocation3 + $0x180] sm:$0xff] }
 0x696   : > { %v7990_v57 = vpop.f32.mrf.mxu1 }
 0x697   : > { %v8221_v49 = vadd.f32 %v8125_v27, %v7990_v57  ;;  %9044 = vst [vmem:[%s16235_s11 + $0x220] sm:$0xff] %v8948_v1  ;;  %v8949_v51 = vadd.f32 %v8717_v13, %v8220_v40  ;;  %v8719_v12 = vpop.f32.mrf.mxu0  ;;  %v8134_v1 = vld [vmem:[%s16235_s11 + $0x278] sm:$0xff]  ;;  %v9140_v13 = vpack.c.bf16 %v9113_v29, %v9112_v39  ;;  %v9845_v29 = vld [vmem:[#allocation3 + $0x1a1] sm:$0xff] }
 0x698   : > { %v7992_v21 = vpop.f32.mrf.mxu1 }
 0x699   : > { %v8222_v38 = vadd.f32 %v8126_v10, %v7992_v21  ;;  %9045 = vst [vmem:[%s16235_s11 + $0x228] sm:$0xff] %v8949_v51  ;;  %v8950_v26 = vadd.f32 %v8719_v12, %v8221_v49  ;;  %v8721_v19 = vpop.f32.mrf.mxu0  ;;  %v9869_v49 = vpack.c.bf16 %v9842_v18, %v9841_v44  ;;  %v8135_v12 = vld [vmem:[%s16235_s11 + $0x280] sm:$0xff]  ;;  %v8144_v44 = vld [vmem:[%s16235_s11 + $0x2c8] sm:$0xff] }
 0x69a   : > { %v7996_v20 = vpop.f32.mrf.mxu1  ;;  %9453 = vmatmul.mubr.bf16.gmra.mxu1 %v9138_v31 }
 0x69b   : > { %v8223_v58 = vadd.f32 %v8127_v32, %v7996_v20  ;;  %9046 = vst [vmem:[%s16235_s11 + $0x230] sm:$0xff] %v8950_v26  ;;  %v8951_v59 = vadd.f32 %v8721_v19, %v8222_v38  ;;  %v8725_v3 = vpop.f32.mrf.mxu0  ;;  %10182 = vmatmul.mubr.bf16.gmra.mxu0 %v9867_v15  ;;  %9462 = vmatprep.mubr.bf16.mxu1 %v14585_v0  ;;  %v9115_v15 = vld [vmem:[#allocation3 + $0x198] sm:$0xff]  ;;  %v8137_v32 = vld [vmem:[%s16235_s11 + $0x290] sm:$0xff] }
 0x69c   : > { %v7998_v9 = vpop.f32.mrf.mxu1  ;;  %10191 = vmatprep.mubr.bf16.mxu0 %v14585_v0 }
 0x69d   : > { %v8224_v50 = vadd.f32 %v8128_v4, %v7998_v9  ;;  %9047 = vst [vmem:[%s16235_s11 + $0x238] sm:$0xff] %v8951_v59  ;;  %v8952_v42 = vadd.f32 %v8725_v3, %v8223_v58  ;;  %v8727_v35 = vpop.f32.mrf.mxu0  ;;  %v9844_v58 = vld [vmem:[#allocation3 + $0x199] sm:$0xff]  ;;  %v9114_v4 = vld [vmem:[#allocation3 + $0x190] sm:$0xff] }
 0x69e   : > { %v8000_v7 = vpop.f32.mrf.mxu1 }
 0x69f   : > { %v8225_v8 = vadd.f32 %v8129_v47, %v8000_v7  ;;  %9048 = vst [vmem:[%s16235_s11 + $0x240] sm:$0xff] %v8952_v42  ;;  %v8953_v11 = vadd.f32 %v8727_v35, %v8224_v50  ;;  %v8729_v14 = vpop.f32.mrf.mxu0  ;;  %v8138_v42 = vld [vmem:[%s16235_s11 + $0x298] sm:$0xff]  ;;  %v9141_v35 = vpack.c.bf16 %v9115_v15, %v9114_v4 }
 0x6a0   : > { %v8002_v17 = vpop.f32.mrf.mxu1  ;;  %v9847_v15 = vld [vmem:[#allocation3 + $0x1b1] sm:$0xff] }
 0x6a1   : > { %v8226_v37 = vadd.f32 %v8130_v36, %v8002_v17  ;;  %9049 = vst [vmem:[%s16235_s11 + $0x248] sm:$0xff] %v8953_v11  ;;  %v8954_v52 = vadd.f32 %v8729_v14, %v8225_v8  ;;  %v8731_v41 = vpop.f32.mrf.mxu0  ;;  %v9870_v8 = vpack.c.bf16 %v9844_v58, %v9843_v6  ;;  %v8139_v14 = vld [vmem:[%s16235_s11 + $0x2a0] sm:$0xff]  ;;  %v8148_v6 = vld [vmem:[%s16235_s11 + $0x2e8] sm:$0xff] }
 0x6a2   : > { %v8006_v23 = vpop.f32.mrf.mxu1  ;;  %9463 = vmatmul.mubr.bf16.gmra.mxu1 %v9139_v62 }
 0x6a3   : > { %v8227_v24 = vadd.f32 %v8131_v48, %v8006_v23  ;;  %9050 = vst [vmem:[%s16235_s11 + $0x250] sm:$0xff] %v8954_v52  ;;  %v8955_v25 = vadd.f32 %v8731_v41, %v8226_v37  ;;  %v8735_v28 = vpop.f32.mrf.mxu0  ;;  %10192 = vmatmul.mubr.bf16.gmra.mxu0 %v9868_v54  ;;  %9472 = vmatprep.mubr.bf16.mxu1 %v14585_v0  ;;  %v9117_v54 = vld [vmem:[#allocation3 + $0x1a8] sm:$0xff]  ;;  %v8141_v48 = vld [vmem:[%s16235_s11 + $0x2b0] sm:$0xff] }
 0x6a4   : > { %v8008_v45 = vpop.f32.mrf.mxu1  ;;  %10201 = vmatprep.mubr.bf16.mxu0 %v14585_v0 }
 0x6a5   : > { %v8228_v43 = vadd.f32 %v8132_v61, %v8008_v45  ;;  %9051 = vst [vmem:[%s16235_s11 + $0x258] sm:$0xff] %v8955_v25  ;;  %v8956_v53 = vadd.f32 %v8735_v28, %v8227_v24  ;;  %v8737_v63 = vpop.f32.mrf.mxu0  ;;  %v9846_v24 = vld [vmem:[#allocation3 + $0x1a9] sm:$0xff]  ;;  %v9116_v61 = vld [vmem:[#allocation3 + $0x1a0] sm:$0xff] }
 0x6a6   : > { %v8010_v30 = vpop.f32.mrf.mxu1 }
 0x6a7   : > { %v8229_v33 = vadd.f32 %v8133_v56, %v8010_v30  ;;  %9052 = vst [vmem:[%s16235_s11 + $0x260] sm:$0xff] %v8956_v53  ;;  %v8957_v34 = vadd.f32 %v8737_v63, %v8228_v43  ;;  %v8739_v55 = vpop.f32.mrf.mxu0  ;;  %v8142_v53 = vld [vmem:[%s16235_s11 + $0x2b8] sm:$0xff]  ;;  %v9142_v63 = vpack.c.bf16 %v9117_v54, %v9116_v61  ;;  %v11259_v54 = vld [vmem:[#allocation3 + $0x49] sm:$0xff] }
 0x6a8   : > { %v8012_v40 = vpop.f32.mrf.mxu1 }
 0x6a9   : > { %v8230_v57 = vadd.f32 %v8134_v1, %v8012_v40  ;;  %9053 = vst [vmem:[%s16235_s11 + $0x268] sm:$0xff] %v8957_v34  ;;  %v8958_v27 = vadd.f32 %v8739_v55, %v8229_v33  ;;  %v8741_v46 = vpop.f32.mrf.mxu0  ;;  %v9871_v33 = vpack.c.bf16 %v9846_v24, %v9845_v29  ;;  %v8143_v55 = vld [vmem:[%s16235_s11 + $0x2c0] sm:$0xff]  ;;  %v9514_v29 = vld [vmem:[%s16235_s11 + $0x8] sm:$0xff] }
 0x6aa   : > { %v8016_v51 = vpop.f32.mrf.mxu1  ;;  %9473 = vmatmul.mubr.bf16.gmra.mxu1 %v9140_v13 }
 0x6ab   : > { %v8231_v2 = vadd.f32 %v8135_v12, %v8016_v51  ;;  %9054 = vst [vmem:[%s16235_s11 + $0x270] sm:$0xff] %v8958_v27  ;;  %v8959_v21 = vadd.f32 %v8741_v46, %v8230_v57  ;;  %v8745_v10 = vpop.f32.mrf.mxu0  ;;  %10202 = vmatmul.mubr.bf16.gmra.mxu0 %v9869_v49  ;;  %9482 = vmatprep.mubr.bf16.mxu1 %v14585_v0  ;;  %v9119_v49 = vld [vmem:[#allocation3 + $0x1b8] sm:$0xff]  ;;  %v8145_v12 = vld [vmem:[%s16235_s11 + $0x2d0] sm:$0xff] }
 0x6ac   : > { %v8018_v31 = vpop.f32.mrf.mxu1  ;;  %10211 = vmatprep.mubr.bf16.mxu0 %v14585_v0 }
 0x6ad   : > { %v8232_v38 = vadd.f32 %v8136_v5, %v8018_v31  ;;  %9055 = vst [vmem:[%s16235_s11 + $0x278] sm:$0xff] %v8959_v21  ;;  %v8960_v26 = vadd.f32 %v8745_v10, %v8231_v2  ;;  %v8747_v19 = vpop.f32.mrf.mxu0  ;;  %v9848_v2 = vld [vmem:[#allocation3 + $0x1b9] sm:$0xff]  ;;  %v9118_v5 = vld [vmem:[#allocation3 + $0x1b0] sm:$0xff] }
 0x6ae   : > { %v8020_v20 = vpop.f32.mrf.mxu1 }
 0x6af   : > { %v8233_v59 = vadd.f32 %v8137_v32, %v8020_v20  ;;  %9056 = vst [vmem:[%s16235_s11 + $0x280] sm:$0xff] %v8960_v26  ;;  %v8961_v3 = vadd.f32 %v8747_v19, %v8232_v38  ;;  %v8749_v9 = vpop.f32.mrf.mxu0  ;;  %v8146_v26 = vld [vmem:[%s16235_s11 + $0x2d8] sm:$0xff]  ;;  %v9143_v19 = vpack.c.bf16 %v9119_v49, %v9118_v5 }
 0x6b0   : > { %v8022_v50 = vpop.f32.mrf.mxu1  ;;  %v11261_v49 = vld [vmem:[#allocation3 + $0x59] sm:$0xff] }
 0x6b1   : > { %v8234_v7 = vadd.f32 %v8138_v42, %v8022_v50  ;;  %9057 = vst [vmem:[%s16235_s11 + $0x288] sm:$0xff] %v8961_v3  ;;  %v8962_v47 = vadd.f32 %v8749_v9, %v8233_v59  ;;  %v8751_v60 = vpop.f32.mrf.mxu0  ;;  %v9872_v59 = vpack.c.bf16 %v9848_v2, %v9847_v15  ;;  %v8147_v9 = vld [vmem:[%s16235_s11 + $0x2e0] sm:$0xff]  ;;  %v9518_v15 = vld [vmem:[%s16235_s11 + $0x28] sm:$0xff] }
 0x6b2   : > { %v8026_v11 = vpop.f32.mrf.mxu1  ;;  %9483 = vmatmul.mubr.bf16.gmra.mxu1 %v9141_v35 }
 0x6b3   : > { %v8235_v16 = vadd.f32 %v8139_v14, %v8026_v11  ;;  %9058 = vst [vmem:[%s16235_s11 + $0x290] sm:$0xff] %v8962_v47  ;;  %v8963_v17 = vadd.f32 %v8751_v60, %v8234_v7  ;;  %v8755_v36 = vpop.f32.mrf.mxu0  ;;  %10212 = vmatmul.mubr.bf16.gmra.mxu0 %v9870_v8  ;;  %9492 = vmatprep.mubr.bf16.mxu1 %v14585_v0  ;;  %v10531_v8 = vld [vmem:[#allocation3 + $0x50] sm:$0xff] }
 0x6b4   : > { %v8028_v62 = vpop.f32.mrf.mxu1  ;;  %10221 = vmatprep.mubr.bf16.mxu0 %v14585_v0  ;;  %v8149_v14 = vld [vmem:[%s16235_s11 + $0x2f0] sm:$0xff] }
 0x6b5   : > { %v8236_v37 = vadd.f32 %v8140_v22, %v8028_v62  ;;  %9059 = vst [vmem:[%s16235_s11 + $0x298] sm:$0xff] %v8963_v17  ;;  %v8964_v52 = vadd.f32 %v8755_v36, %v8235_v16  ;;  %v8757_v41 = vpop.f32.mrf.mxu0  ;;  %v11260_v16 = vld [vmem:[#allocation3 + $0x51] sm:$0xff]  ;;  %v10530_v22 = vld [vmem:[#allocation3 + $0x48] sm:$0xff] }
 0x6b6   : > { %v8030_v23 = vpop.f32.mrf.mxu1 }
 0x6b7   : > { %v8237_v25 = vadd.f32 %v8141_v48, %v8030_v23  ;;  %9060 = vst [vmem:[%s16235_s11 + $0x2a0] sm:$0xff] %v8964_v52  ;;  %v8965_v28 = vadd.f32 %v8757_v41, %v8236_v37  ;;  %v8759_v45 = vpop.f32.mrf.mxu0  ;;  %v8150_v52 = vld [vmem:[%s16235_s11 + $0x2f8] sm:$0xff]  ;;  %v10578_v41 = vpack.c.bf16 %v10531_v8, %v10530_v22  ;;  %v11263_v8 = vld [vmem:[#allocation3 + $0x69] sm:$0xff] }
 0x6b8   : > { %v8032_v43 = vpop.f32.mrf.mxu1 }
 0x6b9   : > { %v8238_v30 = vadd.f32 %v8142_v53, %v8032_v43  ;;  %9061 = vst [vmem:[%s16235_s11 + $0x2a8] sm:$0xff] %v8965_v28  ;;  %v8966_v56 = vadd.f32 %v8759_v45, %v8237_v25  ;;  %v8761_v18 = vpop.f32.mrf.mxu0  ;;  %v11307_v25 = vpack.c.bf16 %v11260_v16, %v11259_v54  ;;  %v9513_v45 = vld [vmem:[%s16235_s11] sm:$0xff]  ;;  %v9522_v54 = vld [vmem:[%s16235_s11 + $0x48] sm:$0xff] }
 0x6ba   : > { %v8036_v34 = vpop.f32.mrf.mxu1  ;;  %9493 = vmatmul.mubr.bf16.gmra.mxu1 %v9142_v63 }
 0x6bb   : > { %v8239_v39 = vadd.f32 %v8143_v55, %v8036_v34  ;;  %9062 = vst [vmem:[%s16235_s11 + $0x2b0] sm:$0xff] %v8966_v56  ;;  %v8967_v40 = vadd.f32 %v8761_v18, %v8238_v30  ;;  %v8765_v1 = vpop.f32.mrf.mxu0  ;;  %10222 = vmatmul.mubr.bf16.gmra.mxu0 %v9871_v33  ;;  %9502 = vmatprep.mubr.bf16.mxu1 %v14585_v0  ;;  %v10533_v33 = vld [vmem:[#allocation3 + $0x60] sm:$0xff]  ;;  %v9515_v55 = vld [vmem:[%s16235_s11 + $0x10] sm:$0xff] }
 0x6bc   : > { %v8038_v13 = vpop.f32.mrf.mxu1  ;;  %10231 = vmatprep.mubr.bf16.mxu0 %v14585_v0 }
 0x6bd   : > { %v8240_v57 = vadd.f32 %v8144_v44, %v8038_v13  ;;  %9063 = vst [vmem:[%s16235_s11 + $0x2b8] sm:$0xff] %v8967_v40  ;;  %v8968_v27 = vadd.f32 %v8765_v1, %v8239_v39  ;;  %v8767_v46 = vpop.f32.mrf.mxu0  ;;  %v11262_v39 = vld [vmem:[#allocation3 + $0x61] sm:$0xff]  ;;  %v10532_v44 = vld [vmem:[#allocation3 + $0x58] sm:$0xff] }
 0x6be   : > { %v8040_v51 = vpop.f32.mrf.mxu1 }
 0x6bf   : > { %v8241_v21 = vadd.f32 %v8145_v12, %v8040_v51  ;;  %9064 = vst [vmem:[%s16235_s11 + $0x2c0] sm:$0xff] %v8968_v27  ;;  %v8969_v10 = vadd.f32 %v8767_v46, %v8240_v57  ;;  %v8769_v31 = vpop.f32.mrf.mxu0  ;;  %v9516_v27 = vld [vmem:[%s16235_s11 + $0x18] sm:$0xff]  ;;  %v10579_v46 = vpack.c.bf16 %v10533_v33, %v10532_v44 }
 0x6c0   : > { %v8042_v38 = vpop.f32.mrf.mxu1  ;;  %v11265_v33 = vld [vmem:[#allocation3 + $0x79] sm:$0xff] }
 0x6c1   : > { %v8242_v20 = vadd.f32 %v8146_v26, %v8042_v38  ;;  %9065 = vst [vmem:[%s16235_s11 + $0x2c8] sm:$0xff] %v8969_v10  ;;  %v8970_v32 = vadd.f32 %v8769_v31, %v8241_v21  ;;  %v8771_v58 = vpop.f32.mrf.mxu0  ;;  %v11308_v21 = vpack.c.bf16 %v11262_v39, %v11261_v49  ;;  %v9517_v31 = vld [vmem:[%s16235_s11 + $0x20] sm:$0xff]  ;;  %v9526_v49 = vld [vmem:[%s16235_s11 + $0x68] sm:$0xff] }
 0x6c2   : > { %v8046_v3 = vpop.f32.mrf.mxu1  ;;  %9503 = vmatmul.mubr.bf16.gmra.mxu1 %v9143_v19 }
 0x6c3   : > { %v8243_v4 = vadd.f32 %v8147_v9, %v8046_v3  ;;  %9066 = vst [vmem:[%s16235_s11 + $0x2d0] sm:$0xff] %v8970_v32  ;;  %v8971_v50 = vadd.f32 %v8771_v58, %v8242_v20  ;;  %v8775_v42 = vpop.f32.mrf.mxu0  ;;  %10232 = vmatmul.mubr.bf16.gmra.mxu0 %v9872_v59  ;;  %10730 = vmatprep.mubr.bf16.mxu1 %v14585_v0  ;;  %v10535_v59 = vld [vmem:[#allocation3 + $0x70] sm:$0xff] }
 0x6c4   : > { %v8048_v35 = vpop.f32.mrf.mxu1  ;;  %11459 = vmatprep.mubr.bf16.mxu0 %v14585_v0  ;;  %v9519_v9 = vld [vmem:[%s16235_s11 + $0x30] sm:$0xff] }
 0x6c5   : > { %v8244_v7 = vadd.f32 %v8148_v6, %v8048_v35  ;;  %9067 = vst [vmem:[%s16235_s11 + $0x2d8] sm:$0xff] %v8971_v50  ;;  %v8972_v47 = vadd.f32 %v8775_v42, %v8243_v4  ;;  %v8777_v60 = vpop.f32.mrf.mxu0  ;;  %v11264_v4 = vld [vmem:[#allocation3 + $0x71] sm:$0xff]  ;;  %v10534_v6 = vld [vmem:[#allocation3 + $0x68] sm:$0xff] }
 0x6c6   : > { %v8050_v11 = vpop.f32.mrf.mxu1 }
 0x6c7   : > { %v8245_v17 = vadd.f32 %v8149_v14, %v8050_v11  ;;  %9068 = vst [vmem:[%s16235_s11 + $0x2e0] sm:$0xff] %v8972_v47  ;;  %v8973_v36 = vadd.f32 %v8777_v60, %v8244_v7  ;;  %v8779_v62 = vpop.f32.mrf.mxu0  ;;  %v9520_v47 = vld [vmem:[%s16235_s11 + $0x38] sm:$0xff]  ;;  %v10580_v60 = vpack.c.bf16 %v10535_v59, %v10534_v6  ;;  %v11267_v59 = vld [vmem:[#allocation3 + $0x89] sm:$0xff] }
 0x6c8   : > { %v8052_v37 = vpop.f32.mrf.mxu1 }
 0x6c9   : > { %v8246_v23 = vadd.f32 %v8150_v52, %v8052_v37  ;;  %9069 = vst [vmem:[%s16235_s11 + $0x2e8] sm:$0xff] %v8973_v36  ;;  %v8974_v48 = vadd.f32 %v8779_v62, %v8245_v17  ;;  %v8781_v24 = vpop.f32.mrf.mxu0  ;;  %v11309_v17 = vpack.c.bf16 %v11264_v4, %v11263_v8  ;;  %v9521_v62 = vld [vmem:[%s16235_s11 + $0x40] sm:$0xff]  ;;  %v9530_v8 = vld [vmem:[%s16235_s11 + $0x88] sm:$0xff] }
 0x6ca   : > { %v9274_v28 = vpop.f32.mrf.mxu1  ;;  %10731 = vmatmul.mubr.bf16.vlgmr.msra.gmra.mxu1 %v10578_v41 }
 0x6cb   : > { %9070 = vst [vmem:[%s16235_s11 + $0x2f0] sm:$0xff] %v8974_v48  ;;  %v9609_v61 = vadd.f32 %v9513_v45, %v9274_v28  ;;  %v8975_v43 = vadd.f32 %v8781_v24, %v8246_v23  ;;  %v10003_v53 = vpop.f32.mrf.mxu0  ;;  %11460 = vmatmul.mubr.bf16.vlgmr.msra.gmra.mxu0 %v11307_v25  ;;  %10740 = vmatprep.mubr.bf16.mxu1 %v14585_v0  ;;  %v10537_v25 = vld [vmem:[#allocation3 + $0x80] sm:$0xff]  ;;  %v9523_v45 = vld [vmem:[%s16235_s11 + $0x50] sm:$0xff] }
 0x6cc   : > { %v9276_v63 = vpop.f32.mrf.mxu1  ;;  %11469 = vmatprep.mubr.bf16.mxu0 %v14585_v0 }
 0x6cd   : > { %9071 = vst [vmem:[%s16235_s11 + $0x2f8] sm:$0xff] %v8975_v43  ;;  %v9610_v30 = vadd.f32 %v9514_v29, %v9276_v63  ;;  %v10338_v56 = vadd.f32 %v10003_v53, %v9609_v61  ;;  %v10005_v18 = vpop.f32.mrf.mxu0  ;;  %v11266_v61 = vld [vmem:[#allocation3 + $0x81] sm:$0xff]  ;;  %v10536_v29 = vld [vmem:[#allocation3 + $0x78] sm:$0xff] }
 0x6ce   : > { %v9278_v34 = vpop.f32.mrf.mxu1 }
 0x6cf   : > { %v9611_v40 = vadd.f32 %v9515_v55, %v9278_v34  ;;  %10434 = vst [vmem:[%s16235_s11] sm:$0xff] %v10338_v56  ;;  %v10339_v1 = vadd.f32 %v10005_v18, %v9610_v30  ;;  %v10007_v13 = vpop.f32.mrf.mxu0  ;;  %v9524_v56 = vld [vmem:[%s16235_s11 + $0x58] sm:$0xff]  ;;  %v10581_v18 = vpack.c.bf16 %v10537_v25, %v10536_v29 }
 0x6d0   : > { %v9280_v57 = vpop.f32.mrf.mxu1  ;;  %v11269_v25 = vld [vmem:[#allocation3 + $0x99] sm:$0xff] }
 0x6d1   : > { %v9612_v51 = vadd.f32 %v9516_v27, %v9280_v57  ;;  %10435 = vst [vmem:[%s16235_s11 + $0x8] sm:$0xff] %v10339_v1  ;;  %v10340_v12 = vadd.f32 %v10007_v13, %v9611_v40  ;;  %v10009_v2 = vpop.f32.mrf.mxu0  ;;  %v11310_v40 = vpack.c.bf16 %v11266_v61, %v11265_v33  ;;  %v9525_v13 = vld [vmem:[%s16235_s11 + $0x60] sm:$0xff]  ;;  %v9534_v33 = vld [vmem:[%s16235_s11 + $0xa8] sm:$0xff] }
 0x6d2   : > { %v9284_v10 = vpop.f32.mrf.mxu1  ;;  %10741 = vmatmul.mubr.bf16.gmra.mxu1 %v10579_v46 }
 0x6d3   : > { %v9613_v5 = vadd.f32 %v9517_v31, %v9284_v10  ;;  %10436 = vst [vmem:[%s16235_s11 + $0x10] sm:$0xff] %v10340_v12  ;;  %v10341_v38 = vadd.f32 %v10009_v2, %v9612_v51  ;;  %v10013_v26 = vpop.f32.mrf.mxu0  ;;  %11470 = vmatmul.mubr.bf16.gmra.mxu0 %v11308_v21  ;;  %10750 = vmatprep.mubr.bf16.mxu1 %v14585_v0  ;;  %v10539_v21 = vld [vmem:[#allocation3 + $0x90] sm:$0xff] }
 0x6d4   : > { %v9286_v19 = vpop.f32.mrf.mxu1  ;;  %11479 = vmatprep.mubr.bf16.mxu0 %v14585_v0  ;;  %v9527_v31 = vld [vmem:[%s16235_s11 + $0x70] sm:$0xff] }
 0x6d5   : > { %v9614_v20 = vadd.f32 %v9518_v15, %v9286_v19  ;;  %10437 = vst [vmem:[%s16235_s11 + $0x18] sm:$0xff] %v10341_v38  ;;  %v10342_v32 = vadd.f32 %v10013_v26, %v9613_v5  ;;  %v10015_v58 = vpop.f32.mrf.mxu0  ;;  %v11268_v5 = vld [vmem:[#allocation3 + $0x91] sm:$0xff]  ;;  %v10538_v15 = vld [vmem:[#allocation3 + $0x88] sm:$0xff] }
 0x6d6   : > { %v9288_v3 = vpop.f32.mrf.mxu1 }
 0x6d7   : > { %v9615_v50 = vadd.f32 %v9519_v9, %v9288_v3  ;;  %10438 = vst [vmem:[%s16235_s11 + $0x20] sm:$0xff] %v10342_v32  ;;  %v10343_v42 = vadd.f32 %v10015_v58, %v9614_v20  ;;  %v10017_v35 = vpop.f32.mrf.mxu0  ;;  %v9528_v32 = vld [vmem:[%s16235_s11 + $0x78] sm:$0xff]  ;;  %v10582_v58 = vpack.c.bf16 %v10539_v21, %v10538_v15  ;;  %v11271_v21 = vld [vmem:[#allocation3 + $0xa9] sm:$0xff] }
 0x6d8   : > { %v9290_v7 = vpop.f32.mrf.mxu1 }
 0x6d9   : > { %v9616_v11 = vadd.f32 %v9520_v47, %v9290_v7  ;;  %10439 = vst [vmem:[%s16235_s11 + $0x28] sm:$0xff] %v10343_v42  ;;  %v10344_v14 = vadd.f32 %v10017_v35, %v9615_v50  ;;  %v10019_v16 = vpop.f32.mrf.mxu0  ;;  %v11311_v50 = vpack.c.bf16 %v11268_v5, %v11267_v59  ;;  %v9529_v35 = vld [vmem:[%s16235_s11 + $0x80] sm:$0xff]  ;;  %v9538_v59 = vld [vmem:[%s16235_s11 + $0xc8] sm:$0xff] }
 0x6da   : > { %v9294_v36 = vpop.f32.mrf.mxu1  ;;  %10751 = vmatmul.mubr.bf16.gmra.mxu1 %v10580_v60 }
 0x6db   : > { %v9617_v22 = vadd.f32 %v9521_v62, %v9294_v36  ;;  %10440 = vst [vmem:[%s16235_s11 + $0x30] sm:$0xff] %v10344_v14  ;;  %v10345_v37 = vadd.f32 %v10019_v16, %v9616_v11  ;;  %v10023_v52 = vpop.f32.mrf.mxu0  ;;  %11480 = vmatmul.mubr.bf16.gmra.mxu0 %v11309_v17  ;;  %10760 = vmatprep.mubr.bf16.mxu1 %v14585_v0  ;;  %v10541_v17 = vld [vmem:[#allocation3 + $0xa0] sm:$0xff]  ;;  %v9531_v62 = vld [vmem:[%s16235_s11 + $0x90] sm:$0xff] }
 0x6dc   : > { %v9296_v41 = vpop.f32.mrf.mxu1  ;;  %11489 = vmatprep.mubr.bf16.mxu0 %v14585_v0 }
 0x6dd   : > { %v9618_v23 = vadd.f32 %v9522_v54, %v9296_v41  ;;  %10441 = vst [vmem:[%s16235_s11 + $0x38] sm:$0xff] %v10345_v37  ;;  %v10346_v48 = vadd.f32 %v10023_v52, %v9617_v22  ;;  %v10025_v24 = vpop.f32.mrf.mxu0  ;;  %v11270_v22 = vld [vmem:[#allocation3 + $0xa1] sm:$0xff]  ;;  %v10540_v54 = vld [vmem:[#allocation3 + $0x98] sm:$0xff] }
 0x6de   : > { %v9298_v28 = vpop.f32.mrf.mxu1 }
 0x6df   : > { %v9619_v43 = vadd.f32 %v9523_v45, %v9298_v28  ;;  %10442 = vst [vmem:[%s16235_s11 + $0x40] sm:$0xff] %v10346_v48  ;;  %v10347_v53 = vadd.f32 %v10025_v24, %v9618_v23  ;;  %v10027_v63 = vpop.f32.mrf.mxu0  ;;  %v9532_v48 = vld [vmem:[%s16235_s11 + $0x98] sm:$0xff]  ;;  %v10583_v24 = vpack.c.bf16 %v10541_v17, %v10540_v54 }
 0x6e0   : > { %v9300_v30 = vpop.f32.mrf.mxu1  ;;  %v11273_v17 = vld [vmem:[#allocation3 + $0xb9] sm:$0xff] }
 0x6e1   : > { %v9620_v34 = vadd.f32 %v9524_v56, %v9300_v30  ;;  %10443 = vst [vmem:[%s16235_s11 + $0x48] sm:$0xff] %v10347_v53  ;;  %v10348_v55 = vadd.f32 %v10027_v63, %v9619_v43  ;;  %v10029_v39 = vpop.f32.mrf.mxu0  ;;  %v11312_v43 = vpack.c.bf16 %v11270_v22, %v11269_v25  ;;  %v9533_v63 = vld [vmem:[%s16235_s11 + $0xa0] sm:$0xff]  ;;  %v9542_v25 = vld [vmem:[%s16235_s11 + $0xe8] sm:$0xff] }
 0x6e2   : > { %v9304_v1 = vpop.f32.mrf.mxu1  ;;  %10761 = vmatmul.mubr.bf16.gmra.mxu1 %v10581_v18 }
 0x6e3   : > { %v9621_v44 = vadd.f32 %v9525_v13, %v9304_v1  ;;  %10444 = vst [vmem:[%s16235_s11 + $0x50] sm:$0xff] %v10348_v55  ;;  %v10349_v57 = vadd.f32 %v10029_v39, %v9620_v34  ;;  %v10033_v27 = vpop.f32.mrf.mxu0  ;;  %11490 = vmatmul.mubr.bf16.gmra.mxu0 %v11310_v40  ;;  %10770 = vmatprep.mubr.bf16.mxu1 %v14585_v0  ;;  %v10543_v40 = vld [vmem:[#allocation3 + $0xb0] sm:$0xff] }
 0x6e4   : > { %v9306_v46 = vpop.f32.mrf.mxu1  ;;  %11499 = vmatprep.mubr.bf16.mxu0 %v14585_v0  ;;  %v9535_v13 = vld [vmem:[%s16235_s11 + $0xb0] sm:$0xff] }
 0x6e5   : > { %v9622_v51 = vadd.f32 %v9526_v49, %v9306_v46  ;;  %10445 = vst [vmem:[%s16235_s11 + $0x58] sm:$0xff] %v10349_v57  ;;  %v10350_v12 = vadd.f32 %v10033_v27, %v9621_v44  ;;  %v10035_v2 = vpop.f32.mrf.mxu0  ;;  %v11272_v44 = vld [vmem:[#allocation3 + $0xb1] sm:$0xff]  ;;  %v10542_v49 = vld [vmem:[#allocation3 + $0xa8] sm:$0xff] }
 0x6e6   : > { %v9308_v10 = vpop.f32.mrf.mxu1 }
 0x6e7   : > { %v9623_v38 = vadd.f32 %v9527_v31, %v9308_v10  ;;  %10446 = vst [vmem:[%s16235_s11 + $0x60] sm:$0xff] %v10350_v12  ;;  %v10351_v26 = vadd.f32 %v10035_v2, %v9622_v51  ;;  %v10037_v19 = vpop.f32.mrf.mxu0  ;;  %v9536_v12 = vld [vmem:[%s16235_s11 + $0xb8] sm:$0xff]  ;;  %v10584_v2 = vpack.c.bf16 %v10543_v40, %v10542_v49  ;;  %v11275_v40 = vld [vmem:[#allocation3 + $0xc9] sm:$0xff] }
 0x6e8   : > { %v9310_v20 = vpop.f32.mrf.mxu1 }
 0x6e9   : > { %v9624_v3 = vadd.f32 %v9528_v32, %v9310_v20  ;;  %10447 = vst [vmem:[%s16235_s11 + $0x68] sm:$0xff] %v10351_v26  ;;  %v10352_v9 = vadd.f32 %v10037_v19, %v9623_v38  ;;  %v10039_v4 = vpop.f32.mrf.mxu0  ;;  %v11313_v38 = vpack.c.bf16 %v11272_v44, %v11271_v21  ;;  %v9537_v19 = vld [vmem:[%s16235_s11 + $0xc0] sm:$0xff]  ;;  %v9546_v21 = vld [vmem:[%s16235_s11 + $0x108] sm:$0xff] }
 0x6ea   : > { %v9314_v42 = vpop.f32.mrf.mxu1  ;;  %10771 = vmatmul.mubr.bf16.gmra.mxu1 %v10582_v58 }
 0x6eb   : > { %v9625_v6 = vadd.f32 %v9529_v35, %v9314_v42  ;;  %10448 = vst [vmem:[%s16235_s11 + $0x70] sm:$0xff] %v10352_v9  ;;  %v10353_v7 = vadd.f32 %v10039_v4, %v9624_v3  ;;  %v10043_v47 = vpop.f32.mrf.mxu0  ;;  %11500 = vmatmul.mubr.bf16.gmra.mxu0 %v11311_v50  ;;  %10780 = vmatprep.mubr.bf16.mxu1 %v14585_v0  ;;  %v10545_v50 = vld [vmem:[#allocation3 + $0xc0] sm:$0xff]  ;;  %v9539_v35 = vld [vmem:[%s16235_s11 + $0xd0] sm:$0xff] }
 0x6ec   : > { %v9316_v60 = vpop.f32.mrf.mxu1  ;;  %11509 = vmatprep.mubr.bf16.mxu0 %v14585_v0 }
 0x6ed   : > { %v9626_v11 = vadd.f32 %v9530_v8, %v9316_v60  ;;  %10449 = vst [vmem:[%s16235_s11 + $0x78] sm:$0xff] %v10353_v7  ;;  %v10354_v14 = vadd.f32 %v10043_v47, %v9625_v6  ;;  %v10045_v16 = vpop.f32.mrf.mxu0  ;;  %v11274_v6 = vld [vmem:[#allocation3 + $0xc1] sm:$0xff]  ;;  %v10544_v8 = vld [vmem:[#allocation3 + $0xb8] sm:$0xff] }
 0x6ee   : > { %v9318_v36 = vpop.f32.mrf.mxu1 }
 0x6ef   : > { %v9627_v37 = vadd.f32 %v9531_v62, %v9318_v36  ;;  %10450 = vst [vmem:[%s16235_s11 + $0x80] sm:$0xff] %v10354_v14  ;;  %v10355_v52 = vadd.f32 %v10045_v16, %v9626_v11  ;;  %v10047_v41 = vpop.f32.mrf.mxu0  ;;  %v9540_v14 = vld [vmem:[%s16235_s11 + $0xd8] sm:$0xff]  ;;  %v10585_v16 = vpack.c.bf16 %v10545_v50, %v10544_v8 }
 0x6f0   : > { %v9320_v23 = vpop.f32.mrf.mxu1  ;;  %v11277_v50 = vld [vmem:[#allocation3 + $0xd9] sm:$0xff] }
 0x6f1   : > { %v9628_v28 = vadd.f32 %v9532_v48, %v9320_v23  ;;  %10451 = vst [vmem:[%s16235_s11 + $0x88] sm:$0xff] %v10355_v52  ;;  %v10356_v45 = vadd.f32 %v10047_v41, %v9627_v37  ;;  %v10049_v61 = vpop.f32.mrf.mxu0  ;;  %v11314_v37 = vpack.c.bf16 %v11274_v6, %v11273_v17  ;;  %v9541_v41 = vld [vmem:[%s16235_s11 + $0xe0] sm:$0xff]  ;;  %v9550_v17 = vld [vmem:[%s16235_s11 + $0x128] sm:$0xff] }
 0x6f2   : > { %v9324_v53 = vpop.f32.mrf.mxu1  ;;  %10781 = vmatmul.mubr.bf16.gmra.mxu1 %v10583_v24 }
 0x6f3   : > { %v9629_v29 = vadd.f32 %v9533_v63, %v9324_v53  ;;  %10452 = vst [vmem:[%s16235_s11 + $0x90] sm:$0xff] %v10356_v45  ;;  %v10357_v30 = vadd.f32 %v10049_v61, %v9628_v28  ;;  %v10053_v56 = vpop.f32.mrf.mxu0  ;;  %11510 = vmatmul.mubr.bf16.gmra.mxu0 %v11312_v43  ;;  %10790 = vmatprep.mubr.bf16.mxu1 %v14585_v0  ;;  %v10547_v43 = vld [vmem:[#allocation3 + $0xd0] sm:$0xff] }
 0x6f4   : > { %v9326_v18 = vpop.f32.mrf.mxu1  ;;  %11519 = vmatprep.mubr.bf16.mxu0 %v14585_v0  ;;  %v9543_v63 = vld [vmem:[%s16235_s11 + $0xf0] sm:$0xff] }
 0x6f5   : > { %v9630_v34 = vadd.f32 %v9534_v33, %v9326_v18  ;;  %10453 = vst [vmem:[%s16235_s11 + $0x98] sm:$0xff] %v10357_v30  ;;  %v10358_v55 = vadd.f32 %v10053_v56, %v9629_v29  ;;  %v10055_v39 = vpop.f32.mrf.mxu0  ;;  %v11276_v29 = vld [vmem:[#allocation3 + $0xd1] sm:$0xff]  ;;  %v10546_v33 = vld [vmem:[#allocation3 + $0xc8] sm:$0xff] }
 0x6f6   : > { %v9328_v1 = vpop.f32.mrf.mxu1 }
 0x6f7   : > { %v9631_v57 = vadd.f32 %v9535_v13, %v9328_v1  ;;  %10454 = vst [vmem:[%s16235_s11 + $0xa0] sm:$0xff] %v10358_v55  ;;  %v10359_v27 = vadd.f32 %v10055_v39, %v9630_v34  ;;  %v10057_v46 = vpop.f32.mrf.mxu0  ;;  %v9544_v55 = vld [vmem:[%s16235_s11 + $0xf8] sm:$0xff]  ;;  %v10586_v39 = vpack.c.bf16 %v10547_v43, %v10546_v33  ;;  %v11279_v43 = vld [vmem:[#allocation3 + $0xe9] sm:$0xff] }
 0x6f8   : > { %v9330_v51 = vpop.f32.mrf.mxu1 }
 0x6f9   : > { %v9632_v10 = vadd.f32 %v9536_v12, %v9330_v51  ;;  %10455 = vst [vmem:[%s16235_s11 + $0xa8] sm:$0xff] %v10359_v27  ;;  %v10360_v31 = vadd.f32 %v10057_v46, %v9631_v57  ;;  %v10059_v5 = vpop.f32.mrf.mxu0  ;;  %v11315_v57 = vpack.c.bf16 %v11276_v29, %v11275_v40  ;;  %v9545_v46 = vld [vmem:[%s16235_s11 + $0x100] sm:$0xff]  ;;  %v9554_v40 = vld [vmem:[%s16235_s11 + $0x148] sm:$0xff] }
 0x6fa   : > { %v9334_v26 = vpop.f32.mrf.mxu1  ;;  %10791 = vmatmul.mubr.bf16.gmra.mxu1 %v10584_v2 }
 0x6fb   : > { %v9633_v15 = vadd.f32 %v9537_v19, %v9334_v26  ;;  %10456 = vst [vmem:[%s16235_s11 + $0xb0] sm:$0xff] %v10360_v31  ;;  %v10361_v20 = vadd.f32 %v10059_v5, %v9632_v10  ;;  %v10063_v32 = vpop.f32.mrf.mxu0  ;;  %11520 = vmatmul.mubr.bf16.gmra.mxu0 %v11313_v38  ;;  %10800 = vmatprep.mubr.bf16.mxu1 %v14585_v0  ;;  %v10549_v38 = vld [vmem:[#allocation3 + $0xe0] sm:$0xff]  ;;  %v9547_v19 = vld [vmem:[%s16235_s11 + $0x110] sm:$0xff] }
 0x6fc   : > { %v9336_v58 = vpop.f32.mrf.mxu1  ;;  %11529 = vmatprep.mubr.bf16.mxu0 %v14585_v0 }
 0x6fd   : > { %v9634_v3 = vadd.f32 %v9538_v59, %v9336_v58  ;;  %10457 = vst [vmem:[%s16235_s11 + $0xb8] sm:$0xff] %v10361_v20  ;;  %v10362_v9 = vadd.f32 %v10063_v32, %v9633_v15  ;;  %v10065_v4 = vpop.f32.mrf.mxu0  ;;  %v11278_v15 = vld [vmem:[#allocation3 + $0xe1] sm:$0xff]  ;;  %v10548_v59 = vld [vmem:[#allocation3 + $0xd8] sm:$0xff] }
 0x6fe   : > { %v9338_v42 = vpop.f32.mrf.mxu1 }
 0x6ff   : > { %v9635_v7 = vadd.f32 %v9539_v35, %v9338_v42  ;;  %10458 = vst [vmem:[%s16235_s11 + $0xc0] sm:$0xff] %v10362_v9  ;;  %v10363_v47 = vadd.f32 %v10065_v4, %v9634_v3  ;;  %v10067_v60 = vpop.f32.mrf.mxu0  ;;  %v9548_v9 = vld [vmem:[%s16235_s11 + $0x118] sm:$0xff]  ;;  %v10587_v4 = vpack.c.bf16 %v10549_v38, %v10548_v59 }
 0x700   : > { %v9340_v11 = vpop.f32.mrf.mxu1  ;;  %v11281_v38 = vld [vmem:[#allocation3 + $0xf9] sm:$0xff] }
 0x701   : > { %v9636_v36 = vadd.f32 %v9540_v14, %v9340_v11  ;;  %10459 = vst [vmem:[%s16235_s11 + $0xc8] sm:$0xff] %v10363_v47  ;;  %v10364_v62 = vadd.f32 %v10067_v60, %v9635_v7  ;;  %v10069_v22 = vpop.f32.mrf.mxu0  ;;  %v11316_v7 = vpack.c.bf16 %v11278_v15, %v11277_v50  ;;  %v9549_v60 = vld [vmem:[%s16235_s11 + $0x120] sm:$0xff]  ;;  %v9558_v50 = vld [vmem:[%s16235_s11 + $0x168] sm:$0xff] }
 0x702   : > { %v9344_v52 = vpop.f32.mrf.mxu1  ;;  %10801 = vmatmul.mubr.bf16.gmra.mxu1 %v10585_v16 }
 0x703   : > { %v9637_v54 = vadd.f32 %v9541_v41, %v9344_v52  ;;  %10460 = vst [vmem:[%s16235_s11 + $0xd0] sm:$0xff] %v10364_v62  ;;  %v10365_v23 = vadd.f32 %v10069_v22, %v9636_v36  ;;  %v10073_v48 = vpop.f32.mrf.mxu0  ;;  %11530 = vmatmul.mubr.bf16.gmra.mxu0 %v11314_v37  ;;  %10810 = vmatprep.mubr.bf16.mxu1 %v14585_v0  ;;  %v10551_v37 = vld [vmem:[#allocation3 + $0xf0] sm:$0xff] }
 0x704   : > { %v9346_v24 = vpop.f32.mrf.mxu1  ;;  %11539 = vmatprep.mubr.bf16.mxu0 %v14585_v0  ;;  %v9551_v41 = vld [vmem:[%s16235_s11 + $0x130] sm:$0xff] }
 0x705   : > { %v9638_v28 = vadd.f32 %v9542_v25, %v9346_v24  ;;  %10461 = vst [vmem:[%s16235_s11 + $0xd8] sm:$0xff] %v10365_v23  ;;  %v10366_v45 = vadd.f32 %v10073_v48, %v9637_v54  ;;  %v10075_v61 = vpop.f32.mrf.mxu0  ;;  %v11280_v54 = vld [vmem:[#allocation3 + $0xf1] sm:$0xff]  ;;  %v10550_v25 = vld [vmem:[#allocation3 + $0xe8] sm:$0xff] }
 0x706   : > { %v9348_v53 = vpop.f32.mrf.mxu1 }
 0x707   : > { %v9639_v30 = vadd.f32 %v9543_v63, %v9348_v53  ;;  %10462 = vst [vmem:[%s16235_s11 + $0xe0] sm:$0xff] %v10366_v45  ;;  %v10367_v56 = vadd.f32 %v10075_v61, %v9638_v28  ;;  %v10077_v18 = vpop.f32.mrf.mxu0  ;;  %v9552_v45 = vld [vmem:[%s16235_s11 + $0x138] sm:$0xff]  ;;  %v10588_v61 = vpack.c.bf16 %v10551_v37, %v10550_v25  ;;  %v11283_v37 = vld [vmem:[#allocation3 + $0x109] sm:$0xff] }
 0x708   : > { %v9350_v34 = vpop.f32.mrf.mxu1 }
 0x709   : > { %v9640_v1 = vadd.f32 %v9544_v55, %v9350_v34  ;;  %10463 = vst [vmem:[%s16235_s11 + $0xe8] sm:$0xff] %v10367_v56  ;;  %v10368_v13 = vadd.f32 %v10077_v18, %v9639_v30  ;;  %v10079_v44 = vpop.f32.mrf.mxu0  ;;  %v11317_v30 = vpack.c.bf16 %v11280_v54, %v11279_v43  ;;  %v9553_v18 = vld [vmem:[%s16235_s11 + $0x140] sm:$0xff]  ;;  %v9562_v43 = vld [vmem:[%s16235_s11 + $0x188] sm:$0xff] }
 0x70a   : > { %v9354_v27 = vpop.f32.mrf.mxu1  ;;  %10811 = vmatmul.mubr.bf16.gmra.mxu1 %v10586_v39 }
 0x70b   : > { %v9641_v49 = vadd.f32 %v9545_v46, %v9354_v27  ;;  %10464 = vst [vmem:[%s16235_s11 + $0xf0] sm:$0xff] %v10368_v13  ;;  %v10369_v51 = vadd.f32 %v10079_v44, %v9640_v1  ;;  %v10083_v12 = vpop.f32.mrf.mxu0  ;;  %11540 = vmatmul.mubr.bf16.gmra.mxu0 %v11315_v57  ;;  %10820 = vmatprep.mubr.bf16.mxu1 %v14585_v0  ;;  %v10553_v57 = vld [vmem:[#allocation3 + $0x100] sm:$0xff]  ;;  %v9555_v46 = vld [vmem:[%s16235_s11 + $0x150] sm:$0xff] }
 0x70c   : > { %v9356_v2 = vpop.f32.mrf.mxu1  ;;  %11549 = vmatprep.mubr.bf16.mxu0 %v14585_v0 }
 0x70d   : > { %v9642_v10 = vadd.f32 %v9546_v21, %v9356_v2  ;;  %10465 = vst [vmem:[%s16235_s11 + $0xf8] sm:$0xff] %v10369_v51  ;;  %v10370_v31 = vadd.f32 %v10083_v12, %v9641_v49  ;;  %v10085_v5 = vpop.f32.mrf.mxu0  ;;  %v11282_v49 = vld [vmem:[#allocation3 + $0x101] sm:$0xff]  ;;  %v10552_v21 = vld [vmem:[#allocation3 + $0xf8] sm:$0xff] }
 0x70e   : > { %v9358_v26 = vpop.f32.mrf.mxu1 }
 0x70f   : > { %v9643_v20 = vadd.f32 %v9547_v19, %v9358_v26  ;;  %10466 = vst [vmem:[%s16235_s11 + $0x100] sm:$0xff] %v10370_v31  ;;  %v10371_v32 = vadd.f32 %v10085_v5, %v9642_v10  ;;  %v10087_v58 = vpop.f32.mrf.mxu0  ;;  %v9556_v31 = vld [vmem:[%s16235_s11 + $0x158] sm:$0xff]  ;;  %v10589_v5 = vpack.c.bf16 %v10553_v57, %v10552_v21 }
 0x710   : > { %v9360_v3 = vpop.f32.mrf.mxu1  ;;  %v11285_v57 = vld [vmem:[#allocation3 + $0x119] sm:$0xff] }
 0x711   : > { %v9644_v42 = vadd.f32 %v9548_v9, %v9360_v3  ;;  %10467 = vst [vmem:[%s16235_s11 + $0x108] sm:$0xff] %v10371_v32  ;;  %v10372_v35 = vadd.f32 %v10087_v58, %v9643_v20  ;;  %v10089_v6 = vpop.f32.mrf.mxu0  ;;  %v11318_v20 = vpack.c.bf16 %v11282_v49, %v11281_v38  ;;  %v9557_v58 = vld [vmem:[%s16235_s11 + $0x160] sm:$0xff]  ;;  %v9566_v38 = vld [vmem:[%s16235_s11 + $0x1a8] sm:$0xff] }
 0x712   : > { %v9364_v47 = vpop.f32.mrf.mxu1  ;;  %10821 = vmatmul.mubr.bf16.gmra.mxu1 %v10587_v4 }
 0x713   : > { %v9645_v8 = vadd.f32 %v9549_v60, %v9364_v47  ;;  %10468 = vst [vmem:[%s16235_s11 + $0x110] sm:$0xff] %v10372_v35  ;;  %v10373_v11 = vadd.f32 %v10089_v6, %v9644_v42  ;;  %v10093_v14 = vpop.f32.mrf.mxu0  ;;  %11550 = vmatmul.mubr.bf16.gmra.mxu0 %v11316_v7  ;;  %10830 = vmatprep.mubr.bf16.mxu1 %v14585_v0  ;;  %v10555_v7 = vld [vmem:[#allocation3 + $0x110] sm:$0xff] }
 0x714   : > { %v9366_v16 = vpop.f32.mrf.mxu1  ;;  %11559 = vmatprep.mubr.bf16.mxu0 %v14585_v0  ;;  %v9559_v60 = vld [vmem:[%s16235_s11 + $0x170] sm:$0xff] }
 0x715   : > { %v9646_v36 = vadd.f32 %v9550_v17, %v9366_v16  ;;  %10469 = vst [vmem:[%s16235_s11 + $0x118] sm:$0xff] %v10373_v11  ;;  %v10374_v62 = vadd.f32 %v10093_v14, %v9645_v8  ;;  %v10095_v22 = vpop.f32.mrf.mxu0  ;;  %v11284_v8 = vld [vmem:[#allocation3 + $0x111] sm:$0xff]  ;;  %v10554_v17 = vld [vmem:[#allocation3 + $0x108] sm:$0xff] }
 0x716   : > { %v9368_v52 = vpop.f32.mrf.mxu1 }
 0x717   : > { %v9647_v23 = vadd.f32 %v9551_v41, %v9368_v52  ;;  %10470 = vst [vmem:[%s16235_s11 + $0x120] sm:$0xff] %v10374_v62  ;;  %v10375_v48 = vadd.f32 %v10095_v22, %v9646_v36  ;;  %v10097_v24 = vpop.f32.mrf.mxu0  ;;  %v9560_v62 = vld [vmem:[%s16235_s11 + $0x178] sm:$0xff]  ;;  %v10590_v22 = vpack.c.bf16 %v10555_v7, %v10554_v17  ;;  %v11287_v7 = vld [vmem:[#allocation3 + $0x129] sm:$0xff] }
 0x718   : > { %v9370_v28 = vpop.f32.mrf.mxu1 }
 0x719   : > { %v9648_v53 = vadd.f32 %v9552_v45, %v9370_v28  ;;  %10471 = vst [vmem:[%s16235_s11 + $0x128] sm:$0xff] %v10375_v48  ;;  %v10376_v63 = vadd.f32 %v10097_v24, %v9647_v23  ;;  %v10099_v29 = vpop.f32.mrf.mxu0  ;;  %v11319_v23 = vpack.c.bf16 %v11284_v8, %v11283_v37  ;;  %v9561_v24 = vld [vmem:[%s16235_s11 + $0x180] sm:$0xff]  ;;  %v9570_v37 = vld [vmem:[%s16235_s11 + $0x1c8] sm:$0xff] }
 0x71a   : > { %v9374_v56 = vpop.f32.mrf.mxu1  ;;  %10831 = vmatmul.mubr.bf16.gmra.mxu1 %v10588_v61 }
 0x71b   : > { %v9649_v33 = vadd.f32 %v9553_v18, %v9374_v56  ;;  %10472 = vst [vmem:[%s16235_s11 + $0x130] sm:$0xff] %v10376_v63  ;;  %v10377_v34 = vadd.f32 %v10099_v29, %v9648_v53  ;;  %v10103_v55 = vpop.f32.mrf.mxu0  ;;  %11560 = vmatmul.mubr.bf16.gmra.mxu0 %v11317_v30  ;;  %10840 = vmatprep.mubr.bf16.mxu1 %v14585_v0  ;;  %v10557_v30 = vld [vmem:[#allocation3 + $0x120] sm:$0xff]  ;;  %v9563_v18 = vld [vmem:[%s16235_s11 + $0x190] sm:$0xff] }
 0x71c   : > { %v9376_v39 = vpop.f32.mrf.mxu1  ;;  %11569 = vmatprep.mubr.bf16.mxu0 %v14585_v0 }
 0x71d   : > { %v9650_v1 = vadd.f32 %v9554_v40, %v9376_v39  ;;  %10473 = vst [vmem:[%s16235_s11 + $0x138] sm:$0xff] %v10377_v34  ;;  %v10378_v13 = vadd.f32 %v10103_v55, %v9649_v33  ;;  %v10105_v44 = vpop.f32.mrf.mxu0  ;;  %v11286_v33 = vld [vmem:[#allocation3 + $0x121] sm:$0xff]  ;;  %v10556_v40 = vld [vmem:[#allocation3 + $0x118] sm:$0xff] }
 0x71e   : > { %v9378_v27 = vpop.f32.mrf.mxu1 }
 0x71f   : > { %v9651_v51 = vadd.f32 %v9555_v46, %v9378_v27  ;;  %10474 = vst [vmem:[%s16235_s11 + $0x140] sm:$0xff] %v10378_v13  ;;  %v10379_v12 = vadd.f32 %v10105_v44, %v9650_v1  ;;  %v10107_v2 = vpop.f32.mrf.mxu0  ;;  %v9564_v13 = vld [vmem:[%s16235_s11 + $0x198] sm:$0xff]  ;;  %v10591_v44 = vpack.c.bf16 %v10557_v30, %v10556_v40 }
 0x720   : > { %v9380_v10 = vpop.f32.mrf.mxu1  ;;  %v11289_v30 = vld [vmem:[#allocation3 + $0x139] sm:$0xff] }
 0x721   : > { %v9652_v26 = vadd.f32 %v9556_v31, %v9380_v10  ;;  %10475 = vst [vmem:[%s16235_s11 + $0x148] sm:$0xff] %v10379_v12  ;;  %v10380_v19 = vadd.f32 %v10107_v2, %v9651_v51  ;;  %v10109_v15 = vpop.f32.mrf.mxu0  ;;  %v11320_v51 = vpack.c.bf16 %v11286_v33, %v11285_v57  ;;  %v9565_v2 = vld [vmem:[%s16235_s11 + $0x1a0] sm:$0xff]  ;;  %v9574_v57 = vld [vmem:[%s16235_s11 + $0x1e8] sm:$0xff] }
 0x722   : > { %v9384_v32 = vpop.f32.mrf.mxu1  ;;  %10841 = vmatmul.mubr.bf16.gmra.mxu1 %v10589_v5 }
 0x723   : > { %v9653_v59 = vadd.f32 %v9557_v58, %v9384_v32  ;;  %10476 = vst [vmem:[%s16235_s11 + $0x150] sm:$0xff] %v10380_v19  ;;  %v10381_v3 = vadd.f32 %v10109_v15, %v9652_v26  ;;  %v10113_v9 = vpop.f32.mrf.mxu0  ;;  %11570 = vmatmul.mubr.bf16.gmra.mxu0 %v11318_v20  ;;  %10850 = vmatprep.mubr.bf16.mxu1 %v14585_v0  ;;  %v10559_v20 = vld [vmem:[#allocation3 + $0x130] sm:$0xff] }
 0x724   : > { %v9386_v4 = vpop.f32.mrf.mxu1  ;;  %11579 = vmatprep.mubr.bf16.mxu0 %v14585_v0  ;;  %v9567_v58 = vld [vmem:[%s16235_s11 + $0x1b0] sm:$0xff] }
 0x725   : > { %v9654_v42 = vadd.f32 %v9558_v50, %v9386_v4  ;;  %10477 = vst [vmem:[%s16235_s11 + $0x158] sm:$0xff] %v10381_v3  ;;  %v10382_v35 = vadd.f32 %v10113_v9, %v9653_v59  ;;  %v10115_v6 = vpop.f32.mrf.mxu0  ;;  %v11288_v59 = vld [vmem:[#allocation3 + $0x131] sm:$0xff]  ;;  %v10558_v50 = vld [vmem:[#allocation3 + $0x128] sm:$0xff] }
 0x726   : > { %v9388_v47 = vpop.f32.mrf.mxu1 }
 0x727   : > { %v9655_v11 = vadd.f32 %v9559_v60, %v9388_v47  ;;  %10478 = vst [vmem:[%s16235_s11 + $0x160] sm:$0xff] %v10382_v35  ;;  %v10383_v14 = vadd.f32 %v10115_v6, %v9654_v42  ;;  %v10117_v16 = vpop.f32.mrf.mxu0  ;;  %v9568_v35 = vld [vmem:[%s16235_s11 + $0x1b8] sm:$0xff]  ;;  %v10592_v6 = vpack.c.bf16 %v10559_v20, %v10558_v50  ;;  %v11291_v20 = vld [vmem:[#allocation3 + $0x149] sm:$0xff] }
 0x728   : > { %v9390_v36 = vpop.f32.mrf.mxu1 }
 0x729   : > { %v9656_v52 = vadd.f32 %v9560_v62, %v9390_v36  ;;  %10479 = vst [vmem:[%s16235_s11 + $0x168] sm:$0xff] %v10383_v14  ;;  %v10384_v41 = vadd.f32 %v10117_v16, %v9655_v11  ;;  %v10119_v54 = vpop.f32.mrf.mxu0  ;;  %v11321_v11 = vpack.c.bf16 %v11288_v59, %v11287_v7  ;;  %v9569_v16 = vld [vmem:[%s16235_s11 + $0x1c0] sm:$0xff]  ;;  %v9578_v7 = vld [vmem:[%s16235_s11 + $0x208] sm:$0xff] }
 0x72a   : > { %v9394_v48 = vpop.f32.mrf.mxu1  ;;  %10851 = vmatmul.mubr.bf16.gmra.mxu1 %v10590_v22 }
 0x72b   : > { %v9657_v25 = vadd.f32 %v9561_v24, %v9394_v48  ;;  %10480 = vst [vmem:[%s16235_s11 + $0x170] sm:$0xff] %v10384_v41  ;;  %v10385_v28 = vadd.f32 %v10119_v54, %v9656_v52  ;;  %v10123_v45 = vpop.f32.mrf.mxu0  ;;  %11580 = vmatmul.mubr.bf16.gmra.mxu0 %v11319_v23  ;;  %10860 = vmatprep.mubr.bf16.mxu1 %v14585_v0  ;;  %v10561_v23 = vld [vmem:[#allocation3 + $0x140] sm:$0xff]  ;;  %v9571_v24 = vld [vmem:[%s16235_s11 + $0x1d0] sm:$0xff] }
 0x72c   : > { %v9396_v61 = vpop.f32.mrf.mxu1  ;;  %11589 = vmatprep.mubr.bf16.mxu0 %v14585_v0 }
 0x72d   : > { %v9658_v53 = vadd.f32 %v9562_v43, %v9396_v61  ;;  %10481 = vst [vmem:[%s16235_s11 + $0x178] sm:$0xff] %v10385_v28  ;;  %v10386_v63 = vadd.f32 %v10123_v45, %v9657_v25  ;;  %v10125_v29 = vpop.f32.mrf.mxu0  ;;  %v11290_v25 = vld [vmem:[#allocation3 + $0x141] sm:$0xff]  ;;  %v10560_v43 = vld [vmem:[#allocation3 + $0x138] sm:$0xff] }
 0x72e   : > { %v9398_v56 = vpop.f32.mrf.mxu1 }
 0x72f   : > { %v9659_v34 = vadd.f32 %v9563_v18, %v9398_v56  ;;  %10482 = vst [vmem:[%s16235_s11 + $0x180] sm:$0xff] %v10386_v63  ;;  %v10387_v55 = vadd.f32 %v10125_v29, %v9658_v53  ;;  %v10127_v39 = vpop.f32.mrf.mxu0  ;;  %v9572_v63 = vld [vmem:[%s16235_s11 + $0x1d8] sm:$0xff]  ;;  %v10593_v29 = vpack.c.bf16 %v10561_v23, %v10560_v43 }
 0x730   : > { %v9400_v1 = vpop.f32.mrf.mxu1  ;;  %v11293_v23 = vld [vmem:[#allocation3 + $0x159] sm:$0xff] }
 0x731   : > { %v9660_v27 = vadd.f32 %v9564_v13, %v9400_v1  ;;  %10483 = vst [vmem:[%s16235_s11 + $0x188] sm:$0xff] %v10387_v55  ;;  %v10388_v46 = vadd.f32 %v10127_v39, %v9659_v34  ;;  %v10129_v49 = vpop.f32.mrf.mxu0  ;;  %v11322_v34 = vpack.c.bf16 %v11290_v25, %v11289_v30  ;;  %v9573_v39 = vld [vmem:[%s16235_s11 + $0x1e0] sm:$0xff]  ;;  %v9582_v30 = vld [vmem:[%s16235_s11 + $0x228] sm:$0xff] }
 0x732   : > { %v9404_v12 = vpop.f32.mrf.mxu1  ;;  %10861 = vmatmul.mubr.bf16.gmra.mxu1 %v10591_v44 }
 0x733   : > { %v9661_v21 = vadd.f32 %v9565_v2, %v9404_v12  ;;  %10484 = vst [vmem:[%s16235_s11 + $0x190] sm:$0xff] %v10388_v46  ;;  %v10389_v10 = vadd.f32 %v10129_v49, %v9660_v27  ;;  %v10133_v31 = vpop.f32.mrf.mxu0  ;;  %11590 = vmatmul.mubr.bf16.gmra.mxu0 %v11320_v51  ;;  %10870 = vmatprep.mubr.bf16.mxu1 %v14585_v0  ;;  %v10563_v51 = vld [vmem:[#allocation3 + $0x150] sm:$0xff] }
 0x734   : > { %v9406_v5 = vpop.f32.mrf.mxu1  ;;  %11599 = vmatprep.mubr.bf16.mxu0 %v14585_v0  ;;  %v9575_v2 = vld [vmem:[%s16235_s11 + $0x1f0] sm:$0xff] }
 0x735   : > { %v9662_v26 = vadd.f32 %v9566_v38, %v9406_v5  ;;  %10485 = vst [vmem:[%s16235_s11 + $0x198] sm:$0xff] %v10389_v10  ;;  %v10390_v19 = vadd.f32 %v10133_v31, %v9661_v21  ;;  %v10135_v15 = vpop.f32.mrf.mxu0  ;;  %v11292_v21 = vld [vmem:[#allocation3 + $0x151] sm:$0xff]  ;;  %v10562_v38 = vld [vmem:[#allocation3 + $0x148] sm:$0xff] }
 0x736   : > { %v9408_v32 = vpop.f32.mrf.mxu1 }
 0x737   : > { %v9663_v3 = vadd.f32 %v9567_v58, %v9408_v32  ;;  %10486 = vst [vmem:[%s16235_s11 + $0x1a0] sm:$0xff] %v10390_v19  ;;  %v10391_v9 = vadd.f32 %v10135_v15, %v9662_v26  ;;  %v10137_v4 = vpop.f32.mrf.mxu0  ;;  %v9576_v19 = vld [vmem:[%s16235_s11 + $0x1f8] sm:$0xff]  ;;  %v10594_v15 = vpack.c.bf16 %v10563_v51, %v10562_v38  ;;  %v11295_v51 = vld [vmem:[#allocation3 + $0x169] sm:$0xff] }
 0x738   : > { %v9410_v42 = vpop.f32.mrf.mxu1 }
 0x739   : > { %v9664_v47 = vadd.f32 %v9568_v35, %v9410_v42  ;;  %10487 = vst [vmem:[%s16235_s11 + $0x1a8] sm:$0xff] %v10391_v9  ;;  %v10392_v60 = vadd.f32 %v10137_v4, %v9663_v3  ;;  %v10139_v8 = vpop.f32.mrf.mxu0  ;;  %v11323_v3 = vpack.c.bf16 %v11292_v21, %v11291_v20  ;;  %v9577_v4 = vld [vmem:[%s16235_s11 + $0x200] sm:$0xff]  ;;  %v9586_v20 = vld [vmem:[%s16235_s11 + $0x248] sm:$0xff] }
 0x73a   : > { %v9414_v14 = vpop.f32.mrf.mxu1  ;;  %10871 = vmatmul.mubr.bf16.gmra.mxu1 %v10592_v6 }
 0x73b   : > { %v9665_v17 = vadd.f32 %v9569_v16, %v9414_v14  ;;  %10488 = vst [vmem:[%s16235_s11 + $0x1b0] sm:$0xff] %v10392_v60  ;;  %v10393_v36 = vadd.f32 %v10139_v8, %v9664_v47  ;;  %v10143_v62 = vpop.f32.mrf.mxu0  ;;  %11600 = vmatmul.mubr.bf16.gmra.mxu0 %v11321_v11  ;;  %10880 = vmatprep.mubr.bf16.mxu1 %v14585_v0  ;;  %v10565_v11 = vld [vmem:[#allocation3 + $0x160] sm:$0xff]  ;;  %v9579_v16 = vld [vmem:[%s16235_s11 + $0x210] sm:$0xff] }
 0x73c   : > { %v9416_v22 = vpop.f32.mrf.mxu1  ;;  %11609 = vmatprep.mubr.bf16.mxu0 %v14585_v0 }
 0x73d   : > { %v9666_v52 = vadd.f32 %v9570_v37, %v9416_v22  ;;  %10489 = vst [vmem:[%s16235_s11 + $0x1b8] sm:$0xff] %v10393_v36  ;;  %v10394_v41 = vadd.f32 %v10143_v62, %v9665_v17  ;;  %v10145_v54 = vpop.f32.mrf.mxu0  ;;  %v11294_v17 = vld [vmem:[#allocation3 + $0x161] sm:$0xff]  ;;  %v10564_v37 = vld [vmem:[#allocation3 + $0x158] sm:$0xff] }
 0x73e   : > { %v9418_v48 = vpop.f32.mrf.mxu1 }
 0x73f   : > { %v9667_v28 = vadd.f32 %v9571_v24, %v9418_v48  ;;  %10490 = vst [vmem:[%s16235_s11 + $0x1c0] sm:$0xff] %v10394_v41  ;;  %v10395_v45 = vadd.f32 %v10145_v54, %v9666_v52  ;;  %v10147_v61 = vpop.f32.mrf.mxu0  ;;  %v9580_v41 = vld [vmem:[%s16235_s11 + $0x218] sm:$0xff]  ;;  %v10595_v54 = vpack.c.bf16 %v10565_v11, %v10564_v37 }
 0x740   : > { %v9420_v53 = vpop.f32.mrf.mxu1  ;;  %v11297_v11 = vld [vmem:[#allocation3 + $0x179] sm:$0xff] }
 0x741   : > { %v9668_v56 = vadd.f32 %v9572_v63, %v9420_v53  ;;  %10491 = vst [vmem:[%s16235_s11 + $0x1c8] sm:$0xff] %v10395_v45  ;;  %v10396_v18 = vadd.f32 %v10147_v61, %v9667_v28  ;;  %v10149_v33 = vpop.f32.mrf.mxu0  ;;  %v11324_v28 = vpack.c.bf16 %v11294_v17, %v11293_v23  ;;  %v9581_v61 = vld [vmem:[%s16235_s11 + $0x220] sm:$0xff]  ;;  %v9590_v23 = vld [vmem:[%s16235_s11 + $0x268] sm:$0xff] }
 0x742   : > { %v9424_v55 = vpop.f32.mrf.mxu1  ;;  %10881 = vmatmul.mubr.bf16.gmra.mxu1 %v10593_v29 }
 0x743   : > { %v9669_v40 = vadd.f32 %v9573_v39, %v9424_v55  ;;  %10492 = vst [vmem:[%s16235_s11 + $0x1d0] sm:$0xff] %v10396_v18  ;;  %v10397_v1 = vadd.f32 %v10149_v33, %v9668_v56  ;;  %v10153_v13 = vpop.f32.mrf.mxu0  ;;  %11610 = vmatmul.mubr.bf16.gmra.mxu0 %v11322_v34  ;;  %10890 = vmatprep.mubr.bf16.mxu1 %v14585_v0  ;;  %v10567_v34 = vld [vmem:[#allocation3 + $0x170] sm:$0xff] }
 0x744   : > { %v9426_v44 = vpop.f32.mrf.mxu1  ;;  %11619 = vmatprep.mubr.bf16.mxu0 %v14585_v0  ;;  %v9583_v39 = vld [vmem:[%s16235_s11 + $0x230] sm:$0xff] }
 0x745   : > { %v9670_v27 = vadd.f32 %v9574_v57, %v9426_v44  ;;  %10493 = vst [vmem:[%s16235_s11 + $0x1d8] sm:$0xff] %v10397_v1  ;;  %v10398_v46 = vadd.f32 %v10153_v13, %v9669_v40  ;;  %v10155_v49 = vpop.f32.mrf.mxu0  ;;  %v11296_v40 = vld [vmem:[#allocation3 + $0x171] sm:$0xff]  ;;  %v10566_v57 = vld [vmem:[#allocation3 + $0x168] sm:$0xff] }
 0x746   : > { %v9428_v12 = vpop.f32.mrf.mxu1 }
 0x747   : > { %v9671_v10 = vadd.f32 %v9575_v2, %v9428_v12  ;;  %10494 = vst [vmem:[%s16235_s11 + $0x1e0] sm:$0xff] %v10398_v46  ;;  %v10399_v31 = vadd.f32 %v10155_v49, %v9670_v27  ;;  %v10157_v5 = vpop.f32.mrf.mxu0  ;;  %v9584_v46 = vld [vmem:[%s16235_s11 + $0x238] sm:$0xff]  ;;  %v10596_v49 = vpack.c.bf16 %v10567_v34, %v10566_v57  ;;  %v11299_v34 = vld [vmem:[#allocation3 + $0x189] sm:$0xff] }
 0x748   : > { %v9430_v26 = vpop.f32.mrf.mxu1 }
 0x749   : > { %v9672_v32 = vadd.f32 %v9576_v19, %v9430_v26  ;;  %10495 = vst [vmem:[%s16235_s11 + $0x1e8] sm:$0xff] %v10399_v31  ;;  %v10400_v58 = vadd.f32 %v10157_v5, %v9671_v10  ;;  %v10159_v59 = vpop.f32.mrf.mxu0  ;;  %v11325_v10 = vpack.c.bf16 %v11296_v40, %v11295_v51  ;;  %v9585_v5 = vld [vmem:[%s16235_s11 + $0x240] sm:$0xff]  ;;  %v9594_v51 = vld [vmem:[%s16235_s11 + $0x288] sm:$0xff] }
 0x74a   : > { %v9434_v9 = vpop.f32.mrf.mxu1  ;;  %10891 = vmatmul.mubr.bf16.gmra.mxu1 %v10594_v15 }
 0x74b   : > { %v9673_v50 = vadd.f32 %v9577_v4, %v9434_v9  ;;  %10496 = vst [vmem:[%s16235_s11 + $0x1f0] sm:$0xff] %v10400_v58  ;;  %v10401_v42 = vadd.f32 %v10159_v59, %v9672_v32  ;;  %v10163_v35 = vpop.f32.mrf.mxu0  ;;  %11620 = vmatmul.mubr.bf16.gmra.mxu0 %v11323_v3  ;;  %10900 = vmatprep.mubr.bf16.mxu1 %v14585_v0  ;;  %v10569_v3 = vld [vmem:[#allocation3 + $0x180] sm:$0xff]  ;;  %v9587_v4 = vld [vmem:[%s16235_s11 + $0x250] sm:$0xff] }
 0x74c   : > { %v9436_v6 = vpop.f32.mrf.mxu1  ;;  %11629 = vmatprep.mubr.bf16.mxu0 %v14585_v0 }
 0x74d   : > { %v9674_v47 = vadd.f32 %v9578_v7, %v9436_v6  ;;  %10497 = vst [vmem:[%s16235_s11 + $0x1f8] sm:$0xff] %v10401_v42  ;;  %v10402_v60 = vadd.f32 %v10163_v35, %v9673_v50  ;;  %v10165_v8 = vpop.f32.mrf.mxu0  ;;  %v11298_v50 = vld [vmem:[#allocation3 + $0x181] sm:$0xff]  ;;  %v10568_v7 = vld [vmem:[#allocation3 + $0x178] sm:$0xff] }
 0x74e   : > { %v9438_v14 = vpop.f32.mrf.mxu1 }
 0x74f   : > { %v9675_v36 = vadd.f32 %v9579_v16, %v9438_v14  ;;  %10498 = vst [vmem:[%s16235_s11 + $0x200] sm:$0xff] %v10402_v60  ;;  %v10403_v62 = vadd.f32 %v10165_v8, %v9674_v47  ;;  %v10167_v22 = vpop.f32.mrf.mxu0  ;;  %v9588_v60 = vld [vmem:[%s16235_s11 + $0x258] sm:$0xff]  ;;  %v10597_v8 = vpack.c.bf16 %v10569_v3, %v10568_v7 }
 0x750   : > { %v9440_v52 = vpop.f32.mrf.mxu1  ;;  %v11301_v3 = vld [vmem:[#allocation3 + $0x199] sm:$0xff] }
 0x751   : > { %v9676_v48 = vadd.f32 %v9580_v41, %v9440_v52  ;;  %10499 = vst [vmem:[%s16235_s11 + $0x208] sm:$0xff] %v10403_v62  ;;  %v10404_v24 = vadd.f32 %v10167_v22, %v9675_v36  ;;  %v10169_v25 = vpop.f32.mrf.mxu0  ;;  %v11326_v36 = vpack.c.bf16 %v11298_v50, %v11297_v11  ;;  %v9589_v22 = vld [vmem:[%s16235_s11 + $0x260] sm:$0xff]  ;;  %v9598_v11 = vld [vmem:[%s16235_s11 + $0x2a8] sm:$0xff] }
 0x752   : > { %v9444_v45 = vpop.f32.mrf.mxu1  ;;  %10901 = vmatmul.mubr.bf16.gmra.mxu1 %v10595_v54 }
 0x753   : > { %v9677_v43 = vadd.f32 %v9581_v61, %v9444_v45  ;;  %10500 = vst [vmem:[%s16235_s11 + $0x210] sm:$0xff] %v10404_v24  ;;  %v10405_v53 = vadd.f32 %v10169_v25, %v9676_v48  ;;  %v10173_v63 = vpop.f32.mrf.mxu0  ;;  %11630 = vmatmul.mubr.bf16.gmra.mxu0 %v11324_v28  ;;  %10910 = vmatprep.mubr.bf16.mxu1 %v14585_v0  ;;  %v10571_v28 = vld [vmem:[#allocation3 + $0x190] sm:$0xff] }
 0x754   : > { %v9446_v29 = vpop.f32.mrf.mxu1  ;;  %11639 = vmatprep.mubr.bf16.mxu0 %v14585_v0  ;;  %v9591_v61 = vld [vmem:[%s16235_s11 + $0x270] sm:$0xff] }
 0x755   : > { %v9678_v56 = vadd.f32 %v9582_v30, %v9446_v29  ;;  %10501 = vst [vmem:[%s16235_s11 + $0x218] sm:$0xff] %v10405_v53  ;;  %v10406_v18 = vadd.f32 %v10173_v63, %v9677_v43  ;;  %v10175_v33 = vpop.f32.mrf.mxu0  ;;  %v11300_v43 = vld [vmem:[#allocation3 + $0x191] sm:$0xff]  ;;  %v10570_v30 = vld [vmem:[#allocation3 + $0x188] sm:$0xff] }
 0x756   : > { %v9448_v55 = vpop.f32.mrf.mxu1 }
 0x757   : > { %v9679_v1 = vadd.f32 %v9583_v39, %v9448_v55  ;;  %10502 = vst [vmem:[%s16235_s11 + $0x220] sm:$0xff] %v10406_v18  ;;  %v10407_v13 = vadd.f32 %v10175_v33, %v9678_v56  ;;  %v10177_v44 = vpop.f32.mrf.mxu0  ;;  %v9592_v18 = vld [vmem:[%s16235_s11 + $0x278] sm:$0xff]  ;;  %v10598_v33 = vpack.c.bf16 %v10571_v28, %v10570_v30  ;;  %v11303_v28 = vld [vmem:[#allocation3 + $0x1a9] sm:$0xff] }
 0x758   : > { %v9450_v27 = vpop.f32.mrf.mxu1 }
 0x759   : > { %v9680_v12 = vadd.f32 %v9584_v46, %v9450_v27  ;;  %10503 = vst [vmem:[%s16235_s11 + $0x228] sm:$0xff] %v10407_v13  ;;  %v10408_v2 = vadd.f32 %v10177_v44, %v9679_v1  ;;  %v10179_v21 = vpop.f32.mrf.mxu0  ;;  %v11327_v1 = vpack.c.bf16 %v11300_v43, %v11299_v34  ;;  %v9593_v44 = vld [vmem:[%s16235_s11 + $0x280] sm:$0xff]  ;;  %v9602_v34 = vld [vmem:[%s16235_s11 + $0x2c8] sm:$0xff] }
 0x75a   : > { %v9454_v31 = vpop.f32.mrf.mxu1  ;;  %10911 = vmatmul.mubr.bf16.gmra.mxu1 %v10596_v49 }
 0x75b   : > { %v9681_v38 = vadd.f32 %v9585_v5, %v9454_v31  ;;  %10504 = vst [vmem:[%s16235_s11 + $0x230] sm:$0xff] %v10408_v2  ;;  %v10409_v26 = vadd.f32 %v10179_v21, %v9680_v12  ;;  %v10183_v19 = vpop.f32.mrf.mxu0  ;;  %11640 = vmatmul.mubr.bf16.gmra.mxu0 %v11325_v10  ;;  %10920 = vmatprep.mubr.bf16.mxu1 %v14585_v0  ;;  %v10573_v10 = vld [vmem:[#allocation3 + $0x1a0] sm:$0xff]  ;;  %v9595_v5 = vld [vmem:[%s16235_s11 + $0x290] sm:$0xff] }
 0x75c   : > { %v9456_v15 = vpop.f32.mrf.mxu1  ;;  %11649 = vmatprep.mubr.bf16.mxu0 %v14585_v0 }
 0x75d   : > { %v9682_v32 = vadd.f32 %v9586_v20, %v9456_v15  ;;  %10505 = vst [vmem:[%s16235_s11 + $0x238] sm:$0xff] %v10409_v26  ;;  %v10410_v58 = vadd.f32 %v10183_v19, %v9681_v38  ;;  %v10185_v59 = vpop.f32.mrf.mxu0  ;;  %v11302_v38 = vld [vmem:[#allocation3 + $0x1a1] sm:$0xff]  ;;  %v10572_v20 = vld [vmem:[#allocation3 + $0x198] sm:$0xff] }
 0x75e   : > { %v9458_v9 = vpop.f32.mrf.mxu1 }
 0x75f   : > { %v9683_v42 = vadd.f32 %v9587_v4, %v9458_v9  ;;  %10506 = vst [vmem:[%s16235_s11 + $0x240] sm:$0xff] %v10410_v58  ;;  %v10411_v35 = vadd.f32 %v10185_v59, %v9682_v32  ;;  %v10187_v6 = vpop.f32.mrf.mxu0  ;;  %v9596_v58 = vld [vmem:[%s16235_s11 + $0x298] sm:$0xff]  ;;  %v10599_v59 = vpack.c.bf16 %v10573_v10, %v10572_v20 }
 0x760   : > { %v9460_v47 = vpop.f32.mrf.mxu1  ;;  %v11305_v10 = vld [vmem:[#allocation3 + $0x1b9] sm:$0xff] }
 0x761   : > { %v9684_v14 = vadd.f32 %v9588_v60, %v9460_v47  ;;  %10507 = vst [vmem:[%s16235_s11 + $0x248] sm:$0xff] %v10411_v35  ;;  %v10412_v16 = vadd.f32 %v10187_v6, %v9683_v42  ;;  %v10189_v17 = vpop.f32.mrf.mxu0  ;;  %v11328_v42 = vpack.c.bf16 %v11302_v38, %v11301_v3  ;;  %v9597_v6 = vld [vmem:[%s16235_s11 + $0x2a0] sm:$0xff] }
 0x762   : > { %v9464_v62 = vpop.f32.mrf.mxu1  ;;  %10921 = vmatmul.mubr.bf16.gmra.mxu1 %v10597_v8 }
 0x763   : > { %v9685_v37 = vadd.f32 %v9589_v22, %v9464_v62  ;;  %10508 = vst [vmem:[%s16235_s11 + $0x250] sm:$0xff] %v10412_v16  ;;  %v10413_v52 = vadd.f32 %v10189_v17, %v9684_v14  ;;  %v10193_v41 = vpop.f32.mrf.mxu0  ;;  %11650 = vmatmul.mubr.bf16.gmra.mxu0 %v11326_v36  ;;  %10930 = vmatprep.mubr.bf16.mxu1 %v14585_v0  ;;  %v10575_v36 = vld [vmem:[#allocation3 + $0x1b0] sm:$0xff] }
 0x764   : > { %v9466_v54 = vpop.f32.mrf.mxu1  ;;  %11659 = vmatprep.mubr.bf16.mxu0 %v14585_v0  ;;  %v9599_v22 = vld [vmem:[%s16235_s11 + $0x2b0] sm:$0xff] }
 0x765   : > { %v9686_v48 = vadd.f32 %v9590_v23, %v9466_v54  ;;  %10509 = vst [vmem:[%s16235_s11 + $0x258] sm:$0xff] %v10413_v52  ;;  %v10414_v24 = vadd.f32 %v10193_v41, %v9685_v37  ;;  %v10195_v25 = vpop.f32.mrf.mxu0  ;;  %v11304_v37 = vld [vmem:[#allocation3 + $0x1b1] sm:$0xff]  ;;  %v10574_v23 = vld [vmem:[#allocation3 + $0x1a8] sm:$0xff] }
 0x766   : > { %v9468_v45 = vpop.f32.mrf.mxu1 }
 0x767   : > { %v9687_v53 = vadd.f32 %v9591_v61, %v9468_v45  ;;  %10510 = vst [vmem:[%s16235_s11 + $0x260] sm:$0xff] %v10414_v24  ;;  %v10415_v63 = vadd.f32 %v10195_v25, %v9686_v48  ;;  %v10197_v29 = vpop.f32.mrf.mxu0  ;;  %v9600_v24 = vld [vmem:[%s16235_s11 + $0x2b8] sm:$0xff]  ;;  %v10600_v25 = vpack.c.bf16 %v10575_v36, %v10574_v23 }
 0x768   : > { %v9470_v56 = vpop.f32.mrf.mxu1 }
 0x769   : > { %v9688_v55 = vadd.f32 %v9592_v18, %v9470_v56  ;;  %10511 = vst [vmem:[%s16235_s11 + $0x268] sm:$0xff] %v10415_v63  ;;  %v10416_v39 = vadd.f32 %v10197_v29, %v9687_v53  ;;  %v10199_v40 = vpop.f32.mrf.mxu0  ;;  %v11329_v53 = vpack.c.bf16 %v11304_v37, %v11303_v28  ;;  %v9601_v29 = vld [vmem:[%s16235_s11 + $0x2c0] sm:$0xff] }
 0x76a   : > { %v9474_v13 = vpop.f32.mrf.mxu1  ;;  %10931 = vmatmul.mubr.bf16.gmra.mxu1 %v10598_v33 }
 0x76b   : > { %v9689_v57 = vadd.f32 %v9593_v44, %v9474_v13  ;;  %10512 = vst [vmem:[%s16235_s11 + $0x270] sm:$0xff] %v10416_v39  ;;  %v10417_v27 = vadd.f32 %v10199_v40, %v9688_v55  ;;  %v10203_v46 = vpop.f32.mrf.mxu0  ;;  %11660 = vmatmul.mubr.bf16.gmra.mxu0 %v11327_v1  ;;  %10940 = vmatprep.mubr.bf16.mxu1 %v14585_v0  ;;  %v10577_v1 = vld [vmem:[#allocation3 + $0x1c0] sm:$0xff]  ;;  %v9603_v44 = vld [vmem:[%s16235_s11 + $0x2d0] sm:$0xff] }
 0x76c   : > { %v9476_v49 = vpop.f32.mrf.mxu1  ;;  %11669 = vmatprep.mubr.bf16.mxu0 %v14585_v0 }
 0x76d   : > { %v9690_v12 = vadd.f32 %v9594_v51, %v9476_v49  ;;  %10513 = vst [vmem:[%s16235_s11 + $0x278] sm:$0xff] %v10417_v27  ;;  %v10418_v2 = vadd.f32 %v10203_v46, %v9689_v57  ;;  %v10205_v21 = vpop.f32.mrf.mxu0  ;;  %v11306_v57 = vld [vmem:[#allocation3 + $0x1c1] sm:$0xff]  ;;  %v10576_v51 = vld [vmem:[#allocation3 + $0x1b8] sm:$0xff] }
 0x76e   : > { %v9478_v31 = vpop.f32.mrf.mxu1 }
 0x76f   : > { %v9691_v26 = vadd.f32 %v9595_v5, %v9478_v31  ;;  %10514 = vst [vmem:[%s16235_s11 + $0x280] sm:$0xff] %v10418_v2  ;;  %v10419_v19 = vadd.f32 %v10205_v21, %v9690_v12  ;;  %v10207_v15 = vpop.f32.mrf.mxu0  ;;  %v12086_v12 = vlaneseq  ;;  %v10601_v21 = vpack.c.bf16 %v10577_v1, %v10576_v51 }
 0x770   : > { %v9480_v32 = vpop.f32.mrf.mxu1 }
 0x771   : > { %v9692_v9 = vadd.f32 %v9596_v58, %v9480_v32  ;;  %10515 = vst [vmem:[%s16235_s11 + $0x288] sm:$0xff] %v10419_v19  ;;  %v10420_v4 = vadd.f32 %v10207_v15, %v9691_v26  ;;  %v10209_v50 = vpop.f32.mrf.mxu0  ;;  %v11330_v26 = vpack.c.bf16 %v11306_v57, %v11305_v10  ;;  %v9605_v15 = vld [vmem:[%s16235_s11 + $0x2e0] sm:$0xff] }
 0x772   : > { %v9484_v35 = vpop.f32.mrf.mxu1  ;;  %10941 = vmatmul.mubr.bf16.gmra.mxu1 %v10599_v59  ;;  %v12087_v59 = vshrl.u32 %v12086_v12, 7  ;;  %v10975_v57 = vld [vmem:[%s16235_s11 + $0x20] sm:$0xff] }
 0x773   : > { %v9693_v7 = vadd.f32 %v9597_v6, %v9484_v35  ;;  %10516 = vst [vmem:[%s16235_s11 + $0x290] sm:$0xff] %v10420_v4  ;;  %v10421_v47 = vadd.f32 %v10209_v50, %v9692_v9  ;;  %v10213_v60 = vpop.f32.mrf.mxu0  ;;  %11670 = vmatmul.mubr.bf16.gmra.mxu0 %v11328_v42  ;;  %10950 = vmatprep.mubr.bf16.mxu1 %v14585_v0  ;;  %v9606_v9 = vld [vmem:[%s16235_s11 + $0x2e8] sm:$0xff]  ;;  %v9607_v6 = vld [vmem:[%s16235_s11 + $0x2f0] sm:$0xff] }
 0x774   : > { %v9486_v8 = vpop.f32.mrf.mxu1  ;;  %11679 = vmatprep.mubr.bf16.mxu0 %v14585_v0 }
 0x775   : > { %v9694_v14 = vadd.f32 %v9598_v11, %v9486_v8  ;;  %10517 = vst [vmem:[%s16235_s11 + $0x298] sm:$0xff] %v10421_v47  ;;  %v10422_v16 = vadd.f32 %v10213_v60, %v9693_v7  ;;  %v10215_v17 = vpop.f32.mrf.mxu0  ;;  %v12088_v8 = vsub.s32 0, %v12087_v59 }
 0x776   : > { %v9488_v62 = vpop.f32.mrf.mxu1 }
 0x777   : > { %v9695_v52 = vadd.f32 %v9599_v22, %v9488_v62  ;;  %10518 = vst [vmem:[%s16235_s11 + $0x2a0] sm:$0xff] %v10422_v16  ;;  %v10423_v41 = vadd.f32 %v10215_v17, %v9694_v14  ;;  %v10217_v54 = vpop.f32.mrf.mxu0  ;;  %v9608_v14 = vld [vmem:[%s16235_s11 + $0x2f8] sm:$0xff]  ;;  %v12084_v16 = vld [vmem:[%s17338_s6] sm:$0x3]  ;;  %v12092_v22 = vsub.s32 1, %v12087_v59 }
 0x778   : > { %v9490_v48 = vpop.f32.mrf.mxu1 }
 0x779   : > { %v9696_v45 = vadd.f32 %v9600_v24, %v9490_v48  ;;  %10519 = vst [vmem:[%s16235_s11 + $0x2a8] sm:$0xff] %v10423_v41  ;;  %v10424_v61 = vadd.f32 %v10217_v54, %v9695_v52  ;;  %v10219_v43 = vpop.f32.mrf.mxu0  ;;  %v10971_v52 = vld [vmem:[%s16235_s11] sm:$0xff]  ;;  %v17037_v48 = vrot.slane %v12084_v16, %v12088_v8 }
 0x77a   : > { %v9494_v63 = vpop.f32.mrf.mxu1  ;;  %10951 = vmatmul.mubr.bf16.gmra.mxu1 %v10600_v25  ;;  %v10972_v25 = vld [vmem:[%s16235_s11 + $0x8] sm:$0xff] }
 0x77b   : > { %v9697_v30 = vadd.f32 %v9601_v29, %v9494_v63  ;;  %10520 = vst [vmem:[%s16235_s11 + $0x2b0] sm:$0xff] %v10424_v61  ;;  %v10425_v56 = vadd.f32 %v10219_v43, %v9696_v45  ;;  %v10223_v18 = vpop.f32.mrf.mxu0  ;;  %11680 = vmatmul.mubr.bf16.gmra.mxu0 %v11329_v53  ;;  %10960 = vmatprep.mubr.bf16.mxu1 %v14585_v0  ;;  %v10973_v63 = vld [vmem:[%s16235_s11 + $0x10] sm:$0xff] }
 0x77c   : > { %v9496_v33 = vpop.f32.mrf.mxu1  ;;  %11689 = vmatprep.mubr.bf16.mxu0 %v14585_v0  ;;  %v9604_v0 = vld [vmem:[%s16235_s11 + $0x2d8] sm:$0xff]  ;;  %v17041_v43 = vrot.slane %v12084_v16, %v12092_v22 }
 0x77d   : > { %v9698_v55 = vadd.f32 %v9602_v34, %v9496_v33  ;;  %10521 = vst [vmem:[%s16235_s11 + $0x2b8] sm:$0xff] %v10425_v56  ;;  %v10426_v39 = vadd.f32 %v10223_v18, %v9697_v30  ;;  %v10225_v40 = vpop.f32.mrf.mxu0  ;;  %v10974_v34 = vld [vmem:[%s16235_s11 + $0x18] sm:$0xff] }
 0x77e   : > { %v9498_v13 = vpop.f32.mrf.mxu1 }
 0x77f   : > { %v9699_v27 = vadd.f32 %v9603_v44, %v9498_v13  ;;  %10522 = vst [vmem:[%s16235_s11 + $0x2c0] sm:$0xff] %v10426_v39  ;;  %v10427_v46 = vadd.f32 %v10225_v40, %v9698_v55  ;;  %v10227_v49 = vpop.f32.mrf.mxu0 }
 0x780   : > { %v9500_v2 = vpop.f32.mrf.mxu1 }
 0x781   : > { %v9700_v31 = vadd.f32 %v9604_v0, %v9500_v2  ;;  %10523 = vst [vmem:[%s16235_s11 + $0x2c8] sm:$0xff] %v10427_v46  ;;  %v10428_v5 = vadd.f32 %v10227_v49, %v9699_v27  ;;  %v10229_v38 = vpop.f32.mrf.mxu0  ;;  %v10976_v0 = vld [vmem:[%s16235_s11 + $0x28] sm:$0xff] }
 0x782   : > { %v9504_v19 = vpop.f32.mrf.mxu1  ;;  %10961 = vmatmul.mubr.bf16.gmra.mxu1 %v10601_v21 }
 0x783   : > { %v9701_v20 = vadd.f32 %v9605_v15, %v9504_v19  ;;  %10524 = vst [vmem:[%s16235_s11 + $0x2d0] sm:$0xff] %v10428_v5  ;;  %v10429_v32 = vadd.f32 %v10229_v38, %v9700_v31  ;;  %v10233_v58 = vpop.f32.mrf.mxu0  ;;  %11690 = vmatmul.mubr.bf16.gmra.mxu0 %v11330_v26 }
 0x784   : > { %v9506_v3 = vpop.f32.mrf.mxu1 }
 0x785   : > { %v9702_v4 = vadd.f32 %v9606_v9, %v9506_v3  ;;  %10525 = vst [vmem:[%s16235_s11 + $0x2d8] sm:$0xff] %v10429_v32  ;;  %v10430_v50 = vadd.f32 %v10233_v58, %v9701_v20  ;;  %v10235_v42 = vpop.f32.mrf.mxu0  ;;  %v10977_v20 = vld [vmem:[%s16235_s11 + $0x30] sm:$0xff] }
 0x786   : > { %v9508_v35 = vpop.f32.mrf.mxu1 }
 0x787   : > { %v9703_v7 = vadd.f32 %v9607_v6, %v9508_v35  ;;  %10526 = vst [vmem:[%s16235_s11 + $0x2e0] sm:$0xff] %v10430_v50  ;;  %v10431_v47 = vadd.f32 %v10235_v42, %v9702_v4  ;;  %v10237_v60 = vpop.f32.mrf.mxu0  ;;  %v10978_v42 = vld [vmem:[%s16235_s11 + $0x38] sm:$0xff] }
 0x788   : > { %v9510_v11 = vpop.f32.mrf.mxu1 }
 0x789   : > { %v9704_v17 = vadd.f32 %v9608_v14, %v9510_v11  ;;  %10527 = vst [vmem:[%s16235_s11 + $0x2e8] sm:$0xff] %v10431_v47  ;;  %v10432_v36 = vadd.f32 %v10237_v60, %v9703_v7  ;;  %v10239_v62 = vpop.f32.mrf.mxu0  ;;  %v10979_v14 = vld [vmem:[%s16235_s11 + $0x40] sm:$0xff] }
 0x78a   : > { %v10732_v37 = vpop.f32.mrf.mxu1 }
 0x78b   : > { %10528 = vst [vmem:[%s16235_s11 + $0x2f0] sm:$0xff] %v10432_v36  ;;  %v11067_v41 = vadd.f32 %v10971_v52, %v10732_v37  ;;  %v10433_v54 = vadd.f32 %v10239_v62, %v9704_v17  ;;  %v11461_v23 = vpop.f32.mrf.mxu0  ;;  %v10980_v52 = vld [vmem:[%s16235_s11 + $0x48] sm:$0xff] }
 0x78c   : > { %v10734_v24 = vpop.f32.mrf.mxu1 }
 0x78d   : > { %10529 = vst [vmem:[%s16235_s11 + $0x2f8] sm:$0xff] %v10433_v54  ;;  %v11068_v28 = vadd.f32 %v10972_v25, %v10734_v24  ;;  %v11796_v45 = vadd.f32 %v11461_v23, %v11067_v41  ;;  %v11463_v61 = vpop.f32.mrf.mxu0 }
 0x78e   : > { %v10736_v53 = vpop.f32.mrf.mxu1 }
 0x78f   : > { %v11069_v29 = vadd.f32 %v10973_v63, %v10736_v53  ;;  %v12096_v30 = vadd.f32 %v17037_v48, %v11796_v45  ;;  %v11797_v56 = vadd.f32 %v11463_v61, %v11068_v28  ;;  %v11465_v18 = vpop.f32.mrf.mxu0  ;;  %v10981_v53 = vld [vmem:[%s16235_s11 + $0x50] sm:$0xff] }
 0x790   : > { %v10738_v33 = vpop.f32.mrf.mxu1 }
 0x791   : > { %v12192_v55 = vmul.f32 0.2, %v12096_v30  ;;  %v11070_v39 = vadd.f32 %v10974_v34, %v10738_v33  ;;  %v12097_v40 = vadd.f32 %v17041_v43, %v11797_v56  ;;  %v11798_v1 = vadd.f32 %v11465_v18, %v11069_v29  ;;  %v11467_v13 = vpop.f32.mrf.mxu0 }
 0x792   : > { %v10742_v44 = vpop.f32.mrf.mxu1 }
 0x793   : > { %v12288_v27 = vmax.f32 %v12096_v30, %v12192_v55  ;;  %v12193_v46 = vmul.f32 0.2, %v12097_v40  ;;  %v11071_v49 = vadd.f32 %v10975_v57, %v10742_v44  ;;  %v12098_v51 = vadd.f32 %v17037_v48, %v11798_v1  ;;  %v11471_v12 = vpop.f32.mrf.mxu0  ;;  %v10982_v55 = vld [vmem:[%s16235_s11 + $0x58] sm:$0xff] }
 0x794   : > { %v10744_v2 = vpop.f32.mrf.mxu1  ;;  %v11799_v21 = vadd.f32 %v11467_v13, %v11070_v39 }
 0x795   : > { %12384 = vst [vmem:[%s16235_s11] sm:$0xff] %v12288_v27  ;;  %v12289_v10 = vmax.f32 %v12097_v40, %v12193_v46  ;;  %v12194_v31 = vmul.f32 0.2, %v12098_v51  ;;  %v11072_v5 = vadd.f32 %v10976_v0, %v10744_v2  ;;  %v11800_v38 = vadd.f32 %v11471_v12, %v11071_v49  ;;  %v11473_v26 = vpop.f32.mrf.mxu0  ;;  %v10983_v46 = vld [vmem:[%s16235_s11 + $0x60] sm:$0xff] }
 0x796   : > { %v12099_v19 = vadd.f32 %v17041_v43, %v11799_v21  ;;  %v10746_v15 = vpop.f32.mrf.mxu1 }
 0x797   : > { %12385 = vst [vmem:[%s16235_s11 + $0x8] sm:$0xff] %v12289_v10  ;;  %v12290_v32 = vmax.f32 %v12098_v51, %v12194_v31  ;;  %v11073_v58 = vadd.f32 %v10977_v20, %v10746_v15  ;;  %v12100_v59 = vadd.f32 %v17037_v48, %v11800_v38  ;;  %v11801_v3 = vadd.f32 %v11473_v26, %v11072_v5  ;;  %v11475_v9 = vpop.f32.mrf.mxu0  ;;  %v10984_v10 = vld [vmem:[%s16235_s11 + $0x68] sm:$0xff] }
 0x798   : > { %v12195_v4 = vmul.f32 0.2, %v12099_v19  ;;  %v10748_v50 = vpop.f32.mrf.mxu1 }
 0x799   : > { %12386 = vst [vmem:[%s16235_s11 + $0x10] sm:$0xff] %v12290_v32  ;;  %v12196_v35 = vmul.f32 0.2, %v12100_v59  ;;  %v11074_v6 = vadd.f32 %v10978_v42, %v10748_v50  ;;  %v12101_v7 = vadd.f32 %v17041_v43, %v11801_v3  ;;  %v11802_v47 = vadd.f32 %v11475_v9, %v11073_v58  ;;  %v11477_v60 = vpop.f32.mrf.mxu0  ;;  %v10985_v58 = vld [vmem:[%s16235_s11 + $0x70] sm:$0xff] }
 0x79a   : > { %v12291_v8 = vmax.f32 %v12099_v19, %v12195_v4  ;;  %v10752_v11 = vpop.f32.mrf.mxu1 }
 0x79b   : > { %v12292_v16 = vmax.f32 %v12100_v59, %v12196_v35  ;;  %v12197_v17 = vmul.f32 0.2, %v12101_v7  ;;  %v11075_v36 = vadd.f32 %v10979_v14, %v10752_v11  ;;  %v12102_v62 = vadd.f32 %v17037_v48, %v11802_v47  ;;  %v11481_v22 = vpop.f32.mrf.mxu0 }
 0x79c   : > { %12387 = vst [vmem:[%s16235_s11 + $0x18] sm:$0xff] %v12291_v8  ;;  %v10754_v37 = vpop.f32.mrf.mxu1  ;;  %v11803_v41 = vadd.f32 %v11477_v60, %v11074_v6  ;;  %v10986_v6 = vld [vmem:[%s16235_s11 + $0x78] sm:$0xff] }
 0x79d   : > { %12388 = vst [vmem:[%s16235_s11 + $0x20] sm:$0xff] %v12292_v16  ;;  %v12293_v54 = vmax.f32 %v12101_v7, %v12197_v17  ;;  %v12198_v23 = vmul.f32 0.2, %v12102_v62  ;;  %v11076_v24 = vadd.f32 %v10980_v52, %v10754_v37  ;;  %v11804_v25 = vadd.f32 %v11481_v22, %v11075_v36  ;;  %v11483_v28 = vpop.f32.mrf.mxu0  ;;  %v10987_v17 = vld [vmem:[%s16235_s11 + $0x80] sm:$0xff] }
 0x79e   : > { %v12103_v45 = vadd.f32 %v17041_v43, %v11803_v41  ;;  %v10756_v61 = vpop.f32.mrf.mxu1 }
 0x79f   : > { %12389 = vst [vmem:[%s16235_s11 + $0x28] sm:$0xff] %v12293_v54  ;;  %v12294_v63 = vmax.f32 %v12102_v62, %v12198_v23  ;;  %v11077_v29 = vadd.f32 %v10981_v53, %v10756_v61  ;;  %v12104_v30 = vadd.f32 %v17037_v48, %v11804_v25  ;;  %v11805_v56 = vadd.f32 %v11483_v28, %v11076_v24  ;;  %v11485_v18 = vpop.f32.mrf.mxu0  ;;  %v10988_v54 = vld [vmem:[%s16235_s11 + $0x88] sm:$0xff] }
 0x7a0   : > { %v12199_v33 = vmul.f32 0.2, %v12103_v45  ;;  %v10758_v34 = vpop.f32.mrf.mxu1 }
 0x7a1   : > { %12390 = vst [vmem:[%s16235_s11 + $0x30] sm:$0xff] %v12294_v63  ;;  %v12200_v39 = vmul.f32 0.2, %v12104_v30  ;;  %v11078_v40 = vadd.f32 %v10982_v55, %v10758_v34  ;;  %v12105_v1 = vadd.f32 %v17041_v43, %v11805_v56  ;;  %v11806_v13 = vadd.f32 %v11485_v18, %v11077_v29  ;;  %v11487_v44 = vpop.f32.mrf.mxu0  ;;  %v10989_v29 = vld [vmem:[%s16235_s11 + $0x90] sm:$0xff] }
 0x7a2   : > { %v12295_v57 = vmax.f32 %v12103_v45, %v12199_v33  ;;  %v10762_v27 = vpop.f32.mrf.mxu1 }
 0x7a3   : > { %v12296_v49 = vmax.f32 %v12104_v30, %v12200_v39  ;;  %v12201_v51 = vmul.f32 0.2, %v12105_v1  ;;  %v11079_v12 = vadd.f32 %v10983_v46, %v10762_v27  ;;  %v12106_v2 = vadd.f32 %v17037_v48, %v11806_v13  ;;  %v11491_v0 = vpop.f32.mrf.mxu0 }
 0x7a4   : > { %12391 = vst [vmem:[%s16235_s11 + $0x38] sm:$0xff] %v12295_v57  ;;  %v10764_v21 = vpop.f32.mrf.mxu1  ;;  %v11807_v31 = vadd.f32 %v11487_v44, %v11078_v40  ;;  %v10990_v40 = vld [vmem:[%s16235_s11 + $0x98] sm:$0xff] }
 0x7a5   : > { %12392 = vst [vmem:[%s16235_s11 + $0x40] sm:$0xff] %v12296_v49  ;;  %v12297_v5 = vmax.f32 %v12105_v1, %v12201_v51  ;;  %v12202_v38 = vmul.f32 0.2, %v12106_v2  ;;  %v11080_v26 = vadd.f32 %v10984_v10, %v10764_v21  ;;  %v11808_v19 = vadd.f32 %v11491_v0, %v11079_v12  ;;  %v11493_v15 = vpop.f32.mrf.mxu0  ;;  %v10991_v51 = vld [vmem:[%s16235_s11 + $0xa0] sm:$0xff] }
 0x7a6   : > { %v12107_v20 = vadd.f32 %v17041_v43, %v11807_v31  ;;  %v10766_v32 = vpop.f32.mrf.mxu1 }
 0x7a7   : > { %12393 = vst [vmem:[%s16235_s11 + $0x48] sm:$0xff] %v12297_v5  ;;  %v12298_v59 = vmax.f32 %v12106_v2, %v12202_v38  ;;  %v11081_v3 = vadd.f32 %v10985_v58, %v10766_v32  ;;  %v12108_v9 = vadd.f32 %v17037_v48, %v11808_v19  ;;  %v11809_v4 = vadd.f32 %v11493_v15, %v11080_v26  ;;  %v11495_v50 = vpop.f32.mrf.mxu0  ;;  %v10992_v5 = vld [vmem:[%s16235_s11 + $0xa8] sm:$0xff] }
 0x7a8   : > { %v12203_v42 = vmul.f32 0.2, %v12107_v20  ;;  %v10768_v35 = vpop.f32.mrf.mxu1 }
 0x7a9   : > { %12394 = vst [vmem:[%s16235_s11 + $0x50] sm:$0xff] %v12298_v59  ;;  %v12204_v7 = vmul.f32 0.2, %v12108_v9  ;;  %v11082_v47 = vadd.f32 %v10986_v6, %v10768_v35  ;;  %v12109_v60 = vadd.f32 %v17041_v43, %v11809_v4  ;;  %v11810_v8 = vadd.f32 %v11495_v50, %v11081_v3  ;;  %v11497_v11 = vpop.f32.mrf.mxu0  ;;  %v10993_v3 = vld [vmem:[%s16235_s11 + $0xb0] sm:$0xff] }
 0x7aa   : > { %v12299_v14 = vmax.f32 %v12107_v20, %v12203_v42  ;;  %v10772_v16 = vpop.f32.mrf.mxu1 }
 0x7ab   : > { %v12300_v36 = vmax.f32 %v12108_v9, %v12204_v7  ;;  %v12205_v62 = vmul.f32 0.2, %v12109_v60  ;;  %v11083_v22 = vadd.f32 %v10987_v17, %v10772_v16  ;;  %v12110_v37 = vadd.f32 %v17037_v48, %v11810_v8  ;;  %v11501_v52 = vpop.f32.mrf.mxu0 }
 0x7ac   : > { %12395 = vst [vmem:[%s16235_s11 + $0x58] sm:$0xff] %v12299_v14  ;;  %v10774_v41 = vpop.f32.mrf.mxu1  ;;  %v11811_v23 = vadd.f32 %v11497_v11, %v11082_v47  ;;  %v10994_v47 = vld [vmem:[%s16235_s11 + $0xb8] sm:$0xff] }
 0x7ad   : > { %12396 = vst [vmem:[%s16235_s11 + $0x60] sm:$0xff] %v12300_v36  ;;  %v12301_v24 = vmax.f32 %v12109_v60, %v12205_v62  ;;  %v12206_v25 = vmul.f32 0.2, %v12110_v37  ;;  %v11084_v28 = vadd.f32 %v10988_v54, %v10774_v41  ;;  %v11812_v45 = vadd.f32 %v11501_v52, %v11083_v22  ;;  %v11503_v61 = vpop.f32.mrf.mxu0  ;;  %v10995_v62 = vld [vmem:[%s16235_s11 + $0xc0] sm:$0xff] }
 0x7ae   : > { %v12111_v53 = vadd.f32 %v17041_v43, %v11811_v23  ;;  %v10776_v63 = vpop.f32.mrf.mxu1 }
 0x7af   : > { %12397 = vst [vmem:[%s16235_s11 + $0x68] sm:$0xff] %v12301_v24  ;;  %v12302_v30 = vmax.f32 %v12110_v37, %v12206_v25  ;;  %v11085_v56 = vadd.f32 %v10989_v29, %v10776_v63  ;;  %v12112_v18 = vadd.f32 %v17037_v48, %v11812_v45  ;;  %v11813_v33 = vadd.f32 %v11503_v61, %v11084_v28  ;;  %v11505_v34 = vpop.f32.mrf.mxu0  ;;  %v10996_v24 = vld [vmem:[%s16235_s11 + $0xc8] sm:$0xff] }
 0x7b0   : > { %v12207_v55 = vmul.f32 0.2, %v12111_v53  ;;  %v10778_v39 = vpop.f32.mrf.mxu1 }
 0x7b1   : > { %12398 = vst [vmem:[%s16235_s11 + $0x70] sm:$0xff] %v12302_v30  ;;  %v12208_v1 = vmul.f32 0.2, %v12112_v18  ;;  %v11086_v13 = vadd.f32 %v10990_v40, %v10778_v39  ;;  %v12113_v44 = vadd.f32 %v17041_v43, %v11813_v33  ;;  %v11814_v57 = vadd.f32 %v11505_v34, %v11085_v56  ;;  %v11507_v27 = vpop.f32.mrf.mxu0  ;;  %v10997_v56 = vld [vmem:[%s16235_s11 + $0xd0] sm:$0xff] }
 0x7b2   : > { %v12303_v46 = vmax.f32 %v12111_v53, %v12207_v55  ;;  %v10782_v49 = vpop.f32.mrf.mxu1 }
 0x7b3   : > { %v12304_v12 = vmax.f32 %v12112_v18, %v12208_v1  ;;  %v12209_v2 = vmul.f32 0.2, %v12113_v44  ;;  %v11087_v0 = vadd.f32 %v10991_v51, %v10782_v49  ;;  %v12114_v21 = vadd.f32 %v17037_v48, %v11814_v57  ;;  %v11511_v10 = vpop.f32.mrf.mxu0 }
 0x7b4   : > { %12399 = vst [vmem:[%s16235_s11 + $0x78] sm:$0xff] %v12303_v46  ;;  %v10784_v31 = vpop.f32.mrf.mxu1  ;;  %v11815_v38 = vadd.f32 %v11507_v27, %v11086_v13  ;;  %v10998_v13 = vld [vmem:[%s16235_s11 + $0xd8] sm:$0xff] }
 0x7b5   : > { %12400 = vst [vmem:[%s16235_s11 + $0x80] sm:$0xff] %v12304_v12  ;;  %v12305_v26 = vmax.f32 %v12113_v44, %v12209_v2  ;;  %v12210_v19 = vmul.f32 0.2, %v12114_v21  ;;  %v11088_v15 = vadd.f32 %v10992_v5, %v10784_v31  ;;  %v11816_v20 = vadd.f32 %v11511_v10, %v11087_v0  ;;  %v11513_v32 = vpop.f32.mrf.mxu0  ;;  %v10999_v2 = vld [vmem:[%s16235_s11 + $0xe0] sm:$0xff] }
 0x7b6   : > { %v12115_v58 = vadd.f32 %v17041_v43, %v11815_v38  ;;  %v10786_v59 = vpop.f32.mrf.mxu1 }
 0x7b7   : > { %12401 = vst [vmem:[%s16235_s11 + $0x88] sm:$0xff] %v12305_v26  ;;  %v12306_v9 = vmax.f32 %v12114_v21, %v12210_v19  ;;  %v11089_v4 = vadd.f32 %v10993_v3, %v10786_v59  ;;  %v12116_v50 = vadd.f32 %v17037_v48, %v11816_v20  ;;  %v11817_v42 = vadd.f32 %v11513_v32, %v11088_v15  ;;  %v11515_v35 = vpop.f32.mrf.mxu0  ;;  %v11000_v26 = vld [vmem:[%s16235_s11 + $0xe8] sm:$0xff] }
 0x7b8   : > { %v12211_v6 = vmul.f32 0.2, %v12115_v58  ;;  %v10788_v7 = vpop.f32.mrf.mxu1 }
 0x7b9   : > { %12402 = vst [vmem:[%s16235_s11 + $0x90] sm:$0xff] %v12306_v9  ;;  %v12212_v60 = vmul.f32 0.2, %v12116_v50  ;;  %v11090_v8 = vadd.f32 %v10994_v47, %v10788_v7  ;;  %v12117_v11 = vadd.f32 %v17041_v43, %v11817_v42  ;;  %v11818_v14 = vadd.f32 %v11515_v35, %v11089_v4  ;;  %v11517_v16 = vpop.f32.mrf.mxu0  ;;  %v11001_v4 = vld [vmem:[%s16235_s11 + $0xf0] sm:$0xff] }
 0x7ba   : > { %v12307_v17 = vmax.f32 %v12115_v58, %v12211_v6  ;;  %v10792_v36 = vpop.f32.mrf.mxu1 }
 0x7bb   : > { %v12308_v22 = vmax.f32 %v12116_v50, %v12212_v60  ;;  %v12213_v37 = vmul.f32 0.2, %v12117_v11  ;;  %v11091_v52 = vadd.f32 %v10995_v62, %v10792_v36  ;;  %v12118_v41 = vadd.f32 %v17037_v48, %v11818_v14  ;;  %v11521_v54 = vpop.f32.mrf.mxu0 }
 0x7bc   : > { %12403 = vst [vmem:[%s16235_s11 + $0x98] sm:$0xff] %v12307_v17  ;;  %v10794_v23 = vpop.f32.mrf.mxu1  ;;  %v11819_v25 = vadd.f32 %v11517_v16, %v11090_v8  ;;  %v11002_v8 = vld [vmem:[%s16235_s11 + $0xf8] sm:$0xff] }
 0x7bd   : > { %12404 = vst [vmem:[%s16235_s11 + $0xa0] sm:$0xff] %v12308_v22  ;;  %v12309_v28 = vmax.f32 %v12117_v11, %v12213_v37  ;;  %v12214_v45 = vmul.f32 0.2, %v12118_v41  ;;  %v11092_v61 = vadd.f32 %v10996_v24, %v10794_v23  ;;  %v11820_v53 = vadd.f32 %v11521_v54, %v11091_v52  ;;  %v11523_v63 = vpop.f32.mrf.mxu0  ;;  %v11003_v37 = vld [vmem:[%s16235_s11 + $0x100] sm:$0xff] }
 0x7be   : > { %v12119_v29 = vadd.f32 %v17041_v43, %v11819_v25  ;;  %v10796_v30 = vpop.f32.mrf.mxu1 }
 0x7bf   : > { %12405 = vst [vmem:[%s16235_s11 + $0xa8] sm:$0xff] %v12309_v28  ;;  %v12310_v18 = vmax.f32 %v12118_v41, %v12214_v45  ;;  %v11093_v33 = vadd.f32 %v10997_v56, %v10796_v30  ;;  %v12120_v34 = vadd.f32 %v17037_v48, %v11820_v53  ;;  %v11821_v55 = vadd.f32 %v11523_v63, %v11092_v61  ;;  %v11525_v39 = vpop.f32.mrf.mxu0  ;;  %v11004_v28 = vld [vmem:[%s16235_s11 + $0x108] sm:$0xff] }
 0x7c0   : > { %v12215_v40 = vmul.f32 0.2, %v12119_v29  ;;  %v10798_v1 = vpop.f32.mrf.mxu1 }
 0x7c1   : > { %12406 = vst [vmem:[%s16235_s11 + $0xb0] sm:$0xff] %v12310_v18  ;;  %v12216_v44 = vmul.f32 0.2, %v12120_v34  ;;  %v11094_v57 = vadd.f32 %v10998_v13, %v10798_v1  ;;  %v12121_v27 = vadd.f32 %v17041_v43, %v11821_v55  ;;  %v11822_v46 = vadd.f32 %v11525_v39, %v11093_v33  ;;  %v11527_v49 = vpop.f32.mrf.mxu0  ;;  %v11005_v33 = vld [vmem:[%s16235_s11 + $0x110] sm:$0xff] }
 0x7c2   : > { %v12311_v51 = vmax.f32 %v12119_v29, %v12215_v40  ;;  %v10802_v12 = vpop.f32.mrf.mxu1 }
 0x7c3   : > { %v12312_v0 = vmax.f32 %v12120_v34, %v12216_v44  ;;  %v12217_v21 = vmul.f32 0.2, %v12121_v27  ;;  %v11095_v10 = vadd.f32 %v10999_v2, %v10802_v12  ;;  %v12122_v31 = vadd.f32 %v17037_v48, %v11822_v46  ;;  %v11531_v5 = vpop.f32.mrf.mxu0 }
 0x7c4   : > { %12407 = vst [vmem:[%s16235_s11 + $0xb8] sm:$0xff] %v12311_v51  ;;  %v10804_v38 = vpop.f32.mrf.mxu1  ;;  %v11823_v19 = vadd.f32 %v11527_v49, %v11094_v57  ;;  %v11006_v57 = vld [vmem:[%s16235_s11 + $0x118] sm:$0xff] }
 0x7c5   : > { %12408 = vst [vmem:[%s16235_s11 + $0xc0] sm:$0xff] %v12312_v0  ;;  %v12313_v15 = vmax.f32 %v12121_v27, %v12217_v21  ;;  %v12218_v20 = vmul.f32 0.2, %v12122_v31  ;;  %v11096_v32 = vadd.f32 %v11000_v26, %v10804_v38  ;;  %v11824_v58 = vadd.f32 %v11531_v5, %v11095_v10  ;;  %v11533_v59 = vpop.f32.mrf.mxu0  ;;  %v11007_v21 = vld [vmem:[%s16235_s11 + $0x120] sm:$0xff] }
 0x7c6   : > { %v12123_v3 = vadd.f32 %v17041_v43, %v11823_v19  ;;  %v10806_v9 = vpop.f32.mrf.mxu1 }
 0x7c7   : > { %12409 = vst [vmem:[%s16235_s11 + $0xc8] sm:$0xff] %v12313_v15  ;;  %v12314_v50 = vmax.f32 %v12122_v31, %v12218_v20  ;;  %v11097_v42 = vadd.f32 %v11001_v4, %v10806_v9  ;;  %v12124_v35 = vadd.f32 %v17037_v48, %v11824_v58  ;;  %v11825_v6 = vadd.f32 %v11533_v59, %v11096_v32  ;;  %v11535_v7 = vpop.f32.mrf.mxu0  ;;  %v11008_v15 = vld [vmem:[%s16235_s11 + $0x128] sm:$0xff] }
 0x7c8   : > { %v12219_v47 = vmul.f32 0.2, %v12123_v3  ;;  %v10808_v60 = vpop.f32.mrf.mxu1 }
 0x7c9   : > { %12410 = vst [vmem:[%s16235_s11 + $0xd0] sm:$0xff] %v12314_v50  ;;  %v12220_v11 = vmul.f32 0.2, %v12124_v35  ;;  %v11098_v14 = vadd.f32 %v11002_v8, %v10808_v60  ;;  %v12125_v16 = vadd.f32 %v17041_v43, %v11825_v6  ;;  %v11826_v17 = vadd.f32 %v11535_v7, %v11097_v42  ;;  %v11537_v36 = vpop.f32.mrf.mxu0  ;;  %v11009_v42 = vld [vmem:[%s16235_s11 + $0x130] sm:$0xff] }
 0x7ca   : > { %v12315_v62 = vmax.f32 %v12123_v3, %v12219_v47  ;;  %v10812_v22 = vpop.f32.mrf.mxu1 }
 0x7cb   : > { %v12316_v52 = vmax.f32 %v12124_v35, %v12220_v11  ;;  %v12221_v41 = vmul.f32 0.2, %v12125_v16  ;;  %v11099_v54 = vadd.f32 %v11003_v37, %v10812_v22  ;;  %v12126_v23 = vadd.f32 %v17037_v48, %v11826_v17  ;;  %v11541_v24 = vpop.f32.mrf.mxu0 }
 0x7cc   : > { %12411 = vst [vmem:[%s16235_s11 + $0xd8] sm:$0xff] %v12315_v62  ;;  %v10814_v25 = vpop.f32.mrf.mxu1  ;;  %v11827_v45 = vadd.f32 %v11537_v36, %v11098_v14  ;;  %v11010_v14 = vld [vmem:[%s16235_s11 + $0x138] sm:$0xff] }
 0x7cd   : > { %12412 = vst [vmem:[%s16235_s11 + $0xe0] sm:$0xff] %v12316_v52  ;;  %v12317_v61 = vmax.f32 %v12125_v16, %v12221_v41  ;;  %v12222_v53 = vmul.f32 0.2, %v12126_v23  ;;  %v11100_v63 = vadd.f32 %v11004_v28, %v10814_v25  ;;  %v11828_v29 = vadd.f32 %v11541_v24, %v11099_v54  ;;  %v11543_v30 = vpop.f32.mrf.mxu0  ;;  %v11011_v41 = vld [vmem:[%s16235_s11 + $0x140] sm:$0xff] }
 0x7ce   : > { %v12127_v56 = vadd.f32 %v17041_v43, %v11827_v45  ;;  %v10816_v18 = vpop.f32.mrf.mxu1 }
 0x7cf   : > { %12413 = vst [vmem:[%s16235_s11 + $0xe8] sm:$0xff] %v12317_v61  ;;  %v12318_v34 = vmax.f32 %v12126_v23, %v12222_v53  ;;  %v11101_v55 = vadd.f32 %v11005_v33, %v10816_v18  ;;  %v12128_v39 = vadd.f32 %v17037_v48, %v11828_v29  ;;  %v11829_v40 = vadd.f32 %v11543_v30, %v11100_v63  ;;  %v11545_v1 = vpop.f32.mrf.mxu0  ;;  %v11012_v61 = vld [vmem:[%s16235_s11 + $0x148] sm:$0xff] }
 0x7d0   : > { %v12223_v13 = vmul.f32 0.2, %v12127_v56  ;;  %v10818_v44 = vpop.f32.mrf.mxu1 }
 0x7d1   : > { %12414 = vst [vmem:[%s16235_s11 + $0xf0] sm:$0xff] %v12318_v34  ;;  %v12224_v27 = vmul.f32 0.2, %v12128_v39  ;;  %v11102_v46 = vadd.f32 %v11006_v57, %v10818_v44  ;;  %v12129_v49 = vadd.f32 %v17041_v43, %v11829_v40  ;;  %v11830_v51 = vadd.f32 %v11545_v1, %v11101_v55  ;;  %v11547_v12 = vpop.f32.mrf.mxu0  ;;  %v11013_v55 = vld [vmem:[%s16235_s11 + $0x150] sm:$0xff] }
 0x7d2   : > { %v12319_v2 = vmax.f32 %v12127_v56, %v12223_v13  ;;  %v10822_v0 = vpop.f32.mrf.mxu1 }
 0x7d3   : > { %v12320_v10 = vmax.f32 %v12128_v39, %v12224_v27  ;;  %v12225_v31 = vmul.f32 0.2, %v12129_v49  ;;  %v11103_v5 = vadd.f32 %v11007_v21, %v10822_v0  ;;  %v12130_v38 = vadd.f32 %v17037_v48, %v11830_v51  ;;  %v11551_v26 = vpop.f32.mrf.mxu0 }
 0x7d4   : > { %12415 = vst [vmem:[%s16235_s11 + $0xf8] sm:$0xff] %v12319_v2  ;;  %v10824_v19 = vpop.f32.mrf.mxu1  ;;  %v11831_v20 = vadd.f32 %v11547_v12, %v11102_v46  ;;  %v11014_v46 = vld [vmem:[%s16235_s11 + $0x158] sm:$0xff] }
 0x7d5   : > { %12416 = vst [vmem:[%s16235_s11 + $0x100] sm:$0xff] %v12320_v10  ;;  %v12321_v32 = vmax.f32 %v12129_v49, %v12225_v31  ;;  %v12226_v58 = vmul.f32 0.2, %v12130_v38  ;;  %v11104_v59 = vadd.f32 %v11008_v15, %v10824_v19  ;;  %v11832_v3 = vadd.f32 %v11551_v26, %v11103_v5  ;;  %v11553_v9 = vpop.f32.mrf.mxu0  ;;  %v11015_v31 = vld [vmem:[%s16235_s11 + $0x160] sm:$0xff] }
 0x7d6   : > { %v12131_v4 = vadd.f32 %v17041_v43, %v11831_v20  ;;  %v10826_v50 = vpop.f32.mrf.mxu1 }
 0x7d7   : > { %12417 = vst [vmem:[%s16235_s11 + $0x108] sm:$0xff] %v12321_v32  ;;  %v12322_v35 = vmax.f32 %v12130_v38, %v12226_v58  ;;  %v11105_v6 = vadd.f32 %v11009_v42, %v10826_v50  ;;  %v12132_v7 = vadd.f32 %v17037_v48, %v11832_v3  ;;  %v11833_v47 = vadd.f32 %v11553_v9, %v11104_v59  ;;  %v11555_v60 = vpop.f32.mrf.mxu0  ;;  %v11016_v32 = vld [vmem:[%s16235_s11 + $0x168] sm:$0xff] }
 0x7d8   : > { %v12227_v8 = vmul.f32 0.2, %v12131_v4  ;;  %v10828_v11 = vpop.f32.mrf.mxu1 }
 0x7d9   : > { %12418 = vst [vmem:[%s16235_s11 + $0x110] sm:$0xff] %v12322_v35  ;;  %v12228_v16 = vmul.f32 0.2, %v12132_v7  ;;  %v11106_v17 = vadd.f32 %v11010_v14, %v10828_v11  ;;  %v12133_v36 = vadd.f32 %v17041_v43, %v11833_v47  ;;  %v11834_v62 = vadd.f32 %v11555_v60, %v11105_v6  ;;  %v11557_v22 = vpop.f32.mrf.mxu0  ;;  %v11017_v6 = vld [vmem:[%s16235_s11 + $0x170] sm:$0xff] }
 0x7da   : > { %v12323_v37 = vmax.f32 %v12131_v4, %v12227_v8  ;;  %v10832_v52 = vpop.f32.mrf.mxu1 }
 0x7db   : > { %v12324_v54 = vmax.f32 %v12132_v7, %v12228_v16  ;;  %v12229_v23 = vmul.f32 0.2, %v12133_v36  ;;  %v11107_v24 = vadd.f32 %v11011_v41, %v10832_v52  ;;  %v12134_v25 = vadd.f32 %v17037_v48, %v11834_v62  ;;  %v11561_v28 = vpop.f32.mrf.mxu0 }
 0x7dc   : > { %12419 = vst [vmem:[%s16235_s11 + $0x118] sm:$0xff] %v12323_v37  ;;  %v10834_v45 = vpop.f32.mrf.mxu1  ;;  %v11835_v53 = vadd.f32 %v11557_v22, %v11106_v17  ;;  %v11018_v17 = vld [vmem:[%s16235_s11 + $0x178] sm:$0xff] }
 0x7dd   : > { %12420 = vst [vmem:[%s16235_s11 + $0x120] sm:$0xff] %v12324_v54  ;;  %v12325_v63 = vmax.f32 %v12133_v36, %v12229_v23  ;;  %v12230_v29 = vmul.f32 0.2, %v12134_v25  ;;  %v11108_v30 = vadd.f32 %v11012_v61, %v10834_v45  ;;  %v11836_v56 = vadd.f32 %v11561_v28, %v11107_v24  ;;  %v11563_v18 = vpop.f32.mrf.mxu0  ;;  %v11019_v23 = vld [vmem:[%s16235_s11 + $0x180] sm:$0xff] }
 0x7de   : > { %v12135_v33 = vadd.f32 %v17041_v43, %v11835_v53  ;;  %v10836_v34 = vpop.f32.mrf.mxu1 }
 0x7df   : > { %12421 = vst [vmem:[%s16235_s11 + $0x128] sm:$0xff] %v12325_v63  ;;  %v12326_v39 = vmax.f32 %v12134_v25, %v12230_v29  ;;  %v11109_v40 = vadd.f32 %v11013_v55, %v10836_v34  ;;  %v12136_v1 = vadd.f32 %v17037_v48, %v11836_v56  ;;  %v11837_v13 = vadd.f32 %v11563_v18, %v11108_v30  ;;  %v11565_v44 = vpop.f32.mrf.mxu0  ;;  %v11020_v63 = vld [vmem:[%s16235_s11 + $0x188] sm:$0xff] }
 0x7e0   : > { %v12231_v57 = vmul.f32 0.2, %v12135_v33  ;;  %v10838_v27 = vpop.f32.mrf.mxu1 }
 0x7e1   : > { %12422 = vst [vmem:[%s16235_s11 + $0x130] sm:$0xff] %v12326_v39  ;;  %v12232_v49 = vmul.f32 0.2, %v12136_v1  ;;  %v11110_v51 = vadd.f32 %v11014_v46, %v10838_v27  ;;  %v12137_v12 = vadd.f32 %v17041_v43, %v11837_v13  ;;  %v11838_v2 = vadd.f32 %v11565_v44, %v11109_v40  ;;  %v11567_v0 = vpop.f32.mrf.mxu0  ;;  %v11021_v40 = vld [vmem:[%s16235_s11 + $0x190] sm:$0xff] }
 0x7e2   : > { %v12327_v21 = vmax.f32 %v12135_v33, %v12231_v57  ;;  %v10842_v10 = vpop.f32.mrf.mxu1 }
 0x7e3   : > { %v12328_v5 = vmax.f32 %v12136_v1, %v12232_v49  ;;  %v12233_v38 = vmul.f32 0.2, %v12137_v12  ;;  %v11111_v26 = vadd.f32 %v11015_v31, %v10842_v10  ;;  %v12138_v19 = vadd.f32 %v17037_v48, %v11838_v2  ;;  %v11571_v15 = vpop.f32.mrf.mxu0 }
 0x7e4   : > { %12423 = vst [vmem:[%s16235_s11 + $0x138] sm:$0xff] %v12327_v21  ;;  %v10844_v20 = vpop.f32.mrf.mxu1  ;;  %v11839_v58 = vadd.f32 %v11567_v0, %v11110_v51  ;;  %v11022_v51 = vld [vmem:[%s16235_s11 + $0x198] sm:$0xff] }
 0x7e5   : > { %12424 = vst [vmem:[%s16235_s11 + $0x140] sm:$0xff] %v12328_v5  ;;  %v12329_v59 = vmax.f32 %v12137_v12, %v12233_v38  ;;  %v12234_v3 = vmul.f32 0.2, %v12138_v19  ;;  %v11112_v9 = vadd.f32 %v11016_v32, %v10844_v20  ;;  %v11840_v4 = vadd.f32 %v11571_v15, %v11111_v26  ;;  %v11573_v50 = vpop.f32.mrf.mxu0  ;;  %v11023_v38 = vld [vmem:[%s16235_s11 + $0x1a0] sm:$0xff] }
 0x7e6   : > { %v12139_v42 = vadd.f32 %v17041_v43, %v11839_v58  ;;  %v10846_v35 = vpop.f32.mrf.mxu1 }
 0x7e7   : > { %12425 = vst [vmem:[%s16235_s11 + $0x148] sm:$0xff] %v12329_v59  ;;  %v12330_v7 = vmax.f32 %v12138_v19, %v12234_v3  ;;  %v11113_v47 = vadd.f32 %v11017_v6, %v10846_v35  ;;  %v12140_v60 = vadd.f32 %v17037_v48, %v11840_v4  ;;  %v11841_v8 = vadd.f32 %v11573_v50, %v11112_v9  ;;  %v11575_v11 = vpop.f32.mrf.mxu0  ;;  %v11024_v59 = vld [vmem:[%s16235_s11 + $0x1a8] sm:$0xff] }
 0x7e8   : > { %v12235_v14 = vmul.f32 0.2, %v12139_v42  ;;  %v10848_v16 = vpop.f32.mrf.mxu1 }
 0x7e9   : > { %12426 = vst [vmem:[%s16235_s11 + $0x150] sm:$0xff] %v12330_v7  ;;  %v12236_v36 = vmul.f32 0.2, %v12140_v60  ;;  %v11114_v62 = vadd.f32 %v11018_v17, %v10848_v16  ;;  %v12141_v22 = vadd.f32 %v17041_v43, %v11841_v8  ;;  %v11842_v37 = vadd.f32 %v11575_v11, %v11113_v47  ;;  %v11577_v52 = vpop.f32.mrf.mxu0  ;;  %v11025_v47 = vld [vmem:[%s16235_s11 + $0x1b0] sm:$0xff] }
 0x7ea   : > { %v12331_v41 = vmax.f32 %v12139_v42, %v12235_v14  ;;  %v10852_v54 = vpop.f32.mrf.mxu1 }
 0x7eb   : > { %v12332_v24 = vmax.f32 %v12140_v60, %v12236_v36  ;;  %v12237_v25 = vmul.f32 0.2, %v12141_v22  ;;  %v11115_v28 = vadd.f32 %v11019_v23, %v10852_v54  ;;  %v12142_v45 = vadd.f32 %v17037_v48, %v11842_v37  ;;  %v11581_v61 = vpop.f32.mrf.mxu0 }
 0x7ec   : > { %12427 = vst [vmem:[%s16235_s11 + $0x158] sm:$0xff] %v12331_v41  ;;  %v10854_v53 = vpop.f32.mrf.mxu1  ;;  %v11843_v29 = vadd.f32 %v11577_v52, %v11114_v62  ;;  %v11026_v62 = vld [vmem:[%s16235_s11 + $0x1b8] sm:$0xff] }
 0x7ed   : > { %12428 = vst [vmem:[%s16235_s11 + $0x160] sm:$0xff] %v12332_v24  ;;  %v12333_v30 = vmax.f32 %v12141_v22, %v12237_v25  ;;  %v12238_v56 = vmul.f32 0.2, %v12142_v45  ;;  %v11116_v18 = vadd.f32 %v11020_v63, %v10854_v53  ;;  %v11844_v33 = vadd.f32 %v11581_v61, %v11115_v28  ;;  %v11583_v34 = vpop.f32.mrf.mxu0  ;;  %v11027_v25 = vld [vmem:[%s16235_s11 + $0x1c0] sm:$0xff] }
 0x7ee   : > { %v12143_v55 = vadd.f32 %v17041_v43, %v11843_v29  ;;  %v10856_v39 = vpop.f32.mrf.mxu1 }
 0x7ef   : > { %12429 = vst [vmem:[%s16235_s11 + $0x168] sm:$0xff] %v12333_v30  ;;  %v12334_v1 = vmax.f32 %v12142_v45, %v12238_v56  ;;  %v11117_v13 = vadd.f32 %v11021_v40, %v10856_v39  ;;  %v12144_v44 = vadd.f32 %v17037_v48, %v11844_v33  ;;  %v11845_v57 = vadd.f32 %v11583_v34, %v11116_v18  ;;  %v11585_v27 = vpop.f32.mrf.mxu0  ;;  %v11028_v30 = vld [vmem:[%s16235_s11 + $0x1c8] sm:$0xff] }
 0x7f0   : > { %v12239_v46 = vmul.f32 0.2, %v12143_v55  ;;  %v10858_v49 = vpop.f32.mrf.mxu1 }
 0x7f1   : > { %12430 = vst [vmem:[%s16235_s11 + $0x170] sm:$0xff] %v12334_v1  ;;  %v12240_v12 = vmul.f32 0.2, %v12144_v44  ;;  %v11118_v2 = vadd.f32 %v11022_v51, %v10858_v49  ;;  %v12145_v0 = vadd.f32 %v17041_v43, %v11845_v57  ;;  %v11846_v21 = vadd.f32 %v11585_v27, %v11117_v13  ;;  %v11587_v10 = vpop.f32.mrf.mxu0  ;;  %v11029_v13 = vld [vmem:[%s16235_s11 + $0x1d0] sm:$0xff] }
 0x7f2   : > { %v12335_v31 = vmax.f32 %v12143_v55, %v12239_v46  ;;  %v10862_v5 = vpop.f32.mrf.mxu1 }
 0x7f3   : > { %v12336_v26 = vmax.f32 %v12144_v44, %v12240_v12  ;;  %v12241_v19 = vmul.f32 0.2, %v12145_v0  ;;  %v11119_v15 = vadd.f32 %v11023_v38, %v10862_v5  ;;  %v12146_v20 = vadd.f32 %v17037_v48, %v11846_v21  ;;  %v11591_v32 = vpop.f32.mrf.mxu0 }
 0x7f4   : > { %12431 = vst [vmem:[%s16235_s11 + $0x178] sm:$0xff] %v12335_v31  ;;  %v10864_v58 = vpop.f32.mrf.mxu1  ;;  %v11847_v3 = vadd.f32 %v11587_v10, %v11118_v2  ;;  %v11030_v2 = vld [vmem:[%s16235_s11 + $0x1d8] sm:$0xff] }
 0x7f5   : > { %12432 = vst [vmem:[%s16235_s11 + $0x180] sm:$0xff] %v12336_v26  ;;  %v12337_v9 = vmax.f32 %v12145_v0, %v12241_v19  ;;  %v12242_v4 = vmul.f32 0.2, %v12146_v20  ;;  %v11120_v50 = vadd.f32 %v11024_v59, %v10864_v58  ;;  %v11848_v42 = vadd.f32 %v11591_v32, %v11119_v15  ;;  %v11593_v35 = vpop.f32.mrf.mxu0  ;;  %v11031_v19 = vld [vmem:[%s16235_s11 + $0x1e0] sm:$0xff] }
 0x7f6   : > { %v12147_v6 = vadd.f32 %v17041_v43, %v11847_v3  ;;  %v10866_v7 = vpop.f32.mrf.mxu1 }
 0x7f7   : > { %12433 = vst [vmem:[%s16235_s11 + $0x188] sm:$0xff] %v12337_v9  ;;  %v12338_v60 = vmax.f32 %v12146_v20, %v12242_v4  ;;  %v11121_v8 = vadd.f32 %v11025_v47, %v10866_v7  ;;  %v12148_v11 = vadd.f32 %v17037_v48, %v11848_v42  ;;  %v11849_v14 = vadd.f32 %v11593_v35, %v11120_v50  ;;  %v11595_v16 = vpop.f32.mrf.mxu0  ;;  %v11032_v9 = vld [vmem:[%s16235_s11 + $0x1e8] sm:$0xff] }
 0x7f8   : > { %v12243_v17 = vmul.f32 0.2, %v12147_v6  ;;  %v10868_v36 = vpop.f32.mrf.mxu1 }
 0x7f9   : > { %12434 = vst [vmem:[%s16235_s11 + $0x190] sm:$0xff] %v12338_v60  ;;  %v12244_v22 = vmul.f32 0.2, %v12148_v11  ;;  %v11122_v37 = vadd.f32 %v11026_v62, %v10868_v36  ;;  %v12149_v52 = vadd.f32 %v17041_v43, %v11849_v14  ;;  %v11850_v41 = vadd.f32 %v11595_v16, %v11121_v8  ;;  %v11597_v54 = vpop.f32.mrf.mxu0  ;;  %v11033_v8 = vld [vmem:[%s16235_s11 + $0x1f0] sm:$0xff] }
 0x7fa   : > { %v12339_v23 = vmax.f32 %v12147_v6, %v12243_v17  ;;  %v10872_v24 = vpop.f32.mrf.mxu1 }
 0x7fb   : > { %v12340_v28 = vmax.f32 %v12148_v11, %v12244_v22  ;;  %v12245_v45 = vmul.f32 0.2, %v12149_v52  ;;  %v11123_v61 = vadd.f32 %v11027_v25, %v10872_v24  ;;  %v12150_v53 = vadd.f32 %v17037_v48, %v11850_v41  ;;  %v11601_v63 = vpop.f32.mrf.mxu0 }
 0x7fc   : > { %12435 = vst [vmem:[%s16235_s11 + $0x198] sm:$0xff] %v12339_v23  ;;  %v10874_v29 = vpop.f32.mrf.mxu1  ;;  %v11851_v56 = vadd.f32 %v11597_v54, %v11122_v37  ;;  %v11034_v37 = vld [vmem:[%s16235_s11 + $0x1f8] sm:$0xff] }
 0x7fd   : > { %12436 = vst [vmem:[%s16235_s11 + $0x1a0] sm:$0xff] %v12340_v28  ;;  %v12341_v18 = vmax.f32 %v12149_v52, %v12245_v45  ;;  %v12246_v33 = vmul.f32 0.2, %v12150_v53  ;;  %v11124_v34 = vadd.f32 %v11028_v30, %v10874_v29  ;;  %v11852_v55 = vadd.f32 %v11601_v63, %v11123_v61  ;;  %v11603_v39 = vpop.f32.mrf.mxu0  ;;  %v11035_v45 = vld [vmem:[%s16235_s11 + $0x200] sm:$0xff] }
 0x7fe   : > { %v12151_v40 = vadd.f32 %v17041_v43, %v11851_v56  ;;  %v10876_v1 = vpop.f32.mrf.mxu1 }
 0x7ff   : > { %12437 = vst [vmem:[%s16235_s11 + $0x1a8] sm:$0xff] %v12341_v18  ;;  %v12342_v44 = vmax.f32 %v12150_v53, %v12246_v33  ;;  %v11125_v57 = vadd.f32 %v11029_v13, %v10876_v1  ;;  %v12152_v27 = vadd.f32 %v17037_v48, %v11852_v55  ;;  %v11853_v46 = vadd.f32 %v11603_v39, %v11124_v34  ;;  %v11605_v49 = vpop.f32.mrf.mxu0  ;;  %v11036_v18 = vld [vmem:[%s16235_s11 + $0x208] sm:$0xff] }
 0x800   : > { %v12247_v51 = vmul.f32 0.2, %v12151_v40  ;;  %v10878_v12 = vpop.f32.mrf.mxu1 }
 0x801   : > { %12438 = vst [vmem:[%s16235_s11 + $0x1b0] sm:$0xff] %v12342_v44  ;;  %v12248_v0 = vmul.f32 0.2, %v12152_v27  ;;  %v11126_v21 = vadd.f32 %v11030_v2, %v10878_v12  ;;  %v12153_v10 = vadd.f32 %v17041_v43, %v11853_v46  ;;  %v11854_v31 = vadd.f32 %v11605_v49, %v11125_v57  ;;  %v11607_v5 = vpop.f32.mrf.mxu0  ;;  %v11037_v57 = vld [vmem:[%s16235_s11 + $0x210] sm:$0xff] }
 0x802   : > { %v12343_v38 = vmax.f32 %v12151_v40, %v12247_v51  ;;  %v10882_v26 = vpop.f32.mrf.mxu1 }
 0x803   : > { %v12344_v15 = vmax.f32 %v12152_v27, %v12248_v0  ;;  %v12249_v20 = vmul.f32 0.2, %v12153_v10  ;;  %v11127_v32 = vadd.f32 %v11031_v19, %v10882_v26  ;;  %v12154_v58 = vadd.f32 %v17037_v48, %v11854_v31  ;;  %v11611_v59 = vpop.f32.mrf.mxu0 }
 0x804   : > { %12439 = vst [vmem:[%s16235_s11 + $0x1b8] sm:$0xff] %v12343_v38  ;;  %v10884_v3 = vpop.f32.mrf.mxu1  ;;  %v11855_v4 = vadd.f32 %v11607_v5, %v11126_v21  ;;  %v11038_v21 = vld [vmem:[%s16235_s11 + $0x218] sm:$0xff] }
 0x805   : > { %12440 = vst [vmem:[%s16235_s11 + $0x1c0] sm:$0xff] %v12344_v15  ;;  %v12345_v50 = vmax.f32 %v12153_v10, %v12249_v20  ;;  %v12250_v42 = vmul.f32 0.2, %v12154_v58  ;;  %v11128_v35 = vadd.f32 %v11032_v9, %v10884_v3  ;;  %v11856_v6 = vadd.f32 %v11611_v59, %v11127_v32  ;;  %v11613_v7 = vpop.f32.mrf.mxu0  ;;  %v11039_v20 = vld [vmem:[%s16235_s11 + $0x220] sm:$0xff] }
 0x806   : > { %v12155_v47 = vadd.f32 %v17041_v43, %v11855_v4  ;;  %v10886_v60 = vpop.f32.mrf.mxu1 }
 0x807   : > { %12441 = vst [vmem:[%s16235_s11 + $0x1c8] sm:$0xff] %v12345_v50  ;;  %v12346_v11 = vmax.f32 %v12154_v58, %v12250_v42  ;;  %v11129_v14 = vadd.f32 %v11033_v8, %v10886_v60  ;;  %v12156_v16 = vadd.f32 %v17037_v48, %v11856_v6  ;;  %v11857_v17 = vadd.f32 %v11613_v7, %v11128_v35  ;;  %v11615_v36 = vpop.f32.mrf.mxu0  ;;  %v11040_v50 = vld [vmem:[%s16235_s11 + $0x228] sm:$0xff] }
 0x808   : > { %v12251_v62 = vmul.f32 0.2, %v12155_v47  ;;  %v10888_v22 = vpop.f32.mrf.mxu1 }
 0x809   : > { %12442 = vst [vmem:[%s16235_s11 + $0x1d0] sm:$0xff] %v12346_v11  ;;  %v12252_v52 = vmul.f32 0.2, %v12156_v16  ;;  %v11130_v41 = vadd.f32 %v11034_v37, %v10888_v22  ;;  %v12157_v54 = vadd.f32 %v17041_v43, %v11857_v17  ;;  %v11858_v23 = vadd.f32 %v11615_v36, %v11129_v14  ;;  %v11617_v24 = vpop.f32.mrf.mxu0  ;;  %v11041_v14 = vld [vmem:[%s16235_s11 + $0x230] sm:$0xff] }
 0x80a   : > { %v12347_v25 = vmax.f32 %v12155_v47, %v12251_v62  ;;  %v10892_v28 = vpop.f32.mrf.mxu1 }
 0x80b   : > { %v12348_v61 = vmax.f32 %v12156_v16, %v12252_v52  ;;  %v12253_v53 = vmul.f32 0.2, %v12157_v54  ;;  %v11131_v63 = vadd.f32 %v11035_v45, %v10892_v28  ;;  %v12158_v29 = vadd.f32 %v17037_v48, %v11858_v23  ;;  %v11621_v30 = vpop.f32.mrf.mxu0 }
 0x80c   : > { %12443 = vst [vmem:[%s16235_s11 + $0x1d8] sm:$0xff] %v12347_v25  ;;  %v10894_v56 = vpop.f32.mrf.mxu1  ;;  %v11859_v33 = vadd.f32 %v11617_v24, %v11130_v41  ;;  %v11042_v41 = vld [vmem:[%s16235_s11 + $0x238] sm:$0xff] }
 0x80d   : > { %12444 = vst [vmem:[%s16235_s11 + $0x1e0] sm:$0xff] %v12348_v61  ;;  %v12349_v34 = vmax.f32 %v12157_v54, %v12253_v53  ;;  %v12254_v55 = vmul.f32 0.2, %v12158_v29  ;;  %v11132_v39 = vadd.f32 %v11036_v18, %v10894_v56  ;;  %v11860_v40 = vadd.f32 %v11621_v30, %v11131_v63  ;;  %v11623_v1 = vpop.f32.mrf.mxu0  ;;  %v11043_v53 = vld [vmem:[%s16235_s11 + $0x240] sm:$0xff] }
 0x80e   : > { %v12159_v13 = vadd.f32 %v17041_v43, %v11859_v33  ;;  %v10896_v44 = vpop.f32.mrf.mxu1 }
 0x80f   : > { %12445 = vst [vmem:[%s16235_s11 + $0x1e8] sm:$0xff] %v12349_v34  ;;  %v12350_v27 = vmax.f32 %v12158_v29, %v12254_v55  ;;  %v11133_v46 = vadd.f32 %v11037_v57, %v10896_v44  ;;  %v12160_v49 = vadd.f32 %v17037_v48, %v11860_v40  ;;  %v11861_v51 = vadd.f32 %v11623_v1, %v11132_v39  ;;  %v11625_v12 = vpop.f32.mrf.mxu0  ;;  %v11044_v34 = vld [vmem:[%s16235_s11 + $0x248] sm:$0xff] }
 0x810   : > { %v12255_v2 = vmul.f32 0.2, %v12159_v13  ;;  %v10898_v0 = vpop.f32.mrf.mxu1 }
 0x811   : > { %12446 = vst [vmem:[%s16235_s11 + $0x1f0] sm:$0xff] %v12350_v27  ;;  %v12256_v10 = vmul.f32 0.2, %v12160_v49  ;;  %v11134_v31 = vadd.f32 %v11038_v21, %v10898_v0  ;;  %v12161_v5 = vadd.f32 %v17041_v43, %v11861_v51  ;;  %v11862_v38 = vadd.f32 %v11625_v12, %v11133_v46  ;;  %v11627_v26 = vpop.f32.mrf.mxu0  ;;  %v11045_v46 = vld [vmem:[%s16235_s11 + $0x250] sm:$0xff] }
 0x812   : > { %v12351_v19 = vmax.f32 %v12159_v13, %v12255_v2  ;;  %v10902_v15 = vpop.f32.mrf.mxu1 }
 0x813   : > { %v12352_v32 = vmax.f32 %v12160_v49, %v12256_v10  ;;  %v12257_v58 = vmul.f32 0.2, %v12161_v5  ;;  %v11135_v59 = vadd.f32 %v11039_v20, %v10902_v15  ;;  %v12162_v3 = vadd.f32 %v17037_v48, %v11862_v38  ;;  %v11631_v9 = vpop.f32.mrf.mxu0 }
 0x814   : > { %12447 = vst [vmem:[%s16235_s11 + $0x1f8] sm:$0xff] %v12351_v19  ;;  %v10904_v4 = vpop.f32.mrf.mxu1  ;;  %v11863_v42 = vadd.f32 %v11627_v26, %v11134_v31  ;;  %v11046_v31 = vld [vmem:[%s16235_s11 + $0x258] sm:$0xff] }
 0x815   : > { %12448 = vst [vmem:[%s16235_s11 + $0x200] sm:$0xff] %v12352_v32  ;;  %v12353_v35 = vmax.f32 %v12161_v5, %v12257_v58  ;;  %v12258_v6 = vmul.f32 0.2, %v12162_v3  ;;  %v11136_v7 = vadd.f32 %v11040_v50, %v10904_v4  ;;  %v11864_v47 = vadd.f32 %v11631_v9, %v11135_v59  ;;  %v11633_v60 = vpop.f32.mrf.mxu0  ;;  %v11047_v58 = vld [vmem:[%s16235_s11 + $0x260] sm:$0xff] }
 0x816   : > { %v12163_v8 = vadd.f32 %v17041_v43, %v11863_v42  ;;  %v10906_v11 = vpop.f32.mrf.mxu1 }
 0x817   : > { %12449 = vst [vmem:[%s16235_s11 + $0x208] sm:$0xff] %v12353_v35  ;;  %v12354_v16 = vmax.f32 %v12162_v3, %v12258_v6  ;;  %v11137_v17 = vadd.f32 %v11041_v14, %v10906_v11  ;;  %v12164_v36 = vadd.f32 %v17037_v48, %v11864_v47  ;;  %v11865_v62 = vadd.f32 %v11633_v60, %v11136_v7  ;;  %v11635_v22 = vpop.f32.mrf.mxu0  ;;  %v11048_v35 = vld [vmem:[%s16235_s11 + $0x268] sm:$0xff] }
 0x818   : > { %v12259_v37 = vmul.f32 0.2, %v12163_v8  ;;  %v10908_v52 = vpop.f32.mrf.mxu1 }
 0x819   : > { %12450 = vst [vmem:[%s16235_s11 + $0x210] sm:$0xff] %v12354_v16  ;;  %v12260_v54 = vmul.f32 0.2, %v12164_v36  ;;  %v11138_v23 = vadd.f32 %v11042_v41, %v10908_v52  ;;  %v12165_v24 = vadd.f32 %v17041_v43, %v11865_v62  ;;  %v11866_v25 = vadd.f32 %v11635_v22, %v11137_v17  ;;  %v11637_v28 = vpop.f32.mrf.mxu0  ;;  %v11049_v17 = vld [vmem:[%s16235_s11 + $0x270] sm:$0xff] }
 0x81a   : > { %v12355_v45 = vmax.f32 %v12163_v8, %v12259_v37  ;;  %v10912_v61 = vpop.f32.mrf.mxu1 }
 0x81b   : > { %v12356_v63 = vmax.f32 %v12164_v36, %v12260_v54  ;;  %v12261_v29 = vmul.f32 0.2, %v12165_v24  ;;  %v11139_v30 = vadd.f32 %v11043_v53, %v10912_v61  ;;  %v12166_v56 = vadd.f32 %v17037_v48, %v11866_v25  ;;  %v11641_v18 = vpop.f32.mrf.mxu0 }
 0x81c   : > { %12451 = vst [vmem:[%s16235_s11 + $0x218] sm:$0xff] %v12355_v45  ;;  %v10914_v33 = vpop.f32.mrf.mxu1  ;;  %v11867_v55 = vadd.f32 %v11637_v28, %v11138_v23  ;;  %v11050_v23 = vld [vmem:[%s16235_s11 + $0x278] sm:$0xff] }
 0x81d   : > { %12452 = vst [vmem:[%s16235_s11 + $0x220] sm:$0xff] %v12356_v63  ;;  %v12357_v39 = vmax.f32 %v12165_v24, %v12261_v29  ;;  %v12262_v40 = vmul.f32 0.2, %v12166_v56  ;;  %v11140_v1 = vadd.f32 %v11044_v34, %v10914_v33  ;;  %v11868_v13 = vadd.f32 %v11641_v18, %v11139_v30  ;;  %v11643_v44 = vpop.f32.mrf.mxu0  ;;  %v11051_v29 = vld [vmem:[%s16235_s11 + $0x280] sm:$0xff] }
 0x81e   : > { %v12167_v57 = vadd.f32 %v17041_v43, %v11867_v55  ;;  %v10916_v27 = vpop.f32.mrf.mxu1 }
 0x81f   : > { %12453 = vst [vmem:[%s16235_s11 + $0x228] sm:$0xff] %v12357_v39  ;;  %v12358_v49 = vmax.f32 %v12166_v56, %v12262_v40  ;;  %v11141_v51 = vadd.f32 %v11045_v46, %v10916_v27  ;;  %v12168_v12 = vadd.f32 %v17037_v48, %v11868_v13  ;;  %v11869_v2 = vadd.f32 %v11643_v44, %v11140_v1  ;;  %v11645_v0 = vpop.f32.mrf.mxu0  ;;  %v11052_v39 = vld [vmem:[%s16235_s11 + $0x288] sm:$0xff] }
 0x820   : > { %v12263_v21 = vmul.f32 0.2, %v12167_v57  ;;  %v10918_v10 = vpop.f32.mrf.mxu1 }
 0x821   : > { %12454 = vst [vmem:[%s16235_s11 + $0x230] sm:$0xff] %v12358_v49  ;;  %v12264_v5 = vmul.f32 0.2, %v12168_v12  ;;  %v11142_v38 = vadd.f32 %v11046_v31, %v10918_v10  ;;  %v12169_v26 = vadd.f32 %v17041_v43, %v11869_v2  ;;  %v11870_v19 = vadd.f32 %v11645_v0, %v11141_v51  ;;  %v11647_v15 = vpop.f32.mrf.mxu0  ;;  %v11053_v51 = vld [vmem:[%s16235_s11 + $0x290] sm:$0xff] }
 0x822   : > { %v12359_v20 = vmax.f32 %v12167_v57, %v12263_v21  ;;  %v10922_v32 = vpop.f32.mrf.mxu1 }
 0x823   : > { %v12360_v59 = vmax.f32 %v12168_v12, %v12264_v5  ;;  %v12265_v3 = vmul.f32 0.2, %v12169_v26  ;;  %v11143_v9 = vadd.f32 %v11047_v58, %v10922_v32  ;;  %v12170_v4 = vadd.f32 %v17037_v48, %v11870_v19  ;;  %v11651_v50 = vpop.f32.mrf.mxu0 }
 0x824   : > { %12455 = vst [vmem:[%s16235_s11 + $0x238] sm:$0xff] %v12359_v20  ;;  %v10924_v42 = vpop.f32.mrf.mxu1  ;;  %v11871_v6 = vadd.f32 %v11647_v15, %v11142_v38  ;;  %v11054_v38 = vld [vmem:[%s16235_s11 + $0x298] sm:$0xff] }
 0x825   : > { %12456 = vst [vmem:[%s16235_s11 + $0x240] sm:$0xff] %v12360_v59  ;;  %v12361_v7 = vmax.f32 %v12169_v26, %v12265_v3  ;;  %v12266_v47 = vmul.f32 0.2, %v12170_v4  ;;  %v11144_v60 = vadd.f32 %v11048_v35, %v10924_v42  ;;  %v11872_v8 = vadd.f32 %v11651_v50, %v11143_v9  ;;  %v11653_v11 = vpop.f32.mrf.mxu0  ;;  %v11055_v3 = vld [vmem:[%s16235_s11 + $0x2a0] sm:$0xff] }
 0x826   : > { %v12171_v14 = vadd.f32 %v17041_v43, %v11871_v6  ;;  %v10926_v16 = vpop.f32.mrf.mxu1 }
 0x827   : > { %12457 = vst [vmem:[%s16235_s11 + $0x248] sm:$0xff] %v12361_v7  ;;  %v12362_v36 = vmax.f32 %v12170_v4, %v12266_v47  ;;  %v11145_v62 = vadd.f32 %v11049_v17, %v10926_v16  ;;  %v12172_v22 = vadd.f32 %v17037_v48, %v11872_v8  ;;  %v11873_v37 = vadd.f32 %v11653_v11, %v11144_v60  ;;  %v11655_v52 = vpop.f32.mrf.mxu0  ;;  %v11056_v7 = vld [vmem:[%s16235_s11 + $0x2a8] sm:$0xff] }
 0x828   : > { %v12267_v41 = vmul.f32 0.2, %v12171_v14  ;;  %v10928_v54 = vpop.f32.mrf.mxu1 }
 0x829   : > { %12458 = vst [vmem:[%s16235_s11 + $0x250] sm:$0xff] %v12362_v36  ;;  %v12268_v24 = vmul.f32 0.2, %v12172_v22  ;;  %v11146_v25 = vadd.f32 %v11050_v23, %v10928_v54  ;;  %v12173_v28 = vadd.f32 %v17041_v43, %v11873_v37  ;;  %v11874_v45 = vadd.f32 %v11655_v52, %v11145_v62  ;;  %v11657_v61 = vpop.f32.mrf.mxu0  ;;  %v11057_v62 = vld [vmem:[%s16235_s11 + $0x2b0] sm:$0xff] }
 0x82a   : > { %v12363_v53 = vmax.f32 %v12171_v14, %v12267_v41  ;;  %v10932_v63 = vpop.f32.mrf.mxu1 }
 0x82b   : > { %v12364_v30 = vmax.f32 %v12172_v22, %v12268_v24  ;;  %v12269_v56 = vmul.f32 0.2, %v12173_v28  ;;  %v11147_v18 = vadd.f32 %v11051_v29, %v10932_v63  ;;  %v12174_v33 = vadd.f32 %v17037_v48, %v11874_v45  ;;  %v11661_v34 = vpop.f32.mrf.mxu0 }
 0x82c   : > { %12459 = vst [vmem:[%s16235_s11 + $0x258] sm:$0xff] %v12363_v53  ;;  %v10934_v55 = vpop.f32.mrf.mxu1  ;;  %v11875_v40 = vadd.f32 %v11657_v61, %v11146_v25  ;;  %v11058_v25 = vld [vmem:[%s16235_s11 + $0x2b8] sm:$0xff] }
 0x82d   : > { %12460 = vst [vmem:[%s16235_s11 + $0x260] sm:$0xff] %v12364_v30  ;;  %v12365_v1 = vmax.f32 %v12173_v28, %v12269_v56  ;;  %v12270_v13 = vmul.f32 0.2, %v12174_v33  ;;  %v11148_v44 = vadd.f32 %v11052_v39, %v10934_v55  ;;  %v11876_v57 = vadd.f32 %v11661_v34, %v11147_v18  ;;  %v11663_v27 = vpop.f32.mrf.mxu0  ;;  %v11059_v56 = vld [vmem:[%s16235_s11 + $0x2c0] sm:$0xff] }
 0x82e   : > { %v12175_v46 = vadd.f32 %v17041_v43, %v11875_v40  ;;  %v10936_v49 = vpop.f32.mrf.mxu1 }
 0x82f   : > { %12461 = vst [vmem:[%s16235_s11 + $0x268] sm:$0xff] %v12365_v1  ;;  %v12366_v12 = vmax.f32 %v12174_v33, %v12270_v13  ;;  %v11149_v2 = vadd.f32 %v11053_v51, %v10936_v49  ;;  %v12176_v0 = vadd.f32 %v17037_v48, %v11876_v57  ;;  %v11877_v21 = vadd.f32 %v11663_v27, %v11148_v44  ;;  %v11665_v10 = vpop.f32.mrf.mxu0  ;;  %v11060_v1 = vld [vmem:[%s16235_s11 + $0x2c8] sm:$0xff] }
 0x830   : > { %v12271_v31 = vmul.f32 0.2, %v12175_v46  ;;  %v10938_v5 = vpop.f32.mrf.mxu1 }
 0x831   : > { %12462 = vst [vmem:[%s16235_s11 + $0x270] sm:$0xff] %v12366_v12  ;;  %v12272_v26 = vmul.f32 0.2, %v12176_v0  ;;  %v11150_v19 = vadd.f32 %v11054_v38, %v10938_v5  ;;  %v12177_v15 = vadd.f32 %v17041_v43, %v11877_v21  ;;  %v11878_v20 = vadd.f32 %v11665_v10, %v11149_v2  ;;  %v11667_v32 = vpop.f32.mrf.mxu0  ;;  %v11061_v2 = vld [vmem:[%s16235_s11 + $0x2d0] sm:$0xff] }
 0x832   : > { %v12367_v58 = vmax.f32 %v12175_v46, %v12271_v31  ;;  %v10942_v59 = vpop.f32.mrf.mxu1 }
 0x833   : > { %v12368_v9 = vmax.f32 %v12176_v0, %v12272_v26  ;;  %v12273_v4 = vmul.f32 0.2, %v12177_v15  ;;  %v11151_v50 = vadd.f32 %v11055_v3, %v10942_v59  ;;  %v12178_v42 = vadd.f32 %v17037_v48, %v11878_v20  ;;  %v11671_v35 = vpop.f32.mrf.mxu0 }
 0x834   : > { %12463 = vst [vmem:[%s16235_s11 + $0x278] sm:$0xff] %v12367_v58  ;;  %v10944_v6 = vpop.f32.mrf.mxu1  ;;  %v11879_v47 = vadd.f32 %v11667_v32, %v11150_v19  ;;  %v11062_v19 = vld [vmem:[%s16235_s11 + $0x2d8] sm:$0xff] }
 0x835   : > { %12464 = vst [vmem:[%s16235_s11 + $0x280] sm:$0xff] %v12368_v9  ;;  %v12369_v60 = vmax.f32 %v12177_v15, %v12273_v4  ;;  %v12274_v8 = vmul.f32 0.2, %v12178_v42  ;;  %v11152_v11 = vadd.f32 %v11056_v7, %v10944_v6  ;;  %v11880_v14 = vadd.f32 %v11671_v35, %v11151_v50  ;;  %v11673_v16 = vpop.f32.mrf.mxu0  ;;  %v11063_v4 = vld [vmem:[%s16235_s11 + $0x2e0] sm:$0xff] }
 0x836   : > { %v12179_v17 = vadd.f32 %v17041_v43, %v11879_v47  ;;  %v10946_v36 = vpop.f32.mrf.mxu1 }
 0x837   : > { %12465 = vst [vmem:[%s16235_s11 + $0x288] sm:$0xff] %v12369_v60  ;;  %v12370_v22 = vmax.f32 %v12178_v42, %v12274_v8  ;;  %v11153_v37 = vadd.f32 %v11057_v62, %v10946_v36  ;;  %v12180_v52 = vadd.f32 %v17037_v48, %v11880_v14  ;;  %v11881_v41 = vadd.f32 %v11673_v16, %v11152_v11  ;;  %v11675_v54 = vpop.f32.mrf.mxu0  ;;  %v11064_v60 = vld [vmem:[%s16235_s11 + $0x2e8] sm:$0xff] }
 0x838   : > { %v12275_v23 = vmul.f32 0.2, %v12179_v17  ;;  %v10948_v24 = vpop.f32.mrf.mxu1 }
 0x839   : > { %12466 = vst [vmem:[%s16235_s11 + $0x290] sm:$0xff] %v12370_v22  ;;  %v12276_v28 = vmul.f32 0.2, %v12180_v52  ;;  %v11154_v45 = vadd.f32 %v11058_v25, %v10948_v24  ;;  %v12181_v61 = vadd.f32 %v17041_v43, %v11881_v41  ;;  %v11882_v53 = vadd.f32 %v11675_v54, %v11153_v37  ;;  %v11677_v63 = vpop.f32.mrf.mxu0  ;;  %v11065_v37 = vld [vmem:[%s16235_s11 + $0x2f0] sm:$0xff] }
 0x83a   : > { %v12371_v29 = vmax.f32 %v12179_v17, %v12275_v23  ;;  %v10952_v30 = vpop.f32.mrf.mxu1 }
 0x83b   : > { %v12372_v18 = vmax.f32 %v12180_v52, %v12276_v28  ;;  %v12277_v33 = vmul.f32 0.2, %v12181_v61  ;;  %v11155_v34 = vadd.f32 %v11059_v56, %v10952_v30  ;;  %v12182_v55 = vadd.f32 %v17037_v48, %v11882_v53  ;;  %v11681_v39 = vpop.f32.mrf.mxu0 }
 0x83c   : > { %12467 = vst [vmem:[%s16235_s11 + $0x298] sm:$0xff] %v12371_v29  ;;  %v10954_v40 = vpop.f32.mrf.mxu1  ;;  %v11883_v13 = vadd.f32 %v11677_v63, %v11154_v45  ;;  %v11066_v45 = vld [vmem:[%s16235_s11 + $0x2f8] sm:$0xff] }
 0x83d   : > { %12468 = vst [vmem:[%s16235_s11 + $0x2a0] sm:$0xff] %v12372_v18  ;;  %v12373_v44 = vmax.f32 %v12181_v61, %v12277_v33  ;;  %v12278_v57 = vmul.f32 0.2, %v12182_v55  ;;  %v11156_v27 = vadd.f32 %v11060_v1, %v10954_v40  ;;  %v11884_v46 = vadd.f32 %v11681_v39, %v11155_v34  ;;  %v11683_v49 = vpop.f32.mrf.mxu0 }
 0x83e   : > { %v12183_v51 = vadd.f32 %v17041_v43, %v11883_v13  ;;  %v10956_v12 = vpop.f32.mrf.mxu1 }
 0x83f   : > { %12469 = vst [vmem:[%s16235_s11 + $0x2a8] sm:$0xff] %v12373_v44  ;;  %v12374_v0 = vmax.f32 %v12182_v55, %v12278_v57  ;;  %v11157_v21 = vadd.f32 %v11061_v2, %v10956_v12  ;;  %v12184_v10 = vadd.f32 %v17037_v48, %v11884_v46  ;;  %v11885_v31 = vadd.f32 %v11683_v49, %v11156_v27  ;;  %v11685_v5 = vpop.f32.mrf.mxu0 }
 0x840   : > { %v12279_v38 = vmul.f32 0.2, %v12183_v51  ;;  %v10958_v26 = vpop.f32.mrf.mxu1 }
 0x841   : > { %12470 = vst [vmem:[%s16235_s11 + $0x2b0] sm:$0xff] %v12374_v0  ;;  %v12280_v15 = vmul.f32 0.2, %v12184_v10  ;;  %v11158_v20 = vadd.f32 %v11062_v19, %v10958_v26  ;;  %v12185_v32 = vadd.f32 %v17041_v43, %v11885_v31  ;;  %v11886_v58 = vadd.f32 %v11685_v5, %v11157_v21  ;;  %v11687_v59 = vpop.f32.mrf.mxu0 }
 0x842   : > { %v12375_v3 = vmax.f32 %v12183_v51, %v12279_v38  ;;  %v10962_v9 = vpop.f32.mrf.mxu1 }
 0x843   : > { %v12376_v50 = vmax.f32 %v12184_v10, %v12280_v15  ;;  %v12281_v42 = vmul.f32 0.2, %v12185_v32  ;;  %v11159_v35 = vadd.f32 %v11063_v4, %v10962_v9  ;;  %v12186_v6 = vadd.f32 %v17037_v48, %v11886_v58  ;;  %v11691_v7 = vpop.f32.mrf.mxu0 }
 0x844   : > { %12471 = vst [vmem:[%s16235_s11 + $0x2b8] sm:$0xff] %v12375_v3  ;;  %v10964_v47 = vpop.f32.mrf.mxu1  ;;  %v11887_v8 = vadd.f32 %v11687_v59, %v11158_v20 }
 0x845   : > { %12472 = vst [vmem:[%s16235_s11 + $0x2c0] sm:$0xff] %v12376_v50  ;;  %v12377_v11 = vmax.f32 %v12185_v32, %v12281_v42  ;;  %v12282_v14 = vmul.f32 0.2, %v12186_v6  ;;  %v11160_v16 = vadd.f32 %v11064_v60, %v10964_v47  ;;  %v11888_v17 = vadd.f32 %v11691_v7, %v11159_v35  ;;  %v11693_v36 = vpop.f32.mrf.mxu0 }
 0x846   : > { %v12187_v62 = vadd.f32 %v17041_v43, %v11887_v8  ;;  %v10966_v22 = vpop.f32.mrf.mxu1 }
 0x847   : > { %12473 = vst [vmem:[%s16235_s11 + $0x2c8] sm:$0xff] %v12377_v11  ;;  %v12378_v52 = vmax.f32 %v12186_v6, %v12282_v14  ;;  %v11161_v41 = vadd.f32 %v11065_v37, %v10966_v22  ;;  %v12188_v54 = vadd.f32 %v17037_v48, %v11888_v17  ;;  %v11889_v23 = vadd.f32 %v11693_v36, %v11160_v16  ;;  %v11695_v24 = vpop.f32.mrf.mxu0 }
 0x848   : > { %v12283_v25 = vmul.f32 0.2, %v12187_v62  ;;  %v10968_v28 = vpop.f32.mrf.mxu1 }
 0x849   : > { %12474 = vst [vmem:[%s16235_s11 + $0x2d0] sm:$0xff] %v12378_v52  ;;  %v12284_v61 = vmul.f32 0.2, %v12188_v54  ;;  %v11162_v53 = vadd.f32 %v11066_v45, %v10968_v28  ;;  %v12189_v63 = vadd.f32 %v17041_v43, %v11889_v23  ;;  %v11890_v29 = vadd.f32 %v11695_v24, %v11161_v41  ;;  %v11697_v56 = vpop.f32.mrf.mxu0 }
 0x84a   : > { %v12379_v30 = vmax.f32 %v12187_v62, %v12283_v25 }
 0x84b   : > { %v12380_v18 = vmax.f32 %v12188_v54, %v12284_v61  ;;  %v12285_v33 = vmul.f32 0.2, %v12189_v63  ;;  %v12190_v34 = vadd.f32 %v17037_v48, %v11890_v29  ;;  %v11891_v55 = vadd.f32 %v11697_v56, %v11162_v53 }
 0x84c   : > { %12475 = vst [vmem:[%s16235_s11 + $0x2d8] sm:$0xff] %v12379_v30 }
 0x84d   : > { %12476 = vst [vmem:[%s16235_s11 + $0x2e0] sm:$0xff] %v12380_v18  ;;  %v12381_v39 = vmax.f32 %v12189_v63, %v12285_v33  ;;  %v12286_v40 = vmul.f32 0.2, %v12190_v34  ;;  %v12191_v1 = vadd.f32 %v17041_v43, %v11891_v55 }
 0x84f   : > { %12477 = vst [vmem:[%s16235_s11 + $0x2e8] sm:$0xff] %v12381_v39  ;;  %v12382_v13 = vmax.f32 %v12190_v34, %v12286_v40  ;;  %v12287_v44 = vmul.f32 0.2, %v12191_v1 }
 0x851   : > { %12478 = vst [vmem:[%s16235_s11 + $0x2f0] sm:$0xff] %v12382_v13  ;;  %v12383_v57 = vmax.f32 %v12191_v1, %v12287_v44 }
 0x853   : > { %12479 = vst [vmem:[%s16235_s11 + $0x2f8] sm:$0xff] %v12383_v57 }
 0x854 PF: > { %s17_s24 = sadd.s32 1, %s14581_s24  }
 0x855   : > { %p14_p4 = scmp.ge.s32.totalorder %s17_s24, 4  }
 0x857   :  { %16 = sbr.rel (!%p14_p4) target bundleno = 1 (0x1), region = 78 }

</bundles_post_ra>
